<compile_context>
chip_gen: v5e
topology: v5e:2x2
jax: 0.10.0
libtpu: 0.0.40
codegen_flags: <defaults>
</compile_context>

<pallas_src>
import jax
import jax.numpy as jnp
from jax.experimental import pallas as pl
from jax.experimental.pallas import tpu as pltpu

EMBEDDING_SIZE = 512
FC_SIZE = 2048
LN_EPS = 1e-5  # nn.LayerNorm default


# ---------------------------------------------------------------------------
# Fused FFN kernel:  LayerNorm( relu(x @ W1 + b1) @ W2 + b2 + x )
# One grid step handles one M tile end-to-end; W1/W2 stay resident in VMEM.
# ---------------------------------------------------------------------------
def _ffn_fused_kernel(x_ref, w1_ref, b1_ref, w2_ref, b2_ref, g_ref, bb_ref,
                      o_ref):
    x = x_ref[...]                                           # [bm, E] f32
    xb = x.astype(jnp.bfloat16)                              # single cast / tile

    # conv1 (1x1): full-width hidden tile, lives only in VMEM/vregs.
    h = jnp.dot(xb, w1_ref[...], preferred_element_type=jnp.float32)  # [bm, H]
    h = jnp.maximum(h + b1_ref[...], 0.0)                    # bias + ReLU (f32)

    # conv2 (1x1) + bias + residual.
    y = jnp.dot(h.astype(jnp.bfloat16), w2_ref[...],
                preferred_element_type=jnp.float32)           # [bm, E]
    y = y + b2_ref[...] + x

    # LayerNorm fused into the same step (f32 throughout).
    mean = jnp.mean(y, axis=-1, keepdims=True)
    var = jnp.mean(jnp.square(y - mean), axis=-1, keepdims=True)
    o_ref[...] = (y - mean) * jax.lax.rsqrt(var + LN_EPS) * g_ref[...] + bb_ref[...]


def _round_up(x, m):
    return ((x + m - 1) // m) * m


def _choose_bm(M, block_m):
    """Row-tile size: big tiles at large M; >=2 tiles when possible (v7x megacore)."""
    if M >= 2 * block_m:
        return block_m
    bm = _round_up(max(1, (M + 1) // 2), 8)   # aim for exactly 2 tiles
    return max(8, min(block_m, bm))


def poswise_feed_forward(x, params, *, block_m=512):
    """x: [B, S, E] f32.  Returns LayerNorm(relu(x@W1+b1)@W2+b2 + x), [B, S, E]."""
    B, S, E = x.shape
    assert E == EMBEDDING_SIZE
    M = B * S
    x2 = x.reshape(M, E).astype(jnp.float32)

    # Conv1d(k=1) weight [out, in, 1] maps to an [in, out] matmul weight (W.T).
    w1 = params["w1"].astype(jnp.bfloat16)                 # [E, H]
    b1 = params["b1"].astype(jnp.float32).reshape(1, -1)   # [1, H]
    w2 = params["w2"].astype(jnp.bfloat16)                 # [H, E]
    b2 = params["b2"].astype(jnp.float32).reshape(1, E)
    gamma = params["gamma"].astype(jnp.float32).reshape(1, E)
    beta = params["beta"].astype(jnp.float32).reshape(1, E)
    H = w1.shape[1]

    # Row tiling (pad M up to a multiple of the block; padded rows sliced off).
    bm = _choose_bm(M, block_m)
    M_pad = _round_up(M, bm)
    if M_pad != M:
        x2 = jnp.pad(x2, ((0, M_pad - M), (0, 0)))
    grid = (M_pad // bm,)

    cost = pl.CostEstimate(
        flops=4 * M_pad * E * H,                 # two matmuls, 2*M*E*H each
        transcendentals=M_pad,                   # one rsqrt per row (LayerNorm)
        bytes_accessed=(2 * M_pad * E * 4        # x in + out, f32
                        + 2 * E * H * 2          # W1 + W2, bf16, fetched once
                        + (H + 3 * E) * 4),      # biases + LN params
    )

    out = pl.pallas_call(
        _ffn_fused_kernel,
        grid=grid,
        out_shape=jax.ShapeDtypeStruct((M_pad, E), jnp.float32),
        in_specs=[
            pl.BlockSpec((bm, E), lambda i: (i, 0)),   # x (also the residual)
            pl.BlockSpec((E, H), lambda i: (0, 0)),    # W1, VMEM-resident
            pl.BlockSpec((1, H), lambda i: (0, 0)),    # b1
            pl.BlockSpec((H, E), lambda i: (0, 0)),    # W2, VMEM-resident
            pl.BlockSpec((1, E), lambda i: (0, 0)),    # b2
            pl.BlockSpec((1, E), lambda i: (0, 0)),    # LN gamma
            pl.BlockSpec((1, E), lambda i: (0, 0)),    # LN beta
        ],
        out_specs=pl.BlockSpec((bm, E), lambda i: (i, 0)),
        compiler_params=pltpu.CompilerParams(
            dimension_semantics=("parallel",),
            vmem_limit_bytes=48 * 1024 * 1024),
        cost_estimate=cost,
    )(x2, w1, b1, w2, b2, gamma, beta)

    return out[:M].reshape(B, S, E)


# ---------------------------------------------------------------------------
# Pure-JAX reference (f32) for validation
# ---------------------------------------------------------------------------
def poswise_feed_forward_ref(x, params):
    B, S, E = x.shape
    x2 = x.reshape(B * S, E)
    h = jnp.maximum(x2 @ params["w1"] + params["b1"], 0.0)
    o = h @ params["w2"] + params["b2"]
    y = o + x2
    mean = jnp.mean(y, axis=-1, keepdims=True)
    var = jnp.mean(jnp.square(y - mean), axis=-1, keepdims=True)
    out = (y - mean) * jax.lax.rsqrt(var + LN_EPS) * params["gamma"] + params["beta"]
    return out.reshape(B, S, E)


# ---------------------------------------------------------------------------
# Deterministic parameter init (shapes mirror the PyTorch module; W stored
# transposed relative to Conv1d's [out, in, 1] layout so the kernel does x@W).
# ---------------------------------------------------------------------------
def init_params(key, scale=0.02):
    k1, k2, k3, k4 = jax.random.split(key, 4)
    return dict(
        w1=jax.random.normal(k1, (EMBEDDING_SIZE, FC_SIZE), jnp.float32) * scale,
        b1=jax.random.normal(k2, (FC_SIZE,), jnp.float32) * scale,
        w2=jax.random.normal(k3, (FC_SIZE, EMBEDDING_SIZE), jnp.float32) * scale,
        b2=jax.random.normal(k4, (EMBEDDING_SIZE,), jnp.float32) * scale,
        gamma=jnp.ones((EMBEDDING_SIZE,), jnp.float32),   # nn.LayerNorm defaults
        beta=jnp.zeros((EMBEDDING_SIZE,), jnp.float32),
    )
    # TODO(synk): nothing untranslatable here — Conv1d(kernel_size=1) is a
    # pointwise linear; dropout is not part of this module.


if __name__ == "__main__":
    key = jax.random.PRNGKey(0)
    k_param, k_x = jax.random.split(key)
    params = init_params(k_param)

    # (2, 8): small spec-consistent shape (M=16 -> two 8-row tiles).
    # (4, 128): medium shape (M=512 -> two 256-row tiles, exercises megacore path).
    for (B, S) in [(2, 8), (4, 128)]:
        k_x, sub = jax.random.split(k_x)
        x = jax.random.normal(sub, (B, S, EMBEDDING_SIZE), jnp.float32)

        out = jax.block_until_ready(poswise_feed_forward(x, params))
        ref = poswise_feed_forward_ref(x, params)

        assert out.shape == (B, S, EMBEDDING_SIZE)
        assert bool(jnp.all(jnp.isfinite(out)))
        # bf16 MXU inputs with f32 accumulation -> loose-but-meaningful tolerance.
        max_err = float(jnp.max(jnp.abs(out - ref)))
        assert bool(jnp.allclose(out, ref, atol=0.1, rtol=0.1)), max_err

    print("KERNEL_OK")
</pallas_src>

<mosaic_0001>
module attributes {stable_mosaic.version = 11 : i64} {
  func.func @_ffn_fused_kernel(%arg0: i32, %arg1: memref<8x512xf32, #tpu.memory_space<vmem>>, %arg2: memref<512x2048xbf16, #tpu.memory_space<vmem>>, %arg3: memref<1x2048xf32, #tpu.memory_space<vmem>>, %arg4: memref<2048x512xbf16, #tpu.memory_space<vmem>>, %arg5: memref<1x512xf32, #tpu.memory_space<vmem>>, %arg6: memref<1x512xf32, #tpu.memory_space<vmem>>, %arg7: memref<1x512xf32, #tpu.memory_space<vmem>>, %arg8: memref<8x512xf32, #tpu.memory_space<vmem>>) attributes {dimension_semantics = [#tpu.dimension_semantics<parallel>], iteration_bounds = array<i64: 2>, scalar_prefetch = 0 : i64, scratch_operands = 0 : i64, tpu.core_type = #tpu.core_type<tc>, window_params = [{transform_indices = @transform_0, window_bounds = array<i64: 8, 512>}, {pipeline_mode = #tpu.pipeline_mode<synchronous>, transform_indices = @transform_1, window_bounds = array<i64: 512, 2048>}, {pipeline_mode = #tpu.pipeline_mode<synchronous>, transform_indices = @transform_2, window_bounds = array<i64: 1, 2048>}, {pipeline_mode = #tpu.pipeline_mode<synchronous>, transform_indices = @transform_3, window_bounds = array<i64: 2048, 512>}, {pipeline_mode = #tpu.pipeline_mode<synchronous>, transform_indices = @transform_4, window_bounds = array<i64: 1, 512>}, {pipeline_mode = #tpu.pipeline_mode<synchronous>, transform_indices = @transform_5, window_bounds = array<i64: 1, 512>}, {pipeline_mode = #tpu.pipeline_mode<synchronous>, transform_indices = @transform_6, window_bounds = array<i64: 1, 512>}, {transform_indices = @transform_7, window_bounds = array<i64: 8, 512>}]} {
    %c0 = arith.constant 0 : index
    %c0_0 = arith.constant 0 : index
    %0 = vector.load %arg1[%c0, %c0_0] : memref<8x512xf32, #tpu.memory_space<vmem>>, vector<8x512xf32>
    %1 = arith.truncf %0 : vector<8x512xf32> to vector<8x512xbf16>
    %c0_1 = arith.constant 0 : index
    %c0_2 = arith.constant 0 : index
    %2 = vector.load %arg2[%c0_1, %c0_2] : memref<512x2048xbf16, #tpu.memory_space<vmem>>, vector<512x2048xbf16>
    %cst = arith.constant dense<0.000000e+00> : vector<8x2048xf32>
    %3 = tpu.matmul %1, %2, %cst {dimension_numbers = #tpu.dot_dimension_numbers<[1], [0], [0], [1], [0, 0, 1, 1], [], []>} : vector<8x512xbf16>, vector<512x2048xbf16>, vector<8x2048xf32> -> vector<8x2048xf32>
    %c0_3 = arith.constant 0 : index
    %c0_4 = arith.constant 0 : index
    %4 = vector.load %arg3[%c0_3, %c0_4] : memref<1x2048xf32, #tpu.memory_space<vmem>>, vector<1x2048xf32>
    %5 = vector.broadcast %4 : vector<1x2048xf32> to vector<8x2048xf32>
    %6 = arith.addf %3, %5 : vector<8x2048xf32>
    %cst_5 = arith.constant 0.000000e+00 : f32
    %7 = vector.broadcast %cst_5 : f32 to vector<8x2048xf32>
    %8 = arith.maximumf %6, %7 : vector<8x2048xf32>
    %9 = arith.truncf %8 : vector<8x2048xf32> to vector<8x2048xbf16>
    %c0_6 = arith.constant 0 : index
    %c0_7 = arith.constant 0 : index
    %10 = vector.load %arg4[%c0_6, %c0_7] : memref<2048x512xbf16, #tpu.memory_space<vmem>>, vector<2048x512xbf16>
    %cst_8 = arith.constant dense<0.000000e+00> : vector<8x512xf32>
    %11 = tpu.matmul %9, %10, %cst_8 {dimension_numbers = #tpu.dot_dimension_numbers<[1], [0], [0], [1], [0, 0, 1, 1], [], []>} : vector<8x2048xbf16>, vector<2048x512xbf16>, vector<8x512xf32> -> vector<8x512xf32>
    %c0_9 = arith.constant 0 : index
    %c0_10 = arith.constant 0 : index
    %12 = vector.load %arg5[%c0_9, %c0_10] : memref<1x512xf32, #tpu.memory_space<vmem>>, vector<1x512xf32>
    %13 = vector.broadcast %12 : vector<1x512xf32> to vector<8x512xf32>
    %14 = arith.addf %11, %13 : vector<8x512xf32>
    %15 = arith.addf %14, %0 : vector<8x512xf32>
    %cst_11 = arith.constant dense<0.000000e+00> : vector<8xf32>
    %16 = vector.multi_reduction <add>, %15, %cst_11 [1] : vector<8x512xf32> to vector<8xf32>
    %17 = vector.shape_cast %16 : vector<8xf32> to vector<8x1xf32>
    %cst_12 = arith.constant 5.120000e+02 : f32
    %18 = vector.broadcast %cst_12 : f32 to vector<8x1xf32>
    %19 = arith.divf %17, %18 : vector<8x1xf32>
    %20 = vector.broadcast %19 : vector<8x1xf32> to vector<8x512xf32>
    %21 = arith.subf %15, %20 : vector<8x512xf32>
    %22 = arith.mulf %21, %21 : vector<8x512xf32>
    %cst_13 = arith.constant dense<0.000000e+00> : vector<8xf32>
    %23 = vector.multi_reduction <add>, %22, %cst_13 [1] : vector<8x512xf32> to vector<8xf32>
    %24 = vector.shape_cast %23 : vector<8xf32> to vector<8x1xf32>
    %cst_14 = arith.constant 5.120000e+02 : f32
    %25 = vector.broadcast %cst_14 : f32 to vector<8x1xf32>
    %26 = arith.divf %24, %25 : vector<8x1xf32>
    %27 = vector.broadcast %19 : vector<8x1xf32> to vector<8x512xf32>
    %28 = arith.subf %15, %27 : vector<8x512xf32>
    %cst_15 = arith.constant 9.99999974E-6 : f32
    %29 = vector.broadcast %cst_15 : f32 to vector<8x1xf32>
    %30 = arith.addf %26, %29 : vector<8x1xf32>
    %31 = math.rsqrt %30 : vector<8x1xf32>
    %32 = vector.broadcast %31 : vector<8x1xf32> to vector<8x512xf32>
    %33 = arith.mulf %28, %32 : vector<8x512xf32>
    %c0_16 = arith.constant 0 : index
    %c0_17 = arith.constant 0 : index
    %34 = vector.load %arg6[%c0_16, %c0_17] : memref<1x512xf32, #tpu.memory_space<vmem>>, vector<1x512xf32>
    %35 = vector.broadcast %34 : vector<1x512xf32> to vector<8x512xf32>
    %36 = arith.mulf %33, %35 : vector<8x512xf32>
    %c0_18 = arith.constant 0 : index
    %c0_19 = arith.constant 0 : index
    %37 = vector.load %arg7[%c0_18, %c0_19] : memref<1x512xf32, #tpu.memory_space<vmem>>, vector<1x512xf32>
    %38 = vector.broadcast %37 : vector<1x512xf32> to vector<8x512xf32>
    %39 = arith.addf %36, %38 : vector<8x512xf32>
    %c0_20 = arith.constant 0 : index
    %c0_21 = arith.constant 0 : index
    %40 = vector.load %arg8[%c0_20, %c0_21] : memref<8x512xf32, #tpu.memory_space<vmem>>, vector<8x512xf32>
    tpu.vector_store %arg8[%c0_20, %c0_21], %39 {strides = array<i32>} : memref<8x512xf32, #tpu.memory_space<vmem>>, vector<8x512xf32>,
    return
  }
  func.func @transform_0(%arg0: i32) -> (i32, i32) {
    %c0_i32 = arith.constant 0 : i32
    %c0_i32_0 = arith.constant 0 : i32
    return %arg0, %c0_i32 : i32, i32
  }
  func.func @transform_1(%arg0: i32) -> (i32, i32) {
    %c0_i32 = arith.constant 0 : i32
    %c0_i32_0 = arith.constant 0 : i32
    %c0_i32_1 = arith.constant 0 : i32
    return %c0_i32, %c0_i32_0 : i32, i32
  }
  func.func @transform_2(%arg0: i32) -> (i32, i32) {
    %c0_i32 = arith.constant 0 : i32
    %c0_i32_0 = arith.constant 0 : i32
    %c0_i32_1 = arith.constant 0 : i32
    return %c0_i32, %c0_i32_0 : i32, i32
  }
  func.func @transform_3(%arg0: i32) -> (i32, i32) {
    %c0_i32 = arith.constant 0 : i32
    %c0_i32_0 = arith.constant 0 : i32
    %c0_i32_1 = arith.constant 0 : i32
    return %c0_i32, %c0_i32_0 : i32, i32
  }
  func.func @transform_4(%arg0: i32) -> (i32, i32) {
    %c0_i32 = arith.constant 0 : i32
    %c0_i32_0 = arith.constant 0 : i32
    %c0_i32_1 = arith.constant 0 : i32
    return %c0_i32, %c0_i32_0 : i32, i32
  }
  func.func @transform_5(%arg0: i32) -> (i32, i32) {
    %c0_i32 = arith.constant 0 : i32
    %c0_i32_0 = arith.constant 0 : i32
    %c0_i32_1 = arith.constant 0 : i32
    return %c0_i32, %c0_i32_0 : i32, i32
  }
  func.func @transform_6(%arg0: i32) -> (i32, i32) {
    %c0_i32 = arith.constant 0 : i32
    %c0_i32_0 = arith.constant 0 : i32
    %c0_i32_1 = arith.constant 0 : i32
    return %c0_i32, %c0_i32_0 : i32, i32
  }
  func.func @transform_7(%arg0: i32) -> (i32, i32) {
    %c0_i32 = arith.constant 0 : i32
    %c0_i32_0 = arith.constant 0 : i32
    return %arg0, %c0_i32 : i32, i32
  }
}

</mosaic_0001>

<bundles_post_ra>
// kernel: tpu_custom_call.1
= control target key start
LH: loop header
LB: loop body
LE: loop exit
PB: predicated region body
PF: predicated region fallthrough
CT: control target
= control target key end

     0   :  { %s14592_s0 = inlined_call_operand.hbm [shape: f32[16,512], index: 0, kind: input, shape index: {}]   ;;  %s14593_s1 = inlined_call_operand.hbm [shape: bf16[512,2048], index: 1, kind: input, shape index: {}]   ;;  %s14594_s2 = inlined_call_operand.hbm [shape: f32[1,2048], index: 2, kind: input, shape index: {}]   ;;  %s14595_s3 = inlined_call_operand.hbm [shape: bf16[2048,512], index: 3, kind: input, shape index: {}]   ;;  %s14596_s4 = inlined_call_operand.hbm [shape: f32[1,512], index: 4, kind: input, shape index: {}]   ;;  %s14597_s5 = inlined_call_operand.hbm [shape: f32[1,512], index: 5, kind: input, shape index: {}]   ;;  %s14598_s6 = inlined_call_operand.hbm [shape: f32[1,512], index: 6, kind: input, shape index: {}]   ;;  %s14599_s7 = inlined_call_operand.hbm [shape: f32[16,512], index: 7, kind: output, shape index: {}]  }
   0x1   :  { %14600 = sst [smem:[#allocation20_spill]] %s14593_s1 }
   0x2   :  { %14601 = sst [smem:[#allocation21_spill]] %s14594_s2 }
   0x3   :  { %12 = vsyncpa [#allocation3], 0 }
   0x4   :  { %14 = vsyncpa [#allocation3 + $0x1], 0 }
   0x5   :  { %15 = vsyncpa [#allocation6], 0 }
   0x6   :  { %16 = vsyncpa [#allocation9], 0 }
   0x7   :  { %17 = vsyncpa [#allocation12], 0 }
   0x8   :  { %18 = vsyncpa [#allocation4], 0 }
   0x9   :  { %20 = vsyncpa [#allocation4 + $0x1], 0  ;;  %s14117_s24 = smov 0   ;;  %s14119_s25 = smov 0  }
   0xa   :  { %s14121_s26 = smov 0   ;;  %s14123_s27 = smov 0  }
   0xb LB: > { %s14602_s1 = sld [smem:[#allocation20_spill]]  ;;  %s14141_s8 = sadd.s32 4294967295, %s14064_s27   ;;  %s14064_s27 = sphi %s14123_s27, %s14615_s27   ;;  %s14060_s26 = sphi %s14121_s26, %s14614_s26   ;;  %s14056_s25 = sphi %s14119_s25, %s14613_s25   ;;  %s14052_s24 = sphi %s14117_s24, %s14612_s24  }
   0xc   : > { %p8505_p0 = scmp.ge.s32.totalorder %s14064_s27, 1  ;;  %p47_p1 = scmp.eq.s32.totalorder %s14141_s8, 0 }
   0xd   : > { %p209_p2 = scmp.lt.s32.totalorder %s14064_s27, 3  ;;  %s14066_s10 = smov [#allocation5]  }
   0xe   : > { %s222_s11 = sshll.u32 %s14066_s10, 4  ;;  %s246_s14 = sshll.u32 %s14595_s3, 4  ;;  %s223_s11 = int_to_ptr.vmem [resolvable:$true] %s222_s11  ;;  %s247_s14 = int_to_ptr.hbm [resolvable:$true] %s246_s14 }
   0xf   : > { %p14146_p3 = pnand %p8505_p0, %p209_p2  ;;  %s14067_s16 = smov [#allocation8]  }
  0x10   : > { %s248_s17 = sshll.u32 %s14067_s16, 4  ;;  %s14068_s18 = smov 1024   ;;  %s249_s17 = int_to_ptr.vmem [resolvable:$true] %s248_s17 }
  0x11   : > { %s220_s30 = sshll.u32 %s14602_s1, 4  ;;  %p13680_p4 = pneg %p14146_p3  ;;  %s221_s30 = int_to_ptr.hbm [resolvable:$true] %s220_s30 }
  0x12   : > { %s14069_s19 = smov 64   ;;  %s14070_s20 = smov 256  }
  0x13   : > { %p14158_p6 = pnand %p13680_p4, %p47_p1  ;;  %s14071_s21 = smov 16  }
  0x14   : > { %s273_s28 = sshll.u32 %s14597_s5, 4  ;;  %s14072_s29 = smov [#allocation11]   ;;  %s274_s28 = int_to_ptr.hbm [resolvable:$true] %s273_s28 }
  0x15   : > { %13683 = dma.hbm_to_vmem [thread:$0]  (!%p14158_p6), %s221_s30, 65536, %s223_s11, [#allocation6], %s14068_s18, %s14068_s18, %s14069_s19  }
  0x16   : > { %13689 = dma.hbm_to_vmem [thread:$0]  (!%p14158_p6), %s247_s14, 65536, %s249_s17, [#allocation9], %s14070_s20, %s14070_s20, %s14071_s21  }
  0x17   : > { %s275_s10 = sshll.u32 %s14072_s29, 4  ;;  %s14605_s2 = sld [smem:[#allocation21_spill]]  ;;  %s276_s10 = int_to_ptr.vmem [resolvable:$true] %s275_s10 }
  0x18   : > { %13695 = dma.hbm_to_vmem [thread:$0]  (!%p14158_p6), %s274_s28, 64, %s276_s10, [#allocation12]  }
  0x19   : > { %s14073_s30 = smov [#allocation7]   ;;  %s261_s18 = sshll.u32 %s14596_s4, 4  ;;  %s262_s18 = int_to_ptr.hbm [resolvable:$true] %s261_s18 }
  0x1a   : > { %s237_s11 = sshll.u32 %s14073_s30, 4  ;;  %s285_s21 = sshll.u32 %s14598_s6, 4  ;;  %s238_s11 = int_to_ptr.vmem [resolvable:$true] %s237_s11  ;;  %s286_s21 = int_to_ptr.hbm [resolvable:$true] %s285_s21 }
  0x1b   : > { %s14074_s22 = smov [#allocation10]   ;;  %s14075_s28 = smov [#allocation13]  }
  0x1c   : > { %s263_s23 = sshll.u32 %s14074_s22, 4  ;;  %s287_s29 = sshll.u32 %s14075_s28, 4  ;;  %s264_s23 = int_to_ptr.vmem [resolvable:$true] %s263_s23  ;;  %s288_s29 = int_to_ptr.vmem [resolvable:$true] %s287_s29 }
  0x1d   : > { %s235_s16 = sshll.u32 %s14605_s2, 4  ;;  %s8504_s10 = sadd.s32 4294967294, %s14064_s27   ;;  %s236_s16 = int_to_ptr.hbm [resolvable:$true] %s235_s16 }
  0x1e   : > { %13686 = dma.hbm_to_vmem [thread:$0]  (!%p14158_p6), %s236_s16, 256, %s238_s11, [#allocation6]  }
  0x1f   : > { %13692 = dma.hbm_to_vmem [thread:$0]  (!%p14158_p6), %s262_s18, 64, %s264_s23, [#allocation9]  }
  0x20   : > { %13698 = dma.hbm_to_vmem [thread:$0]  (!%p14158_p6), %s286_s21, 64, %s288_s29, [#allocation12]  }
  0x21   : > { %s14188_s12 = sadd.s32 1, %s14064_s27   ;;  %s33_s16 = sadd.s32 1, %s14060_s26 }
  0x22   : > { %s30_s13 = ssub.s32 %s14064_s27, %s14188_s12  ;;  %p40_p8 = scmp.ne.s32.totalorder %s14060_s26, %s14056_s25 }
  0x23   : > { %p31_p7 = scmp.eq.s32.totalorder %s30_s13, 0  ;;  %p41_p9 = scmp.eq.s32.totalorder %s14064_s27, 0 }
  0x24   : > { %p46_p10 = scmp.ne.s32.totalorder %s14056_s25, %s14052_s24  ;;  %p196_p13 = scmp.eq.s32.totalorder %s14141_s8, 1 }
  0x25   : > { %s14199_s30 = scalar_select %p31_p7, %s14060_s26, %s33_s16  }
  0x26   : > { %p14201_p11 = por %p41_p9, %p40_p8  ;;  %p14207_p12 = por %p47_p1, %p46_p10 }
  0x27   : > { %p202_p0 = scmp.eq.s32.totalorder %s8504_s10, 1  ;;  %p13713_p2 = scmp.lt.s32.totalorder %s14064_s27, 2 }
  0x28   : > { %s298_s14 = sand.u32 1, %s14060_s26   ;;  %p14214_p4 = por %p196_p13, %p40_p8 }
  0x29   : > { %p14218_p6 = por %p202_p0, %p46_p10  ;;  %s8513_s19 = sshll.u32 %s298_s14, 5 }
  0x2a   : > { %s12626_s20 = sshll.u32 %s14064_s27, 5  ;;  %s302_s28 = scalar_lea.vmem [#allocation2], %s8513_s19 }
  0x2b   : > { %s307_s23 = scalar_lea.hbm %s14592_s0, %s12626_s20  ;;  %s311_s29 = sshll.u32 %s302_s28, 4  ;;  %s312_s29 = int_to_ptr.vmem [resolvable:$true] %s311_s29 }
  0x2c   : > { %s309_s13 = sshll.u32 %s307_s23, 4  ;;  %p14228_p7 = pnand %p13713_p2, %p14201_p11  ;;  %s310_s13 = int_to_ptr.hbm [resolvable:$true] %s309_s13 }
  0x2d   : > { %s299_s16 = scalar_lea.sflag [#allocation3], %s298_s14  ;;  %s13956_s1 = sshra.s32 %s310_s13, 4  ;;  %s13957_s1 = int_to_ptr.hbm [resolvable:$true] %s13956_s1 }
  0x2e   : > { %s13958_s2 = scalar_lea.hbm %s13957_s1, 32  ;;  %p13960_p9 = pneg %p14228_p7 }
  0x2f   : > { %p13959_p8 = scmp.ne.s32.totalorder %s13957_s1, %s13958_s2  ;;  %s13963_s21 = scalar_lea.hbm %s14592_s0, 64 }
  0x30   : > { %p13964_p11 = scmp.lt.s32.totalorder %s13957_s1, %s14592_s0  ;;  %p13965_p0 = scmp.lt.s32.totalorder %s13963_s21, %s13958_s2 }
  0x31   : > { %p13961_p10 = pnand %p13960_p9, %p13959_p8 }
  0x32   : > { %p13966_p2 = por %p13965_p0, %p13964_p11 }
  0x33   : > { %p13962_p13 = pneg %p13961_p10 }
  0x35   : > { %p13967_p5 = pnand %p13966_p2, %p13962_p13 }
  0x37   : > { %13970 = shalt.err (!%p13967_p5)
}
  0x38   : > { %13702 = dma.hbm_to_vmem [thread:$0]  (!%p14228_p7), %s310_s13, 512, %s312_s29, %s299_s16  }
  0x39   : > { %320 = sbr.rel (%p14146_p3) target bundleno = 1564 (0x61c), region = 48  ;;  %s14245_s14 = sand.u32 (!%p14146_p3), 1, %s14056_s25  }
  0x3a   : > { %s8517_s23 = sshll.u32 (!%p14146_p3), %s14245_s14, 5  ;;  %s323_s28 = scalar_lea.sflag (!%p14146_p3), [#allocation3], %s14245_s14 }
  0x3b   : > { %s14251_s1 = scalar_lea.vmem (!%p14146_p3), [#allocation2], %s8517_s23 }
  0x3e   : > { %14031 = dma.done.wait (%p14207_p12), %s323_s28, 512  }
  0x3f   : > { %14033 = vsyncadd (%p14207_p12), %s323_s28, 4294966784 }
  0x40   : > { %14035 = dma.done.wait (%p47_p1), [#allocation6], 65792  }
  0x41   : > { %14037 = vsyncadd (%p47_p1), [#allocation6], 4294901504 }
  0x42   : > { %14039 = dma.done.wait (%p47_p1), [#allocation9], 65600  }
  0x43   : > { %14041 = vsyncadd (%p47_p1), [#allocation9], 4294901696 }
  0x44   : > { %14043 = dma.done.wait (%p47_p1), [#allocation12], 128  }
  0x45   : > { %14045 = vsyncadd (%p47_p1), [#allocation12], 4294967168  ;;  %v8975_v0 = vld [vmem:[#allocation5 + $0x380] sm:$0xf]  ;;  %s13651_s2 = sshll.u32 %s14141_s8, 5  ;;  %s387_s8 = scalar_lea.vmem [#allocation14], %s8517_s23 }
  0x46   : > { %v12747_v1 = vld [vmem:[#allocation5 + $0x3bc] sm:$0xf0]  ;;  %s8372_s29 = scalar_lea.hbm %s14599_s7, %s13651_s2  ;;  %s8374_s13 = sshll.u32 %s387_s8, 4  ;;  %s8375_s13 = int_to_ptr.vmem [resolvable:$true] %s8374_s13 }
  0x47   : > { %v9487_v2 = vld [vmem:[#allocation5 + $0x780] sm:$0xf]  ;;  %v8976_v3 = vor.u32 %v12747_v1, %v8975_v0  ;;  %s8376_s10 = sshll.u32 %s8372_s29, 4  ;;  %s8361_s16 = scalar_lea.sflag [#allocation4], %s14245_s14  ;;  %s8377_s10 = int_to_ptr.hbm [resolvable:$true] %s8376_s10 }
  0x48   : > { %v12875_v4 = vld [vmem:[#allocation5 + $0x7bc] sm:$0xf0]  ;;  %s14000_s19 = sshra.s32 %s8377_s10, 4  ;;  %s14006_s11 = scalar_lea.hbm %s14599_s7, 64  ;;  %s14001_s19 = int_to_ptr.hbm [resolvable:$true] %s14000_s19 }
  0x49   : > { %v9999_v5 = vld [vmem:[#allocation5 + $0xb80] sm:$0xf]  ;;  %v9488_v7 = vor.u32 %v12875_v4, %v9487_v2  ;;  %3504 = vmatpush.bf16.msra.mxu0 %v8976_v3  ;;  %s14002_s20 = scalar_lea.hbm %s14001_s19, 32  ;;  %p14007_p12 = scmp.lt.s32.totalorder %s14001_s19, %s14599_s7 }
  0x4a   : > { %v13003_v6 = vld [vmem:[#allocation5 + $0xbbc] sm:$0xf0]  ;;  %p14003_p1 = scmp.ne.s32.totalorder %s14001_s19, %s14002_s20  ;;  %p14008_p7 = scmp.lt.s32.totalorder %s14006_s11, %s14002_s20 }
  0x4b   : > { %v10000_v8 = vor.u32 %v13003_v6, %v9999_v5  ;;  %v10511_v9 = vld [vmem:[#allocation5 + $0xf80] sm:$0xf]  ;;  %3517 = vmatpush.bf16.msra.mxu1 %v9488_v7 }
  0x4c   : > { %v13131_v10 = vld [vmem:[#allocation5 + $0xfbc] sm:$0xf0]  ;;  %p14004_p3 = pnand %p14003_p1, %p14214_p4  ;;  %p14009_p8 = por %p14008_p7, %p14007_p12 }
  0x4d   : > { %v8911_v11 = vld [vmem:[#allocation5 + $0x300] sm:$0xf]  ;;  %v10512_v12 = vor.u32 %v13131_v10, %v10511_v9  ;;  %3530 = vmatpush.bf16.msra.mxu2 %v10000_v8 }
  0x4e   : > { %v12731_v13 = vld [vmem:[#allocation5 + $0x33c] sm:$0xf0]  ;;  %p14005_p5 = pneg %p14004_p3 }
  0x4f   : > { %v9423_v14 = vld [vmem:[#allocation5 + $0x700] sm:$0xf]  ;;  %v8912_v16 = vor.u32 %v12731_v13, %v8911_v11  ;;  %3543 = vmatpush.bf16.msra.mxu3 %v10512_v12 }
  0x50   : > { %v12859_v15 = vld [vmem:[#allocation5 + $0x73c] sm:$0xf0]  ;;  %p14010_p9 = pnand %p14009_p8, %p14005_p5 }
  0x51   : > { %v9424_v17 = vor.u32 %v12859_v15, %v9423_v14  ;;  %v9935_v18 = vld [vmem:[#allocation5 + $0xb00] sm:$0xf]  ;;  %3505 = vmatpush.bf16.msra.mxu0 %v8912_v16 }
  0x52   : > { %v12987_v19 = vld [vmem:[#allocation5 + $0xb3c] sm:$0xf0] }
  0x53   : > { %v10447_v20 = vld [vmem:[#allocation5 + $0xf00] sm:$0xf]  ;;  %v9936_v21 = vor.u32 %v12987_v19, %v9935_v18  ;;  %3518 = vmatpush.bf16.msra.mxu1 %v9424_v17 }
  0x54   : > { %v13115_v22 = vld [vmem:[#allocation5 + $0xf3c] sm:$0xf0] }
  0x55   : > { %v8847_v23 = vld [vmem:[#allocation5 + $0x280] sm:$0xf]  ;;  %v10448_v25 = vor.u32 %v13115_v22, %v10447_v20  ;;  %3531 = vmatpush.bf16.msra.mxu2 %v9936_v21 }
  0x56   : > { %v12715_v24 = vld [vmem:[#allocation5 + $0x2bc] sm:$0xf0] }
  0x57   : > { %v9359_v26 = vld [vmem:[#allocation5 + $0x680] sm:$0xf]  ;;  %v8848_v29 = vor.u32 %v12715_v24, %v8847_v23  ;;  %3544 = vmatpush.bf16.msra.mxu3 %v10448_v25 }
  0x58   : > { %v12843_v27 = vld [vmem:[#allocation5 + $0x6bc] sm:$0xf0] }
  0x59   : > { %v9871_v28 = vld [vmem:[#allocation5 + $0xa80] sm:$0xf]  ;;  %v9360_v33 = vor.u32 %v12843_v27, %v9359_v26  ;;  %3506 = vmatpush.bf16.msra.mxu0 %v8848_v29  ;;  %v8977_v29 = vld [vmem:[#allocation5 + $0x3c0] sm:$0xf0] }
  0x5a   : > { %v12971_v30 = vld [vmem:[#allocation5 + $0xabc] sm:$0xf0] }
  0x5b   : > { %v10383_v31 = vld [vmem:[#allocation5 + $0xe80] sm:$0xf]  ;;  %v9872_v34 = vor.u32 %v12971_v30, %v9871_v28  ;;  %3519 = vmatpush.bf16.msra.mxu1 %v9360_v33  ;;  %v12739_v28 = vld [vmem:[#allocation5 + $0x384] sm:$0xf] }
  0x5c   : > { %v13099_v32 = vld [vmem:[#allocation5 + $0xebc] sm:$0xf0]  ;;  %v12867_v30 = vld [vmem:[#allocation5 + $0x784] sm:$0xf] }
  0x5d   : > { %v8783_v35 = vld [vmem:[#allocation5 + $0x200] sm:$0xf]  ;;  %v10384_v38 = vor.u32 %v13099_v32, %v10383_v31  ;;  %3532 = vmatpush.bf16.msra.mxu2 %v9872_v34  ;;  %v9489_v32 = vld [vmem:[#allocation5 + $0x7c0] sm:$0xf0] }
  0x5e   : > { %v12699_v36 = vld [vmem:[#allocation5 + $0x23c] sm:$0xf0]  ;;  %v12995_v33 = vld [vmem:[#allocation5 + $0xb84] sm:$0xf] }
  0x5f   : > { %v9295_v37 = vld [vmem:[#allocation5 + $0x600] sm:$0xf]  ;;  %v8784_v44 = vor.u32 %v12699_v36, %v8783_v35  ;;  %3545 = vmatpush.bf16.msra.mxu3 %v10384_v38  ;;  %v10001_v34 = vld [vmem:[#allocation5 + $0xbc0] sm:$0xf0] }
  0x60   : > { %v12827_v39 = vld [vmem:[#allocation5 + $0x63c] sm:$0xf0]  ;;  %v10513_v38 = vld [vmem:[#allocation5 + $0xfc0] sm:$0xf0] }
  0x61   : > { %v9807_v40 = vld [vmem:[#allocation5 + $0xa00] sm:$0xf]  ;;  %v9296_v45 = vor.u32 %v12827_v39, %v9295_v37  ;;  %3507 = vmatpush.bf16.msra.mxu0 %v8784_v44  ;;  %v13123_v37 = vld [vmem:[#allocation5 + $0xf84] sm:$0xf] }
  0x62   : > { %v12955_v41 = vld [vmem:[#allocation5 + $0xa3c] sm:$0xf0]  ;;  %v8913_v44 = vld [vmem:[#allocation5 + $0x340] sm:$0xf0] }
  0x63   : > { %v10319_v42 = vld [vmem:[#allocation5 + $0xe00] sm:$0xf]  ;;  %v9808_v46 = vor.u32 %v12955_v41, %v9807_v40  ;;  %3520 = vmatpush.bf16.msra.mxu1 %v9296_v45  ;;  %v8980_v40 = vor.u32 %v12739_v28, %v8977_v29  ;;  %v9492_v41 = vor.u32 %v12867_v30, %v9489_v32  ;;  %v12851_v45 = vld [vmem:[#allocation5 + $0x704] sm:$0xf] }
  0x64   : > { %v13083_v43 = vld [vmem:[#allocation5 + $0xe3c] sm:$0xf0]  ;;  %v12931_v28 = vld [vmem:[#allocation5 + $0x984] sm:$0xf] }
  0x65   : > { %v8719_v47 = vld [vmem:[#allocation5 + $0x180] sm:$0xf]  ;;  %v10320_v50 = vor.u32 %v13083_v43, %v10319_v42  ;;  %3533 = vmatpush.bf16.msra.mxu2 %v9808_v46  ;;  %v10004_v42 = vor.u32 %v12995_v33, %v10001_v34  ;;  %v12723_v43 = vld [vmem:[#allocation5 + $0x304] sm:$0xf]  ;;  %v10516_v46 = vor.u32 %v13123_v37, %v10513_v38 }
  0x66   : > { %v12683_v48 = vld [vmem:[#allocation5 + $0x1bc] sm:$0xf0]  ;;  %v9745_v29 = vld [vmem:[#allocation5 + $0x9c0] sm:$0xf0] }
  0x67   : > { %v9231_v49 = vld [vmem:[#allocation5 + $0x580] sm:$0xf]  ;;  %v8720_v56 = vor.u32 %v12683_v48, %v8719_v47  ;;  %3546 = vmatpush.bf16.msra.mxu3 %v10320_v50  ;;  %v9425_v47 = vld [vmem:[#allocation5 + $0x740] sm:$0xf0]  ;;  %v9748_v34 = vor.u32 %v12931_v28, %v9745_v29  ;;  %v9943_v28 = vld [vmem:[#allocation5 + $0xb08] sm:$0xf] }
  0x68   : > { %v12811_v51 = vld [vmem:[#allocation5 + $0x5bc] sm:$0xf0]  ;;  %v12979_v48 = vld [vmem:[#allocation5 + $0xb04] sm:$0xf]  ;;  %v12988_v29 = vld [vmem:[#allocation5 + $0xb44] sm:$0xf0] }
  0x69   : > { %v9743_v52 = vld [vmem:[#allocation5 + $0x980] sm:$0xf]  ;;  %v9232_v57 = vor.u32 %v12811_v51, %v9231_v49  ;;  %3508 = vmatpush.bf16.msra.mxu0 %v8720_v56  ;;  %v9937_v49 = vld [vmem:[#allocation5 + $0xb40] sm:$0xf0] }
  0x6a   : > { %v12939_v53 = vld [vmem:[#allocation5 + $0x9bc] sm:$0xf0]  ;;  %v13107_v50 = vld [vmem:[#allocation5 + $0xf04] sm:$0xf] }
  0x6b   : > { %v10255_v54 = vld [vmem:[#allocation5 + $0xd80] sm:$0xf]  ;;  %v9744_v58 = vor.u32 %v12939_v53, %v9743_v52  ;;  %3521 = vmatpush.bf16.msra.mxu1 %v9232_v57  ;;  %v10449_v51 = vld [vmem:[#allocation5 + $0xf40] sm:$0xf0]  ;;  %v8916_v52 = vor.u32 %v12723_v43, %v8913_v44 }
  0x6c   : > { %v13067_v55 = vld [vmem:[#allocation5 + $0xdbc] sm:$0xf0]  ;;  %v12707_v53 = vld [vmem:[#allocation5 + $0x284] sm:$0xf] }
  0x6d   : > { %v8655_v59 = vld [vmem:[#allocation5 + $0x100] sm:$0xf]  ;;  %v10256_v62 = vor.u32 %v13067_v55, %v10255_v54  ;;  %3534 = vmatpush.bf16.msra.mxu2 %v9744_v58  ;;  %v9428_v54 = vor.u32 %v12851_v45, %v9425_v47  ;;  %v9940_v55 = vor.u32 %v12979_v48, %v9937_v49  ;;  %v8849_v56 = vld [vmem:[#allocation5 + $0x2c0] sm:$0xf0] }
  0x6e   : > { %v12667_v60 = vld [vmem:[#allocation5 + $0x13c] sm:$0xf0]  ;;  %v12835_v57 = vld [vmem:[#allocation5 + $0x684] sm:$0xf] }
  0x6f   : > { %v9167_v61 = vld [vmem:[#allocation5 + $0x500] sm:$0xf]  ;;  %v8656_v4 = vor.u32 %v12667_v60, %v8655_v59  ;;  %3547 = vmatpush.bf16.msra.mxu3 %v10256_v62  ;;  %v9361_v58 = vld [vmem:[#allocation5 + $0x6c0] sm:$0xf0]  ;;  %v10452_v59 = vor.u32 %v13107_v50, %v10449_v51 }
  0x70   : > { %v12795_v63 = vld [vmem:[#allocation5 + $0x53c] sm:$0xf0]  ;;  %v12963_v60 = vld [vmem:[#allocation5 + $0xa84] sm:$0xf] }
  0x71   : > { %v9679_v0 = vld [vmem:[#allocation5 + $0x900] sm:$0xf]  ;;  %v9168_v5 = vor.u32 %v12795_v63, %v9167_v61  ;;  %3509 = vmatpush.bf16.msra.mxu0 %v8656_v4  ;;  %v9873_v61 = vld [vmem:[#allocation5 + $0xac0] sm:$0xf0] }
  0x72   : > { %v12923_v1 = vld [vmem:[#allocation5 + $0x93c] sm:$0xf0]  ;;  %v13091_v62 = vld [vmem:[#allocation5 + $0xe84] sm:$0xf] }
  0x73   : > { %v10191_v2 = vld [vmem:[#allocation5 + $0xd00] sm:$0xf]  ;;  %v9680_v6 = vor.u32 %v12923_v1, %v9679_v0  ;;  %3522 = vmatpush.bf16.msra.mxu1 %v9168_v5  ;;  %v10385_v63 = vld [vmem:[#allocation5 + $0xec0] sm:$0xf0]  ;;  %v8852_v0 = vor.u32 %v12707_v53, %v8849_v56  ;;  %v9364_v1 = vor.u32 %v12835_v57, %v9361_v58  ;;  %v9876_v5 = vor.u32 %v12963_v60, %v9873_v61 }
  0x74   : > { %v13051_v3 = vld [vmem:[#allocation5 + $0xd3c] sm:$0xf0]  ;;  %v13059_v30 = vld [vmem:[#allocation5 + $0xd84] sm:$0xf] }
  0x75   : > { %v8591_v7 = vld [vmem:[#allocation5 + $0x80] sm:$0xf]  ;;  %v10192_v10 = vor.u32 %v13051_v3, %v10191_v2  ;;  %3535 = vmatpush.bf16.msra.mxu2 %v9680_v6  ;;  %v12691_v2 = vld [vmem:[#allocation5 + $0x204] sm:$0xf]  ;;  %v390_v3 = vld [vmem:[%s14251_s1 + $0x10] sm:$0xff] }
  0x76   : > { %v12651_v8 = vld [vmem:[#allocation5 + $0xbc] sm:$0xf0]  ;;  %v8785_v6 = vld [vmem:[#allocation5 + $0x240] sm:$0xf0] }
  0x77   : > { %v9103_v9 = vld [vmem:[#allocation5 + $0x480] sm:$0xf]  ;;  %v8592_v16 = vor.u32 %v12651_v8, %v8591_v7  ;;  %3548 = vmatpush.bf16.msra.mxu3 %v10192_v10  ;;  %v12819_v7 = vld [vmem:[#allocation5 + $0x604] sm:$0xf]  ;;  %v14271_v8 = vpack.c.bf16 %v390_v3, %v390_v3  ;;  %v391_v10 = vld [vmem:[%s14251_s1 + $0x18] sm:$0xff] }
  0x78   : > { %v12779_v11 = vld [vmem:[#allocation5 + $0x4bc] sm:$0xf0]  ;;  %v12787_v37 = vld [vmem:[#allocation5 + $0x504] sm:$0xf] }
  0x79   : > { %v9615_v12 = vld [vmem:[#allocation5 + $0x880] sm:$0xf]  ;;  %v9104_v19 = vor.u32 %v12779_v11, %v9103_v9  ;;  %3510 = vmatpush.bf16.msra.mxu0 %v8592_v16  ;;  %v10388_v11 = vor.u32 %v13091_v62, %v10385_v63  ;;  %v13075_v16 = vld [vmem:[#allocation5 + $0xe04] sm:$0xf] }
  0x7a   : > { %v12907_v13 = vld [vmem:[#allocation5 + $0x8bc] sm:$0xf0]  ;;  %v10193_v43 = vld [vmem:[#allocation5 + $0xd40] sm:$0xf0] }
  0x7b   : > { %v10127_v14 = vld [vmem:[#allocation5 + $0xc80] sm:$0xf]  ;;  %v9616_v20 = vor.u32 %v12907_v13, %v9615_v12  ;;  %3523 = vmatpush.bf16.msra.mxu1 %v9104_v19  ;;  %v9297_v12 = vld [vmem:[#allocation5 + $0x640] sm:$0xf0]  ;;  %v389_v19 = vld [vmem:[%s14251_s1 + $0x8] sm:$0xff] }
  0x7c   : > { %v13035_v15 = vld [vmem:[#allocation5 + $0xcbc] sm:$0xf0]  ;;  %v12947_v13 = vld [vmem:[#allocation5 + $0xa04] sm:$0xf] }
  0x7d   : > { %v8527_v17 = vld [vmem:[#allocation5] sm:$0xf]  ;;  %v10128_v24 = vor.u32 %v13035_v15, %v10127_v14  ;;  %3536 = vmatpush.bf16.msra.mxu2 %v9616_v20  ;;  %v9809_v14 = vld [vmem:[#allocation5 + $0xa40] sm:$0xf0]  ;;  %v14276_v15 = vpack.c.bf16 %v391_v10, %v391_v10  ;;  %v9300_v20 = vor.u32 %v12819_v7, %v9297_v12  ;;  %v12876_v10 = vld [vmem:[#allocation5 + $0x7c4] sm:$0xf0] }
  0x7e   : > { %v12635_v18 = vld [vmem:[#allocation5 + $0x3c] sm:$0xf0]  ;;  %v12643_v47 = vld [vmem:[#allocation5 + $0x84] sm:$0xf]  ;;  %v13004_v12 = vld [vmem:[#allocation5 + $0xbc4] sm:$0xf0] }
  0x7f   : > { %v9039_v21 = vld [vmem:[#allocation5 + $0x400] sm:$0xf]  ;;  %v8528_v31 = vor.u32 %v12635_v18, %v8527_v17  ;;  %3549 = vmatpush.bf16.msra.mxu3 %v10128_v24  ;;  %v10321_v17 = vld [vmem:[#allocation5 + $0xe40] sm:$0xf0]  ;;  %v8788_v18 = vor.u32 %v12691_v2, %v8785_v6  ;;  %v9495_v6 = vld [vmem:[#allocation5 + $0x788] sm:$0xf] }
  0x80   : > { %v12763_v22 = vld [vmem:[#allocation5 + $0x43c] sm:$0xf0]  ;;  %v12803_v24 = vld [vmem:[#allocation5 + $0x584] sm:$0xf] }
  0x81   : > { %v9551_v23 = vld [vmem:[#allocation5 + $0x800] sm:$0xf]  ;;  %v9040_v35 = vor.u32 %v12763_v22, %v9039_v21  ;;  %3511 = vmatpush.bf16.msra.mxu0 %v8528_v31  ;;  %v9812_v21 = vor.u32 %v12947_v13, %v9809_v14  ;;  %v12675_v22 = vld [vmem:[#allocation5 + $0x184] sm:$0xf] }
  0x82   : > { %v12891_v25 = vld [vmem:[#allocation5 + $0x83c] sm:$0xf0]  ;;  %v10257_v31 = vld [vmem:[#allocation5 + $0xdc0] sm:$0xf0] }
  0x83   : > { %v10063_v26 = vld [vmem:[#allocation5 + $0xc00] sm:$0xf]  ;;  %v9552_v36 = vor.u32 %v12891_v25, %v9551_v23  ;;  %3524 = vmatpush.bf16.msra.mxu1 %v9040_v35  ;;  %v8721_v23 = vld [vmem:[#allocation5 + $0x1c0] sm:$0xf0]  ;;  %v14282_v25 = vpack.c.bf16 %v389_v19, %v389_v19  ;;  %v10260_v38 = vor.u32 %v13059_v30, %v10257_v31  ;;  %v10455_v30 = vld [vmem:[#allocation5 + $0xf08] sm:$0xf] }
  0x84   : > { %v13019_v27 = vld [vmem:[#allocation5 + $0xc3c] sm:$0xf0]  ;;  %v8724_v32 = vor.u32 %v12675_v22, %v8721_v23  ;;  %v12659_v35 = vld [vmem:[#allocation5 + $0x104] sm:$0xf]  ;;  %v8919_v22 = vld [vmem:[#allocation5 + $0x308] sm:$0xf] }
  0x85   : > { %v10064_v39 = vor.u32 %v13019_v27, %v10063_v26  ;;  %3537 = vmatpush.bf16.msra.mxu2 %v9552_v36  ;;  %3556 = vmatpush.bf16.msrb.mxu0 %v8980_v40  ;;  %v388_v4 = vld [vmem:[%s14251_s1] sm:$0xff]  ;;  %v10324_v26 = vor.u32 %v13075_v16, %v10321_v17  ;;  %v10519_v16 = vld [vmem:[#allocation5 + $0xf88] sm:$0xf] }
  0x86   : > { %v14273_v9 = vpack.c.bf16 %v388_v4, %v388_v4  ;;  %v9233_v27 = vld [vmem:[#allocation5 + $0x5c0] sm:$0xf0]  ;;  %3525 = vmatmul.bf16.vlgmr.msra.gmra.mxu1 %v14282_v25  ;;  %v8983_v4 = vld [vmem:[#allocation5 + $0x388] sm:$0xf] }
  0x87   : > { %3550 = vmatpush.bf16.msra.mxu3 %v10064_v39  ;;  %3569 = vmatpush.bf16.msrb.mxu1 %v9492_v41  ;;  %v9236_v33 = vor.u32 %v12803_v24, %v9233_v27  ;;  %v8657_v36 = vld [vmem:[#allocation5 + $0x140] sm:$0xf0]  ;;  %v13132_v17 = vld [vmem:[#allocation5 + $0xfc4] sm:$0xf0] }
  0x88   : > { %3538 = vmatmul.bf16.vlgmr.msra.gmra.mxu2 %v14271_v8  ;;  %3512 = vmatmul.bf16.vlgmr.msra.gmra.mxu0 %v14273_v9  ;;  %v9169_v39 = vld [vmem:[#allocation5 + $0x540] sm:$0xf0]  ;;  %v8660_v44 = vor.u32 %v12659_v35, %v8657_v36  ;;  %v12732_v23 = vld [vmem:[#allocation5 + $0x344] sm:$0xf0] }
  0x89   : > { %3582 = vmatpush.bf16.msrb.mxu2 %v10004_v42  ;;  %3557 = vmatpush.bf16.msrb.mxu0 %v8916_v52  ;;  %v12915_v40 = vld [vmem:[#allocation5 + $0x904] sm:$0xf]  ;;  %v9172_v45 = vor.u32 %v12787_v37, %v9169_v39  ;;  %v9431_v24 = vld [vmem:[#allocation5 + $0x708] sm:$0xf] }
  0x8a   : > { %3551 = vmatmul.bf16.vlgmr.msra.gmra.mxu3 %v14276_v15  ;;  %v9681_v41 = vld [vmem:[#allocation5 + $0x940] sm:$0xf0]  ;;  %v12860_v27 = vld [vmem:[#allocation5 + $0x744] sm:$0xf0] }
  0x8b   : > { %3595 = vmatpush.bf16.msrb.mxu3 %v10516_v46  ;;  %3570 = vmatpush.bf16.msrb.mxu1 %v9428_v54  ;;  %v13043_v42 = vld [vmem:[#allocation5 + $0xd04] sm:$0xf]  ;;  %v9684_v46 = vor.u32 %v12915_v40, %v9681_v41  ;;  %v13116_v31 = vld [vmem:[#allocation5 + $0xf44] sm:$0xf0] }
  0x8c   : > { %v8593_v48 = vld [vmem:[#allocation5 + $0xc0] sm:$0xf0]  ;;  %v10196_v50 = vor.u32 %v13043_v42, %v10193_v43  ;;  %v8855_v35 = vld [vmem:[#allocation5 + $0x288] sm:$0xf] }
  0x8d   : > { %3583 = vmatpush.bf16.msrb.mxu2 %v9940_v55  ;;  %3558 = vmatpush.bf16.msrb.mxu0 %v8852_v0  ;;  %v12771_v49 = vld [vmem:[#allocation5 + $0x484] sm:$0xf]  ;;  %v8596_v56 = vor.u32 %v12643_v47, %v8593_v48  ;;  %v12716_v36 = vld [vmem:[#allocation5 + $0x2c4] sm:$0xf0] }
  0x8e   : > { %v9105_v51 = vld [vmem:[#allocation5 + $0x4c0] sm:$0xf0]  ;;  %v9367_v37 = vld [vmem:[#allocation5 + $0x688] sm:$0xf] }
  0x8f   : > { %3596 = vmatpush.bf16.msrb.mxu3 %v10452_v59  ;;  %3571 = vmatpush.bf16.msrb.mxu1 %v9364_v1  ;;  %v12899_v52 = vld [vmem:[#allocation5 + $0x884] sm:$0xf]  ;;  %v9108_v59 = vor.u32 %v12771_v49, %v9105_v51  ;;  %v12844_v39 = vld [vmem:[#allocation5 + $0x6c4] sm:$0xf0] }
  0x90   : > { %v9617_v53 = vld [vmem:[#allocation5 + $0x8c0] sm:$0xf0]  ;;  %v9879_v40 = vld [vmem:[#allocation5 + $0xa88] sm:$0xf] }
  0x91   : > { %3584 = vmatpush.bf16.msrb.mxu2 %v9876_v5  ;;  %3559 = vmatpush.bf16.msrb.mxu0 %v8788_v18  ;;  %v13027_v54 = vld [vmem:[#allocation5 + $0xc84] sm:$0xf]  ;;  %v9620_v60 = vor.u32 %v12899_v52, %v9617_v53  ;;  %v12748_v5 = vld [vmem:[#allocation5 + $0x3c4] sm:$0xf0] }
  0x92   : > { %v10129_v55 = vld [vmem:[#allocation5 + $0xcc0] sm:$0xf0]  ;;  %v8984_v19 = vor.u32 %v12748_v5, %v8983_v4  ;;  %v12972_v41 = vld [vmem:[#allocation5 + $0xac4] sm:$0xf0] }
  0x93   : > { %3597 = vmatpush.bf16.msrb.mxu3 %v10388_v11  ;;  %3572 = vmatpush.bf16.msrb.mxu1 %v9300_v20  ;;  %v12627_v57 = vld [vmem:[#allocation5 + $0x4] sm:$0xf]  ;;  %v10132_v0 = vor.u32 %v13027_v54, %v10129_v55  ;;  %v10007_v11 = vld [vmem:[#allocation5 + $0xb88] sm:$0xf]  ;;  %v9496_v20 = vor.u32 %v12876_v10, %v9495_v6 }
  0x94   : > { %v8529_v58 = vld [vmem:[#allocation5 + $0x40] sm:$0xf0]  ;;  %v10391_v42 = vld [vmem:[#allocation5 + $0xe88] sm:$0xf] }
  0x95   : > { %3585 = vmatpush.bf16.msrb.mxu2 %v9812_v21  ;;  %3560 = vmatpush.bf16.msrb.mxu0 %v8724_v32  ;;  %v12755_v61 = vld [vmem:[#allocation5 + $0x404] sm:$0xf]  ;;  %v8532_v7 = vor.u32 %v12627_v57, %v8529_v58  ;;  %v10008_v21 = vor.u32 %v13004_v12, %v10007_v11  ;;  %v8920_v32 = vor.u32 %v12732_v23, %v8919_v22  ;;  %v13100_v43 = vld [vmem:[#allocation5 + $0xec4] sm:$0xf0] }
  0x96   : > { %v9041_v62 = vld [vmem:[#allocation5 + $0x440] sm:$0xf0]  ;;  %v8791_v47 = vld [vmem:[#allocation5 + $0x208] sm:$0xf] }
  0x97   : > { %3598 = vmatpush.bf16.msrb.mxu3 %v10324_v26  ;;  %3573 = vmatpush.bf16.msrb.mxu1 %v9236_v33  ;;  %v12883_v63 = vld [vmem:[#allocation5 + $0x804] sm:$0xf]  ;;  %v9044_v13 = vor.u32 %v12755_v61, %v9041_v62  ;;  %v10520_v26 = vor.u32 %v13132_v17, %v10519_v16  ;;  %v9432_v33 = vor.u32 %v12860_v27, %v9431_v24  ;;  %v12700_v48 = vld [vmem:[#allocation5 + $0x244] sm:$0xf0] }
  0x98   : > { %v9553_v1 = vld [vmem:[#allocation5 + $0x840] sm:$0xf0]  ;;  %v9303_v49 = vld [vmem:[#allocation5 + $0x608] sm:$0xf] }
  0x99   : > { %3586 = vmatpush.bf16.msrb.mxu2 %v9748_v34  ;;  %3561 = vmatpush.bf16.msrb.mxu0 %v8660_v44  ;;  %v13011_v2 = vld [vmem:[#allocation5 + $0xc04] sm:$0xf]  ;;  %v9556_v14 = vor.u32 %v12883_v63, %v9553_v1  ;;  %v9944_v34 = vor.u32 %v12988_v29, %v9943_v28  ;;  %v8856_v44 = vor.u32 %v12716_v36, %v8855_v35  ;;  %v12828_v51 = vld [vmem:[#allocation5 + $0x644] sm:$0xf0] }
  0x9a   : > { %v10065_v3 = vld [vmem:[#allocation5 + $0xc40] sm:$0xf0]  ;;  %v9815_v52 = vld [vmem:[#allocation5 + $0xa08] sm:$0xf]  ;;  %v9304_v57 = vor.u32 %v12828_v51, %v9303_v49  ;;  %v12996_v49 = vld [vmem:[#allocation5 + $0xb8c] sm:$0xf] }
  0x9b   : > { %3599 = vmatpush.bf16.msrb.mxu3 %v10260_v38  ;;  %3574 = vmatpush.bf16.msrb.mxu1 %v9172_v45  ;;  %v10068_v18 = vor.u32 %v13011_v2, %v10065_v3  ;;  %v10456_v38 = vor.u32 %v13116_v31, %v10455_v30  ;;  %v9368_v45 = vor.u32 %v12844_v39, %v9367_v37  ;;  %v12956_v53 = vld [vmem:[#allocation5 + $0xa44] sm:$0xf0] }
  0x9c   : > { %v10327_v54 = vld [vmem:[#allocation5 + $0xe08] sm:$0xf]  ;;  %v9816_v58 = vor.u32 %v12956_v53, %v9815_v52  ;;  %v13124_v53 = vld [vmem:[#allocation5 + $0xf8c] sm:$0xf] }
  0x9d   : > { %3587 = vmatpush.bf16.msrb.mxu2 %v9684_v46  ;;  %3562 = vmatpush.bf16.msrb.mxu0 %v8596_v56  ;;  %v9880_v46 = vor.u32 %v12972_v41, %v9879_v40  ;;  %v13084_v55 = vld [vmem:[#allocation5 + $0xe44] sm:$0xf0]  ;;  %v8792_v56 = vor.u32 %v12700_v48, %v8791_v47  ;;  %v9497_v48 = vld [vmem:[#allocation5 + $0x7c8] sm:$0xf0] }
  0x9e   : > { %v9239_v61 = vld [vmem:[#allocation5 + $0x588] sm:$0xf]  ;;  %v10328_v62 = vor.u32 %v13084_v55, %v10327_v54  ;;  %v10521_v54 = vld [vmem:[#allocation5 + $0xfc8] sm:$0xf0] }
  0x9f   : > { %3600 = vmatpush.bf16.msrb.mxu3 %v10196_v50  ;;  %3575 = vmatpush.bf16.msrb.mxu1 %v9108_v59  ;;  %v10392_v50 = vor.u32 %v13100_v43, %v10391_v42  ;;  %v8727_v59 = vld [vmem:[#allocation5 + $0x188] sm:$0xf] }
  0xa0   : > { %v12812_v63 = vld [vmem:[#allocation5 + $0x5c4] sm:$0xf0] }
  0xa1   : > { %3588 = vmatpush.bf16.msrb.mxu2 %v9620_v60  ;;  %3563 = vmatpush.bf16.msrb.mxu0 %v8532_v7  ;;  %v12684_v60 = vld [vmem:[#allocation5 + $0x1c4] sm:$0xf0]  ;;  %v9240_v5 = vor.u32 %v12812_v63, %v9239_v61  ;;  %v12852_v61 = vld [vmem:[#allocation5 + $0x70c] sm:$0xf] }
  0xa2   : > { %v12940_v1 = vld [vmem:[#allocation5 + $0x9c4] sm:$0xf0]  ;;  %v8728_v4 = vor.u32 %v12684_v60, %v8727_v59  ;;  %v12724_v59 = vld [vmem:[#allocation5 + $0x30c] sm:$0xf] }
  0xa3   : > { %3601 = vmatpush.bf16.msrb.mxu3 %v10132_v0  ;;  %3576 = vmatpush.bf16.msrb.mxu1 %v9044_v13  ;;  %v9751_v0 = vld [vmem:[#allocation5 + $0x988] sm:$0xf]  ;;  %v8921_v60 = vld [vmem:[#allocation5 + $0x348] sm:$0xf0] }
  0xa4   : > { %3564 = vmatmul.bf16.vlgmr.msrb.gmra.mxu0 %v14273_v9  ;;  %v10263_v2 = vld [vmem:[#allocation5 + $0xd88] sm:$0xf]  ;;  %v9752_v6 = vor.u32 %v12940_v1, %v9751_v0  ;;  %v9433_v63 = vld [vmem:[#allocation5 + $0x748] sm:$0xf0] }
  0xa5   : > { %3589 = vmatpush.bf16.msrb.mxu2 %v9556_v14  ;;  %3608 = vmatpush.bf16.msra.mxu0 %v8984_v19  ;;  %v13068_v3 = vld [vmem:[#allocation5 + $0xdc4] sm:$0xf0]  ;;  %v12980_v0 = vld [vmem:[#allocation5 + $0xb0c] sm:$0xf] }
  0xa6   : > { %3577 = vmatmul.bf16.vlgmr.msrb.gmra.mxu1 %v14282_v25  ;;  %v8663_v7 = vld [vmem:[#allocation5 + $0x108] sm:$0xf]  ;;  %v10264_v12 = vor.u32 %v13068_v3, %v10263_v2  ;;  %v9945_v1 = vld [vmem:[#allocation5 + $0xb48] sm:$0xf0] }
  0xa7   : > { %3602 = vmatpush.bf16.msrb.mxu3 %v10068_v18  ;;  %3621 = vmatpush.bf16.msra.mxu1 %v9496_v20  ;;  %v12668_v10 = vld [vmem:[#allocation5 + $0x144] sm:$0xf0]  ;;  %v13108_v2 = vld [vmem:[#allocation5 + $0xf0c] sm:$0xf] }
  0xa8   : > { %3590 = vmatmul.bf16.vlgmr.msrb.gmra.mxu2 %v14271_v8  ;;  %v9175_v11 = vld [vmem:[#allocation5 + $0x508] sm:$0xf]  ;;  %v8664_v19 = vor.u32 %v12668_v10, %v8663_v7  ;;  %v10457_v3 = vld [vmem:[#allocation5 + $0xf48] sm:$0xf0] }
  0xa9   : > { %3634 = vmatpush.bf16.msra.mxu2 %v10008_v21  ;;  %3609 = vmatpush.bf16.msra.mxu0 %v8920_v32  ;;  %v12796_v13 = vld [vmem:[#allocation5 + $0x544] sm:$0xf0]  ;;  %v12708_v7 = vld [vmem:[#allocation5 + $0x28c] sm:$0xf] }
  0xaa   : > { %3603 = vmatmul.bf16.vlgmr.msrb.gmra.mxu3 %v14276_v15  ;;  %v9687_v14 = vld [vmem:[#allocation5 + $0x908] sm:$0xf]  ;;  %v9176_v20 = vor.u32 %v12796_v13, %v9175_v11  ;;  %v8857_v10 = vld [vmem:[#allocation5 + $0x2c8] sm:$0xf0] }
  0xab   : > { %3647 = vmatpush.bf16.msra.mxu3 %v10520_v26  ;;  %3622 = vmatpush.bf16.msra.mxu1 %v9432_v33  ;;  %v12924_v16 = vld [vmem:[#allocation5 + $0x944] sm:$0xf0]  ;;  %v12836_v11 = vld [vmem:[#allocation5 + $0x68c] sm:$0xf] }
  0xac   : > { %v10199_v17 = vld [vmem:[#allocation5 + $0xd08] sm:$0xf]  ;;  %v9688_v21 = vor.u32 %v12924_v16, %v9687_v14  ;;  %v9369_v13 = vld [vmem:[#allocation5 + $0x6c8] sm:$0xf0] }
  0xad   : > { %3635 = vmatpush.bf16.msra.mxu2 %v9944_v34  ;;  %3610 = vmatpush.bf16.msra.mxu0 %v8856_v44  ;;  %v13052_v18 = vld [vmem:[#allocation5 + $0xd44] sm:$0xf0]  ;;  %v12740_v44 = vld [vmem:[#allocation5 + $0x38c] sm:$0xf] }
  0xae   : > { %v8599_v22 = vld [vmem:[#allocation5 + $0x88] sm:$0xf]  ;;  %v10200_v26 = vor.u32 %v13052_v18, %v10199_v17  ;;  %v12964_v14 = vld [vmem:[#allocation5 + $0xa8c] sm:$0xf] }
  0xaf   : > { %3648 = vmatpush.bf16.msra.mxu3 %v10456_v38  ;;  %3623 = vmatpush.bf16.msra.mxu1 %v9368_v45  ;;  %v12652_v23 = vld [vmem:[#allocation5 + $0xc4] sm:$0xf0]  ;;  %v8985_v45 = vld [vmem:[#allocation5 + $0x3c8] sm:$0xf0] }
  0xb0   : > { %v9111_v24 = vld [vmem:[#allocation5 + $0x488] sm:$0xf]  ;;  %v8600_v32 = vor.u32 %v12652_v23, %v8599_v22  ;;  %v9881_v16 = vld [vmem:[#allocation5 + $0xac8] sm:$0xf0] }
  0xb1   : > { %3636 = vmatpush.bf16.msra.mxu2 %v9880_v46  ;;  %3611 = vmatpush.bf16.msra.mxu0 %v8792_v56  ;;  %v12780_v27 = vld [vmem:[#allocation5 + $0x4c4] sm:$0xf0]  ;;  %v12868_v46 = vld [vmem:[#allocation5 + $0x78c] sm:$0xf]  ;;  %v8988_v56 = vor.u32 %v12740_v44, %v8985_v45 }
  0xb2   : > { %v9623_v28 = vld [vmem:[#allocation5 + $0x888] sm:$0xf]  ;;  %v9112_v35 = vor.u32 %v12780_v27, %v9111_v24  ;;  %v13092_v17 = vld [vmem:[#allocation5 + $0xe8c] sm:$0xf] }
  0xb3   : > { %3649 = vmatpush.bf16.msra.mxu3 %v10392_v50  ;;  %3624 = vmatpush.bf16.msra.mxu1 %v9304_v57  ;;  %v12908_v29 = vld [vmem:[#allocation5 + $0x8c4] sm:$0xf0]  ;;  %v10009_v50 = vld [vmem:[#allocation5 + $0xbc8] sm:$0xf0]  ;;  %v9500_v57 = vor.u32 %v12868_v46, %v9497_v48 }
  0xb4   : > { %v10135_v30 = vld [vmem:[#allocation5 + $0xc88] sm:$0xf]  ;;  %v9624_v36 = vor.u32 %v12908_v29, %v9623_v28  ;;  %v10393_v18 = vld [vmem:[#allocation5 + $0xec8] sm:$0xf0] }
  0xb5   : > { %3637 = vmatpush.bf16.msra.mxu2 %v9816_v58  ;;  %3612 = vmatpush.bf16.msra.mxu0 %v8728_v4  ;;  %v13036_v31 = vld [vmem:[#allocation5 + $0xcc4] sm:$0xf0]  ;;  %v10012_v58 = vor.u32 %v12996_v49, %v10009_v50  ;;  %v8924_v4 = vor.u32 %v12724_v59, %v8921_v60  ;;  %v12692_v22 = vld [vmem:[#allocation5 + $0x20c] sm:$0xf] }
  0xb6   : > { %v8535_v33 = vld [vmem:[#allocation5 + $0x8] sm:$0xf]  ;;  %v10136_v40 = vor.u32 %v13036_v31, %v10135_v30  ;;  %v8793_v23 = vld [vmem:[#allocation5 + $0x248] sm:$0xf0] }
  0xb7   : > { %3650 = vmatpush.bf16.msra.mxu3 %v10328_v62  ;;  %3625 = vmatpush.bf16.msra.mxu1 %v9240_v5  ;;  %v12636_v34 = vld [vmem:[#allocation5 + $0x44] sm:$0xf0]  ;;  %v10524_v62 = vor.u32 %v13124_v53, %v10521_v54  ;;  %v9436_v5 = vor.u32 %v12852_v61, %v9433_v63  ;;  %v12820_v24 = vld [vmem:[#allocation5 + $0x60c] sm:$0xf] }
  0xb8   : > { %v9047_v37 = vld [vmem:[#allocation5 + $0x408] sm:$0xf]  ;;  %v8536_v47 = vor.u32 %v12636_v34, %v8535_v33  ;;  %v9305_v27 = vld [vmem:[#allocation5 + $0x648] sm:$0xf0] }
  0xb9   : > { %3638 = vmatpush.bf16.msra.mxu2 %v9752_v6  ;;  %3613 = vmatpush.bf16.msra.mxu0 %v8664_v19  ;;  %v12764_v38 = vld [vmem:[#allocation5 + $0x444] sm:$0xf0]  ;;  %v9948_v6 = vor.u32 %v12980_v0, %v9945_v1  ;;  %v8860_v19 = vor.u32 %v12708_v7, %v8857_v10  ;;  %v12948_v28 = vld [vmem:[#allocation5 + $0xa0c] sm:$0xf]  ;;  %v9308_v33 = vor.u32 %v12820_v24, %v9305_v27  ;;  %v10015_v24 = vld [vmem:[#allocation5 + $0xb90] sm:$0xf] }
  0xba   : > { %v9559_v39 = vld [vmem:[#allocation5 + $0x808] sm:$0xf]  ;;  %v9048_v51 = vor.u32 %v12764_v38, %v9047_v37  ;;  %v9817_v29 = vld [vmem:[#allocation5 + $0xa48] sm:$0xf0] }
  0xbb   : > { %3651 = vmatpush.bf16.msra.mxu3 %v10264_v12  ;;  %3626 = vmatpush.bf16.msra.mxu1 %v9176_v20  ;;  %v12892_v41 = vld [vmem:[#allocation5 + $0x844] sm:$0xf0]  ;;  %v10460_v12 = vor.u32 %v13108_v2, %v10457_v3  ;;  %v9372_v20 = vor.u32 %v12836_v11, %v9369_v13  ;;  %v13076_v30 = vld [vmem:[#allocation5 + $0xe0c] sm:$0xf]  ;;  %v9820_v34 = vor.u32 %v12948_v28, %v9817_v29  ;;  %v10527_v29 = vld [vmem:[#allocation5 + $0xf90] sm:$0xf] }
  0xbc   : > { %v10071_v42 = vld [vmem:[#allocation5 + $0xc08] sm:$0xf]  ;;  %v9560_v52 = vor.u32 %v12892_v41, %v9559_v39  ;;  %v10329_v31 = vld [vmem:[#allocation5 + $0xe48] sm:$0xf0] }
  0xbd   : > { %3639 = vmatpush.bf16.msra.mxu2 %v9688_v21  ;;  %v13020_v43 = vld [vmem:[#allocation5 + $0xc44] sm:$0xf0]  ;;  %3614 = vmatpush.bf16.msra.mxu0 %v8600_v32  ;;  %v9884_v21 = vor.u32 %v12964_v14, %v9881_v16  ;;  %v8796_v32 = vor.u32 %v12692_v22, %v8793_v23  ;;  %v12804_v37 = vld [vmem:[#allocation5 + $0x58c] sm:$0xf]  ;;  %v10332_v38 = vor.u32 %v13076_v30, %v10329_v31  ;;  %v12877_v23 = vld [vmem:[#allocation5 + $0x7cc] sm:$0xf0] }
  0xbe   : > { %v10072_v55 = vor.u32 %v13020_v43, %v10071_v42  ;;  %v9241_v39 = vld [vmem:[#allocation5 + $0x5c8] sm:$0xf0]  ;;  %v13133_v30 = vld [vmem:[#allocation5 + $0xfcc] sm:$0xf0] }
  0xbf   : > { %3652 = vmatpush.bf16.msra.mxu3 %v10200_v26  ;;  %3627 = vmatpush.bf16.msra.mxu1 %v9112_v35  ;;  %v10396_v26 = vor.u32 %v13092_v17, %v10393_v18  ;;  %v12676_v35 = vld [vmem:[#allocation5 + $0x18c] sm:$0xf]  ;;  %v9244_v45 = vor.u32 %v12804_v37, %v9241_v39  ;;  %v9439_v37 = vld [vmem:[#allocation5 + $0x710] sm:$0xf] }
  0xc0   : > { %v9753_v41 = vld [vmem:[#allocation5 + $0x9c8] sm:$0xf0]  ;;  %v12861_v39 = vld [vmem:[#allocation5 + $0x74c] sm:$0xf0] }
  0xc1   : > { %3640 = vmatpush.bf16.msra.mxu2 %v9624_v36  ;;  %3615 = vmatpush.bf16.msra.mxu0 %v8536_v47  ;;  %v8729_v36 = vld [vmem:[#allocation5 + $0x1c8] sm:$0xf0] }
  0xc2   : > { %v13060_v42 = vld [vmem:[#allocation5 + $0xd8c] sm:$0xf]  ;;  %v8732_v44 = vor.u32 %v12676_v35, %v8729_v36  ;;  %v8927_v35 = vld [vmem:[#allocation5 + $0x310] sm:$0xf] }
  0xc3   : > { %3653 = vmatpush.bf16.msra.mxu3 %v10136_v40  ;;  %3628 = vmatpush.bf16.msra.mxu1 %v9048_v51  ;;  %v12932_v40 = vld [vmem:[#allocation5 + $0x98c] sm:$0xf]  ;;  %v12733_v36 = vld [vmem:[#allocation5 + $0x34c] sm:$0xf0] }
  0xc4   : > { %3616 = vmatmul.bf16.vlgmr.msra.gmra.mxu0 %v14273_v9  ;;  %v10265_v43 = vld [vmem:[#allocation5 + $0xdc8] sm:$0xf0]  ;;  %v9756_v46 = vor.u32 %v12932_v40, %v9753_v41  ;;  %v9951_v40 = vld [vmem:[#allocation5 + $0xb10] sm:$0xf] }
  0xc5   : > { %3641 = vmatpush.bf16.msra.mxu2 %v9560_v52  ;;  %3660 = vmatpush.bf16.msrb.mxu0 %v8988_v56  ;;  %v12660_v47 = vld [vmem:[#allocation5 + $0x10c] sm:$0xf]  ;;  %v10268_v50 = vor.u32 %v13060_v42, %v10265_v43  ;;  %v12989_v41 = vld [vmem:[#allocation5 + $0xb4c] sm:$0xf0] }
  0xc6   : > { %3629 = vmatmul.bf16.vlgmr.msra.gmra.mxu1 %v14282_v25  ;;  %v8665_v48 = vld [vmem:[#allocation5 + $0x148] sm:$0xf0]  ;;  %v10463_v42 = vld [vmem:[#allocation5 + $0xf10] sm:$0xf] }
  0xc7   : > { %3654 = vmatpush.bf16.msra.mxu3 %v10072_v55  ;;  %3673 = vmatpush.bf16.msrb.mxu1 %v9500_v57  ;;  %v12788_v49 = vld [vmem:[#allocation5 + $0x50c] sm:$0xf]  ;;  %v8668_v56 = vor.u32 %v12660_v47, %v8665_v48  ;;  %v13117_v43 = vld [vmem:[#allocation5 + $0xf4c] sm:$0xf0] }
  0xc8   : > { %3642 = vmatmul.bf16.vlgmr.msra.gmra.mxu2 %v14271_v8  ;;  %v9177_v51 = vld [vmem:[#allocation5 + $0x548] sm:$0xf0]  ;;  %v8863_v47 = vld [vmem:[#allocation5 + $0x290] sm:$0xf] }
  0xc9   : > { %3686 = vmatpush.bf16.msrb.mxu2 %v10012_v58  ;;  %3661 = vmatpush.bf16.msrb.mxu0 %v8924_v4  ;;  %v12916_v52 = vld [vmem:[#allocation5 + $0x90c] sm:$0xf]  ;;  %v9180_v57 = vor.u32 %v12788_v49, %v9177_v51  ;;  %v12717_v48 = vld [vmem:[#allocation5 + $0x2cc] sm:$0xf0] }
  0xca   : > { %3655 = vmatmul.bf16.vlgmr.msra.gmra.mxu3 %v14276_v15  ;;  %v9689_v53 = vld [vmem:[#allocation5 + $0x948] sm:$0xf0]  ;;  %v9375_v49 = vld [vmem:[#allocation5 + $0x690] sm:$0xf] }
  0xcb   : > { %3699 = vmatpush.bf16.msrb.mxu3 %v10524_v62  ;;  %3674 = vmatpush.bf16.msrb.mxu1 %v9436_v5  ;;  %v13044_v54 = vld [vmem:[#allocation5 + $0xd0c] sm:$0xf]  ;;  %v9692_v58 = vor.u32 %v12916_v52, %v9689_v53  ;;  %v12845_v51 = vld [vmem:[#allocation5 + $0x6cc] sm:$0xf0] }
  0xcc   : > { %v10201_v55 = vld [vmem:[#allocation5 + $0xd48] sm:$0xf0]  ;;  %v9887_v52 = vld [vmem:[#allocation5 + $0xa90] sm:$0xf] }
  0xcd   : > { %3687 = vmatpush.bf16.msrb.mxu2 %v9948_v6  ;;  %3662 = vmatpush.bf16.msrb.mxu0 %v8860_v19  ;;  %v12644_v59 = vld [vmem:[#allocation5 + $0x8c] sm:$0xf]  ;;  %v10204_v62 = vor.u32 %v13044_v54, %v10201_v55  ;;  %v8991_v19 = vld [vmem:[#allocation5 + $0x390] sm:$0xf] }
  0xce   : > { %v8601_v60 = vld [vmem:[#allocation5 + $0xc8] sm:$0xf0]  ;;  %v12973_v53 = vld [vmem:[#allocation5 + $0xacc] sm:$0xf0] }
  0xcf   : > { %3700 = vmatpush.bf16.msrb.mxu3 %v10460_v12  ;;  %3675 = vmatpush.bf16.msrb.mxu1 %v9372_v20  ;;  %v12772_v61 = vld [vmem:[#allocation5 + $0x48c] sm:$0xf]  ;;  %v8604_v4 = vor.u32 %v12644_v59, %v8601_v60  ;;  %v12749_v20 = vld [vmem:[#allocation5 + $0x3cc] sm:$0xf0] }
  0xd0   : > { %v9113_v63 = vld [vmem:[#allocation5 + $0x4c8] sm:$0xf0]  ;;  %v10399_v54 = vld [vmem:[#allocation5 + $0xe90] sm:$0xf] }
  0xd1   : > { %3688 = vmatpush.bf16.msrb.mxu2 %v9884_v21  ;;  %3663 = vmatpush.bf16.msrb.mxu0 %v8796_v32  ;;  %v12900_v0 = vld [vmem:[#allocation5 + $0x88c] sm:$0xf]  ;;  %v9116_v7 = vor.u32 %v12772_v61, %v9113_v63  ;;  %v9503_v21 = vld [vmem:[#allocation5 + $0x790] sm:$0xf]  ;;  %v8992_v32 = vor.u32 %v12749_v20, %v8991_v19 }
  0xd2   : > { %v9625_v1 = vld [vmem:[#allocation5 + $0x8c8] sm:$0xf0]  ;;  %v13101_v55 = vld [vmem:[#allocation5 + $0xecc] sm:$0xf0] }
  0xd3   : > { %3701 = vmatpush.bf16.msrb.mxu3 %v10396_v26  ;;  %3676 = vmatpush.bf16.msrb.mxu1 %v9308_v33  ;;  %v13028_v2 = vld [vmem:[#allocation5 + $0xc8c] sm:$0xf]  ;;  %v9628_v10 = vor.u32 %v12900_v0, %v9625_v1  ;;  %v13005_v26 = vld [vmem:[#allocation5 + $0xbcc] sm:$0xf0]  ;;  %v9504_v33 = vor.u32 %v12877_v23, %v9503_v21 }
  0xd4   : > { %v10137_v3 = vld [vmem:[#allocation5 + $0xcc8] sm:$0xf0]  ;;  %v8799_v59 = vld [vmem:[#allocation5 + $0x210] sm:$0xf] }
  0xd5   : > { %3689 = vmatpush.bf16.msrb.mxu2 %v9820_v34  ;;  %3664 = vmatpush.bf16.msrb.mxu0 %v8732_v44  ;;  %v12628_v5 = vld [vmem:[#allocation5 + $0xc] sm:$0xf]  ;;  %v10140_v14 = vor.u32 %v13028_v2, %v10137_v3  ;;  %v10016_v34 = vor.u32 %v13005_v26, %v10015_v24  ;;  %v8928_v44 = vor.u32 %v12733_v36, %v8927_v35  ;;  %v12701_v60 = vld [vmem:[#allocation5 + $0x24c] sm:$0xf0] }
  0xd6   : > { %v8537_v6 = vld [vmem:[#allocation5 + $0x48] sm:$0xf0]  ;;  %v9311_v61 = vld [vmem:[#allocation5 + $0x610] sm:$0xf] }
  0xd7   : > { %3702 = vmatpush.bf16.msrb.mxu3 %v10332_v38  ;;  %3677 = vmatpush.bf16.msrb.mxu1 %v9244_v45  ;;  %v12756_v11 = vld [vmem:[#allocation5 + $0x40c] sm:$0xf]  ;;  %v8540_v22 = vor.u32 %v12628_v5, %v8537_v6  ;;  %v10528_v38 = vor.u32 %v13133_v30, %v10527_v29  ;;  %v9440_v45 = vor.u32 %v12861_v39, %v9439_v37  ;;  %v12829_v63 = vld [vmem:[#allocation5 + $0x64c] sm:$0xf0] }
  0xd8   : > { %v9049_v12 = vld [vmem:[#allocation5 + $0x448] sm:$0xf0]  ;;  %v9823_v0 = vld [vmem:[#allocation5 + $0xa10] sm:$0xf]  ;;  %v9312_v5 = vor.u32 %v12829_v63, %v9311_v61  ;;  %v12997_v61 = vld [vmem:[#allocation5 + $0xb94] sm:$0xf] }
  0xd9   : > { %3690 = vmatpush.bf16.msrb.mxu2 %v9756_v46  ;;  %3665 = vmatpush.bf16.msrb.mxu0 %v8668_v56  ;;  %v12884_v13 = vld [vmem:[#allocation5 + $0x80c] sm:$0xf]  ;;  %v9052_v27 = vor.u32 %v12756_v11, %v9049_v12  ;;  %v9952_v46 = vor.u32 %v12989_v41, %v9951_v40  ;;  %v8864_v56 = vor.u32 %v12717_v48, %v8863_v47  ;;  %v12957_v1 = vld [vmem:[#allocation5 + $0xa4c] sm:$0xf0] }
  0xda   : > { %v9561_v16 = vld [vmem:[#allocation5 + $0x848] sm:$0xf0]  ;;  %v10335_v2 = vld [vmem:[#allocation5 + $0xe10] sm:$0xf]  ;;  %v9824_v6 = vor.u32 %v12957_v1, %v9823_v0  ;;  %v13125_v1 = vld [vmem:[#allocation5 + $0xf94] sm:$0xf] }
  0xdb   : > { %3703 = vmatpush.bf16.msrb.mxu3 %v10268_v50  ;;  %3678 = vmatpush.bf16.msrb.mxu1 %v9180_v57  ;;  %v13012_v17 = vld [vmem:[#allocation5 + $0xc0c] sm:$0xf]  ;;  %v9564_v28 = vor.u32 %v12884_v13, %v9561_v16  ;;  %v10464_v50 = vor.u32 %v13117_v43, %v10463_v42  ;;  %v9376_v57 = vor.u32 %v12845_v51, %v9375_v49  ;;  %v13085_v3 = vld [vmem:[#allocation5 + $0xe4c] sm:$0xf0] }
  0xdc   : > { %v10073_v18 = vld [vmem:[#allocation5 + $0xc48] sm:$0xf0]  ;;  %v9247_v11 = vld [vmem:[#allocation5 + $0x590] sm:$0xf]  ;;  %v10336_v12 = vor.u32 %v13085_v3, %v10335_v2  ;;  %v10529_v2 = vld [vmem:[#allocation5 + $0xfd0] sm:$0xf0] }
  0xdd   : > { %3691 = vmatpush.bf16.msrb.mxu2 %v9692_v58  ;;  %3666 = vmatpush.bf16.msrb.mxu0 %v8604_v4  ;;  %v10076_v31 = vor.u32 %v13012_v17, %v10073_v18  ;;  %v9888_v58 = vor.u32 %v12973_v53, %v9887_v52  ;;  %v8800_v4 = vor.u32 %v12701_v60, %v8799_v59  ;;  %v12813_v13 = vld [vmem:[#allocation5 + $0x5cc] sm:$0xf0]  ;;  %v9505_v60 = vld [vmem:[#allocation5 + $0x7d0] sm:$0xf0] }
  0xde   : > { %v12941_v16 = vld [vmem:[#allocation5 + $0x9cc] sm:$0xf0]  ;;  %v9248_v20 = vor.u32 %v12813_v13, %v9247_v11  ;;  %v12853_v11 = vld [vmem:[#allocation5 + $0x714] sm:$0xf] }
  0xdf   : > { %3704 = vmatpush.bf16.msrb.mxu3 %v10204_v62  ;;  %3679 = vmatpush.bf16.msrb.mxu1 %v9116_v7  ;;  %v10400_v62 = vor.u32 %v13101_v55, %v10399_v54  ;;  %v8735_v7 = vld [vmem:[#allocation5 + $0x190] sm:$0xf]  ;;  %v9441_v13 = vld [vmem:[#allocation5 + $0x750] sm:$0xf0] }
  0xe0   : > { %v10271_v17 = vld [vmem:[#allocation5 + $0xd90] sm:$0xf] }
  0xe1   : > { %3692 = vmatpush.bf16.msrb.mxu2 %v9628_v10  ;;  %3667 = vmatpush.bf16.msrb.mxu0 %v8540_v22  ;;  %v12685_v10 = vld [vmem:[#allocation5 + $0x1cc] sm:$0xf0] }
  0xe2   : > { %v13069_v18 = vld [vmem:[#allocation5 + $0xdcc] sm:$0xf0]  ;;  %v8736_v19 = vor.u32 %v12685_v10, %v8735_v7  ;;  %v12725_v7 = vld [vmem:[#allocation5 + $0x314] sm:$0xf] }
  0xe3   : > { %3705 = vmatpush.bf16.msrb.mxu3 %v10140_v14  ;;  %3680 = vmatpush.bf16.msrb.mxu1 %v9052_v27  ;;  %v9759_v14 = vld [vmem:[#allocation5 + $0x990] sm:$0xf]  ;;  %v10272_v26 = vor.u32 %v13069_v18, %v10271_v17  ;;  %v8929_v10 = vld [vmem:[#allocation5 + $0x350] sm:$0xf0] }
  0xe4   : > { %3668 = vmatmul.bf16.vlgmr.msrb.gmra.mxu0 %v14273_v9  ;;  %v9760_v21 = vor.u32 %v12941_v16, %v9759_v14  ;;  %v8671_v22 = vld [vmem:[#allocation5 + $0x110] sm:$0xf]  ;;  %v12981_v14 = vld [vmem:[#allocation5 + $0xb14] sm:$0xf] }
  0xe5   : > { %3693 = vmatpush.bf16.msrb.mxu2 %v9564_v28  ;;  %3712 = vmatpush.bf16.msra.mxu0 %v8992_v32  ;;  %v12669_v23 = vld [vmem:[#allocation5 + $0x14c] sm:$0xf0]  ;;  %v9953_v16 = vld [vmem:[#allocation5 + $0xb50] sm:$0xf0] }
  0xe6   : > { %3681 = vmatmul.bf16.vlgmr.msrb.gmra.mxu1 %v14282_v25  ;;  %v9183_v24 = vld [vmem:[#allocation5 + $0x510] sm:$0xf]  ;;  %v8672_v32 = vor.u32 %v12669_v23, %v8671_v22  ;;  %v13109_v17 = vld [vmem:[#allocation5 + $0xf14] sm:$0xf] }
  0xe7   : > { %3706 = vmatpush.bf16.msrb.mxu3 %v10076_v31  ;;  %3725 = vmatpush.bf16.msra.mxu1 %v9504_v33  ;;  %v12797_v27 = vld [vmem:[#allocation5 + $0x54c] sm:$0xf0]  ;;  %v10465_v18 = vld [vmem:[#allocation5 + $0xf50] sm:$0xf0] }
  0xe8   : > { %3694 = vmatmul.bf16.vlgmr.msrb.gmra.mxu2 %v14271_v8  ;;  %v9695_v28 = vld [vmem:[#allocation5 + $0x910] sm:$0xf]  ;;  %v9184_v33 = vor.u32 %v12797_v27, %v9183_v24  ;;  %v12709_v22 = vld [vmem:[#allocation5 + $0x294] sm:$0xf] }
  0xe9   : > { %3738 = vmatpush.bf16.msra.mxu2 %v10016_v34  ;;  %3713 = vmatpush.bf16.msra.mxu0 %v8928_v44  ;;  %v12925_v29 = vld [vmem:[#allocation5 + $0x94c] sm:$0xf0]  ;;  %v8865_v23 = vld [vmem:[#allocation5 + $0x2d0] sm:$0xf0] }
  0xea   : > { %3707 = vmatmul.bf16.vlgmr.msrb.gmra.mxu3 %v14276_v15  ;;  %v10207_v30 = vld [vmem:[#allocation5 + $0xd10] sm:$0xf]  ;;  %v9696_v34 = vor.u32 %v12925_v29, %v9695_v28  ;;  %v12837_v24 = vld [vmem:[#allocation5 + $0x694] sm:$0xf] }
  0xeb   : > { %3751 = vmatpush.bf16.msra.mxu3 %v10528_v38  ;;  %3726 = vmatpush.bf16.msra.mxu1 %v9440_v45  ;;  %v13053_v31 = vld [vmem:[#allocation5 + $0xd4c] sm:$0xf0]  ;;  %v9377_v27 = vld [vmem:[#allocation5 + $0x6d0] sm:$0xf0] }
  0xec   : > { %v8607_v35 = vld [vmem:[#allocation5 + $0x90] sm:$0xf]  ;;  %v10208_v38 = vor.u32 %v13053_v31, %v10207_v30  ;;  %v12965_v28 = vld [vmem:[#allocation5 + $0xa94] sm:$0xf] }
  0xed   : > { %3739 = vmatpush.bf16.msra.mxu2 %v9952_v46  ;;  %3714 = vmatpush.bf16.msra.mxu0 %v8864_v56  ;;  %v12653_v36 = vld [vmem:[#allocation5 + $0xcc] sm:$0xf0]  ;;  %v12741_v56 = vld [vmem:[#allocation5 + $0x394] sm:$0xf] }
  0xee   : > { %v9119_v37 = vld [vmem:[#allocation5 + $0x490] sm:$0xf]  ;;  %v8608_v44 = vor.u32 %v12653_v36, %v8607_v35  ;;  %v9889_v29 = vld [vmem:[#allocation5 + $0xad0] sm:$0xf0] }
  0xef   : > { %3752 = vmatpush.bf16.msra.mxu3 %v10464_v50  ;;  %3727 = vmatpush.bf16.msra.mxu1 %v9376_v57  ;;  %v12781_v39 = vld [vmem:[#allocation5 + $0x4cc] sm:$0xf0]  ;;  %v8993_v57 = vld [vmem:[#allocation5 + $0x3d0] sm:$0xf0]  ;;  %v9892_v35 = vor.u32 %v12965_v28, %v9889_v29 }
  0xf0   : > { %v9631_v40 = vld [vmem:[#allocation5 + $0x890] sm:$0xf]  ;;  %v9120_v47 = vor.u32 %v12781_v39, %v9119_v37  ;;  %v13093_v30 = vld [vmem:[#allocation5 + $0xe94] sm:$0xf] }
  0xf1   : > { %3740 = vmatpush.bf16.msra.mxu2 %v9888_v58  ;;  %3715 = vmatpush.bf16.msra.mxu0 %v8800_v4  ;;  %v12909_v41 = vld [vmem:[#allocation5 + $0x8cc] sm:$0xf0]  ;;  %v12869_v58 = vld [vmem:[#allocation5 + $0x794] sm:$0xf]  ;;  %v8996_v4 = vor.u32 %v12741_v56, %v8993_v57 }
  0xf2   : > { %v10143_v42 = vld [vmem:[#allocation5 + $0xc90] sm:$0xf]  ;;  %v9632_v48 = vor.u32 %v12909_v41, %v9631_v40  ;;  %v10401_v31 = vld [vmem:[#allocation5 + $0xed0] sm:$0xf0] }
  0xf3   : > { %3753 = vmatpush.bf16.msra.mxu3 %v10400_v62  ;;  %3728 = vmatpush.bf16.msra.mxu1 %v9312_v5  ;;  %v13037_v43 = vld [vmem:[#allocation5 + $0xccc] sm:$0xf0]  ;;  %v10017_v62 = vld [vmem:[#allocation5 + $0xbd0] sm:$0xf0]  ;;  %v9508_v5 = vor.u32 %v12869_v58, %v9505_v60  ;;  %v10404_v39 = vor.u32 %v13093_v30, %v10401_v31 }
  0xf4   : > { %v8543_v45 = vld [vmem:[#allocation5 + $0x10] sm:$0xf]  ;;  %v10144_v52 = vor.u32 %v13037_v43, %v10143_v42  ;;  %v8801_v36 = vld [vmem:[#allocation5 + $0x250] sm:$0xf0]  ;;  %v14301_v42 = vld [vmem:[#allocation7] sm:$0xff] }
  0xf5   : > { %3741 = vmatpush.bf16.msra.mxu2 %v9824_v6  ;;  %3716 = vmatpush.bf16.msra.mxu0 %v8736_v19  ;;  %v12637_v46 = vld [vmem:[#allocation5 + $0x4c] sm:$0xf0]  ;;  %v10020_v6 = vor.u32 %v12997_v61, %v10017_v62  ;;  %v8932_v19 = vor.u32 %v12725_v7, %v8929_v10  ;;  %v12821_v37 = vld [vmem:[#allocation5 + $0x614] sm:$0xf] }
  0xf6   : > { %v9055_v49 = vld [vmem:[#allocation5 + $0x410] sm:$0xf]  ;;  %v8544_v59 = vor.u32 %v12637_v46, %v8543_v45  ;;  %v12949_v40 = vld [vmem:[#allocation5 + $0xa14] sm:$0xf] }
  0xf7   : > { %3754 = vmatpush.bf16.msra.mxu3 %v10336_v12  ;;  %3729 = vmatpush.bf16.msra.mxu1 %v9248_v20  ;;  %v12765_v50 = vld [vmem:[#allocation5 + $0x44c] sm:$0xf0]  ;;  %v10532_v12 = vor.u32 %v13125_v1, %v10529_v2  ;;  %v9444_v20 = vor.u32 %v12853_v11, %v9441_v13  ;;  %v9825_v41 = vld [vmem:[#allocation5 + $0xa50] sm:$0xf0] }
  0xf8   : > { %v9567_v51 = vld [vmem:[#allocation5 + $0x810] sm:$0xf]  ;;  %v9056_v63 = vor.u32 %v12765_v50, %v9055_v49  ;;  %v13077_v43 = vld [vmem:[#allocation5 + $0xe14] sm:$0xf] }
  0xf9   : > { %3742 = vmatpush.bf16.msra.mxu2 %v9760_v21  ;;  %3717 = vmatpush.bf16.msra.mxu0 %v8672_v32  ;;  %v12893_v53 = vld [vmem:[#allocation5 + $0x84c] sm:$0xf0]  ;;  %v9956_v21 = vor.u32 %v12981_v14, %v9953_v16  ;;  %v8868_v32 = vor.u32 %v12709_v22, %v8865_v23  ;;  %v12677_v46 = vld [vmem:[#allocation5 + $0x194] sm:$0xf] }
  0xfa   : > { %v10079_v54 = vld [vmem:[#allocation5 + $0xc10] sm:$0xf]  ;;  %v9568_v0 = vor.u32 %v12893_v53, %v9567_v51  ;;  %v8737_v49 = vld [vmem:[#allocation5 + $0x1d0] sm:$0xf0]  ;;  %v912_v51 = vperm.slane %v14301_v42, 0 }
  0xfb   : > { %3755 = vmatpush.bf16.msra.mxu3 %v10272_v26  ;;  %3730 = vmatpush.bf16.msra.mxu1 %v9184_v33  ;;  %v13021_v55 = vld [vmem:[#allocation5 + $0xc4c] sm:$0xf0]  ;;  %v10468_v26 = vor.u32 %v13109_v17, %v10465_v18  ;;  %v12693_v33 = vld [vmem:[#allocation5 + $0x214] sm:$0xf]  ;;  %v8740_v58 = vor.u32 %v12677_v46, %v8737_v49  ;;  %v9511_v46 = vld [vmem:[#allocation5 + $0x798] sm:$0xf] }
  0xfc   : > { %v10080_v3 = vor.u32 %v13021_v55, %v10079_v54  ;;  %v8804_v45 = vor.u32 %v12693_v33, %v8801_v36  ;;  %v12805_v50 = vld [vmem:[#allocation5 + $0x594] sm:$0xf]  ;;  %v10023_v49 = vld [vmem:[#allocation5 + $0xb98] sm:$0xf] }
  0xfd   : > { %3743 = vmatpush.bf16.msra.mxu2 %v9696_v34  ;;  %3718 = vmatpush.bf16.msra.mxu0 %v8608_v44  ;;  %v9380_v34 = vor.u32 %v12837_v24, %v9377_v27  ;;  %v10337_v44 = vld [vmem:[#allocation5 + $0xe50] sm:$0xf0] }
  0xfe   : > { %v9249_v53 = vld [vmem:[#allocation5 + $0x5d0] sm:$0xf0] }
  0xff   : > { %3756 = vmatpush.bf16.msra.mxu3 %v10208_v38  ;;  %3731 = vmatpush.bf16.msra.mxu1 %v9120_v47  ;;  %v9313_v38 = vld [vmem:[#allocation5 + $0x650] sm:$0xf0]  ;;  %v9252_v60 = vor.u32 %v12805_v50, %v9249_v53  ;;  %v13006_v50 = vld [vmem:[#allocation5 + $0xbd4] sm:$0xf0] }
 0x100   : > { %v9316_v47 = vor.u32 %v12821_v37, %v9313_v38  ;;  %v12933_v54 = vld [vmem:[#allocation5 + $0x994] sm:$0xf] }
 0x101   : > { %3744 = vmatpush.bf16.msra.mxu2 %v9632_v48  ;;  %3719 = vmatpush.bf16.msra.mxu0 %v8544_v59  ;;  %v9828_v48 = vor.u32 %v12949_v40, %v9825_v41  ;;  %v9761_v55 = vld [vmem:[#allocation5 + $0x9d0] sm:$0xf0] }
 0x102   : > { %v13061_v56 = vld [vmem:[#allocation5 + $0xd94] sm:$0xf]  ;;  %v9764_v61 = vor.u32 %v12933_v54, %v9761_v55  ;;  %v10535_v54 = vld [vmem:[#allocation5 + $0xf98] sm:$0xf] }
 0x103   : > { %3757 = vmatpush.bf16.msra.mxu3 %v10144_v52  ;;  %3732 = vmatpush.bf16.msra.mxu1 %v9056_v63  ;;  %v10340_v52 = vor.u32 %v13077_v43, %v10337_v44  ;;  %v10273_v57 = vld [vmem:[#allocation5 + $0xdd0] sm:$0xf0]  ;;  %v3526_v11 = vpop.f32.mrf.mxu1  ;;  %v8999_v44 = vld [vmem:[#allocation5 + $0x398] sm:$0xf] }
 0x104   : > { %3720 = vmatmul.bf16.vlgmr.msra.gmra.mxu0 %v14273_v9  ;;  %v12661_v62 = vld [vmem:[#allocation5 + $0x114] sm:$0xf]  ;;  %v10276_v2 = vor.u32 %v13061_v56, %v10273_v57  ;;  %v13134_v55 = vld [vmem:[#allocation5 + $0xfd4] sm:$0xf0] }
 0x105   : > { %3745 = vmatpush.bf16.msra.mxu2 %v9568_v0  ;;  %3764 = vmatpush.bf16.msrb.mxu0 %v8996_v4  ;;  %v3513_v59 = vpop.f32.mrf.mxu0  ;;  %v8673_v63 = vld [vmem:[#allocation5 + $0x150] sm:$0xf0] }
 0x106   : > { %3733 = vmatmul.bf16.vlgmr.msra.gmra.mxu1 %v14282_v25  ;;  %v12789_v0 = vld [vmem:[#allocation5 + $0x514] sm:$0xf]  ;;  %v3514_v1 = vadd.f32 %v3513_v59, %v912_v51  ;;  %v8676_v10 = vor.u32 %v12661_v62, %v8673_v63  ;;  %v12734_v62 = vld [vmem:[#allocation5 + $0x354] sm:$0xf0] }
 0x107   : > { %3758 = vmatpush.bf16.msra.mxu3 %v10080_v3  ;;  %3777 = vmatpush.bf16.msrb.mxu1 %v9508_v5  ;;  %v9185_v3 = vld [vmem:[#allocation5 + $0x550] sm:$0xf0]  ;;  %v9447_v63 = vld [vmem:[#allocation5 + $0x718] sm:$0xf] }
 0x108   : > { %3746 = vmatmul.bf16.vlgmr.msra.gmra.mxu2 %v14271_v8  ;;  %v12917_v4 = vld [vmem:[#allocation5 + $0x914] sm:$0xf]  ;;  %v3527_v18 = vadd.f32 %v3526_v11, %v3514_v1  ;;  %v10536_v1 = vor.u32 %v13134_v55, %v10535_v54 }
 0x109   : > { %3790 = vmatpush.bf16.msrb.mxu2 %v10020_v6  ;;  %3765 = vmatpush.bf16.msrb.mxu0 %v8932_v19  ;;  %v9697_v5 = vld [vmem:[#allocation5 + $0x950] sm:$0xf0] }
 0x10a   : > { %3759 = vmatmul.bf16.vlgmr.msra.gmra.mxu3 %v14276_v15  ;;  %v13045_v6 = vld [vmem:[#allocation5 + $0xd14] sm:$0xf]  ;;  %v9700_v13 = vor.u32 %v12917_v4, %v9697_v5  ;;  %v12990_v4 = vld [vmem:[#allocation5 + $0xb54] sm:$0xf0] }
 0x10b   : > { %3803 = vmatpush.bf16.msrb.mxu3 %v10532_v12  ;;  %3778 = vmatpush.bf16.msrb.mxu1 %v9444_v20  ;;  %v10209_v7 = vld [vmem:[#allocation5 + $0xd50] sm:$0xf0]  ;;  %v9188_v12 = vor.u32 %v12789_v0, %v9185_v3  ;;  %v3539_v23 = vpop.f32.mrf.mxu2  ;;  %v3528_v51 = vpop.f32.mrf.mxu1  ;;  %v9959_v3 = vld [vmem:[#allocation5 + $0xb18] sm:$0xf] }
 0x10c   : > { %v12645_v14 = vld [vmem:[#allocation5 + $0x94] sm:$0xf]  ;;  %v10212_v19 = vor.u32 %v13045_v6, %v10209_v7  ;;  %v3540_v27 = vadd.f32 %v3539_v23, %v3527_v18  ;;  %v10471_v5 = vld [vmem:[#allocation5 + $0xf18] sm:$0xf]  ;;  %v9960_v11 = vor.u32 %v12990_v4, %v9959_v3 }
 0x10d   : > { %3791 = vmatpush.bf16.msrb.mxu2 %v9956_v21  ;;  %3766 = vmatpush.bf16.msrb.mxu0 %v8868_v32  ;;  %v8609_v16 = vld [vmem:[#allocation5 + $0xd0] sm:$0xf0]  ;;  %v3552_v28 = vpop.f32.mrf.mxu3  ;;  %v3515_v32 = vpop.f32.mrf.mxu0  ;;  %v13118_v6 = vld [vmem:[#allocation5 + $0xf54] sm:$0xf0] }
 0x10e   : > { %v12773_v17 = vld [vmem:[#allocation5 + $0x494] sm:$0xf]  ;;  %v8612_v29 = vor.u32 %v12645_v14, %v8609_v16  ;;  %v14304_v38 = vadd.f32 %v3552_v28, %v3540_v27  ;;  %v9383_v14 = vld [vmem:[#allocation5 + $0x698] sm:$0xf]  ;;  %v10472_v16 = vor.u32 %v13118_v6, %v10471_v5 }
 0x10f   : > { %3804 = vmatpush.bf16.msrb.mxu3 %v10468_v26  ;;  %3779 = vmatpush.bf16.msrb.mxu1 %v9380_v34  ;;  %v9121_v20 = vld [vmem:[#allocation5 + $0x4d0] sm:$0xf0]  ;;  %v9895_v18 = vld [vmem:[#allocation5 + $0xa98] sm:$0xf] }
 0x110   : > { %v12901_v21 = vld [vmem:[#allocation5 + $0x894] sm:$0xf]  ;;  %v9124_v33 = vor.u32 %v12773_v17, %v9121_v20  ;;  %v12846_v17 = vld [vmem:[#allocation5 + $0x6d4] sm:$0xf0] }
 0x111   : > { %3792 = vmatpush.bf16.msrb.mxu2 %v9892_v35  ;;  %3767 = vmatpush.bf16.msrb.mxu0 %v8804_v45  ;;  %v9633_v22 = vld [vmem:[#allocation5 + $0x8d0] sm:$0xf0]  ;;  %v12750_v45 = vld [vmem:[#allocation5 + $0x3d4] sm:$0xf0] }
 0x112   : > { %v13029_v24 = vld [vmem:[#allocation5 + $0xc94] sm:$0xf]  ;;  %v9636_v34 = vor.u32 %v12901_v21, %v9633_v22  ;;  %v9000_v57 = vor.u32 %v12750_v45, %v8999_v44  ;;  %v10407_v20 = vld [vmem:[#allocation5 + $0xe98] sm:$0xf] }
 0x113   : > { %3805 = vmatpush.bf16.msrb.mxu3 %v10404_v39  ;;  %3780 = vmatpush.bf16.msrb.mxu1 %v9316_v47  ;;  %v10145_v26 = vld [vmem:[#allocation5 + $0xcd0] sm:$0xf0]  ;;  %v13102_v21 = vld [vmem:[#allocation5 + $0xed4] sm:$0xf0] }
 0x114   : > { %v12629_v30 = vld [vmem:[#allocation5 + $0x14] sm:$0xf]  ;;  %v10148_v39 = vor.u32 %v13029_v24, %v10145_v26  ;;  %v8807_v23 = vld [vmem:[#allocation5 + $0x218] sm:$0xf]  ;;  %v9384_v24 = vor.u32 %v12846_v17, %v9383_v14 }
 0x115   : > { %3793 = vmatpush.bf16.msrb.mxu2 %v9828_v48  ;;  %3768 = vmatpush.bf16.msrb.mxu0 %v8740_v58  ;;  %v8545_v31 = vld [vmem:[#allocation5 + $0x50] sm:$0xf0]  ;;  %v12878_v48 = vld [vmem:[#allocation5 + $0x7d4] sm:$0xf0]  ;;  %v3541_v58 = vpop.f32.mrf.mxu2  ;;  %v3554_v0 = vpop.f32.mrf.mxu3 }
 0x116   : > { %v12757_v35 = vld [vmem:[#allocation5 + $0x414] sm:$0xf]  ;;  %v8548_v47 = vor.u32 %v12629_v30, %v8545_v31  ;;  %v9512_v59 = vor.u32 %v12878_v48, %v9511_v46  ;;  %v12702_v27 = vld [vmem:[#allocation5 + $0x254] sm:$0xf0]  ;;  %v10408_v30 = vor.u32 %v13102_v21, %v10407_v20 }
 0x117   : > { %3806 = vmatpush.bf16.msrb.mxu3 %v10340_v52  ;;  %3781 = vmatpush.bf16.msrb.mxu1 %v9252_v60  ;;  %v9057_v36 = vld [vmem:[#allocation5 + $0x450] sm:$0xf0]  ;;  %v10024_v60 = vor.u32 %v13006_v50, %v10023_v49  ;;  %v9319_v28 = vld [vmem:[#allocation5 + $0x618] sm:$0xf] }
 0x118   : > { %v12885_v37 = vld [vmem:[#allocation5 + $0x814] sm:$0xf]  ;;  %v9060_v52 = vor.u32 %v12757_v35, %v9057_v36  ;;  %v12830_v31 = vld [vmem:[#allocation5 + $0x654] sm:$0xf0]  ;;  %v8808_v36 = vor.u32 %v12702_v27, %v8807_v23 }
 0x119   : > { %3794 = vmatpush.bf16.msrb.mxu2 %v9764_v61  ;;  %3769 = vmatpush.bf16.msrb.mxu0 %v8676_v10  ;;  %v9569_v40 = vld [vmem:[#allocation5 + $0x850] sm:$0xf0]  ;;  %v8935_v61 = vld [vmem:[#allocation5 + $0x318] sm:$0xf] }
 0x11a   : > { %v13013_v41 = vld [vmem:[#allocation5 + $0xc14] sm:$0xf]  ;;  %v9572_v53 = vor.u32 %v12885_v37, %v9569_v40  ;;  %v8936_v7 = vor.u32 %v12734_v62, %v8935_v61  ;;  %v9831_v32 = vld [vmem:[#allocation5 + $0xa18] sm:$0xf] }
 0x11b   : > { %3807 = vmatpush.bf16.msrb.mxu3 %v10276_v2  ;;  %3782 = vmatpush.bf16.msrb.mxu1 %v9188_v12  ;;  %v10081_v43 = vld [vmem:[#allocation5 + $0xc50] sm:$0xf0]  ;;  %v12862_v2 = vld [vmem:[#allocation5 + $0x754] sm:$0xf0] }
 0x11c   : > { %v10084_v56 = vor.u32 %v13013_v41, %v10081_v43  ;;  %v9448_v10 = vor.u32 %v12862_v2, %v9447_v63  ;;  %v8871_v12 = vld [vmem:[#allocation5 + $0x298] sm:$0xf] }
 0x11d   : > { %3795 = vmatpush.bf16.msrb.mxu2 %v9700_v13  ;;  %3770 = vmatpush.bf16.msrb.mxu0 %v8612_v29  ;;  %v12718_v13 = vld [vmem:[#allocation5 + $0x2d4] sm:$0xf0]  ;;  %v913_v29 = vperm.slane %v14301_v42, 1 }
 0x11e   : > { %v8872_v22 = vor.u32 %v12718_v13, %v8871_v12  ;;  %v13086_v35 = vld [vmem:[#allocation5 + $0xe54] sm:$0xf0] }
 0x11f   : > { %3808 = vmatpush.bf16.msrb.mxu3 %v10212_v19  ;;  %3783 = vmatpush.bf16.msrb.mxu1 %v9124_v33  ;;  %v12974_v19 = vld [vmem:[#allocation5 + $0xad4] sm:$0xf0] }
 0x120   : > { %v9896_v26 = vor.u32 %v12974_v19, %v9895_v18  ;;  %v12958_v33 = vld [vmem:[#allocation5 + $0xa54] sm:$0xf0] }
 0x121   : > { %3796 = vmatpush.bf16.msrb.mxu2 %v9636_v34  ;;  %3771 = vmatpush.bf16.msrb.mxu0 %v8548_v47  ;;  %v10343_v34 = vld [vmem:[#allocation5 + $0xe18] sm:$0xf]  ;;  %v3565_v37 = vpop.f32.mrf.mxu0  ;;  %v9832_v40 = vor.u32 %v12958_v33, %v9831_v32 }
 0x122   : > { %v8743_v41 = vld [vmem:[#allocation5 + $0x198] sm:$0xf]  ;;  %v3566_v45 = vadd.f32 %v3565_v37, %v913_v29  ;;  %v10344_v47 = vor.u32 %v13086_v35, %v10343_v34 }
 0x123   : > { %3809 = vmatpush.bf16.msrb.mxu3 %v10148_v39  ;;  %3784 = vmatpush.bf16.msrb.mxu1 %v9060_v52  ;;  %v9320_v39 = vor.u32 %v12830_v31, %v9319_v28  ;;  %v12686_v43 = vld [vmem:[#allocation5 + $0x1d4] sm:$0xf0]  ;;  %v3578_v46 = vpop.f32.mrf.mxu1 }
 0x124   : > { %3772 = vmatmul.bf16.vlgmr.msrb.gmra.mxu0 %v14273_v9  ;;  %v9255_v44 = vld [vmem:[#allocation5 + $0x598] sm:$0xf]  ;;  %v8744_v54 = vor.u32 %v12686_v43, %v8743_v41  ;;  %v12870_v41 = vld [vmem:[#allocation5 + $0x79c] sm:$0xf] }
 0x125   : > { %3797 = vmatpush.bf16.msrb.mxu2 %v9572_v53  ;;  %3816 = vmatpush.bf16.msra.mxu0 %v9000_v57  ;;  %v12814_v48 = vld [vmem:[#allocation5 + $0x5d4] sm:$0xf0]  ;;  %v3579_v53 = vadd.f32 %v3578_v46, %v3566_v45  ;;  %v12998_v45 = vld [vmem:[#allocation5 + $0xb9c] sm:$0xf] }
 0x126   : > { %3785 = vmatmul.bf16.vlgmr.msrb.gmra.mxu1 %v14282_v25  ;;  %v9767_v49 = vld [vmem:[#allocation5 + $0x998] sm:$0xf]  ;;  %v9256_v55 = vor.u32 %v12814_v48, %v9255_v44  ;;  %v9513_v44 = vld [vmem:[#allocation5 + $0x7d8] sm:$0xf0] }
 0x127   : > { %3810 = vmatpush.bf16.msrb.mxu3 %v10084_v56  ;;  %3829 = vmatpush.bf16.msra.mxu1 %v9512_v59  ;;  %v12942_v50 = vld [vmem:[#allocation5 + $0x9d4] sm:$0xf0]  ;;  %v10025_v46 = vld [vmem:[#allocation5 + $0xbd8] sm:$0xf0] }
 0x128   : > { %3798 = vmatmul.bf16.vlgmr.msrb.gmra.mxu2 %v14271_v8  ;;  %v10279_v51 = vld [vmem:[#allocation5 + $0xd98] sm:$0xf]  ;;  %v9768_v56 = vor.u32 %v12942_v50, %v9767_v49  ;;  %v13126_v49 = vld [vmem:[#allocation5 + $0xf9c] sm:$0xf] }
 0x129   : > { %3842 = vmatpush.bf16.msra.mxu2 %v10024_v60  ;;  %3817 = vmatpush.bf16.msra.mxu0 %v8936_v7  ;;  %v13070_v52 = vld [vmem:[#allocation5 + $0xdd4] sm:$0xf0]  ;;  %v3567_v7 = vpop.f32.mrf.mxu0  ;;  %v10537_v50 = vld [vmem:[#allocation5 + $0xfd8] sm:$0xf0] }
 0x12a   : > { %3811 = vmatmul.bf16.vlgmr.msrb.gmra.mxu3 %v14276_v15  ;;  %v8679_v57 = vld [vmem:[#allocation5 + $0x118] sm:$0xf]  ;;  %v10280_v61 = vor.u32 %v13070_v52, %v10279_v51 }
 0x12b   : > { %3855 = vmatpush.bf16.msra.mxu3 %v10536_v1  ;;  %3830 = vmatpush.bf16.msra.mxu1 %v9448_v10  ;;  %v12670_v58 = vld [vmem:[#allocation5 + $0x154] sm:$0xf0]  ;;  %v3591_v60 = vpop.f32.mrf.mxu2 }
 0x12c   : > { %v9191_v59 = vld [vmem:[#allocation5 + $0x518] sm:$0xf]  ;;  %v3592_v1 = vadd.f32 %v3591_v60, %v3579_v53  ;;  %v8680_v5 = vor.u32 %v12670_v58, %v8679_v57  ;;  %v9516_v53 = vor.u32 %v12870_v41, %v9513_v44  ;;  %v12854_v57 = vld [vmem:[#allocation5 + $0x71c] sm:$0xf]  ;;  %v10540_v58 = vor.u32 %v13126_v49, %v10537_v50 }
 0x12d   : > { %3843 = vmatpush.bf16.msra.mxu2 %v9960_v11  ;;  %3818 = vmatpush.bf16.msra.mxu0 %v8872_v22  ;;  %v12798_v62 = vld [vmem:[#allocation5 + $0x554] sm:$0xf0]  ;;  %v3604_v2 = vpop.f32.mrf.mxu3  ;;  %v12982_v60 = vld [vmem:[#allocation5 + $0xb1c] sm:$0xf] }
 0x12e   : > { %v9703_v63 = vld [vmem:[#allocation5 + $0x918] sm:$0xf]  ;;  %v14311_v6 = vadd.f32 %v3604_v2, %v3592_v1  ;;  %v9192_v10 = vor.u32 %v12798_v62, %v9191_v59  ;;  %v9449_v59 = vld [vmem:[#allocation5 + $0x758] sm:$0xf0] }
 0x12f   : > { %3856 = vmatpush.bf16.msra.mxu3 %v10472_v16  ;;  %3831 = vmatpush.bf16.msra.mxu1 %v9384_v24  ;;  %v12926_v0 = vld [vmem:[#allocation5 + $0x954] sm:$0xf0]  ;;  %v3580_v16 = vpop.f32.mrf.mxu1  ;;  %v13110_v62 = vld [vmem:[#allocation5 + $0xf1c] sm:$0xf]  ;;  %v9452_v1 = vor.u32 %v12854_v57, %v9449_v59 }
 0x130   : > { %v10215_v3 = vld [vmem:[#allocation5 + $0xd18] sm:$0xf]  ;;  %v9704_v11 = vor.u32 %v12926_v0, %v9703_v63  ;;  %v10473_v63 = vld [vmem:[#allocation5 + $0xf58] sm:$0xf0] }
 0x131   : > { %3844 = vmatpush.bf16.msra.mxu2 %v9896_v26  ;;  %3819 = vmatpush.bf16.msra.mxu0 %v8808_v36  ;;  %v13054_v4 = vld [vmem:[#allocation5 + $0xd54] sm:$0xf0]  ;;  %v10476_v7 = vor.u32 %v13110_v62, %v10473_v63  ;;  %v9257_v41 = vld [vmem:[#allocation5 + $0x5d8] sm:$0xf0] }
 0x132   : > { %v8615_v12 = vld [vmem:[#allocation5 + $0x98] sm:$0xf]  ;;  %v10216_v17 = vor.u32 %v13054_v4, %v10215_v3  ;;  %v12710_v3 = vld [vmem:[#allocation5 + $0x29c] sm:$0xf] }
 0x133   : > { %3857 = vmatpush.bf16.msra.mxu3 %v10408_v30  ;;  %3832 = vmatpush.bf16.msra.mxu1 %v9320_v39  ;;  %v12654_v13 = vld [vmem:[#allocation5 + $0xd4] sm:$0xf0]  ;;  %v3593_v32 = vpop.f32.mrf.mxu2  ;;  %v12742_v39 = vld [vmem:[#allocation5 + $0x39c] sm:$0xf] }
 0x134   : > { %v9127_v14 = vld [vmem:[#allocation5 + $0x498] sm:$0xf]  ;;  %v8616_v23 = vor.u32 %v12654_v13, %v8615_v12  ;;  %v8873_v4 = vld [vmem:[#allocation5 + $0x2d8] sm:$0xf0] }
 0x135   : > { %3845 = vmatpush.bf16.msra.mxu2 %v9832_v40  ;;  %3820 = vmatpush.bf16.msra.mxu0 %v8744_v54  ;;  %v12782_v18 = vld [vmem:[#allocation5 + $0x4d4] sm:$0xf0]  ;;  %v3606_v37 = vpop.f32.mrf.mxu3  ;;  %v9001_v40 = vld [vmem:[#allocation5 + $0x3d8] sm:$0xf0]  ;;  %v10028_v54 = vor.u32 %v12998_v45, %v10025_v46  ;;  %v8876_v16 = vor.u32 %v12710_v3, %v8873_v4 }
 0x136   : > { %v9639_v19 = vld [vmem:[#allocation5 + $0x898] sm:$0xf]  ;;  %v9128_v27 = vor.u32 %v12782_v18, %v9127_v14  ;;  %v9004_v52 = vor.u32 %v12742_v39, %v9001_v40  ;;  %v9897_v12 = vld [vmem:[#allocation5 + $0xad8] sm:$0xf0] }
 0x137   : > { %3858 = vmatpush.bf16.msra.mxu3 %v10344_v47  ;;  %3833 = vmatpush.bf16.msra.mxu1 %v9256_v55  ;;  %v12910_v20 = vld [vmem:[#allocation5 + $0x8d4] sm:$0xf0]  ;;  %v12726_v55 = vld [vmem:[#allocation5 + $0x31c] sm:$0xf] }
 0x138   : > { %v10151_v21 = vld [vmem:[#allocation5 + $0xc98] sm:$0xf]  ;;  %v9640_v28 = vor.u32 %v12910_v20, %v9639_v19  ;;  %v13094_v13 = vld [vmem:[#allocation5 + $0xe9c] sm:$0xf] }
 0x139   : > { %3846 = vmatpush.bf16.msra.mxu2 %v9768_v56  ;;  %v13038_v22 = vld [vmem:[#allocation5 + $0xcd4] sm:$0xf0]  ;;  %3821 = vmatpush.bf16.msra.mxu0 %v8680_v5  ;;  %v8937_v56 = vld [vmem:[#allocation5 + $0x358] sm:$0xf0] }
 0x13a   : > { %v8551_v24 = vld [vmem:[#allocation5 + $0x18] sm:$0xf]  ;;  %v10152_v33 = vor.u32 %v13038_v22, %v10151_v21  ;;  %v8940_v0 = vor.u32 %v12726_v55, %v8937_v56  ;;  %v12838_v5 = vld [vmem:[#allocation5 + $0x69c] sm:$0xf]  ;;  %v914_v22 = vperm.slane %v14301_v42, 2 }
 0x13b   : > { %3859 = vmatpush.bf16.msra.mxu3 %v10280_v61  ;;  %v12638_v26 = vld [vmem:[#allocation5 + $0x54] sm:$0xf0]  ;;  %3834 = vmatpush.bf16.msra.mxu1 %v9192_v10  ;;  %v9961_v61 = vld [vmem:[#allocation5 + $0xb58] sm:$0xf0] }
 0x13c   : > { %v9063_v29 = vld [vmem:[#allocation5 + $0x418] sm:$0xf]  ;;  %v8552_v43 = vor.u32 %v12638_v26, %v8551_v24  ;;  %v9964_v2 = vor.u32 %v12982_v60, %v9961_v61  ;;  %v9385_v10 = vld [vmem:[#allocation5 + $0x6d8] sm:$0xf0] }
 0x13d   : > { %3847 = vmatpush.bf16.msra.mxu2 %v9704_v11  ;;  %v12766_v30 = vld [vmem:[#allocation5 + $0x454] sm:$0xf0]  ;;  %3822 = vmatpush.bf16.msra.mxu0 %v8616_v23  ;;  %v12966_v11 = vld [vmem:[#allocation5 + $0xa9c] sm:$0xf]  ;;  %v9388_v18 = vor.u32 %v12838_v5, %v9385_v10 }
 0x13e   : > { %v9575_v31 = vld [vmem:[#allocation5 + $0x818] sm:$0xf]  ;;  %v9064_v47 = vor.u32 %v12766_v30, %v9063_v29  ;;  %v10409_v14 = vld [vmem:[#allocation5 + $0xed8] sm:$0xf0]  ;;  %v9900_v19 = vor.u32 %v12966_v11, %v9897_v12 }
 0x13f   : > { %3860 = vmatpush.bf16.msra.mxu3 %v10216_v17  ;;  %v12894_v34 = vld [vmem:[#allocation5 + $0x854] sm:$0xf0]  ;;  %3835 = vmatpush.bf16.msra.mxu1 %v9128_v27  ;;  %v12694_v17 = vld [vmem:[#allocation5 + $0x21c] sm:$0xf]  ;;  %v10412_v23 = vor.u32 %v13094_v13, %v10409_v14 }
 0x140   : > { %v10087_v35 = vld [vmem:[#allocation5 + $0xc18] sm:$0xf]  ;;  %v9576_v48 = vor.u32 %v12894_v34, %v9575_v31  ;;  %v8809_v20 = vld [vmem:[#allocation5 + $0x258] sm:$0xf0] }
 0x141   : > { %v13022_v36 = vld [vmem:[#allocation5 + $0xc54] sm:$0xf0]  ;;  %3848 = vmatpush.bf16.msra.mxu2 %v9640_v28  ;;  %3823 = vmatpush.bf16.msra.mxu0 %v8552_v43  ;;  %v12822_v21 = vld [vmem:[#allocation5 + $0x61c] sm:$0xf]  ;;  %v8812_v30 = vor.u32 %v12694_v17, %v8809_v20  ;;  %v3617_v31 = vpop.f32.mrf.mxu0 }
 0x142   : > { %v10088_v51 = vor.u32 %v13022_v36, %v10087_v35  ;;  %v9321_v24 = vld [vmem:[#allocation5 + $0x658] sm:$0xf0]  ;;  %v3618_v37 = vadd.f32 %v3617_v31, %v914_v22 }
 0x143   : > { %3861 = vmatpush.bf16.msra.mxu3 %v10152_v33  ;;  %3836 = vmatpush.bf16.msra.mxu1 %v9064_v47  ;;  %v12950_v26 = vld [vmem:[#allocation5 + $0xa1c] sm:$0xf]  ;;  %v9324_v32 = vor.u32 %v12822_v21, %v9321_v24  ;;  %v3630_v39 = vpop.f32.mrf.mxu1 }
 0x144   : > { %3824 = vmatmul.bf16.vlgmr.msra.gmra.mxu0 %v14273_v9  ;;  %v9833_v27 = vld [vmem:[#allocation5 + $0xa58] sm:$0xf0]  ;;  %v3631_v47 = vadd.f32 %v3630_v39, %v3618_v37  ;;  %v12879_v37 = vld [vmem:[#allocation5 + $0x7dc] sm:$0xf0] }
 0x145   : > { %3849 = vmatpush.bf16.msra.mxu2 %v9576_v48  ;;  %3868 = vmatpush.bf16.msrb.mxu0 %v9004_v52  ;;  %v13078_v28 = vld [vmem:[#allocation5 + $0xe1c] sm:$0xf]  ;;  %v9836_v33 = vor.u32 %v12950_v26, %v9833_v27  ;;  %v10031_v39 = vld [vmem:[#allocation5 + $0xba0] sm:$0xf] }
 0x146   : > { %3837 = vmatmul.bf16.vlgmr.msra.gmra.mxu1 %v14282_v25  ;;  %v10345_v29 = vld [vmem:[#allocation5 + $0xe58] sm:$0xf0] }
 0x147   : > { %3862 = vmatpush.bf16.msra.mxu3 %v10088_v51  ;;  %3881 = vmatpush.bf16.msrb.mxu1 %v9516_v53  ;;  %v12678_v34 = vld [vmem:[#allocation5 + $0x19c] sm:$0xf]  ;;  %v10348_v40 = vor.u32 %v13078_v28, %v10345_v29 }
 0x148   : > { %3850 = vmatmul.bf16.vlgmr.msra.gmra.mxu2 %v14271_v8  ;;  %v8745_v35 = vld [vmem:[#allocation5 + $0x1d8] sm:$0xf0] }
 0x149   : > { %3894 = vmatpush.bf16.msrb.mxu2 %v10028_v54  ;;  %3869 = vmatpush.bf16.msrb.mxu0 %v8940_v0  ;;  %v12806_v36 = vld [vmem:[#allocation5 + $0x59c] sm:$0xf]  ;;  %v8748_v48 = vor.u32 %v12678_v34, %v8745_v35  ;;  %v12751_v34 = vld [vmem:[#allocation5 + $0x3dc] sm:$0xf0] }
 0x14a   : > { %3863 = vmatmul.bf16.vlgmr.msra.gmra.mxu3 %v14276_v15  ;;  %v12934_v43 = vld [vmem:[#allocation5 + $0x99c] sm:$0xf]  ;;  %v9260_v49 = vor.u32 %v12806_v36, %v9257_v41  ;;  %v9519_v35 = vld [vmem:[#allocation5 + $0x7a0] sm:$0xf] }
 0x14b   : > { %3907 = vmatpush.bf16.msrb.mxu3 %v10540_v58  ;;  %3882 = vmatpush.bf16.msrb.mxu1 %v9452_v1  ;;  %v9769_v44 = vld [vmem:[#allocation5 + $0x9d8] sm:$0xf0]  ;;  %v3643_v54 = vpop.f32.mrf.mxu2  ;;  %v3619_v1 = vpop.f32.mrf.mxu0 }
 0x14c   : > { %v13062_v45 = vld [vmem:[#allocation5 + $0xd9c] sm:$0xf]  ;;  %v9772_v50 = vor.u32 %v12934_v43, %v9769_v44  ;;  %v3644_v59 = vadd.f32 %v3643_v54, %v3631_v47  ;;  %v3632_v10 = vpop.f32.mrf.mxu1  ;;  %v10543_v44 = vld [vmem:[#allocation5 + $0xfa0] sm:$0xf] }
 0x14d   : > { %3895 = vmatpush.bf16.msrb.mxu2 %v9964_v2  ;;  %3870 = vmatpush.bf16.msrb.mxu0 %v8876_v16  ;;  %v10281_v46 = vld [vmem:[#allocation5 + $0xdd8] sm:$0xf0]  ;;  %v3656_v60 = vpop.f32.mrf.mxu3  ;;  %v12863_v54 = vld [vmem:[#allocation5 + $0x75c] sm:$0xf0] }
 0x14e   : > { %v12662_v51 = vld [vmem:[#allocation5 + $0x11c] sm:$0xf]  ;;  %v10284_v55 = vor.u32 %v13062_v45, %v10281_v46  ;;  %v14318_v0 = vadd.f32 %v3656_v60, %v3644_v59  ;;  %v13135_v45 = vld [vmem:[#allocation5 + $0xfdc] sm:$0xf0] }
 0x14f   : > { %3908 = vmatpush.bf16.msrb.mxu3 %v10476_v7  ;;  %3883 = vmatpush.bf16.msrb.mxu1 %v9388_v18  ;;  %v8681_v52 = vld [vmem:[#allocation5 + $0x158] sm:$0xf0]  ;;  %v9391_v1 = vld [vmem:[#allocation5 + $0x6a0] sm:$0xf] }
 0x150   : > { %v12790_v53 = vld [vmem:[#allocation5 + $0x51c] sm:$0xf]  ;;  %v8684_v63 = vor.u32 %v12662_v51, %v8681_v52  ;;  %v12735_v51 = vld [vmem:[#allocation5 + $0x35c] sm:$0xf0] }
 0x151   : > { %3896 = vmatpush.bf16.msrb.mxu2 %v9900_v19  ;;  %3871 = vmatpush.bf16.msrb.mxu0 %v8812_v30  ;;  %v9193_v56 = vld [vmem:[#allocation5 + $0x558] sm:$0xf0]  ;;  %v9455_v52 = vld [vmem:[#allocation5 + $0x720] sm:$0xf] }
 0x152   : > { %v12918_v57 = vld [vmem:[#allocation5 + $0x91c] sm:$0xf]  ;;  %v9196_v2 = vor.u32 %v12790_v53, %v9193_v56  ;;  %v10544_v53 = vor.u32 %v13135_v45, %v10543_v44  ;;  %v12991_v56 = vld [vmem:[#allocation5 + $0xb5c] sm:$0xf0]  ;;  %v9456_v60 = vor.u32 %v12863_v54, %v9455_v52 }
 0x153   : > { %3909 = vmatpush.bf16.msrb.mxu3 %v10412_v23  ;;  %3884 = vmatpush.bf16.msrb.mxu1 %v9324_v32  ;;  %v9705_v58 = vld [vmem:[#allocation5 + $0x958] sm:$0xf0]  ;;  %v3645_v27 = vpop.f32.mrf.mxu2  ;;  %v13103_v10 = vld [vmem:[#allocation5 + $0xedc] sm:$0xf0] }
 0x154   : > { %v13046_v61 = vld [vmem:[#allocation5 + $0xd1c] sm:$0xf]  ;;  %v9708_v3 = vor.u32 %v12918_v57, %v9705_v58  ;;  %v10479_v57 = vld [vmem:[#allocation5 + $0xf20] sm:$0xf] }
 0x155   : > { %3897 = vmatpush.bf16.msrb.mxu2 %v9836_v33  ;;  %v10217_v62 = vld [vmem:[#allocation5 + $0xd58] sm:$0xf0]  ;;  %3872 = vmatpush.bf16.msrb.mxu0 %v8748_v48  ;;  %v3658_v32 = vpop.f32.mrf.mxu3  ;;  %v9007_v33 = vld [vmem:[#allocation5 + $0x3a0] sm:$0xf]  ;;  %v9520_v48 = vor.u32 %v12879_v37, %v9519_v35 }
 0x156   : > { %v12646_v4 = vld [vmem:[#allocation5 + $0x9c] sm:$0xf]  ;;  %v10220_v11 = vor.u32 %v13046_v61, %v10217_v62  ;;  %v9008_v47 = vor.u32 %v12751_v34, %v9007_v33  ;;  %v13119_v58 = vld [vmem:[#allocation5 + $0xf5c] sm:$0xf0] }
 0x157   : > { %3910 = vmatpush.bf16.msrb.mxu3 %v10348_v40  ;;  %3885 = vmatpush.bf16.msrb.mxu1 %v9260_v49  ;;  %v8617_v5 = vld [vmem:[#allocation5 + $0xd8] sm:$0xf0]  ;;  %v13007_v40 = vld [vmem:[#allocation5 + $0xbdc] sm:$0xf0] }
 0x158   : > { %v12774_v7 = vld [vmem:[#allocation5 + $0x49c] sm:$0xf]  ;;  %v8620_v18 = vor.u32 %v12646_v4, %v8617_v5  ;;  %v10032_v49 = vor.u32 %v13007_v40, %v10031_v39  ;;  %v8879_v62 = vld [vmem:[#allocation5 + $0x2a0] sm:$0xf] }
 0x159   : > { %3898 = vmatpush.bf16.msrb.mxu2 %v9772_v50  ;;  %v9129_v12 = vld [vmem:[#allocation5 + $0x4d8] sm:$0xf0]  ;;  %3873 = vmatpush.bf16.msrb.mxu0 %v8684_v63  ;;  %v8943_v50 = vld [vmem:[#allocation5 + $0x320] sm:$0xf] }
 0x15a   : > { %v12902_v13 = vld [vmem:[#allocation5 + $0x89c] sm:$0xf]  ;;  %v9132_v21 = vor.u32 %v12774_v7, %v9129_v12  ;;  %v8944_v59 = vor.u32 %v12735_v51, %v8943_v50  ;;  %v12719_v63 = vld [vmem:[#allocation5 + $0x2dc] sm:$0xf0] }
 0x15b   : > { %3911 = vmatpush.bf16.msrb.mxu3 %v10284_v55  ;;  %v9641_v14 = vld [vmem:[#allocation5 + $0x8d8] sm:$0xf0]  ;;  %3886 = vmatpush.bf16.msrb.mxu1 %v9196_v2  ;;  %v9967_v55 = vld [vmem:[#allocation5 + $0xb20] sm:$0xf]  ;;  %v10480_v2 = vor.u32 %v13119_v58, %v10479_v57 }
 0x15c   : > { %v13030_v16 = vld [vmem:[#allocation5 + $0xc9c] sm:$0xf]  ;;  %v9644_v22 = vor.u32 %v12902_v13, %v9641_v14  ;;  %v9968_v61 = vor.u32 %v12991_v56, %v9967_v55  ;;  %v9903_v4 = vld [vmem:[#allocation5 + $0xaa0] sm:$0xf] }
 0x15d   : > { %v10153_v17 = vld [vmem:[#allocation5 + $0xcd8] sm:$0xf0]  ;;  %3899 = vmatpush.bf16.msrb.mxu2 %v9708_v3  ;;  %3874 = vmatpush.bf16.msrb.mxu0 %v8620_v18  ;;  %v12847_v3 = vld [vmem:[#allocation5 + $0x6dc] sm:$0xf0]  ;;  %v915_v18 = vperm.slane %v14301_v42, 3 }
 0x15e   : > { %v12630_v19 = vld [vmem:[#allocation5 + $0x1c] sm:$0xf]  ;;  %v10156_v28 = vor.u32 %v13030_v16, %v10153_v17  ;;  %v12975_v5 = vld [vmem:[#allocation5 + $0xadc] sm:$0xf0]  ;;  %v9392_v13 = vor.u32 %v12847_v3, %v9391_v1 }
 0x15f   : > { %v8553_v20 = vld [vmem:[#allocation5 + $0x58] sm:$0xf0]  ;;  %3912 = vmatpush.bf16.msrb.mxu3 %v10220_v11  ;;  %3887 = vmatpush.bf16.msrb.mxu1 %v9132_v21  ;;  %v10415_v7 = vld [vmem:[#allocation5 + $0xea0] sm:$0xf]  ;;  %v8880_v11 = vor.u32 %v12719_v63, %v8879_v62  ;;  %v9904_v14 = vor.u32 %v12975_v5, %v9903_v4 }
 0x160   : > { %v12758_v23 = vld [vmem:[#allocation5 + $0x41c] sm:$0xf]  ;;  %v8556_v36 = vor.u32 %v12630_v19, %v8553_v20  ;;  %v8815_v12 = vld [vmem:[#allocation5 + $0x220] sm:$0xf]  ;;  %v10416_v19 = vor.u32 %v13103_v10, %v10415_v7 }
 0x161   : > { %v9065_v24 = vld [vmem:[#allocation5 + $0x458] sm:$0xf0]  ;;  %3900 = vmatpush.bf16.msrb.mxu2 %v9644_v22  ;;  %v12703_v16 = vld [vmem:[#allocation5 + $0x25c] sm:$0xf0]  ;;  %v3669_v27 = vpop.f32.mrf.mxu0 }
 0x162   : > { %v12886_v26 = vld [vmem:[#allocation5 + $0x81c] sm:$0xf]  ;;  %v9068_v41 = vor.u32 %v12758_v23, %v9065_v24  ;;  %3875 = vmatpush.bf16.msrb.mxu0 %v8556_v36  ;;  %v9327_v17 = vld [vmem:[#allocation5 + $0x620] sm:$0xf]  ;;  %v3670_v33 = vadd.f32 %v3669_v27, %v915_v18 }
 0x163   : > { %v9577_v29 = vld [vmem:[#allocation5 + $0x858] sm:$0xf0]  ;;  %3913 = vmatpush.bf16.msrb.mxu3 %v10156_v28  ;;  %v12831_v20 = vld [vmem:[#allocation5 + $0x65c] sm:$0xf0]  ;;  %v3682_v34 = vpop.f32.mrf.mxu1 }
 0x164   : > { %v13014_v30 = vld [vmem:[#allocation5 + $0xc1c] sm:$0xf]  ;;  %v9580_v43 = vor.u32 %v12886_v26, %v9577_v29  ;;  %3888 = vmatpush.bf16.msrb.mxu1 %v9068_v41  ;;  %v9839_v21 = vld [vmem:[#allocation5 + $0xa20] sm:$0xf]  ;;  %v8816_v26 = vor.u32 %v12703_v16, %v8815_v12  ;;  %v9328_v28 = vor.u32 %v12831_v20, %v9327_v17  ;;  %v3683_v41 = vadd.f32 %v3682_v34, %v3670_v33  ;;  %v9521_v33 = vld [vmem:[#allocation5 + $0x7e0] sm:$0xf0] }
 0x165   : > { %v10089_v31 = vld [vmem:[#allocation5 + $0xc58] sm:$0xf0]  ;;  %3876 = vmatmul.bf16.vlgmr.msrb.gmra.mxu0 %v14273_v9  ;;  %v12959_v22 = vld [vmem:[#allocation5 + $0xa5c] sm:$0xf0]  ;;  %v12999_v34 = vld [vmem:[#allocation5 + $0xba4] sm:$0xf] }
 0x166   : > { %v10092_v46 = vor.u32 %v13014_v30, %v10089_v31  ;;  %3901 = vmatpush.bf16.msrb.mxu2 %v9580_v43  ;;  %3920 = vmatpush.bf16.msra.mxu0 %v9008_v47  ;;  %v10351_v23 = vld [vmem:[#allocation5 + $0xe20] sm:$0xf]  ;;  %v9840_v29 = vor.u32 %v12959_v22, %v9839_v21 }
 0x167   : > { %3889 = vmatmul.bf16.vlgmr.msrb.gmra.mxu1 %v14282_v25  ;;  %v13087_v24 = vld [vmem:[#allocation5 + $0xe5c] sm:$0xf0] }
 0x168   : > { %3914 = vmatpush.bf16.msrb.mxu3 %v10092_v46  ;;  %3933 = vmatpush.bf16.msra.mxu1 %v9520_v48  ;;  %v8751_v30 = vld [vmem:[#allocation5 + $0x1a0] sm:$0xf]  ;;  %v10352_v42 = vor.u32 %v13087_v24, %v10351_v23 }
 0x169   : > { %3902 = vmatmul.bf16.vlgmr.msrb.gmra.mxu2 %v14271_v8  ;;  %v12687_v31 = vld [vmem:[#allocation5 + $0x1dc] sm:$0xf0] }
 0x16a   : > { %3946 = vmatpush.bf16.msra.mxu2 %v10032_v49  ;;  %3921 = vmatpush.bf16.msra.mxu0 %v8944_v59  ;;  %v9263_v32 = vld [vmem:[#allocation5 + $0x5a0] sm:$0xf]  ;;  %v8752_v43 = vor.u32 %v12687_v31, %v8751_v30  ;;  %v9009_v30 = vld [vmem:[#allocation5 + $0x3e0] sm:$0xf0] }
 0x16b   : > { %3915 = vmatmul.bf16.vlgmr.msrb.gmra.mxu3 %v14276_v15  ;;  %v12815_v35 = vld [vmem:[#allocation5 + $0x5dc] sm:$0xf0]  ;;  %v3695_v49 = vpop.f32.mrf.mxu2  ;;  %v3684_v3 = vpop.f32.mrf.mxu1  ;;  %v12871_v31 = vld [vmem:[#allocation5 + $0x7a4] sm:$0xf] }
 0x16c   : > { %3959 = vmatpush.bf16.msra.mxu3 %v10544_v53  ;;  %3934 = vmatpush.bf16.msra.mxu1 %v9456_v60  ;;  %v9775_v36 = vld [vmem:[#allocation5 + $0x9a0] sm:$0xf]  ;;  %v9264_v44 = vor.u32 %v12815_v35, %v9263_v32  ;;  %v3696_v54 = vadd.f32 %v3695_v49, %v3683_v41  ;;  %v3671_v60 = vpop.f32.mrf.mxu0  ;;  %v9457_v49 = vld [vmem:[#allocation5 + $0x760] sm:$0xf0] }
 0x16d   : > { %v12943_v37 = vld [vmem:[#allocation5 + $0x9dc] sm:$0xf0]  ;;  %v3708_v55 = vpop.f32.mrf.mxu3  ;;  %v12839_v60 = vld [vmem:[#allocation5 + $0x6a4] sm:$0xf] }
 0x16e   : > { %3947 = vmatpush.bf16.msra.mxu2 %v9968_v61  ;;  %3922 = vmatpush.bf16.msra.mxu0 %v8880_v11  ;;  %v10287_v39 = vld [vmem:[#allocation5 + $0xda0] sm:$0xf]  ;;  %v9776_v45 = vor.u32 %v12943_v37, %v9775_v36  ;;  %v14325_v59 = vadd.f32 %v3708_v55, %v3696_v54  ;;  %v13127_v37 = vld [vmem:[#allocation5 + $0xfa4] sm:$0xf] }
 0x16f   : > { %v13071_v40 = vld [vmem:[#allocation5 + $0xddc] sm:$0xf0]  ;;  %v10417_v3 = vld [vmem:[#allocation5 + $0xee0] sm:$0xf0] }
 0x170   : > { %3960 = vmatpush.bf16.msra.mxu3 %v10480_v2  ;;  %3935 = vmatpush.bf16.msra.mxu1 %v9392_v13  ;;  %v8687_v46 = vld [vmem:[#allocation5 + $0x120] sm:$0xf]  ;;  %v10288_v50 = vor.u32 %v13071_v40, %v10287_v39  ;;  %v10545_v39 = vld [vmem:[#allocation5 + $0xfe0] sm:$0xf0] }
 0x171   : > { %v12671_v47 = vld [vmem:[#allocation5 + $0x15c] sm:$0xf0] }
 0x172   : > { %3948 = vmatpush.bf16.msra.mxu2 %v9904_v14  ;;  %3923 = vmatpush.bf16.msra.mxu0 %v8816_v26  ;;  %v9199_v48 = vld [vmem:[#allocation5 + $0x520] sm:$0xf]  ;;  %v8688_v58 = vor.u32 %v12671_v47, %v8687_v46  ;;  %v8945_v46 = vld [vmem:[#allocation5 + $0x360] sm:$0xf0] }
 0x173   : > { %v12799_v51 = vld [vmem:[#allocation5 + $0x55c] sm:$0xf0]  ;;  %v3697_v22 = vpop.f32.mrf.mxu2  ;;  %v12855_v47 = vld [vmem:[#allocation5 + $0x724] sm:$0xf] }
 0x174   : > { %3961 = vmatpush.bf16.msra.mxu3 %v10416_v19  ;;  %3936 = vmatpush.bf16.msra.mxu1 %v9328_v28  ;;  %v9711_v52 = vld [vmem:[#allocation5 + $0x920] sm:$0xf]  ;;  %v9200_v61 = vor.u32 %v12799_v51, %v9199_v48  ;;  %v10548_v48 = vor.u32 %v13127_v37, %v10545_v39  ;;  %v9969_v51 = vld [vmem:[#allocation5 + $0xb60] sm:$0xf0]  ;;  %v9460_v55 = vor.u32 %v12855_v47, %v9457_v49 }
 0x175   : > { %v12927_v53 = vld [vmem:[#allocation5 + $0x95c] sm:$0xf0]  ;;  %v3710_v28 = vpop.f32.mrf.mxu3  ;;  %v12919_v49 = vld [vmem:[#allocation5 + $0x924] sm:$0xf] }
 0x176   : > { %3949 = vmatpush.bf16.msra.mxu2 %v9840_v29  ;;  %v10223_v56 = vld [vmem:[#allocation5 + $0xd20] sm:$0xf]  ;;  %3924 = vmatpush.bf16.msra.mxu0 %v8752_v43  ;;  %v9712_v62 = vor.u32 %v12927_v53, %v9711_v52  ;;  %v12743_v29 = vld [vmem:[#allocation5 + $0x3a4] sm:$0xf]  ;;  %v9524_v43 = vor.u32 %v12871_v31, %v9521_v33 }
 0x177   : > { %v13055_v57 = vld [vmem:[#allocation5 + $0xd5c] sm:$0xf0]  ;;  %v9012_v41 = vor.u32 %v12743_v29, %v9009_v30  ;;  %v13111_v52 = vld [vmem:[#allocation5 + $0xf24] sm:$0xf] }
 0x178   : > { %3962 = vmatpush.bf16.msra.mxu3 %v10352_v42  ;;  %3937 = vmatpush.bf16.msra.mxu1 %v9264_v44  ;;  %v8623_v63 = vld [vmem:[#allocation5 + $0xa0] sm:$0xf]  ;;  %v10224_v4 = vor.u32 %v13055_v57, %v10223_v56  ;;  %v10033_v42 = vld [vmem:[#allocation5 + $0xbe0] sm:$0xf0] }
 0x179   : > { %v12655_v1 = vld [vmem:[#allocation5 + $0xdc] sm:$0xf0]  ;;  %v10036_v44 = vor.u32 %v12999_v34, %v10033_v42  ;;  %v10481_v53 = vld [vmem:[#allocation5 + $0xf60] sm:$0xf0] }
 0x17a   : > { %3950 = vmatpush.bf16.msra.mxu2 %v9776_v45  ;;  %v9135_v2 = vld [vmem:[#allocation5 + $0x4a0] sm:$0xf]  ;;  %3925 = vmatpush.bf16.msra.mxu0 %v8688_v58  ;;  %v8624_v13 = vor.u32 %v12655_v1, %v8623_v63  ;;  %v12727_v45 = vld [vmem:[#allocation5 + $0x324] sm:$0xf] }
 0x17b   : > { %v12783_v5 = vld [vmem:[#allocation5 + $0x4dc] sm:$0xf0]  ;;  %v8948_v54 = vor.u32 %v12727_v45, %v8945_v46  ;;  %v12711_v57 = vld [vmem:[#allocation5 + $0x2a4] sm:$0xf] }
 0x17c   : > { %3963 = vmatpush.bf16.msra.mxu3 %v10288_v50  ;;  %v9647_v7 = vld [vmem:[#allocation5 + $0x8a0] sm:$0xf]  ;;  %3938 = vmatpush.bf16.msra.mxu1 %v9200_v61  ;;  %v9136_v17 = vor.u32 %v12783_v5, %v9135_v2  ;;  %v12983_v50 = vld [vmem:[#allocation5 + $0xb24] sm:$0xf]  ;;  %v10484_v61 = vor.u32 %v13111_v52, %v10481_v53 }
 0x17d   : > { %v12911_v10 = vld [vmem:[#allocation5 + $0x8dc] sm:$0xf0]  ;;  %v9972_v56 = vor.u32 %v12983_v50, %v9969_v51  ;;  %v8881_v58 = vld [vmem:[#allocation5 + $0x2e0] sm:$0xf0] }
 0x17e   : > { %v10159_v11 = vld [vmem:[#allocation5 + $0xca0] sm:$0xf]  ;;  %3951 = vmatpush.bf16.msra.mxu2 %v9712_v62  ;;  %v9648_v18 = vor.u32 %v12911_v10, %v9647_v7  ;;  %3926 = vmatpush.bf16.msra.mxu0 %v8624_v13  ;;  %v9393_v62 = vld [vmem:[#allocation5 + $0x6e0] sm:$0xf0] }
 0x17f   : > { %v13039_v12 = vld [vmem:[#allocation5 + $0xcdc] sm:$0xf0]  ;;  %v12967_v63 = vld [vmem:[#allocation5 + $0xaa4] sm:$0xf]  ;;  %v9396_v7 = vor.u32 %v12839_v60, %v9393_v62 }
 0x180   : > { %v8559_v14 = vld [vmem:[#allocation5 + $0x20] sm:$0xf]  ;;  %3964 = vmatpush.bf16.msra.mxu3 %v10224_v4  ;;  %v10160_v23 = vor.u32 %v13039_v12, %v10159_v11  ;;  %3939 = vmatpush.bf16.msra.mxu1 %v9136_v17  ;;  %v9905_v1 = vld [vmem:[#allocation5 + $0xae0] sm:$0xf0]  ;;  %v8884_v4 = vor.u32 %v12711_v57, %v8881_v58 }
 0x181   : > { %v12639_v16 = vld [vmem:[#allocation5 + $0x5c] sm:$0xf0]  ;;  %v13095_v2 = vld [vmem:[#allocation5 + $0xea4] sm:$0xf]  ;;  %v9908_v10 = vor.u32 %v12967_v63, %v9905_v1 }
 0x182   : > { %v9071_v19 = vld [vmem:[#allocation5 + $0x420] sm:$0xf]  ;;  %v8560_v32 = vor.u32 %v12639_v16, %v8559_v14  ;;  %3952 = vmatpush.bf16.msra.mxu2 %v9648_v18  ;;  %v12695_v5 = vld [vmem:[#allocation5 + $0x224] sm:$0xf]  ;;  %v10420_v16 = vor.u32 %v13095_v2, %v10417_v3 }
 0x183   : > { %v12767_v20 = vld [vmem:[#allocation5 + $0x45c] sm:$0xf0]  ;;  %v8817_v11 = vld [vmem:[#allocation5 + $0x260] sm:$0xf0]  ;;  %v3734_v31 = vpop.f32.mrf.mxu1 }
 0x184   : > { %v9583_v21 = vld [vmem:[#allocation5 + $0x820] sm:$0xf]  ;;  %v9072_v35 = vor.u32 %v12767_v20, %v9071_v19  ;;  %3965 = vmatpush.bf16.msra.mxu3 %v10160_v23  ;;  %3927 = vmatpush.bf16.msra.mxu0 %v8560_v32  ;;  %v12823_v12 = vld [vmem:[#allocation5 + $0x624] sm:$0xf]  ;;  %v8820_v22 = vor.u32 %v12695_v5, %v8817_v11  ;;  %v3721_v23 = vpop.f32.mrf.mxu0 }
 0x185   : > { %v12895_v24 = vld [vmem:[#allocation5 + $0x85c] sm:$0xf0]  ;;  %v9329_v17 = vld [vmem:[#allocation5 + $0x660] sm:$0xf0] }
 0x186   : > { %v10095_v26 = vld [vmem:[#allocation5 + $0xc20] sm:$0xf]  ;;  %v9584_v36 = vor.u32 %v12895_v24, %v9583_v21  ;;  %3940 = vmatpush.bf16.msra.mxu1 %v9072_v35  ;;  %v12951_v18 = vld [vmem:[#allocation5 + $0xa24] sm:$0xf]  ;;  %v9332_v24 = vor.u32 %v12823_v12, %v9329_v17 }
 0x187   : > { %v13023_v27 = vld [vmem:[#allocation5 + $0xc5c] sm:$0xf0]  ;;  %3928 = vmatmul.bf16.vlgmr.msra.gmra.mxu0 %v14273_v9  ;;  %v9841_v19 = vld [vmem:[#allocation5 + $0xa60] sm:$0xf0] }
 0x188   : > { %v10096_v40 = vor.u32 %v13023_v27, %v10095_v26  ;;  %3953 = vmatpush.bf16.msra.mxu2 %v9584_v36  ;;  %3972 = vmatpush.bf16.msrb.mxu0 %v9012_v41  ;;  %v14331_v13 = vld [vmem:[#allocation7] sm:$0xff]  ;;  %v9844_v26 = vor.u32 %v12951_v18, %v9841_v19 }
 0x189   : > { %3941 = vmatmul.bf16.vlgmr.msra.gmra.mxu1 %v14282_v25  ;;  %v916_v14 = vperm.slane %v14331_v13, 4  ;;  %v13079_v20 = vld [vmem:[#allocation5 + $0xe24] sm:$0xf] }
 0x18a   : > { %3966 = vmatpush.bf16.msra.mxu3 %v10096_v40  ;;  %3985 = vmatpush.bf16.msrb.mxu1 %v9524_v43  ;;  %v10353_v21 = vld [vmem:[#allocation5 + $0xe60] sm:$0xf0] }
 0x18b   : > { %3954 = vmatmul.bf16.vlgmr.msra.gmra.mxu2 %v14271_v8  ;;  %v12679_v27 = vld [vmem:[#allocation5 + $0x1a4] sm:$0xf]  ;;  %v3722_v30 = vadd.f32 %v3721_v23, %v916_v14  ;;  %v10356_v32 = vor.u32 %v13079_v20, %v10353_v21  ;;  %v3747_v46 = vpop.f32.mrf.mxu2  ;;  %v3736_v1 = vpop.f32.mrf.mxu1 }
 0x18c   : > { %3998 = vmatpush.bf16.msrb.mxu2 %v10036_v44  ;;  %3973 = vmatpush.bf16.msrb.mxu0 %v8948_v54  ;;  %v8753_v28 = vld [vmem:[#allocation5 + $0x1e0] sm:$0xf0]  ;;  %v3723_v57 = vpop.f32.mrf.mxu0  ;;  %v12976_v1 = vld [vmem:[#allocation5 + $0xae4] sm:$0xf0] }
 0x18d   : > { %3967 = vmatmul.bf16.vlgmr.msra.gmra.mxu3 %v14276_v15  ;;  %v12807_v29 = vld [vmem:[#allocation5 + $0x5a4] sm:$0xf]  ;;  %v3735_v37 = vadd.f32 %v3734_v31, %v3722_v30  ;;  %v8756_v39 = vor.u32 %v12679_v27, %v8753_v28  ;;  %v3760_v52 = vpop.f32.mrf.mxu3  ;;  %v9015_v28 = vld [vmem:[#allocation5 + $0x3a8] sm:$0xf] }
 0x18e   : > { %4011 = vmatpush.bf16.msrb.mxu3 %v10548_v48  ;;  %3986 = vmatpush.bf16.msrb.mxu1 %v9460_v55  ;;  %v9265_v33 = vld [vmem:[#allocation5 + $0x5e0] sm:$0xf0]  ;;  %v9527_v30 = vld [vmem:[#allocation5 + $0x7a8] sm:$0xf] }
 0x18f   : > { %v12935_v34 = vld [vmem:[#allocation5 + $0x9a4] sm:$0xf]  ;;  %v9268_v40 = vor.u32 %v12807_v29, %v9265_v33  ;;  %v3748_v51 = vadd.f32 %v3747_v46, %v3735_v37  ;;  %v12752_v29 = vld [vmem:[#allocation5 + $0x3e4] sm:$0xf0] }
 0x190   : > { %3999 = vmatpush.bf16.msrb.mxu2 %v9972_v56  ;;  %3974 = vmatpush.bf16.msrb.mxu0 %v8884_v4  ;;  %v9777_v42 = vld [vmem:[#allocation5 + $0x9e0] sm:$0xf0]  ;;  %v10039_v33 = vld [vmem:[#allocation5 + $0xba8] sm:$0xf] }
 0x191   : > { %v13063_v35 = vld [vmem:[#allocation5 + $0xda4] sm:$0xf]  ;;  %v9780_v41 = vor.u32 %v12935_v34, %v9777_v42  ;;  %v14334_v56 = vadd.f32 %v3760_v52, %v3748_v51  ;;  %v13008_v34 = vld [vmem:[#allocation5 + $0xbe4] sm:$0xf0] }
 0x192   : > { %4012 = vmatpush.bf16.msrb.mxu3 %v10484_v61  ;;  %3987 = vmatpush.bf16.msrb.mxu1 %v9396_v7  ;;  %v10289_v36 = vld [vmem:[#allocation5 + $0xde0] sm:$0xf0]  ;;  %v13136_v37 = vld [vmem:[#allocation5 + $0xfe4] sm:$0xf0] }
 0x193   : > { %v12663_v43 = vld [vmem:[#allocation5 + $0x124] sm:$0xf]  ;;  %v10292_v47 = vor.u32 %v13063_v35, %v10289_v36  ;;  %v3749_v21 = vpop.f32.mrf.mxu2  ;;  %v10551_v36 = vld [vmem:[#allocation5 + $0xfa8] sm:$0xf] }
 0x194   : > { %4000 = vmatpush.bf16.msrb.mxu2 %v9908_v10  ;;  %3975 = vmatpush.bf16.msrb.mxu0 %v8820_v22  ;;  %v8689_v44 = vld [vmem:[#allocation5 + $0x160] sm:$0xf0]  ;;  %v9463_v46 = vld [vmem:[#allocation5 + $0x728] sm:$0xf] }
 0x195   : > { %v12791_v45 = vld [vmem:[#allocation5 + $0x524] sm:$0xf]  ;;  %v8692_v55 = vor.u32 %v12663_v43, %v8689_v44  ;;  %v3762_v27 = vpop.f32.mrf.mxu3  ;;  %v10040_v43 = vor.u32 %v13008_v34, %v10039_v33  ;;  %v8951_v44 = vld [vmem:[#allocation5 + $0x328] sm:$0xf] }
 0x196   : > { %4013 = vmatpush.bf16.msrb.mxu3 %v10420_v16  ;;  %3988 = vmatpush.bf16.msrb.mxu1 %v9332_v24  ;;  %v9201_v48 = vld [vmem:[#allocation5 + $0x560] sm:$0xf0]  ;;  %v10487_v51 = vld [vmem:[#allocation5 + $0xf28] sm:$0xf] }
 0x197   : > { %v9713_v50 = vld [vmem:[#allocation5 + $0x960] sm:$0xf0]  ;;  %v9204_v58 = vor.u32 %v12791_v45, %v9201_v48  ;;  %v12736_v45 = vld [vmem:[#allocation5 + $0x364] sm:$0xf0] }
 0x198   : > { %4001 = vmatpush.bf16.msrb.mxu2 %v9844_v26  ;;  %v13047_v53 = vld [vmem:[#allocation5 + $0xd24] sm:$0xf]  ;;  %3976 = vmatpush.bf16.msrb.mxu0 %v8756_v39  ;;  %v9716_v60 = vor.u32 %v12919_v49, %v9713_v50  ;;  %v12864_v48 = vld [vmem:[#allocation5 + $0x764] sm:$0xf0] }
 0x199   : > { %v10225_v54 = vld [vmem:[#allocation5 + $0xd60] sm:$0xf0]  ;;  %v9975_v49 = vld [vmem:[#allocation5 + $0xb28] sm:$0xf] }
 0x19a   : > { %4014 = vmatpush.bf16.msrb.mxu3 %v10356_v32  ;;  %3989 = vmatpush.bf16.msrb.mxu1 %v9268_v40  ;;  %v12647_v61 = vld [vmem:[#allocation5 + $0xa4] sm:$0xf]  ;;  %v10228_v2 = vor.u32 %v13047_v53, %v10225_v54  ;;  %v12880_v32 = vld [vmem:[#allocation5 + $0x7e4] sm:$0xf0]  ;;  %v9016_v40 = vor.u32 %v12752_v29, %v9015_v28  ;;  %v8952_v53 = vor.u32 %v12736_v45, %v8951_v44 }
 0x19b   : > { %v8625_v62 = vld [vmem:[#allocation5 + $0xe0] sm:$0xf0]  ;;  %v12992_v50 = vld [vmem:[#allocation5 + $0xb64] sm:$0xf0]  ;;  %v9464_v54 = vor.u32 %v12864_v48, %v9463_v46 }
 0x19c   : > { %4002 = vmatpush.bf16.msrb.mxu2 %v9780_v41  ;;  %v12775_v63 = vld [vmem:[#allocation5 + $0x4a4] sm:$0xf]  ;;  %3977 = vmatpush.bf16.msrb.mxu0 %v8692_v55  ;;  %v8628_v11 = vor.u32 %v12647_v61, %v8625_v62  ;;  %v9528_v41 = vor.u32 %v12880_v32, %v9527_v30  ;;  %v13120_v52 = vld [vmem:[#allocation5 + $0xf64] sm:$0xf0]  ;;  %v9976_v55 = vor.u32 %v12992_v50, %v9975_v49 }
 0x19d   : > { %v9137_v3 = vld [vmem:[#allocation5 + $0x4e0] sm:$0xf0]  ;;  %v8887_v57 = vld [vmem:[#allocation5 + $0x2a8] sm:$0xf]  ;;  %v10488_v61 = vor.u32 %v13120_v52, %v10487_v51 }
 0x19e   : > { %4015 = vmatpush.bf16.msrb.mxu3 %v10292_v47  ;;  %v12903_v4 = vld [vmem:[#allocation5 + $0x8a4] sm:$0xf]  ;;  %3990 = vmatpush.bf16.msrb.mxu1 %v9204_v58  ;;  %v9140_v16 = vor.u32 %v12775_v63, %v9137_v3  ;;  %v10552_v47 = vor.u32 %v13136_v37, %v10551_v36  ;;  %v12720_v58 = vld [vmem:[#allocation5 + $0x2e4] sm:$0xf0] }
 0x19f   : > { %v9649_v5 = vld [vmem:[#allocation5 + $0x8e0] sm:$0xf0]  ;;  %v12848_v62 = vld [vmem:[#allocation5 + $0x6e4] sm:$0xf0] }
 0x1a0   : > { %v13031_v7 = vld [vmem:[#allocation5 + $0xca4] sm:$0xf]  ;;  %4003 = vmatpush.bf16.msrb.mxu2 %v9716_v60  ;;  %v9652_v17 = vor.u32 %v12903_v4, %v9649_v5  ;;  %3978 = vmatpush.bf16.msrb.mxu0 %v8628_v11  ;;  %v9399_v60 = vld [vmem:[#allocation5 + $0x6a8] sm:$0xf]  ;;  %v8888_v4 = vor.u32 %v12720_v58, %v8887_v57 }
 0x1a1   : > { %v10161_v10 = vld [vmem:[#allocation5 + $0xce0] sm:$0xf0]  ;;  %v9911_v63 = vld [vmem:[#allocation5 + $0xaa8] sm:$0xf] }
 0x1a2   : > { %v12631_v12 = vld [vmem:[#allocation5 + $0x24] sm:$0xf]  ;;  %4016 = vmatpush.bf16.msrb.mxu3 %v10228_v2  ;;  %v10164_v22 = vor.u32 %v13031_v7, %v10161_v10  ;;  %3991 = vmatpush.bf16.msrb.mxu1 %v9140_v16  ;;  %v10423_v2 = vld [vmem:[#allocation5 + $0xea8] sm:$0xf]  ;;  %v9400_v7 = vor.u32 %v12848_v62, %v9399_v60  ;;  %v9912_v10 = vor.u32 %v12976_v1, %v9911_v63 }
 0x1a3   : > { %v8561_v14 = vld [vmem:[#allocation5 + $0x60] sm:$0xf0]  ;;  %v13104_v3 = vld [vmem:[#allocation5 + $0xee4] sm:$0xf0] }
 0x1a4   : > { %v12759_v18 = vld [vmem:[#allocation5 + $0x424] sm:$0xf]  ;;  %v8564_v31 = vor.u32 %v12631_v12, %v8561_v14  ;;  %4004 = vmatpush.bf16.msrb.mxu2 %v9652_v17  ;;  %v8823_v5 = vld [vmem:[#allocation5 + $0x228] sm:$0xf]  ;;  %v917_v14 = vperm.slane %v14331_v13, 5  ;;  %v10424_v16 = vor.u32 %v13104_v3, %v10423_v2 }
 0x1a5   : > { %v9073_v19 = vld [vmem:[#allocation5 + $0x460] sm:$0xf0]  ;;  %v12704_v11 = vld [vmem:[#allocation5 + $0x264] sm:$0xf0] }
 0x1a6   : > { %v12887_v20 = vld [vmem:[#allocation5 + $0x824] sm:$0xf]  ;;  %v9076_v42 = vor.u32 %v12759_v18, %v9073_v19  ;;  %4017 = vmatpush.bf16.msrb.mxu3 %v10164_v22  ;;  %3979 = vmatpush.bf16.msrb.mxu0 %v8564_v31  ;;  %v9335_v12 = vld [vmem:[#allocation5 + $0x628] sm:$0xf]  ;;  %v8824_v22 = vor.u32 %v12704_v11, %v8823_v5  ;;  %v3786_v31 = vpop.f32.mrf.mxu1 }
 0x1a7   : > { %v9585_v23 = vld [vmem:[#allocation5 + $0x860] sm:$0xf0]  ;;  %v12832_v17 = vld [vmem:[#allocation5 + $0x664] sm:$0xf0] }
 0x1a8   : > { %v13015_v24 = vld [vmem:[#allocation5 + $0xc24] sm:$0xf]  ;;  %v9588_v35 = vor.u32 %v12887_v20, %v9585_v23  ;;  %3992 = vmatpush.bf16.msrb.mxu1 %v9076_v42  ;;  %v9847_v18 = vld [vmem:[#allocation5 + $0xa28] sm:$0xf]  ;;  %v3773_v23 = vpop.f32.mrf.mxu0 }
 0x1a9   : > { %v10097_v26 = vld [vmem:[#allocation5 + $0xc60] sm:$0xf0]  ;;  %3980 = vmatmul.bf16.vlgmr.msrb.gmra.mxu0 %v14273_v9  ;;  %v12960_v19 = vld [vmem:[#allocation5 + $0xa64] sm:$0xf0]  ;;  %v3774_v30 = vadd.f32 %v3773_v23, %v917_v14 }
 0x1aa   : > { %v10100_v39 = vor.u32 %v13015_v24, %v10097_v26  ;;  %4005 = vmatpush.bf16.msrb.mxu2 %v9588_v35  ;;  %4024 = vmatpush.bf16.msra.mxu0 %v9016_v40  ;;  %v10359_v20 = vld [vmem:[#allocation5 + $0xe28] sm:$0xf]  ;;  %v9336_v24 = vor.u32 %v12832_v17, %v9335_v12  ;;  %v9848_v26 = vor.u32 %v12960_v19, %v9847_v18 }
 0x1ab   : > { %3993 = vmatmul.bf16.vlgmr.msrb.gmra.mxu1 %v14282_v25  ;;  %v13088_v21 = vld [vmem:[#allocation5 + $0xe64] sm:$0xf0]  ;;  %v3787_v37 = vadd.f32 %v3786_v31, %v3774_v30  ;;  %v3799_v46 = vpop.f32.mrf.mxu2  ;;  %v9017_v30 = vld [vmem:[#allocation5 + $0x3e8] sm:$0xf0] }
 0x1ac   : > { %4018 = vmatpush.bf16.msrb.mxu3 %v10100_v39  ;;  %4037 = vmatpush.bf16.msra.mxu1 %v9528_v41  ;;  %v8759_v27 = vld [vmem:[#allocation5 + $0x1a8] sm:$0xf]  ;;  %v10360_v32 = vor.u32 %v13088_v21, %v10359_v20  ;;  %v12872_v31 = vld [vmem:[#allocation5 + $0x7ac] sm:$0xf] }
 0x1ad   : > { %4006 = vmatmul.bf16.vlgmr.msrb.gmra.mxu2 %v14271_v8  ;;  %v12688_v28 = vld [vmem:[#allocation5 + $0x1e4] sm:$0xf0]  ;;  %v3800_v51 = vadd.f32 %v3799_v46, %v3787_v37  ;;  %v3812_v52 = vpop.f32.mrf.mxu3  ;;  %v13128_v37 = vld [vmem:[#allocation5 + $0xfac] sm:$0xf] }
 0x1ae   : > { %4050 = vmatpush.bf16.msra.mxu2 %v10040_v43  ;;  %4025 = vmatpush.bf16.msra.mxu0 %v8952_v53  ;;  %v9271_v29 = vld [vmem:[#allocation5 + $0x5a8] sm:$0xf]  ;;  %v8760_v39 = vor.u32 %v12688_v28, %v8759_v27  ;;  %v3788_v2 = vpop.f32.mrf.mxu1  ;;  %v8953_v46 = vld [vmem:[#allocation5 + $0x368] sm:$0xf0] }
 0x1af   : > { %4019 = vmatmul.bf16.vlgmr.msrb.gmra.mxu3 %v14276_v15  ;;  %v12816_v33 = vld [vmem:[#allocation5 + $0x5e4] sm:$0xf0]  ;;  %v14341_v57 = vadd.f32 %v3812_v52, %v3800_v51  ;;  %v9977_v51 = vld [vmem:[#allocation5 + $0xb68] sm:$0xf0] }
 0x1b0   : > { %4063 = vmatpush.bf16.msra.mxu3 %v10552_v47  ;;  %4038 = vmatpush.bf16.msra.mxu1 %v9464_v54  ;;  %v9783_v34 = vld [vmem:[#allocation5 + $0x9a8] sm:$0xf]  ;;  %v9272_v40 = vor.u32 %v12816_v33, %v9271_v29  ;;  %v3775_v58 = vpop.f32.mrf.mxu0  ;;  %v12744_v29 = vld [vmem:[#allocation5 + $0x3ac] sm:$0xf] }
 0x1b1   : > { %v12944_v42 = vld [vmem:[#allocation5 + $0x9e4] sm:$0xf0]  ;;  %v9529_v33 = vld [vmem:[#allocation5 + $0x7e8] sm:$0xf0] }
 0x1b2   : > { %4051 = vmatpush.bf16.msra.mxu2 %v9976_v55  ;;  %4026 = vmatpush.bf16.msra.mxu0 %v8888_v4  ;;  %v10295_v35 = vld [vmem:[#allocation5 + $0xda8] sm:$0xf]  ;;  %v9784_v41 = vor.u32 %v12944_v42, %v9783_v34  ;;  %v13000_v34 = vld [vmem:[#allocation5 + $0xbac] sm:$0xf] }
 0x1b3   : > { %v13072_v36 = vld [vmem:[#allocation5 + $0xde4] sm:$0xf0]  ;;  %v10041_v42 = vld [vmem:[#allocation5 + $0xbe8] sm:$0xf0] }
 0x1b4   : > { %4064 = vmatpush.bf16.msra.mxu3 %v10488_v61  ;;  %4039 = vmatpush.bf16.msra.mxu1 %v9400_v7  ;;  %v8695_v43 = vld [vmem:[#allocation5 + $0x128] sm:$0xf]  ;;  %v10296_v47 = vor.u32 %v13072_v36, %v10295_v35  ;;  %v13112_v52 = vld [vmem:[#allocation5 + $0xf2c] sm:$0xf] }
 0x1b5   : > { %v12672_v44 = vld [vmem:[#allocation5 + $0x164] sm:$0xf0]  ;;  %v3814_v28 = vpop.f32.mrf.mxu3  ;;  %v12968_v2 = vld [vmem:[#allocation5 + $0xaac] sm:$0xf] }
 0x1b6   : > { %4052 = vmatpush.bf16.msra.mxu2 %v9912_v10  ;;  %4027 = vmatpush.bf16.msra.mxu0 %v8824_v22  ;;  %v9207_v45 = vld [vmem:[#allocation5 + $0x528] sm:$0xf]  ;;  %v8696_v55 = vor.u32 %v12672_v44, %v8695_v43  ;;  %v3801_v22 = vpop.f32.mrf.mxu2  ;;  %v9532_v43 = vor.u32 %v12872_v31, %v9529_v33  ;;  %v10044_v44 = vor.u32 %v13000_v34, %v10041_v42  ;;  %v12808_v31 = vld [vmem:[#allocation5 + $0x5ac] sm:$0xf] }
 0x1b7   : > { %v12800_v48 = vld [vmem:[#allocation5 + $0x564] sm:$0xf0]  ;;  %v13080_v22 = vld [vmem:[#allocation5 + $0xe2c] sm:$0xf] }
 0x1b8   : > { %4065 = vmatpush.bf16.msra.mxu3 %v10424_v16  ;;  %4040 = vmatpush.bf16.msra.mxu1 %v9336_v24  ;;  %v9719_v49 = vld [vmem:[#allocation5 + $0x928] sm:$0xf]  ;;  %v9208_v60 = vor.u32 %v12800_v48, %v9207_v45  ;;  %v12728_v45 = vld [vmem:[#allocation5 + $0x32c] sm:$0xf] }
 0x1b9   : > { %v12928_v50 = vld [vmem:[#allocation5 + $0x964] sm:$0xf0]  ;;  %v9273_v42 = vld [vmem:[#allocation5 + $0x5e8] sm:$0xf0] }
 0x1ba   : > { %4053 = vmatpush.bf16.msra.mxu2 %v9848_v26  ;;  %v10231_v53 = vld [vmem:[#allocation5 + $0xd28] sm:$0xf]  ;;  %4028 = vmatpush.bf16.msra.mxu0 %v8760_v39  ;;  %v9720_v61 = vor.u32 %v12928_v50, %v9719_v49  ;;  %v10553_v39 = vld [vmem:[#allocation5 + $0xfe8] sm:$0xf0] }
 0x1bb   : > { %v13056_v54 = vld [vmem:[#allocation5 + $0xd64] sm:$0xf0]  ;;  %v10556_v48 = vor.u32 %v13128_v37, %v10553_v39  ;;  %v9465_v49 = vld [vmem:[#allocation5 + $0x768] sm:$0xf0] }
 0x1bc   : > { %4066 = vmatpush.bf16.msra.mxu3 %v10360_v32  ;;  %4041 = vmatpush.bf16.msra.mxu1 %v9272_v40  ;;  %v8631_v62 = vld [vmem:[#allocation5 + $0xa8] sm:$0xf]  ;;  %v10232_v3 = vor.u32 %v13056_v54, %v10231_v53  ;;  %v12984_v50 = vld [vmem:[#allocation5 + $0xb2c] sm:$0xf]  ;;  %v8956_v54 = vor.u32 %v12728_v45, %v8953_v46 }
 0x1bd   : > { %v12656_v63 = vld [vmem:[#allocation5 + $0xe4] sm:$0xf0]  ;;  %v10489_v53 = vld [vmem:[#allocation5 + $0xf68] sm:$0xf0]  ;;  %v9980_v58 = vor.u32 %v12984_v50, %v9977_v51 }
 0x1be   : > { %4054 = vmatpush.bf16.msra.mxu2 %v9784_v41  ;;  %v9143_v1 = vld [vmem:[#allocation5 + $0x4a8] sm:$0xf]  ;;  %4029 = vmatpush.bf16.msra.mxu0 %v8696_v55  ;;  %v8632_v12 = vor.u32 %v12656_v63, %v8631_v62  ;;  %v9020_v41 = vor.u32 %v12744_v29, %v9017_v30  ;;  %v12840_v62 = vld [vmem:[#allocation5 + $0x6ac] sm:$0xf]  ;;  %v10492_v63 = vor.u32 %v13112_v52, %v10489_v53 }
 0x1bf   : > { %v12784_v4 = vld [vmem:[#allocation5 + $0x4e4] sm:$0xf0]  ;;  %v12680_v29 = vld [vmem:[#allocation5 + $0x1ac] sm:$0xf] }
 0x1c0   : > { %4067 = vmatpush.bf16.msra.mxu3 %v10296_v47  ;;  %v9655_v5 = vld [vmem:[#allocation5 + $0x8a8] sm:$0xf]  ;;  %4042 = vmatpush.bf16.msra.mxu1 %v9208_v60  ;;  %v9144_v17 = vor.u32 %v12784_v4, %v9143_v1  ;;  %v12856_v47 = vld [vmem:[#allocation5 + $0x72c] sm:$0xf] }
 0x1c1   : > { %v12912_v7 = vld [vmem:[#allocation5 + $0x8e4] sm:$0xf0]  ;;  %v9468_v55 = vor.u32 %v12856_v47, %v9465_v49  ;;  %v12712_v60 = vld [vmem:[#allocation5 + $0x2ac] sm:$0xf] }
 0x1c2   : > { %v10167_v10 = vld [vmem:[#allocation5 + $0xca8] sm:$0xf]  ;;  %4055 = vmatpush.bf16.msra.mxu2 %v9720_v61  ;;  %v9656_v18 = vor.u32 %v12912_v7, %v9655_v5  ;;  %4030 = vmatpush.bf16.msra.mxu0 %v8632_v12  ;;  %v8889_v61 = vld [vmem:[#allocation5 + $0x2e8] sm:$0xf0] }
 0x1c3   : > { %v13040_v11 = vld [vmem:[#allocation5 + $0xce4] sm:$0xf0]  ;;  %v9401_v1 = vld [vmem:[#allocation5 + $0x6e8] sm:$0xf0]  ;;  %v8892_v7 = vor.u32 %v12712_v60, %v8889_v61  ;;  %v3838_v33 = vpop.f32.mrf.mxu1 }
 0x1c4   : > { %v8567_v14 = vld [vmem:[#allocation5 + $0x28] sm:$0xf]  ;;  %4068 = vmatpush.bf16.msra.mxu3 %v10232_v3  ;;  %v10168_v23 = vor.u32 %v13040_v11, %v10167_v10  ;;  %4043 = vmatpush.bf16.msra.mxu1 %v9144_v17  ;;  %v9913_v3 = vld [vmem:[#allocation5 + $0xae8] sm:$0xf0]  ;;  %v9404_v11 = vor.u32 %v12840_v62, %v9401_v1  ;;  %v918_v17 = vperm.slane %v14331_v13, 6 }
 0x1c5   : > { %v12640_v16 = vld [vmem:[#allocation5 + $0x64] sm:$0xf0]  ;;  %v13096_v4 = vld [vmem:[#allocation5 + $0xeac] sm:$0xf]  ;;  %v9916_v12 = vor.u32 %v12968_v2, %v9913_v3 }
 0x1c6   : > { %v9079_v19 = vld [vmem:[#allocation5 + $0x428] sm:$0xf]  ;;  %v8568_v32 = vor.u32 %v12640_v16, %v8567_v14  ;;  %4056 = vmatpush.bf16.msra.mxu2 %v9656_v18  ;;  %v10425_v5 = vld [vmem:[#allocation5 + $0xee8] sm:$0xf0] }
 0x1c7   : > { %v12768_v20 = vld [vmem:[#allocation5 + $0x464] sm:$0xf0]  ;;  %v12696_v10 = vld [vmem:[#allocation5 + $0x22c] sm:$0xf]  ;;  %v10428_v18 = vor.u32 %v13096_v4, %v10425_v5 }
 0x1c8   : > { %v9591_v21 = vld [vmem:[#allocation5 + $0x828] sm:$0xf]  ;;  %v9080_v35 = vor.u32 %v12768_v20, %v9079_v19  ;;  %4069 = vmatpush.bf16.msra.mxu3 %v10168_v23  ;;  %4031 = vmatpush.bf16.msra.mxu0 %v8568_v32  ;;  %v8825_v14 = vld [vmem:[#allocation5 + $0x268] sm:$0xf0] }
 0x1c9   : > { %v12896_v24 = vld [vmem:[#allocation5 + $0x864] sm:$0xf0]  ;;  %v12824_v16 = vld [vmem:[#allocation5 + $0x62c] sm:$0xf] }
 0x1ca   : > { %v10103_v26 = vld [vmem:[#allocation5 + $0xc28] sm:$0xf]  ;;  %v9592_v36 = vor.u32 %v12896_v24, %v9591_v21  ;;  %4044 = vmatpush.bf16.msra.mxu1 %v9080_v35  ;;  %v9337_v19 = vld [vmem:[#allocation5 + $0x668] sm:$0xf0]  ;;  %v8828_v24 = vor.u32 %v12696_v10, %v8825_v14 }
 0x1cb   : > { %v13024_v27 = vld [vmem:[#allocation5 + $0xc64] sm:$0xf0]  ;;  %4032 = vmatmul.bf16.vlgmr.msra.gmra.mxu0 %v14273_v9  ;;  %v12952_v20 = vld [vmem:[#allocation5 + $0xa2c] sm:$0xf]  ;;  %v3840_v5 = vpop.f32.mrf.mxu1 }
 0x1cc   : > { %v10104_v40 = vor.u32 %v13024_v27, %v10103_v26  ;;  %4057 = vmatpush.bf16.msra.mxu2 %v9592_v36  ;;  %4076 = vmatpush.bf16.msrb.mxu0 %v9020_v41  ;;  %v9849_v21 = vld [vmem:[#allocation5 + $0xa68] sm:$0xf0]  ;;  %v3825_v26 = vpop.f32.mrf.mxu0  ;;  %v9340_v27 = vor.u32 %v12824_v16, %v9337_v19  ;;  %v12849_v5 = vld [vmem:[#allocation5 + $0x6ec] sm:$0xf0] }
 0x1cd   : > { %4045 = vmatmul.bf16.vlgmr.msra.gmra.mxu1 %v14282_v25  ;;  %v10361_v23 = vld [vmem:[#allocation5 + $0xe68] sm:$0xf0]  ;;  %v9852_v28 = vor.u32 %v12952_v20, %v9849_v21  ;;  %v3826_v32 = vadd.f32 %v3825_v26, %v918_v17 }
 0x1ce   : > { %4070 = vmatpush.bf16.msra.mxu3 %v10104_v40  ;;  %4089 = vmatpush.bf16.msrb.mxu1 %v9532_v43  ;;  %v8761_v30 = vld [vmem:[#allocation5 + $0x1e8] sm:$0xf0]  ;;  %v10364_v34 = vor.u32 %v13080_v22, %v10361_v23  ;;  %v9276_v43 = vor.u32 %v12808_v31, %v9273_v42 }
 0x1cf   : > { %4058 = vmatmul.bf16.vlgmr.msra.gmra.mxu2 %v14271_v8  ;;  %v12936_v35 = vld [vmem:[#allocation5 + $0x9ac] sm:$0xf]  ;;  %v3839_v40 = vadd.f32 %v3838_v33, %v3826_v32  ;;  %v8764_v41 = vor.u32 %v12680_v29, %v8761_v30  ;;  %v9023_v32 = vld [vmem:[#allocation5 + $0x3b0] sm:$0xf] }
 0x1d0   : > { %4102 = vmatpush.bf16.msrb.mxu2 %v10044_v44  ;;  %4077 = vmatpush.bf16.msrb.mxu0 %v8956_v54  ;;  %v9785_v36 = vld [vmem:[#allocation5 + $0x9e8] sm:$0xf0]  ;;  %v3864_v54 = vpop.f32.mrf.mxu3  ;;  %v12753_v33 = vld [vmem:[#allocation5 + $0x3ec] sm:$0xf0] }
 0x1d1   : > { %4071 = vmatmul.bf16.vlgmr.msra.gmra.mxu3 %v14276_v15  ;;  %v13064_v37 = vld [vmem:[#allocation5 + $0xdac] sm:$0xf]  ;;  %v9788_v44 = vor.u32 %v12936_v35, %v9785_v36  ;;  %v12881_v35 = vld [vmem:[#allocation5 + $0x7ec] sm:$0xf0] }
 0x1d2   : > { %4115 = vmatpush.bf16.msrb.mxu3 %v10556_v48  ;;  %4090 = vmatpush.bf16.msrb.mxu1 %v9468_v55  ;;  %v10297_v39 = vld [vmem:[#allocation5 + $0xde8] sm:$0xf0]  ;;  %v3851_v48 = vpop.f32.mrf.mxu2  ;;  %v10047_v36 = vld [vmem:[#allocation5 + $0xbb0] sm:$0xf] }
 0x1d3   : > { %v12664_v45 = vld [vmem:[#allocation5 + $0x12c] sm:$0xf]  ;;  %v10300_v49 = vor.u32 %v13064_v37, %v10297_v39  ;;  %v3852_v53 = vadd.f32 %v3851_v48, %v3839_v40  ;;  %v13009_v37 = vld [vmem:[#allocation5 + $0xbec] sm:$0xf0] }
 0x1d4   : > { %4103 = vmatpush.bf16.msrb.mxu2 %v9980_v58  ;;  %4078 = vmatpush.bf16.msrb.mxu0 %v8892_v7  ;;  %v8697_v46 = vld [vmem:[#allocation5 + $0x168] sm:$0xf0]  ;;  %v3827_v62 = vpop.f32.mrf.mxu0  ;;  %v8959_v48 = vld [vmem:[#allocation5 + $0x330] sm:$0xf] }
 0x1d5   : > { %v12792_v47 = vld [vmem:[#allocation5 + $0x52c] sm:$0xf]  ;;  %v8700_v60 = vor.u32 %v12664_v45, %v8697_v46  ;;  %v14348_v61 = vadd.f32 %v3864_v54, %v3852_v53  ;;  %v9024_v45 = vor.u32 %v12753_v33, %v9023_v32  ;;  %v9983_v53 = vld [vmem:[#allocation5 + $0xb30] sm:$0xf] }
 0x1d6   : > { %4116 = vmatpush.bf16.msrb.mxu3 %v10492_v63  ;;  %4091 = vmatpush.bf16.msrb.mxu1 %v9404_v11  ;;  %v9209_v50 = vld [vmem:[#allocation5 + $0x568] sm:$0xf0]  ;;  %v12993_v54 = vld [vmem:[#allocation5 + $0xb6c] sm:$0xf0] }
 0x1d7   : > { %v12920_v51 = vld [vmem:[#allocation5 + $0x92c] sm:$0xf]  ;;  %v9212_v63 = vor.u32 %v12792_v47, %v9209_v50  ;;  %v10048_v47 = vor.u32 %v13009_v37, %v10047_v36  ;;  %v9471_v50 = vld [vmem:[#allocation5 + $0x730] sm:$0xf] }
 0x1d8   : > { %4104 = vmatpush.bf16.msrb.mxu2 %v9916_v12  ;;  %4079 = vmatpush.bf16.msrb.mxu0 %v8828_v24  ;;  %v9721_v52 = vld [vmem:[#allocation5 + $0x968] sm:$0xf0]  ;;  %v3866_v31 = vpop.f32.mrf.mxu3  ;;  %v8767_v33 = vld [vmem:[#allocation5 + $0x1b0] sm:$0xf] }
 0x1d9   : > { %v13048_v55 = vld [vmem:[#allocation5 + $0xd2c] sm:$0xf]  ;;  %v9724_v1 = vor.u32 %v12920_v51, %v9721_v52  ;;  %v12865_v52 = vld [vmem:[#allocation5 + $0x76c] sm:$0xf0] }
 0x1da   : > { %4117 = vmatpush.bf16.msrb.mxu3 %v10428_v18  ;;  %4092 = vmatpush.bf16.msrb.mxu1 %v9340_v27  ;;  %v10233_v58 = vld [vmem:[#allocation5 + $0xd68] sm:$0xf0]  ;;  %v3853_v26 = vpop.f32.mrf.mxu2  ;;  %v9472_v62 = vor.u32 %v12865_v52, %v9471_v50  ;;  %v12817_v37 = vld [vmem:[#allocation5 + $0x5ec] sm:$0xf0] }
 0x1db   : > { %v12648_v2 = vld [vmem:[#allocation5 + $0xac] sm:$0xf]  ;;  %v10236_v7 = vor.u32 %v13048_v55, %v10233_v58  ;;  %v10495_v55 = vld [vmem:[#allocation5 + $0xf30] sm:$0xf] }
 0x1dc   : > { %4105 = vmatpush.bf16.msrb.mxu2 %v9852_v28  ;;  %4080 = vmatpush.bf16.msrb.mxu0 %v8764_v41  ;;  %v8633_v3 = vld [vmem:[#allocation5 + $0xe8] sm:$0xf0]  ;;  %v10559_v41 = vld [vmem:[#allocation5 + $0xfb0] sm:$0xf] }
 0x1dd   : > { %v12776_v4 = vld [vmem:[#allocation5 + $0x4ac] sm:$0xf]  ;;  %v8636_v17 = vor.u32 %v12648_v2, %v8633_v3  ;;  %v13121_v58 = vld [vmem:[#allocation5 + $0xf6c] sm:$0xf0] }
 0x1de   : > { %4118 = vmatpush.bf16.msrb.mxu3 %v10364_v34  ;;  %4093 = vmatpush.bf16.msrb.mxu1 %v9276_v43  ;;  %v9145_v10 = vld [vmem:[#allocation5 + $0x4e8] sm:$0xf0]  ;;  %v9535_v34 = vld [vmem:[#allocation5 + $0x7b0] sm:$0xf] }
 0x1df   : > { %v12904_v11 = vld [vmem:[#allocation5 + $0x8ac] sm:$0xf]  ;;  %v9148_v20 = vor.u32 %v12776_v4, %v9145_v10  ;;  %v13137_v43 = vld [vmem:[#allocation5 + $0xfec] sm:$0xf0]  ;;  %v9536_v46 = vor.u32 %v12881_v35, %v9535_v34  ;;  %v10496_v4 = vor.u32 %v13121_v58, %v10495_v55 }
 0x1e0   : > { %4106 = vmatpush.bf16.msrb.mxu2 %v9788_v44  ;;  %v9657_v12 = vld [vmem:[#allocation5 + $0x8e8] sm:$0xf0]  ;;  %4081 = vmatpush.bf16.msrb.mxu0 %v8700_v60  ;;  %v10560_v51 = vor.u32 %v13137_v43, %v10559_v41  ;;  %v12721_v2 = vld [vmem:[#allocation5 + $0x2ec] sm:$0xf0] }
 0x1e1   : > { %v13032_v14 = vld [vmem:[#allocation5 + $0xcac] sm:$0xf]  ;;  %v9660_v21 = vor.u32 %v12904_v11, %v9657_v12  ;;  %v9407_v3 = vld [vmem:[#allocation5 + $0x6b0] sm:$0xf] }
 0x1e2   : > { %4119 = vmatpush.bf16.msrb.mxu3 %v10300_v49  ;;  %v10169_v16 = vld [vmem:[#allocation5 + $0xce8] sm:$0xf0]  ;;  %4094 = vmatpush.bf16.msrb.mxu1 %v9212_v63  ;;  %v12737_v49 = vld [vmem:[#allocation5 + $0x36c] sm:$0xf0]  ;;  %v9984_v63 = vor.u32 %v12993_v54, %v9983_v53 }
 0x1e3   : > { %v12632_v18 = vld [vmem:[#allocation5 + $0x2c] sm:$0xf]  ;;  %v10172_v27 = vor.u32 %v13032_v14, %v10169_v16  ;;  %v8960_v60 = vor.u32 %v12737_v49, %v8959_v48  ;;  %v12977_v10 = vld [vmem:[#allocation5 + $0xaec] sm:$0xf0] }
 0x1e4   : > { %v8569_v19 = vld [vmem:[#allocation5 + $0x68] sm:$0xf0]  ;;  %4107 = vmatpush.bf16.msrb.mxu2 %v9724_v1  ;;  %4082 = vmatpush.bf16.msrb.mxu0 %v8636_v17  ;;  %v8895_v1 = vld [vmem:[#allocation5 + $0x2b0] sm:$0xf]  ;;  %v9408_v17 = vor.u32 %v12849_v5, %v9407_v3  ;;  %v3890_v36 = vpop.f32.mrf.mxu1 }
 0x1e5   : > { %v12760_v22 = vld [vmem:[#allocation5 + $0x42c] sm:$0xf]  ;;  %v8572_v42 = vor.u32 %v12632_v18, %v8569_v19  ;;  %v10431_v11 = vld [vmem:[#allocation5 + $0xeb0] sm:$0xf]  ;;  %v8896_v14 = vor.u32 %v12721_v2, %v8895_v1 }
 0x1e6   : > { %v9081_v23 = vld [vmem:[#allocation5 + $0x468] sm:$0xf0]  ;;  %4120 = vmatpush.bf16.msrb.mxu3 %v10236_v7  ;;  %4095 = vmatpush.bf16.msrb.mxu1 %v9148_v20  ;;  %v9919_v7 = vld [vmem:[#allocation5 + $0xab0] sm:$0xf] }
 0x1e7   : > { %v12888_v24 = vld [vmem:[#allocation5 + $0x82c] sm:$0xf]  ;;  %v9084_v39 = vor.u32 %v12760_v22, %v9081_v23  ;;  %v13105_v12 = vld [vmem:[#allocation5 + $0xeec] sm:$0xf0]  ;;  %v9920_v18 = vor.u32 %v12977_v10, %v9919_v7 }
 0x1e8   : > { %v9593_v28 = vld [vmem:[#allocation5 + $0x868] sm:$0xf0]  ;;  %4108 = vmatpush.bf16.msrb.mxu2 %v9660_v21  ;;  %4083 = vmatpush.bf16.msrb.mxu0 %v8572_v42  ;;  %v8831_v16 = vld [vmem:[#allocation5 + $0x230] sm:$0xf]  ;;  %v919_v21 = vperm.slane %v14331_v13, 7  ;;  %v10432_v22 = vor.u32 %v13105_v12, %v10431_v11 }
 0x1e9   : > { %v13016_v29 = vld [vmem:[#allocation5 + $0xc2c] sm:$0xf]  ;;  %v9596_v40 = vor.u32 %v12888_v24, %v9593_v28  ;;  %v12705_v19 = vld [vmem:[#allocation5 + $0x26c] sm:$0xf0] }
 0x1ea   : > { %v10105_v30 = vld [vmem:[#allocation5 + $0xc68] sm:$0xf0]  ;;  %4121 = vmatpush.bf16.msrb.mxu3 %v10172_v27  ;;  %4096 = vmatpush.bf16.msrb.mxu1 %v9084_v39  ;;  %v9343_v20 = vld [vmem:[#allocation5 + $0x630] sm:$0xf] }
 0x1eb   : > { %v10108_v44 = vor.u32 %v13016_v29, %v10105_v30  ;;  %4084 = vmatmul.bf16.vlgmr.msrb.gmra.mxu0 %v14273_v9  ;;  %v12833_v23 = vld [vmem:[#allocation5 + $0x66c] sm:$0xf0]  ;;  %v8832_v29 = vor.u32 %v12705_v19, %v8831_v16  ;;  %v3877_v30 = vpop.f32.mrf.mxu0 }
 0x1ec   : > { %4109 = vmatpush.bf16.msrb.mxu2 %v9596_v40  ;;  %4128 = vmatpush.bf16.msra.mxu0 %v9024_v45  ;;  %v9855_v24 = vld [vmem:[#allocation5 + $0xa30] sm:$0xf]  ;;  %v9344_v31 = vor.u32 %v12833_v23, %v9343_v20  ;;  %v3878_v35 = vadd.f32 %v3877_v30, %v919_v21  ;;  %v3892_v12 = vpop.f32.mrf.mxu1 }
 0x1ed   : > { %4097 = vmatmul.bf16.vlgmr.msrb.gmra.mxu1 %v14282_v25  ;;  %v12961_v26 = vld [vmem:[#allocation5 + $0xa6c] sm:$0xf0] }
 0x1ee   : > { %4122 = vmatpush.bf16.msrb.mxu3 %v10108_v44  ;;  %4141 = vmatpush.bf16.msra.mxu1 %v9536_v46  ;;  %v10367_v27 = vld [vmem:[#allocation5 + $0xe30] sm:$0xf]  ;;  %v9856_v32 = vor.u32 %v12961_v26, %v9855_v24  ;;  %v3891_v44 = vadd.f32 %v3890_v36, %v3878_v35  ;;  %v12745_v35 = vld [vmem:[#allocation5 + $0x3b4] sm:$0xf] }
 0x1ef   : > { %4110 = vmatmul.bf16.vlgmr.msrb.gmra.mxu2 %v14271_v8  ;;  %v13089_v28 = vld [vmem:[#allocation5 + $0xe6c] sm:$0xf0]  ;;  %v9025_v36 = vld [vmem:[#allocation5 + $0x3f0] sm:$0xf0] }
 0x1f0   : > { %4154 = vmatpush.bf16.msra.mxu2 %v10048_v47  ;;  %4129 = vmatpush.bf16.msra.mxu0 %v8960_v60  ;;  %v12689_v34 = vld [vmem:[#allocation5 + $0x1ec] sm:$0xf0]  ;;  %v10368_v13 = vor.u32 %v13089_v28, %v10367_v27  ;;  %v3916_v60 = vpop.f32.mrf.mxu3 }
 0x1f1   : > { %4123 = vmatmul.bf16.vlgmr.msrb.gmra.mxu3 %v14276_v15  ;;  %v9279_v42 = vld [vmem:[#allocation5 + $0x5b0] sm:$0xf]  ;;  %v8768_v45 = vor.u32 %v12689_v34, %v8767_v33 }
 0x1f2   : > { %4167 = vmatpush.bf16.msra.mxu3 %v10560_v51  ;;  %4142 = vmatpush.bf16.msra.mxu1 %v9472_v62  ;;  %v9791_v39 = vld [vmem:[#allocation5 + $0x9b0] sm:$0xf]  ;;  %v9280_v46 = vor.u32 %v12817_v37, %v9279_v42  ;;  %v3903_v51 = vpop.f32.mrf.mxu2 }
 0x1f3   : > { %v12945_v40 = vld [vmem:[#allocation5 + $0x9ec] sm:$0xf0]  ;;  %v3904_v58 = vadd.f32 %v3903_v51, %v3891_v44  ;;  %v3879_v3 = vpop.f32.mrf.mxu0  ;;  %v12729_v51 = vld [vmem:[#allocation5 + $0x334] sm:$0xf] }
 0x1f4   : > { %4155 = vmatpush.bf16.msra.mxu2 %v9984_v63  ;;  %4130 = vmatpush.bf16.msra.mxu0 %v8896_v14  ;;  %v10303_v41 = vld [vmem:[#allocation5 + $0xdb0] sm:$0xf]  ;;  %v9792_v47 = vor.u32 %v12945_v40, %v9791_v39  ;;  %v9537_v39 = vld [vmem:[#allocation5 + $0x7f0] sm:$0xf0] }
 0x1f5   : > { %v13073_v43 = vld [vmem:[#allocation5 + $0xdec] sm:$0xf0]  ;;  %v14355_v2 = vadd.f32 %v3916_v60, %v3904_v58  ;;  %v13001_v40 = vld [vmem:[#allocation5 + $0xbb4] sm:$0xf] }
 0x1f6   : > { %4168 = vmatpush.bf16.msra.mxu3 %v10496_v4  ;;  %4143 = vmatpush.bf16.msra.mxu1 %v9408_v17  ;;  %v8703_v48 = vld [vmem:[#allocation5 + $0x130] sm:$0xf]  ;;  %v10304_v52 = vor.u32 %v13073_v43, %v10303_v41  ;;  %v10049_v41 = vld [vmem:[#allocation5 + $0xbf0] sm:$0xf0] }
 0x1f7   : > { %v12673_v49 = vld [vmem:[#allocation5 + $0x16c] sm:$0xf0]  ;;  %v12985_v58 = vld [vmem:[#allocation5 + $0xb34] sm:$0xf] }
 0x1f8   : > { %4156 = vmatpush.bf16.msra.mxu2 %v9920_v18  ;;  %4131 = vmatpush.bf16.msra.mxu0 %v8832_v29  ;;  %v9215_v50 = vld [vmem:[#allocation5 + $0x530] sm:$0xf]  ;;  %v8704_v1 = vor.u32 %v12673_v49, %v8703_v48  ;;  %v3918_v42 = vpop.f32.mrf.mxu3  ;;  %v9028_v48 = vor.u32 %v12745_v35, %v9025_v36  ;;  %v9985_v60 = vld [vmem:[#allocation5 + $0xb70] sm:$0xf0] }
 0x1f9   : > { %v12801_v53 = vld [vmem:[#allocation5 + $0x56c] sm:$0xf0]  ;;  %v12713_v3 = vld [vmem:[#allocation5 + $0x2b4] sm:$0xf] }
 0x1fa   : > { %4169 = vmatpush.bf16.msra.mxu3 %v10432_v22  ;;  %4144 = vmatpush.bf16.msra.mxu1 %v9344_v31  ;;  %v9727_v54 = vld [vmem:[#allocation5 + $0x930] sm:$0xf]  ;;  %v9216_v4 = vor.u32 %v12801_v53, %v9215_v50  ;;  %v3905_v30 = vpop.f32.mrf.mxu2  ;;  %v10052_v50 = vor.u32 %v13001_v40, %v10049_v41  ;;  %v12857_v53 = vld [vmem:[#allocation5 + $0x734] sm:$0xf] }
 0x1fb   : > { %v12929_v55 = vld [vmem:[#allocation5 + $0x96c] sm:$0xf0]  ;;  %v12953_v30 = vld [vmem:[#allocation5 + $0xa34] sm:$0xf] }
 0x1fc   : > { %4157 = vmatpush.bf16.msra.mxu2 %v9856_v32  ;;  %v10239_v62 = vld [vmem:[#allocation5 + $0xd30] sm:$0xf]  ;;  %4132 = vmatpush.bf16.msra.mxu0 %v8768_v45  ;;  %v9728_v5 = vor.u32 %v12929_v55, %v9727_v54  ;;  %v13129_v45 = vld [vmem:[#allocation5 + $0xfb4] sm:$0xf] }
 0x1fd   : > { %v13057_v63 = vld [vmem:[#allocation5 + $0xd6c] sm:$0xf0]  ;;  %v9473_v55 = vld [vmem:[#allocation5 + $0x770] sm:$0xf0] }
 0x1fe   : > { %4170 = vmatpush.bf16.msra.mxu3 %v10368_v13  ;;  %4145 = vmatpush.bf16.msra.mxu1 %v9280_v46  ;;  %v8639_v7 = vld [vmem:[#allocation5 + $0xb0] sm:$0xf]  ;;  %v10240_v14 = vor.u32 %v13057_v63, %v10239_v62  ;;  %v12873_v13 = vld [vmem:[#allocation5 + $0x7b4] sm:$0xf] }
 0x1ff   : > { %v12657_v10 = vld [vmem:[#allocation5 + $0xec] sm:$0xf0]  ;;  %v10561_v46 = vld [vmem:[#allocation5 + $0xff0] sm:$0xf0]  ;;  %v9540_v49 = vor.u32 %v12873_v13, %v9537_v39 }
 0x200   : > { %4158 = vmatpush.bf16.msra.mxu2 %v9792_v47  ;;  %v9151_v11 = vld [vmem:[#allocation5 + $0x4b0] sm:$0xf]  ;;  %4133 = vmatpush.bf16.msra.mxu0 %v8704_v1  ;;  %v8640_v21 = vor.u32 %v12657_v10, %v8639_v7  ;;  %v10564_v54 = vor.u32 %v13129_v45, %v10561_v46  ;;  %v13113_v62 = vld [vmem:[#allocation5 + $0xf34] sm:$0xf] }
 0x201   : > { %v12785_v16 = vld [vmem:[#allocation5 + $0x4ec] sm:$0xf0]  ;;  %v10497_v63 = vld [vmem:[#allocation5 + $0xf70] sm:$0xf0] }
 0x202   : > { %4171 = vmatpush.bf16.msra.mxu3 %v10304_v52  ;;  %v9663_v17 = vld [vmem:[#allocation5 + $0x8b0] sm:$0xf]  ;;  %4146 = vmatpush.bf16.msra.mxu1 %v9216_v4  ;;  %v9152_v24 = vor.u32 %v12785_v16, %v9151_v11  ;;  %v8961_v52 = vld [vmem:[#allocation5 + $0x370] sm:$0xf0]  ;;  %v9476_v4 = vor.u32 %v12857_v53, %v9473_v55  ;;  %v10500_v12 = vor.u32 %v13113_v62, %v10497_v63 }
 0x203   : > { %v12913_v18 = vld [vmem:[#allocation5 + $0x8ec] sm:$0xf0]  ;;  %v8964_v1 = vor.u32 %v12729_v51, %v8961_v52  ;;  %v8897_v7 = vld [vmem:[#allocation5 + $0x2f0] sm:$0xf0] }
 0x204   : > { %v10175_v19 = vld [vmem:[#allocation5 + $0xcb0] sm:$0xf]  ;;  %4159 = vmatpush.bf16.msra.mxu2 %v9728_v5  ;;  %v9664_v26 = vor.u32 %v12913_v18, %v9663_v17  ;;  %4134 = vmatpush.bf16.msra.mxu0 %v8640_v21  ;;  %v9988_v5 = vor.u32 %v12985_v58, %v9985_v60  ;;  %v12841_v10 = vld [vmem:[#allocation5 + $0x6b4] sm:$0xf]  ;;  %v14358_v17 = vld [vmem:[#allocation7 + $0x8] sm:$0xff]  ;;  %v3929_v42 = vpop.f32.mrf.mxu0 }
 0x205   : > { %v13041_v20 = vld [vmem:[#allocation5 + $0xcec] sm:$0xf0]  ;;  %v9409_v11 = vld [vmem:[#allocation5 + $0x6f0] sm:$0xf0] }
 0x206   : > { %v8575_v22 = vld [vmem:[#allocation5 + $0x30] sm:$0xf]  ;;  %4172 = vmatpush.bf16.msra.mxu3 %v10240_v14  ;;  %v10176_v31 = vor.u32 %v13041_v20, %v10175_v19  ;;  %4147 = vmatpush.bf16.msra.mxu1 %v9152_v24  ;;  %v12969_v14 = vld [vmem:[#allocation5 + $0xab4] sm:$0xf]  ;;  %v8900_v20 = vor.u32 %v12713_v3, %v8897_v7  ;;  %v3942_v41 = vpop.f32.mrf.mxu1 }
 0x207   : > { %v12641_v23 = vld [vmem:[#allocation5 + $0x6c] sm:$0xf0]  ;;  %v9921_v16 = vld [vmem:[#allocation5 + $0xaf0] sm:$0xf0] }
 0x208   : > { %v9087_v27 = vld [vmem:[#allocation5 + $0x430] sm:$0xf]  ;;  %v8576_v37 = vor.u32 %v12641_v23, %v8575_v22  ;;  %4160 = vmatpush.bf16.msra.mxu2 %v9664_v26  ;;  %v13097_v18 = vld [vmem:[#allocation5 + $0xeb4] sm:$0xf]  ;;  %v9412_v22 = vor.u32 %v12841_v10, %v9409_v11  ;;  %v9924_v23 = vor.u32 %v12969_v14, %v9921_v16 }
 0x209   : > { %v12769_v28 = vld [vmem:[#allocation5 + $0x46c] sm:$0xf0]  ;;  %v10433_v19 = vld [vmem:[#allocation5 + $0xef0] sm:$0xf0] }
 0x20a   : > { %v9599_v29 = vld [vmem:[#allocation5 + $0x830] sm:$0xf]  ;;  %v9088_v43 = vor.u32 %v12769_v28, %v9087_v27  ;;  %4173 = vmatpush.bf16.msra.mxu3 %v10176_v31  ;;  %4135 = vmatpush.bf16.msra.mxu0 %v8576_v37  ;;  %v12697_v21 = vld [vmem:[#allocation5 + $0x234] sm:$0xf]  ;;  %v920_v27 = vperm.slane %v14358_v17, 0  ;;  %v10436_v28 = vor.u32 %v13097_v18, %v10433_v19 }
 0x20b   : > { %v12897_v32 = vld [vmem:[#allocation5 + $0x86c] sm:$0xf0]  ;;  %v8833_v24 = vld [vmem:[#allocation5 + $0x270] sm:$0xf0] }
 0x20c   : > { %v10111_v33 = vld [vmem:[#allocation5 + $0xc30] sm:$0xf]  ;;  %v9600_v44 = vor.u32 %v12897_v32, %v9599_v29  ;;  %4148 = vmatpush.bf16.msra.mxu1 %v9088_v43  ;;  %v12825_v26 = vld [vmem:[#allocation5 + $0x634] sm:$0xf]  ;;  %v3930_v40 = vadd.f32 %v3929_v42, %v920_v27 }
 0x20d   : > { %v13025_v34 = vld [vmem:[#allocation5 + $0xc6c] sm:$0xf0]  ;;  %4136 = vmatmul.bf16.vlgmr.msra.gmra.mxu0 %v14273_v9  ;;  %v9345_v29 = vld [vmem:[#allocation5 + $0x670] sm:$0xf0] }
 0x20e   : > { %v10112_v47 = vor.u32 %v13025_v34, %v10111_v33  ;;  %4161 = vmatpush.bf16.msra.mxu2 %v9600_v44  ;;  %4180 = vmatpush.bf16.msrb.mxu0 %v9028_v48  ;;  %v9857_v31 = vld [vmem:[#allocation5 + $0xa70] sm:$0xf0]  ;;  %v8836_v34 = vor.u32 %v12697_v21, %v8833_v24  ;;  %v9348_v35 = vor.u32 %v12825_v26, %v9345_v29  ;;  %v3955_v58 = vpop.f32.mrf.mxu2  ;;  %v3944_v21 = vpop.f32.mrf.mxu1 }
 0x20f   : > { %4149 = vmatmul.bf16.vlgmr.msra.gmra.mxu1 %v14282_v25  ;;  %v13081_v32 = vld [vmem:[#allocation5 + $0xe34] sm:$0xf]  ;;  %v9860_v36 = vor.u32 %v12953_v30, %v9857_v31  ;;  %v9415_v21 = vld [vmem:[#allocation5 + $0x6b8] sm:$0xf] }
 0x210   : > { %4174 = vmatpush.bf16.msra.mxu3 %v10112_v47  ;;  %4193 = vmatpush.bf16.msrb.mxu1 %v9540_v49  ;;  %v10369_v33 = vld [vmem:[#allocation5 + $0xe70] sm:$0xf0]  ;;  %v3943_v49 = vadd.f32 %v3942_v41, %v3930_v40 }
 0x211   : > { %4162 = vmatmul.bf16.vlgmr.msra.gmra.mxu2 %v14271_v8  ;;  %v12681_v13 = vld [vmem:[#allocation5 + $0x1b4] sm:$0xf]  ;;  %v10372_v43 = vor.u32 %v13081_v32, %v10369_v33 }
 0x212   : > { %4206 = vmatpush.bf16.msrb.mxu2 %v10052_v50  ;;  %4181 = vmatpush.bf16.msrb.mxu0 %v8964_v1  ;;  %v8769_v37 = vld [vmem:[#allocation5 + $0x1f0] sm:$0xf0]  ;;  %v3956_v3 = vadd.f32 %v3955_v58, %v3943_v49  ;;  %v13010_v49 = vld [vmem:[#allocation5 + $0xbf4] sm:$0xf0] }
 0x213   : > { %4175 = vmatmul.bf16.vlgmr.msra.gmra.mxu3 %v14276_v15  ;;  %v12809_v39 = vld [vmem:[#allocation5 + $0x5b4] sm:$0xf]  ;;  %v8772_v50 = vor.u32 %v12681_v13, %v8769_v37 }
 0x214   : > { %4219 = vmatpush.bf16.msrb.mxu3 %v10564_v54  ;;  %4194 = vmatpush.bf16.msrb.mxu1 %v9476_v4  ;;  %v9281_v44 = vld [vmem:[#allocation5 + $0x5f0] sm:$0xf0]  ;;  %v3968_v4 = vpop.f32.mrf.mxu3 }
 0x215   : > { %v12937_v45 = vld [vmem:[#allocation5 + $0x9b4] sm:$0xf]  ;;  %v9284_v51 = vor.u32 %v12809_v39, %v9281_v44  ;;  %v14364_v11 = vadd.f32 %v3968_v4, %v3956_v3  ;;  %v12754_v44 = vld [vmem:[#allocation5 + $0x3f4] sm:$0xf0] }
 0x216   : > { %4207 = vmatpush.bf16.msrb.mxu2 %v9988_v5  ;;  %4182 = vmatpush.bf16.msrb.mxu0 %v8900_v20  ;;  %v9793_v46 = vld [vmem:[#allocation5 + $0x9f0] sm:$0xf0]  ;;  %v12866_v4 = vld [vmem:[#allocation5 + $0x774] sm:$0xf0] }
 0x217   : > { %v13065_v47 = vld [vmem:[#allocation5 + $0xdb4] sm:$0xf]  ;;  %v9796_v52 = vor.u32 %v12937_v45, %v9793_v46  ;;  %v9543_v45 = vld [vmem:[#allocation5 + $0x7b8] sm:$0xf] }
 0x218   : > { %4220 = vmatpush.bf16.msrb.mxu3 %v10500_v12  ;;  %4195 = vmatpush.bf16.msrb.mxu1 %v9412_v22  ;;  %v10305_v48 = vld [vmem:[#allocation5 + $0xdf0] sm:$0xf0]  ;;  %v3931_v12 = vpop.f32.mrf.mxu0 }
 0x219   : > { %v12665_v53 = vld [vmem:[#allocation5 + $0x134] sm:$0xf]  ;;  %v10308_v60 = vor.u32 %v13065_v47, %v10305_v48  ;;  %v12882_v47 = vld [vmem:[#allocation5 + $0x7f4] sm:$0xf0] }
 0x21a   : > { %4208 = vmatpush.bf16.msrb.mxu2 %v9924_v23  ;;  %4183 = vmatpush.bf16.msrb.mxu0 %v8836_v34  ;;  %v8705_v54 = vld [vmem:[#allocation5 + $0x170] sm:$0xf0]  ;;  %v10055_v48 = vld [vmem:[#allocation5 + $0xbb8] sm:$0xf]  ;;  %v9544_v58 = vor.u32 %v12882_v47, %v9543_v45 }
 0x21b   : > { %v12793_v55 = vld [vmem:[#allocation5 + $0x534] sm:$0xf]  ;;  %v8708_v10 = vor.u32 %v12665_v53, %v8705_v54  ;;  %v13138_v53 = vld [vmem:[#allocation5 + $0xff4] sm:$0xf0] }
 0x21c   : > { %4221 = vmatpush.bf16.msrb.mxu3 %v10436_v28  ;;  %4196 = vmatpush.bf16.msrb.mxu1 %v9348_v35  ;;  %v9217_v62 = vld [vmem:[#allocation5 + $0x570] sm:$0xf0]  ;;  %v3970_v41 = vpop.f32.mrf.mxu3  ;;  %v13122_v12 = vld [vmem:[#allocation5 + $0xf74] sm:$0xf0] }
 0x21d   : > { %v12921_v63 = vld [vmem:[#allocation5 + $0x934] sm:$0xf]  ;;  %v9220_v14 = vor.u32 %v12793_v55, %v9217_v62  ;;  %v8967_v62 = vld [vmem:[#allocation5 + $0x338] sm:$0xf] }
 0x21e   : > { %4209 = vmatpush.bf16.msrb.mxu2 %v9860_v36  ;;  %v9729_v1 = vld [vmem:[#allocation5 + $0x970] sm:$0xf0]  ;;  %4184 = vmatpush.bf16.msrb.mxu0 %v8772_v50  ;;  %v3957_v36 = vpop.f32.mrf.mxu2  ;;  %v12690_v47 = vld [vmem:[#allocation5 + $0x1f4] sm:$0xf0] }
 0x21f   : > { %v13049_v5 = vld [vmem:[#allocation5 + $0xd34] sm:$0xf]  ;;  %v9732_v16 = vor.u32 %v12921_v63, %v9729_v1  ;;  %v12738_v63 = vld [vmem:[#allocation5 + $0x374] sm:$0xf0] }
 0x220   : > { %4222 = vmatpush.bf16.msrb.mxu3 %v10372_v43  ;;  %v10241_v7 = vld [vmem:[#allocation5 + $0xd70] sm:$0xf0]  ;;  %4197 = vmatpush.bf16.msrb.mxu1 %v9284_v51  ;;  %v9031_v43 = vld [vmem:[#allocation5 + $0x3b8] sm:$0xf] }
 0x221   : > { %v12649_v18 = vld [vmem:[#allocation5 + $0xb4] sm:$0xf]  ;;  %v10244_v22 = vor.u32 %v13049_v5, %v10241_v7  ;;  %v9032_v55 = vor.u32 %v12754_v44, %v9031_v43  ;;  %v9479_v1 = vld [vmem:[#allocation5 + $0x738] sm:$0xf] }
 0x222   : > { %4210 = vmatpush.bf16.msrb.mxu2 %v9796_v52  ;;  %v8641_v19 = vld [vmem:[#allocation5 + $0xf0] sm:$0xf0]  ;;  %4185 = vmatpush.bf16.msrb.mxu0 %v8708_v10  ;;  %v10567_v52 = vld [vmem:[#allocation5 + $0xfb8] sm:$0xf] }
 0x223   : > { %v12777_v20 = vld [vmem:[#allocation5 + $0x4b4] sm:$0xf]  ;;  %v8644_v29 = vor.u32 %v12649_v18, %v8641_v19  ;;  %v10568_v3 = vor.u32 %v13138_v53, %v10567_v52  ;;  %v9991_v5 = vld [vmem:[#allocation5 + $0xb38] sm:$0xf] }
 0x224   : > { %4223 = vmatpush.bf16.msrb.mxu3 %v10308_v60  ;;  %v9153_v23 = vld [vmem:[#allocation5 + $0x4f0] sm:$0xf0]  ;;  %4198 = vmatpush.bf16.msrb.mxu1 %v9220_v14  ;;  %v10056_v60 = vor.u32 %v13010_v49, %v10055_v48  ;;  %v12994_v7 = vld [vmem:[#allocation5 + $0xb74] sm:$0xf0]  ;;  %v8968_v14 = vor.u32 %v12738_v63, %v8967_v62 }
 0x225   : > { %v12905_v24 = vld [vmem:[#allocation5 + $0x8b4] sm:$0xf]  ;;  %v9156_v32 = vor.u32 %v12777_v20, %v9153_v23  ;;  %v10503_v10 = vld [vmem:[#allocation5 + $0xf38] sm:$0xf]  ;;  %v9992_v18 = vor.u32 %v12994_v7, %v9991_v5 }
 0x226   : > { %v9665_v26 = vld [vmem:[#allocation5 + $0x8f0] sm:$0xf0]  ;;  %4211 = vmatpush.bf16.msrb.mxu2 %v9732_v16  ;;  %4186 = vmatpush.bf16.msrb.mxu0 %v8644_v29  ;;  %v9480_v16 = vor.u32 %v12866_v4, %v9479_v1  ;;  %v8903_v19 = vld [vmem:[#allocation5 + $0x2b8] sm:$0xf]  ;;  %v3981_v43 = vpop.f32.mrf.mxu0 }
 0x227   : > { %v13033_v27 = vld [vmem:[#allocation5 + $0xcb4] sm:$0xf]  ;;  %v9668_v33 = vor.u32 %v12905_v24, %v9665_v26  ;;  %v12722_v20 = vld [vmem:[#allocation5 + $0x2f4] sm:$0xf0] }
 0x228   : > { %v10177_v28 = vld [vmem:[#allocation5 + $0xcf0] sm:$0xf0]  ;;  %4224 = vmatpush.bf16.msrb.mxu3 %v10244_v22  ;;  %4199 = vmatpush.bf16.msrb.mxu1 %v9156_v32  ;;  %v10504_v22 = vor.u32 %v13122_v12, %v10503_v10  ;;  %v12850_v23 = vld [vmem:[#allocation5 + $0x6f4] sm:$0xf0]  ;;  %v8904_v29 = vor.u32 %v12722_v20, %v8903_v19 }
 0x229   : > { %v12633_v30 = vld [vmem:[#allocation5 + $0x34] sm:$0xf]  ;;  %v10180_v13 = vor.u32 %v13033_v27, %v10177_v28  ;;  %v9927_v24 = vld [vmem:[#allocation5 + $0xab8] sm:$0xf] }
 0x22a   : > { %v8577_v31 = vld [vmem:[#allocation5 + $0x70] sm:$0xf0]  ;;  %4212 = vmatpush.bf16.msrb.mxu2 %v9668_v33  ;;  %v12978_v26 = vld [vmem:[#allocation5 + $0xaf4] sm:$0xf0] }
 0x22b   : > { %v12761_v34 = vld [vmem:[#allocation5 + $0x434] sm:$0xf]  ;;  %v8580_v46 = vor.u32 %v12633_v30, %v8577_v31  ;;  %v10439_v27 = vld [vmem:[#allocation5 + $0xeb8] sm:$0xf]  ;;  %v9416_v31 = vor.u32 %v12850_v23, %v9415_v21  ;;  %v9928_v32 = vor.u32 %v12978_v26, %v9927_v24 }
 0x22c   : > { %v9089_v42 = vld [vmem:[#allocation5 + $0x470] sm:$0xf0]  ;;  %4225 = vmatpush.bf16.msrb.mxu3 %v10180_v13  ;;  %v13106_v28 = vld [vmem:[#allocation5 + $0xef4] sm:$0xf0] }
 0x22d   : > { %v12889_v35 = vld [vmem:[#allocation5 + $0x834] sm:$0xf]  ;;  %v9092_v50 = vor.u32 %v12761_v34, %v9089_v42  ;;  %4187 = vmatpush.bf16.msrb.mxu0 %v8580_v46  ;;  %v8839_v30 = vld [vmem:[#allocation5 + $0x238] sm:$0xf]  ;;  %v921_v42 = vperm.slane %v14358_v17, 1 }
 0x22e   : > { %v9601_v37 = vld [vmem:[#allocation5 + $0x870] sm:$0xf0]  ;;  %v12706_v33 = vld [vmem:[#allocation5 + $0x274] sm:$0xf0]  ;;  %v3983_v24 = vpop.f32.mrf.mxu0 }
 0x22f   : > { %v13017_v39 = vld [vmem:[#allocation5 + $0xc34] sm:$0xf]  ;;  %v9604_v51 = vor.u32 %v12889_v35, %v9601_v37  ;;  %4200 = vmatpush.bf16.msrb.mxu1 %v9092_v50  ;;  %v9351_v34 = vld [vmem:[#allocation5 + $0x638] sm:$0xf]  ;;  %v10440_v35 = vor.u32 %v13106_v28, %v10439_v27  ;;  %v8840_v41 = vor.u32 %v12706_v33, %v8839_v30  ;;  %v3982_v49 = vadd.f32 %v3981_v43, %v921_v42  ;;  %v3994_v50 = vpop.f32.mrf.mxu1  ;;  %v13114_v24 = vld [vmem:[#allocation5 + $0xf3c] sm:$0xf] }
 0x230   : > { %v10113_v40 = vld [vmem:[#allocation5 + $0xc70] sm:$0xf0]  ;;  %4188 = vmatmul.bf16.vlgmr.msrb.gmra.mxu0 %v14273_v9  ;;  %v12834_v36 = vld [vmem:[#allocation5 + $0x674] sm:$0xf0]  ;;  %v4007_v7 = vpop.f32.mrf.mxu2 }
 0x231   : > { %v10116_v54 = vor.u32 %v13017_v39, %v10113_v40  ;;  %4213 = vmatpush.bf16.msrb.mxu2 %v9604_v51  ;;  %4232 = vmatpush.bf16.msra.mxu0 %v9032_v55  ;;  %v9863_v13 = vld [vmem:[#allocation5 + $0xa38] sm:$0xf]  ;;  %v9352_v44 = vor.u32 %v12834_v36, %v9351_v34 }
 0x232   : > { %4201 = vmatmul.bf16.vlgmr.msrb.gmra.mxu1 %v14282_v25  ;;  %v12962_v37 = vld [vmem:[#allocation5 + $0xa74] sm:$0xf0]  ;;  %v4020_v19 = vpop.f32.mrf.mxu3 }
 0x233   : > { %4226 = vmatpush.bf16.msrb.mxu3 %v10116_v54  ;;  %4245 = vmatpush.bf16.msra.mxu1 %v9544_v58  ;;  %v10375_v39 = vld [vmem:[#allocation5 + $0xe38] sm:$0xf]  ;;  %v9864_v45 = vor.u32 %v12962_v37, %v9863_v13 }
 0x234   : > { %4214 = vmatmul.bf16.vlgmr.msrb.gmra.mxu2 %v14271_v8  ;;  %v13090_v40 = vld [vmem:[#allocation5 + $0xe74] sm:$0xf0] }
 0x235   : > { %4258 = vmatpush.bf16.msra.mxu2 %v10056_v60  ;;  %4233 = vmatpush.bf16.msra.mxu0 %v8968_v14  ;;  %v8775_v46 = vld [vmem:[#allocation5 + $0x1b8] sm:$0xf]  ;;  %v10376_v51 = vor.u32 %v13090_v40, %v10375_v39  ;;  %v3995_v60 = vadd.f32 %v3994_v50, %v3982_v49 }
 0x236   : > { %4227 = vmatmul.bf16.vlgmr.msrb.gmra.mxu3 %v14276_v15  ;;  %v9287_v48 = vld [vmem:[#allocation5 + $0x5b8] sm:$0xf]  ;;  %v8776_v62 = vor.u32 %v12690_v47, %v8775_v46 }
 0x237   : > { %4271 = vmatpush.bf16.msra.mxu3 %v10568_v3  ;;  %4246 = vmatpush.bf16.msra.mxu1 %v9480_v16  ;;  %v12818_v52 = vld [vmem:[#allocation5 + $0x5f4] sm:$0xf0] }
 0x238   : > { %v9799_v53 = vld [vmem:[#allocation5 + $0x9b8] sm:$0xf]  ;;  %v9288_v63 = vor.u32 %v12818_v52, %v9287_v48  ;;  %v4009_v46 = vpop.f32.mrf.mxu2  ;;  %v12746_v52 = vld [vmem:[#allocation5 + $0x3bc] sm:$0xf] }
 0x239   : > { %4259 = vmatpush.bf16.msra.mxu2 %v9992_v18  ;;  %4234 = vmatpush.bf16.msra.mxu0 %v8904_v29  ;;  %v12946_v54 = vld [vmem:[#allocation5 + $0x9f4] sm:$0xf0]  ;;  %v4008_v18 = vadd.f32 %v4007_v7, %v3995_v60  ;;  %v13002_v60 = vld [vmem:[#allocation5 + $0xbbc] sm:$0xf] }
 0x23a   : > { %v10311_v55 = vld [vmem:[#allocation5 + $0xdb8] sm:$0xf]  ;;  %v9800_v1 = vor.u32 %v12946_v54, %v9799_v53  ;;  %v9033_v53 = vld [vmem:[#allocation5 + $0x3f8] sm:$0xf0] }
 0x23b   : > { %4272 = vmatpush.bf16.msra.mxu3 %v10504_v22  ;;  %4247 = vmatpush.bf16.msra.mxu1 %v9416_v31  ;;  %v13074_v58 = vld [vmem:[#allocation5 + $0xdf4] sm:$0xf0]  ;;  %v14371_v23 = vadd.f32 %v4020_v19, %v4008_v18  ;;  %v3996_v31 = vpop.f32.mrf.mxu1  ;;  %v12874_v54 = vld [vmem:[#allocation5 + $0x7bc] sm:$0xf]  ;;  %v9036_v7 = vor.u32 %v12746_v52, %v9033_v53 }
 0x23c   : > { %v8711_v3 = vld [vmem:[#allocation5 + $0x138] sm:$0xf]  ;;  %v10312_v10 = vor.u32 %v13074_v58, %v10311_v55  ;;  %v9545_v58 = vld [vmem:[#allocation5 + $0x7f8] sm:$0xf0] }
 0x23d   : > { %4260 = vmatpush.bf16.msra.mxu2 %v9928_v32  ;;  %4235 = vmatpush.bf16.msra.mxu0 %v8840_v41  ;;  %v12674_v4 = vld [vmem:[#allocation5 + $0x174] sm:$0xf0]  ;;  %v12858_v18 = vld [vmem:[#allocation5 + $0x73c] sm:$0xf] }
 0x23e   : > { %v9223_v5 = vld [vmem:[#allocation5 + $0x538] sm:$0xf]  ;;  %v8712_v22 = vor.u32 %v12674_v4, %v8711_v3  ;;  %v13130_v3 = vld [vmem:[#allocation5 + $0xfbc] sm:$0xf] }
 0x23f   : > { %4273 = vmatpush.bf16.msra.mxu3 %v10440_v35  ;;  %4248 = vmatpush.bf16.msra.mxu1 %v9352_v44  ;;  %v12802_v12 = vld [vmem:[#allocation5 + $0x574] sm:$0xf0]  ;;  %v10569_v4 = vld [vmem:[#allocation5 + $0xff8] sm:$0xf0] }
 0x240   : > { %v9735_v14 = vld [vmem:[#allocation5 + $0x938] sm:$0xf]  ;;  %v9224_v26 = vor.u32 %v12802_v12, %v9223_v5  ;;  %v10572_v19 = vor.u32 %v13130_v3, %v10569_v4  ;;  %v8905_v31 = vld [vmem:[#allocation5 + $0x2f8] sm:$0xf0] }
 0x241   : > { %4261 = vmatpush.bf16.msra.mxu2 %v9864_v45  ;;  %v12930_v16 = vld [vmem:[#allocation5 + $0x974] sm:$0xf0]  ;;  %4236 = vmatpush.bf16.msra.mxu0 %v8776_v62  ;;  %v10057_v62 = vld [vmem:[#allocation5 + $0xbf8] sm:$0xf0] }
 0x242   : > { %v10247_v20 = vld [vmem:[#allocation5 + $0xd38] sm:$0xf]  ;;  %v9736_v27 = vor.u32 %v12930_v16, %v9735_v14  ;;  %v10060_v12 = vor.u32 %v13002_v60, %v10057_v62  ;;  %v12730_v14 = vld [vmem:[#allocation5 + $0x33c] sm:$0xf] }
 0x243   : > { %4274 = vmatpush.bf16.msra.mxu3 %v10376_v51  ;;  %v13058_v21 = vld [vmem:[#allocation5 + $0xd74] sm:$0xf0]  ;;  %4249 = vmatpush.bf16.msra.mxu1 %v9288_v63  ;;  %v4022_v51 = vpop.f32.mrf.mxu3  ;;  %v8969_v16 = vld [vmem:[#allocation5 + $0x378] sm:$0xf0] }
 0x244   : > { %v8647_v28 = vld [vmem:[#allocation5 + $0xb8] sm:$0xf]  ;;  %v10248_v32 = vor.u32 %v13058_v21, %v10247_v20  ;;  %v9481_v20 = vld [vmem:[#allocation5 + $0x778] sm:$0xf0] }
 0x245   : > { %4262 = vmatpush.bf16.msra.mxu2 %v9800_v1  ;;  %v12658_v29 = vld [vmem:[#allocation5 + $0xf4] sm:$0xf0]  ;;  %4237 = vmatpush.bf16.msra.mxu0 %v8712_v22  ;;  %v12986_v21 = vld [vmem:[#allocation5 + $0xb3c] sm:$0xf] }
 0x246   : > { %v9159_v30 = vld [vmem:[#allocation5 + $0x4b8] sm:$0xf]  ;;  %v8648_v13 = vor.u32 %v12658_v29, %v8647_v28  ;;  %v9993_v22 = vld [vmem:[#allocation5 + $0xb78] sm:$0xf0]  ;;  %v9484_v28 = vor.u32 %v12858_v18, %v9481_v20 }
 0x247   : > { %4275 = vmatpush.bf16.msra.mxu3 %v10312_v10  ;;  %v12786_v33 = vld [vmem:[#allocation5 + $0x4f4] sm:$0xf0]  ;;  %4250 = vmatpush.bf16.msra.mxu1 %v9224_v26  ;;  %v9548_v10 = vor.u32 %v12874_v54, %v9545_v58  ;;  %v10505_v26 = vld [vmem:[#allocation5 + $0xf78] sm:$0xf0]  ;;  %v9996_v29 = vor.u32 %v12986_v21, %v9993_v22 }
 0x248   : > { %v9671_v34 = vld [vmem:[#allocation5 + $0x8b8] sm:$0xf]  ;;  %v9160_v40 = vor.u32 %v12786_v33, %v9159_v30  ;;  %v12714_v30 = vld [vmem:[#allocation5 + $0x2bc] sm:$0xf]  ;;  %v10508_v33 = vor.u32 %v13114_v24, %v10505_v26  ;;  %v4033_v53 = vpop.f32.mrf.mxu0 }
 0x249   : > { %v12914_v42 = vld [vmem:[#allocation5 + $0x8f4] sm:$0xf0]  ;;  %4263 = vmatpush.bf16.msra.mxu2 %v9736_v27  ;;  %4238 = vmatpush.bf16.msra.mxu0 %v8648_v13  ;;  %v8972_v27 = vor.u32 %v12730_v14, %v8969_v16  ;;  %v10441_v13 = vld [vmem:[#allocation5 + $0xef8] sm:$0xf0] }
 0x24a   : > { %v10183_v35 = vld [vmem:[#allocation5 + $0xcb8] sm:$0xf]  ;;  %v9672_v41 = vor.u32 %v12914_v42, %v9671_v34  ;;  %v9417_v34 = vld [vmem:[#allocation5 + $0x6f8] sm:$0xf0] }
 0x24b   : > { %v13042_v36 = vld [vmem:[#allocation5 + $0xcf4] sm:$0xf0]  ;;  %4276 = vmatpush.bf16.msra.mxu3 %v10248_v32  ;;  %4251 = vmatpush.bf16.msra.mxu1 %v9160_v40  ;;  %v12842_v32 = vld [vmem:[#allocation5 + $0x6bc] sm:$0xf] }
 0x24c   : > { %v8583_v37 = vld [vmem:[#allocation5 + $0x38] sm:$0xf]  ;;  %v10184_v47 = vor.u32 %v13042_v36, %v10183_v35  ;;  %v12970_v42 = vld [vmem:[#allocation5 + $0xabc] sm:$0xf]  ;;  %v9420_v40 = vor.u32 %v12842_v32, %v9417_v34 }
 0x24d   : > { %v12642_v39 = vld [vmem:[#allocation5 + $0x74] sm:$0xf0]  ;;  %4264 = vmatpush.bf16.msra.mxu2 %v9672_v41  ;;  %v9929_v35 = vld [vmem:[#allocation5 + $0xaf8] sm:$0xf0] }
 0x24e   : > { %v9095_v43 = vld [vmem:[#allocation5 + $0x438] sm:$0xf]  ;;  %v8584_v55 = vor.u32 %v12642_v39, %v8583_v37  ;;  %v13098_v36 = vld [vmem:[#allocation5 + $0xebc] sm:$0xf]  ;;  %v8908_v37 = vor.u32 %v12714_v30, %v8905_v31  ;;  %v9932_v41 = vor.u32 %v12970_v42, %v9929_v35 }
 0x24f   : > { %v12770_v44 = vld [vmem:[#allocation5 + $0x474] sm:$0xf0]  ;;  %4277 = vmatpush.bf16.msra.mxu3 %v10184_v47  ;;  %v12698_v39 = vld [vmem:[#allocation5 + $0x23c] sm:$0xf]  ;;  %v10444_v46 = vor.u32 %v13098_v36, %v10441_v13 }
 0x250   : > { %v9607_v45 = vld [vmem:[#allocation5 + $0x838] sm:$0xf]  ;;  %v9096_v63 = vor.u32 %v12770_v44, %v9095_v43  ;;  %4239 = vmatpush.bf16.msra.mxu0 %v8584_v55  ;;  %v8841_v43 = vld [vmem:[#allocation5 + $0x278] sm:$0xf0]  ;;  %v4035_v35 = vpop.f32.mrf.mxu0 }
 0x251   : > { %v12898_v48 = vld [vmem:[#allocation5 + $0x874] sm:$0xf0]  ;;  %v12826_v44 = vld [vmem:[#allocation5 + $0x63c] sm:$0xf]  ;;  %v8844_v52 = vor.u32 %v12698_v39, %v8841_v43  ;;  %v13229_v35 = vld [vmem:[#allocation8 + $0x2cc] sm:$0xf0] }
 0x252   : > { %v10119_v49 = vld [vmem:[#allocation5 + $0xc38] sm:$0xf]  ;;  %v9608_v1 = vor.u32 %v12898_v48, %v9607_v45  ;;  %4252 = vmatpush.bf16.msra.mxu1 %v9096_v63  ;;  %v922_v45 = vperm.slane %v14358_v17, 2  ;;  %v9353_v47 = vld [vmem:[#allocation5 + $0x678] sm:$0xf0]  ;;  %v4059_v24 = vpop.f32.mrf.mxu2 }
 0x253   : > { %v13026_v50 = vld [vmem:[#allocation5 + $0xc74] sm:$0xf0]  ;;  %4240 = vmatmul.bf16.vlgmr.msra.gmra.mxu0 %v14273_v9  ;;  %v12954_v48 = vld [vmem:[#allocation5 + $0xa3c] sm:$0xf]  ;;  %v9356_v54 = vor.u32 %v12826_v44, %v9353_v47 }
 0x254   : > { %v10120_v5 = vor.u32 %v13026_v50, %v10119_v49  ;;  %4265 = vmatpush.bf16.msra.mxu2 %v9608_v1  ;;  %4284 = vmatpush.bf16.msrb.mxu0 %v9036_v7  ;;  %v9865_v49 = vld [vmem:[#allocation5 + $0xa78] sm:$0xf0]  ;;  %v4034_v63 = vadd.f32 %v4033_v53, %v922_v45  ;;  %v4046_v1 = vpop.f32.mrf.mxu1  ;;  %v4072_v31 = vpop.f32.mrf.mxu3 }
 0x255   : > { %4253 = vmatmul.bf16.vlgmr.msra.gmra.mxu1 %v14282_v25  ;;  %v13082_v50 = vld [vmem:[#allocation5 + $0xe3c] sm:$0xf]  ;;  %v9868_v55 = vor.u32 %v12954_v48, %v9865_v49 }
 0x256   : > { %4278 = vmatpush.bf16.msra.mxu3 %v10120_v5  ;;  %4297 = vmatpush.bf16.msrb.mxu1 %v9548_v10  ;;  %v10377_v51 = vld [vmem:[#allocation5 + $0xe78] sm:$0xf0]  ;;  %v4047_v14 = vadd.f32 %v4046_v1, %v4034_v63 }
 0x257   : > { %4266 = vmatmul.bf16.vlgmr.msra.gmra.mxu2 %v14271_v8  ;;  %v12682_v58 = vld [vmem:[#allocation5 + $0x1bc] sm:$0xf]  ;;  %v10380_v3 = vor.u32 %v13082_v50, %v10377_v51 }
 0x258   : > { %4310 = vmatpush.bf16.msrb.mxu2 %v10060_v12  ;;  %4285 = vmatpush.bf16.msrb.mxu0 %v8972_v27  ;;  %v8777_v60 = vld [vmem:[#allocation5 + $0x1f8] sm:$0xf0]  ;;  %v4060_v30 = vadd.f32 %v4059_v24, %v4047_v14  ;;  %v13201_v14 = vld [vmem:[#allocation8 + $0x1ec] sm:$0xf0] }
 0x259   : > { %4279 = vmatmul.bf16.vlgmr.msra.gmra.mxu3 %v14276_v15  ;;  %v12810_v62 = vld [vmem:[#allocation5 + $0x5bc] sm:$0xf]  ;;  %v8780_v16 = vor.u32 %v12682_v58, %v8777_v60 }
 0x25a   : > { %4323 = vmatpush.bf16.msrb.mxu3 %v10572_v19  ;;  %4298 = vmatpush.bf16.msrb.mxu1 %v9484_v28  ;;  %v9289_v4 = vld [vmem:[#allocation5 + $0x5f8] sm:$0xf0]  ;;  %v14378_v42 = vadd.f32 %v4072_v31, %v4060_v30  ;;  %v4061_v60 = vpop.f32.mrf.mxu2  ;;  %v13165_v30 = vld [vmem:[#allocation8 + $0xcc] sm:$0xf0]  ;;  %v10799_v31 = vld [vmem:[#allocation8 + $0x1c0] sm:$0xf] }
 0x25b   : > { %v12938_v5 = vld [vmem:[#allocation5 + $0x9bc] sm:$0xf]  ;;  %v9292_v18 = vor.u32 %v12810_v62, %v9289_v4 }
 0x25c   : > { %4311 = vmatpush.bf16.msrb.mxu2 %v9996_v29  ;;  %4286 = vmatpush.bf16.msrb.mxu0 %v8908_v37  ;;  %v9801_v7 = vld [vmem:[#allocation5 + $0x9f8] sm:$0xf0]  ;;  %v4074_v4 = vpop.f32.mrf.mxu3 }
 0x25d   : > { %v13066_v10 = vld [vmem:[#allocation5 + $0xdbc] sm:$0xf]  ;;  %v9804_v19 = vor.u32 %v12938_v5, %v9801_v7  ;;  %v10687_v5 = vld [vmem:[#allocation8 + $0xe0] sm:$0xf]  ;;  %v13169_v7 = vld [vmem:[#allocation8 + $0xec] sm:$0xf0] }
 0x25e   : > { %4324 = vmatpush.bf16.msrb.mxu3 %v10508_v33  ;;  %4299 = vmatpush.bf16.msrb.mxu1 %v9420_v40  ;;  %v10313_v12 = vld [vmem:[#allocation5 + $0xdf8] sm:$0xf0] }
 0x25f   : > { %v12666_v20 = vld [vmem:[#allocation5 + $0x13c] sm:$0xf]  ;;  %v10316_v26 = vor.u32 %v13066_v10, %v10313_v12  ;;  %v10815_v10 = vld [vmem:[#allocation8 + $0x1e0] sm:$0xf] }
 0x260   : > { %4312 = vmatpush.bf16.msrb.mxu2 %v9932_v41  ;;  %4287 = vmatpush.bf16.msrb.mxu0 %v8844_v52  ;;  %v8713_v21 = vld [vmem:[#allocation5 + $0x178] sm:$0xf0]  ;;  %v4048_v41 = vpop.f32.mrf.mxu1 }
 0x261   : > { %v12794_v22 = vld [vmem:[#allocation5 + $0x53c] sm:$0xf]  ;;  %v8716_v34 = vor.u32 %v12666_v20, %v8713_v21  ;;  %v11071_v21 = vld [vmem:[#allocation8 + $0x3e0] sm:$0xf] }
 0x262   : > { %4325 = vmatpush.bf16.msrb.mxu3 %v10444_v46  ;;  %4300 = vmatpush.bf16.msrb.mxu1 %v9356_v54  ;;  %v9225_v27 = vld [vmem:[#allocation5 + $0x578] sm:$0xf0]  ;;  %v10655_v41 = vld [vmem:[#allocation8 + $0xa0] sm:$0xf] }
 0x263   : > { %v12922_v28 = vld [vmem:[#allocation5 + $0x93c] sm:$0xf]  ;;  %v9228_v36 = vor.u32 %v12794_v22, %v9225_v27  ;;  %v13265_v22 = vld [vmem:[#allocation8 + $0x3ec] sm:$0xf0]  ;;  %v10816_v27 = vor.u32 %v13201_v14, %v10815_v10 }
 0x264   : > { %4313 = vmatpush.bf16.msrb.mxu2 %v9868_v55  ;;  %v9737_v29 = vld [vmem:[#allocation5 + $0x978] sm:$0xf0]  ;;  %4288 = vmatpush.bf16.msrb.mxu0 %v8780_v16  ;;  %v10943_v16 = vld [vmem:[#allocation8 + $0x2e0] sm:$0xf]  ;;  %v13153_v10 = vld [vmem:[#allocation8 + $0x6c] sm:$0xf0] }
 0x265   : > { %v13050_v32 = vld [vmem:[#allocation5 + $0xd3c] sm:$0xf]  ;;  %v9740_v13 = vor.u32 %v12922_v28, %v9737_v29  ;;  %v10671_v29 = vld [vmem:[#allocation8 + $0xc0] sm:$0xf] }
 0x266   : > { %4326 = vmatpush.bf16.msrb.mxu3 %v10380_v3  ;;  %v10249_v33 = vld [vmem:[#allocation5 + $0xd78] sm:$0xf0]  ;;  %4301 = vmatpush.bf16.msrb.mxu1 %v9292_v18  ;;  %v13233_v18 = vld [vmem:[#allocation8 + $0x2ec] sm:$0xf0] }
 0x267   : > { %v12650_v37 = vld [vmem:[#allocation5 + $0xbc] sm:$0xf]  ;;  %v10252_v43 = vor.u32 %v13050_v32, %v10249_v33  ;;  %v10944_v28 = vor.u32 %v13233_v18, %v10943_v16  ;;  %v11072_v32 = vor.u32 %v13265_v22, %v11071_v21  ;;  %v13197_v33 = vld [vmem:[#allocation8 + $0x1cc] sm:$0xf0]  ;;  %v11007_v21 = vld [vmem:[#allocation8 + $0x360] sm:$0xf] }
 0x268   : > { %4314 = vmatpush.bf16.msrb.mxu2 %v9804_v19  ;;  %v8649_v39 = vld [vmem:[#allocation5 + $0xf8] sm:$0xf0]  ;;  %4289 = vmatpush.bf16.msrb.mxu0 %v8716_v34  ;;  %v10927_v34 = vld [vmem:[#allocation8 + $0x2c0] sm:$0xf]  ;;  %v13185_v18 = vld [vmem:[#allocation8 + $0x16c] sm:$0xf0] }
 0x269   : > { %v12778_v40 = vld [vmem:[#allocation5 + $0x4bc] sm:$0xf]  ;;  %v8652_v49 = vor.u32 %v12650_v37, %v8649_v39  ;;  %v10672_v37 = vor.u32 %v13165_v30, %v10671_v29  ;;  %v10800_v39 = vor.u32 %v13197_v33, %v10799_v31  ;;  %v13249_v22 = vld [vmem:[#allocation8 + $0x36c] sm:$0xf0]  ;;  %v10607_v29 = vld [vmem:[#allocation8 + $0x40] sm:$0xf] }
 0x26a   : > { %4327 = vmatpush.bf16.msrb.mxu3 %v10316_v26  ;;  %v9161_v44 = vld [vmem:[#allocation5 + $0x4f8] sm:$0xf0]  ;;  %4302 = vmatpush.bf16.msrb.mxu1 %v9228_v36  ;;  %v10688_v26 = vor.u32 %v13169_v7, %v10687_v5  ;;  %v11055_v36 = vld [vmem:[#allocation8 + $0x3c0] sm:$0xf]  ;;  %v4098_v16 = vpop.f32.mrf.mxu1  ;;  %v13149_v30 = vld [vmem:[#allocation8 + $0x4c] sm:$0xf0]  ;;  %v11008_v33 = vor.u32 %v13249_v22, %v11007_v21 }
 0x26b   : > { %v12906_v45 = vld [vmem:[#allocation5 + $0x8bc] sm:$0xf]  ;;  %v9164_v52 = vor.u32 %v12778_v40, %v9161_v44  ;;  %v10928_v40 = vor.u32 %v13229_v35, %v10927_v34  ;;  %v10783_v44 = vld [vmem:[#allocation8 + $0x1a0] sm:$0xf]  ;;  %v13181_v34 = vld [vmem:[#allocation8 + $0x14c] sm:$0xf0] }
 0x26c   : > { %v9673_v46 = vld [vmem:[#allocation5 + $0x8f8] sm:$0xf0]  ;;  %4315 = vmatpush.bf16.msrb.mxu2 %v9740_v13  ;;  %4290 = vmatpush.bf16.msrb.mxu0 %v8652_v49  ;;  %v13261_v13 = vld [vmem:[#allocation8 + $0x3cc] sm:$0xf0]  ;;  %v11039_v49 = vld [vmem:[#allocation8 + $0x3a0] sm:$0xf] }
 0x26d   : > { %v13034_v47 = vld [vmem:[#allocation5 + $0xcbc] sm:$0xf]  ;;  %v9676_v53 = vor.u32 %v12906_v45, %v9673_v46  ;;  %v11056_v45 = vor.u32 %v13261_v13, %v11055_v36  ;;  %v13193_v46 = vld [vmem:[#allocation8 + $0x1ac] sm:$0xf0]  ;;  %v10623_v7 = vld [vmem:[#allocation8 + $0x60] sm:$0xf] }
 0x26e   : > { %v10185_v48 = vld [vmem:[#allocation5 + $0xcf8] sm:$0xf0]  ;;  %4328 = vmatpush.bf16.msrb.mxu3 %v10252_v43  ;;  %4303 = vmatpush.bf16.msrb.mxu1 %v9164_v52  ;;  %v13161_v43 = vld [vmem:[#allocation8 + $0xac] sm:$0xf0]  ;;  %v10639_v52 = vld [vmem:[#allocation8 + $0x80] sm:$0xf] }
 0x26f   : > { %v12634_v50 = vld [vmem:[#allocation5 + $0x3c] sm:$0xf]  ;;  %v10188_v62 = vor.u32 %v13034_v47, %v10185_v48  ;;  %v10911_v47 = vld [vmem:[#allocation8 + $0x2a0] sm:$0xf]  ;;  %v13225_v48 = vld [vmem:[#allocation8 + $0x2ac] sm:$0xf0] }
 0x270   : > { %v8585_v51 = vld [vmem:[#allocation5 + $0x78] sm:$0xf0]  ;;  %4316 = vmatpush.bf16.msrb.mxu2 %v9676_v53  ;;  %v10784_v53 = vor.u32 %v13193_v46, %v10783_v44  ;;  %v10735_v31 = vld [vmem:[#allocation8 + $0x140] sm:$0xf]  ;;  %v13213_v36 = vld [vmem:[#allocation8 + $0x24c] sm:$0xf0] }
 0x271   : > { %v12762_v54 = vld [vmem:[#allocation5 + $0x43c] sm:$0xf]  ;;  %v8588_v12 = vor.u32 %v12634_v50, %v8585_v51  ;;  %v13257_v50 = vld [vmem:[#allocation8 + $0x3ac] sm:$0xf0]  ;;  %v10656_v51 = vor.u32 %v13161_v43, %v10655_v41  ;;  %v10863_v35 = vld [vmem:[#allocation8 + $0x240] sm:$0xf]  ;;  %v10608_v41 = vor.u32 %v13149_v30, %v10607_v29 }
 0x272   : > { %v9097_v55 = vld [vmem:[#allocation5 + $0x478] sm:$0xf0]  ;;  %4329 = vmatpush.bf16.msrb.mxu3 %v10188_v62  ;;  %v11040_v60 = vor.u32 %v13257_v50, %v11039_v49  ;;  %v10895_v62 = vld [vmem:[#allocation8 + $0x280] sm:$0xf]  ;;  %v10864_v46 = vor.u32 %v13213_v36, %v10863_v35  ;;  %v4100_v50 = vpop.f32.mrf.mxu1  ;;  %v13361_v21 = vld [vmem:[#allocation8 + $0x6ec] sm:$0xf0] }
 0x273   : > { %v12890_v58 = vld [vmem:[#allocation5 + $0x83c] sm:$0xf]  ;;  %v9100_v19 = vor.u32 %v12762_v54, %v9097_v55  ;;  %4291 = vmatpush.bf16.msrb.mxu0 %v8588_v12  ;;  %v10912_v54 = vor.u32 %v13225_v48, %v10911_v47  ;;  %v10767_v55 = vld [vmem:[#allocation8 + $0x180] sm:$0xf]  ;;  %v13145_v48 = vld [vmem:[#allocation8 + $0x2c] sm:$0xf0] }
 0x274   : > { %v9609_v63 = vld [vmem:[#allocation5 + $0x878] sm:$0xf0]  ;;  %v10751_v12 = vld [vmem:[#allocation8 + $0x160] sm:$0xf]  ;;  %v4336_v22 = vmax.f32 %v14304_v38, 0.0  ;;  %v4338_v30 = vmax.f32 %v14318_v0, 0.0 }
 0x275   : > { %v13018_v1 = vld [vmem:[#allocation5 + $0xc3c] sm:$0xf]  ;;  %v9612_v20 = vor.u32 %v12890_v58, %v9609_v63  ;;  %4304 = vmatpush.bf16.msrb.mxu1 %v9100_v19  ;;  %v923_v58 = vperm.slane %v14358_v17, 3  ;;  %v11023_v63 = vld [vmem:[#allocation8 + $0x380] sm:$0xf] }
 0x276   : > { %v10121_v3 = vld [vmem:[#allocation5 + $0xc78] sm:$0xf0]  ;;  %4292 = vmatmul.bf16.vlgmr.msrb.gmra.mxu0 %v14273_v9  ;;  %v13157_v9 = vld [vmem:[#allocation8 + $0x8c] sm:$0xf0]  ;;  %v10879_v19 = vld [vmem:[#allocation8 + $0x260] sm:$0xf]  ;;  %v14391_v0 = vpack.c.bf16 %v4336_v22, %v4336_v22 }
 0x277   : > { %v10124_v24 = vor.u32 %v13018_v1, %v10121_v3  ;;  %4317 = vmatpush.bf16.msrb.mxu2 %v9612_v20  ;;  %7450 = vmatpush.bf16.msra.mxu0 %v10688_v26  ;;  %v13253_v1 = vld [vmem:[#allocation8 + $0x38c] sm:$0xf0]  ;;  %v4085_v3 = vpop.f32.mrf.mxu0  ;;  %v10624_v26 = vor.u32 %v13153_v10, %v10623_v7  ;;  %v10591_v47 = vld [vmem:[#allocation8 + $0x20] sm:$0xf] }
 0x278   : > { %4305 = vmatmul.bf16.vlgmr.msrb.gmra.mxu1 %v14282_v25  ;;  %v10640_v25 = vor.u32 %v13157_v9, %v10639_v52  ;;  %v4086_v14 = vadd.f32 %v4085_v3, %v923_v58  ;;  %v11024_v17 = vor.u32 %v13253_v1, %v11023_v63  ;;  %v13217_v20 = vld [vmem:[#allocation8 + $0x26c] sm:$0xf0]  ;;  %v10719_v49 = vld [vmem:[#allocation8 + $0x120] sm:$0xf]  ;;  %v10592_v58 = vor.u32 %v13145_v48, %v10591_v47 }
 0x279   : > { %4330 = vmatpush.bf16.msrb.mxu3 %v10124_v24  ;;  %7463 = vmatpush.bf16.msra.mxu1 %v10816_v27  ;;  %v10752_v27 = vor.u32 %v13185_v18, %v10751_v12  ;;  %v13177_v52 = vld [vmem:[#allocation8 + $0x12c] sm:$0xf0]  ;;  %v10975_v9 = vld [vmem:[#allocation8 + $0x320] sm:$0xf] }
 0x27a   : > { %4318 = vmatmul.bf16.vlgmr.msrb.gmra.mxu2 %v14271_v8  ;;  %v13189_v8 = vld [vmem:[#allocation8 + $0x18c] sm:$0xf0]  ;;  %v4099_v24 = vadd.f32 %v4098_v16, %v4086_v14  ;;  %v10703_v63 = vld [vmem:[#allocation8 + $0x100] sm:$0xf] }
 0x27b   : > { %7476 = vmatpush.bf16.msra.mxu2 %v10944_v28  ;;  %7451 = vmatpush.bf16.msra.mxu0 %v10672_v37  ;;  %v10768_v4 = vor.u32 %v13189_v8, %v10767_v55  ;;  %v10880_v28 = vor.u32 %v13217_v20, %v10879_v19  ;;  %v4124_v37 = vpop.f32.mrf.mxu3  ;;  %v13241_v55 = vld [vmem:[#allocation8 + $0x32c] sm:$0xf0]  ;;  %v10959_v7 = vld [vmem:[#allocation8 + $0x300] sm:$0xf] }
 0x27c   : > { %4331 = vmatmul.bf16.vlgmr.msrb.gmra.mxu3 %v14276_v15  ;;  %v13221_v15 = vld [vmem:[#allocation8 + $0x28c] sm:$0xf0]  ;;  %v11199_v14 = vld [vmem:[#allocation8 + $0x4e0] sm:$0xf] }
 0x27d   : > { %7489 = vmatpush.bf16.msra.mxu3 %v11072_v32  ;;  %7464 = vmatpush.bf16.msra.mxu1 %v10800_v39  ;;  %v10896_v5 = vor.u32 %v13221_v15, %v10895_v62  ;;  %v4111_v32 = vpop.f32.mrf.mxu2  ;;  %v10991_v39 = vld [vmem:[#allocation8 + $0x340] sm:$0xf]  ;;  %v13141_v8 = vld [vmem:[#allocation8 + $0xc] sm:$0xf0]  ;;  %v10720_v62 = vor.u32 %v13177_v52, %v10719_v49 }
 0x27e   : > { %v4112_v13 = vadd.f32 %v4111_v32, %v4099_v24  ;;  %v13173_v1 = vld [vmem:[#allocation8 + $0x10c] sm:$0xf0]  ;;  %v11455_v20 = vld [vmem:[#allocation8 + $0x6e0] sm:$0xf]  ;;  %v4337_v24 = vmax.f32 %v14311_v6, 0.0 }
 0x27f   : > { %7477 = vmatpush.bf16.msra.mxu2 %v10928_v40  ;;  %7452 = vmatpush.bf16.msra.mxu0 %v10656_v51  ;;  %v13245_v40 = vld [vmem:[#allocation8 + $0x34c] sm:$0xf0]  ;;  %v4087_v44 = vpop.f32.mrf.mxu0  ;;  %v11456_v35 = vor.u32 %v13361_v21, %v11455_v20  ;;  %v11183_v36 = vld [vmem:[#allocation8 + $0x4c0] sm:$0xf] }
 0x280   : > { %v14385_v43 = vadd.f32 %v4124_v37, %v4112_v13  ;;  %v10992_v51 = vor.u32 %v13245_v40, %v10991_v39  ;;  %v13237_v10 = vld [vmem:[#allocation8 + $0x30c] sm:$0xf0]  ;;  %v11311_v38 = vld [vmem:[#allocation8 + $0x5c0] sm:$0xf] }
 0x281   : > { %7490 = vmatpush.bf16.msra.mxu3 %v11056_v45  ;;  %7465 = vmatpush.bf16.msra.mxu1 %v10784_v53  ;;  %v10736_v45 = vor.u32 %v13181_v34, %v10735_v31  ;;  %v10847_v53 = vld [vmem:[#allocation8 + $0x220] sm:$0xf]  ;;  %v13297_v16 = vld [vmem:[#allocation8 + $0x4ec] sm:$0xf0]  ;;  %v4339_v31 = vmax.f32 %v14325_v59, 0.0  ;;  %v10960_v32 = vor.u32 %v13237_v10, %v10959_v7  ;;  %v14393_v59 = vpack.c.bf16 %v4337_v24, %v4337_v24 }
 0x282   : > { %v13329_v19 = vld [vmem:[#allocation8 + $0x5ec] sm:$0xf0]  ;;  %v11439_v39 = vld [vmem:[#allocation8 + $0x6c0] sm:$0xf] }
 0x283   : > { %7478 = vmatpush.bf16.msra.mxu2 %v10912_v54  ;;  %7453 = vmatpush.bf16.msra.mxu0 %v10640_v25  ;;  %v13209_v54 = vld [vmem:[#allocation8 + $0x22c] sm:$0xf0]  ;;  %v10831_v25 = vld [vmem:[#allocation8 + $0x200] sm:$0xf]  ;;  %v4126_v12 = vpop.f32.mrf.mxu3  ;;  %v14397_v52 = vpack.c.bf16 %v4339_v31, %v4339_v31 }
 0x284   : > { %v10848_v15 = vor.u32 %v13209_v54, %v10847_v53  ;;  %v13393_v29 = vld [vmem:[#allocation8 + $0x7ec] sm:$0xf0]  ;;  %v11167_v49 = vld [vmem:[#allocation8 + $0x4a0] sm:$0xf] }
 0x285   : > { %7491 = vmatpush.bf16.msra.mxu3 %v11040_v60  ;;  %7466 = vmatpush.bf16.msra.mxu1 %v10768_v4  ;;  %v10575_v60 = vld [vmem:[#allocation8] sm:$0xf]  ;;  %v4113_v3 = vpop.f32.mrf.mxu2  ;;  %v10976_v4 = vor.u32 %v13241_v55, %v10975_v9  ;;  %v13293_v13 = vld [vmem:[#allocation8 + $0x4cc] sm:$0xf0] }
 0x286   : > { %v10576_v18 = vor.u32 %v13141_v8, %v10575_v60  ;;  %v13325_v37 = vld [vmem:[#allocation8 + $0x5cc] sm:$0xf0]  ;;  %v11423_v9 = vld [vmem:[#allocation8 + $0x6a0] sm:$0xf]  ;;  %v14403_v3 = vld [vmem:[#allocation7 + $0x8] sm:$0xff] }
 0x287   : > { %7479 = vmatpush.bf16.msra.mxu2 %v10896_v5  ;;  %7454 = vmatpush.bf16.msra.mxu0 %v10624_v26  ;;  %v13205_v5 = vld [vmem:[#allocation8 + $0x20c] sm:$0xf0]  ;;  %v10704_v26 = vor.u32 %v13173_v1, %v10703_v63  ;;  %v11312_v47 = vor.u32 %v13325_v37, %v11311_v38  ;;  %v11407_v10 = vld [vmem:[#allocation8 + $0x680] sm:$0xf] }
 0x288   : > { %v13357_v40 = vld [vmem:[#allocation8 + $0x6cc] sm:$0xf0]  ;;  %v11135_v21 = vld [vmem:[#allocation8 + $0x460] sm:$0xf] }
 0x289   : > { %7492 = vmatpush.bf16.msra.mxu3 %v11024_v17  ;;  %7467 = vmatpush.bf16.msra.mxu1 %v10752_v27  ;;  %v11327_v17 = vld [vmem:[#allocation8 + $0x5e0] sm:$0xf]  ;;  %v10832_v27 = vor.u32 %v13205_v5, %v10831_v25  ;;  %v13389_v44 = vld [vmem:[#allocation8 + $0x7cc] sm:$0xf0]  ;;  %v11440_v48 = vor.u32 %v13357_v40, %v11439_v39 }
 0x28a   : > { %v11328_v34 = vor.u32 %v13329_v19, %v11327_v17  ;;  %v13289_v50 = vld [vmem:[#allocation8 + $0x4ac] sm:$0xf0]  ;;  %v11279_v25 = vld [vmem:[#allocation8 + $0x580] sm:$0xf] }
 0x28b   : > { %7480 = vmatpush.bf16.msra.mxu2 %v10880_v28  ;;  %7455 = vmatpush.bf16.msra.mxu0 %v10608_v41  ;;  %v11583_v28 = vld [vmem:[#allocation8 + $0x7e0] sm:$0xf]  ;;  %v13321_v54 = vld [vmem:[#allocation8 + $0x5ac] sm:$0xf0]  ;;  %v11168_v8 = vor.u32 %v13289_v50, %v11167_v49 }
 0x28c   : > { %v11584_v6 = vor.u32 %v13393_v29, %v11583_v28  ;;  %v11567_v41 = vld [vmem:[#allocation8 + $0x7c0] sm:$0xf]  ;;  %v13353_v55 = vld [vmem:[#allocation8 + $0x6ac] sm:$0xf0] }
 0x28d   : > { %7493 = vmatpush.bf16.msra.mxu3 %v11008_v33  ;;  %7468 = vmatpush.bf16.msra.mxu1 %v10736_v45  ;;  %v11200_v33 = vor.u32 %v13297_v16, %v11199_v14  ;;  %v11184_v45 = vor.u32 %v13293_v13, %v11183_v36  ;;  %v11568_v53 = vor.u32 %v13389_v44, %v11567_v41  ;;  %v13385_v60 = vld [vmem:[#allocation8 + $0x7ac] sm:$0xf0]  ;;  %v11535_v14 = vld [vmem:[#allocation8 + $0x780] sm:$0xf] }
 0x28e   : > { %v11424_v63 = vor.u32 %v13353_v55, %v11423_v9  ;;  %v13285_v1 = vld [vmem:[#allocation8 + $0x48c] sm:$0xf0]  ;;  %v11263_v24 = vld [vmem:[#allocation8 + $0x560] sm:$0xf] }
 0x28f   : > { %7481 = vmatpush.bf16.msra.mxu2 %v10864_v46  ;;  %7456 = vmatpush.bf16.msra.mxu0 %v10592_v58  ;;  %v14395_v46 = vpack.c.bf16 %v4338_v30, %v4338_v30  ;;  %v11551_v58 = vld [vmem:[#allocation8 + $0x7a0] sm:$0xf]  ;;  %v13317_v7 = vld [vmem:[#allocation8 + $0x58c] sm:$0xf0] }
 0x290   : > { %v11552_v5 = vor.u32 %v13385_v60, %v11551_v58  ;;  %v13349_v12 = vld [vmem:[#allocation8 + $0x68c] sm:$0xf0]  ;;  %v11280_v19 = vor.u32 %v13317_v7, %v11279_v25  ;;  %v11391_v30 = vld [vmem:[#allocation8 + $0x660] sm:$0xf] }
 0x291   : > { %7494 = vmatpush.bf16.msra.mxu3 %v10992_v51  ;;  %7469 = vmatpush.bf16.msra.mxu1 %v10720_v62  ;;  %v11295_v51 = vld [vmem:[#allocation8 + $0x5a0] sm:$0xf]  ;;  %v13381_v16 = vld [vmem:[#allocation8 + $0x78c] sm:$0xf0]  ;;  %v11408_v20 = vor.u32 %v13349_v12, %v11407_v10 }
 0x292   : > { %v11151_v62 = vld [vmem:[#allocation8 + $0x480] sm:$0xf]  ;;  %v13281_v22 = vld [vmem:[#allocation8 + $0x46c] sm:$0xf0]  ;;  %v11536_v28 = vor.u32 %v13381_v16, %v11535_v14 }
 0x293   : > { %7482 = vmatpush.bf16.msra.mxu2 %v10848_v15  ;;  %7457 = vmatpush.bf16.msra.mxu0 %v10576_v18  ;;  %v11296_v15 = vor.u32 %v13321_v54, %v11295_v51  ;;  %v11152_v17 = vor.u32 %v13285_v1, %v11151_v62  ;;  %v4137_v18 = vpop.f32.mrf.mxu0  ;;  %v13313_v29 = vld [vmem:[#allocation8 + $0x56c] sm:$0xf0]  ;;  %v11119_v38 = vld [vmem:[#allocation8 + $0x440] sm:$0xf] }
 0x294   : > { %v13345_v31 = vld [vmem:[#allocation8 + $0x66c] sm:$0xf0]  ;;  %v11264_v36 = vor.u32 %v13313_v29, %v11263_v24  ;;  %v11247_v37 = vld [vmem:[#allocation8 + $0x540] sm:$0xf]  ;;  %v4163_v39 = vpop.f32.mrf.mxu2 }
 0x295   : > { %7495 = vmatpush.bf16.msra.mxu3 %v10976_v4  ;;  %7470 = vmatpush.bf16.msra.mxu1 %v10704_v26  ;;  %v924_v4 = vperm.slane %v14403_v3, 4  ;;  %v11392_v13 = vor.u32 %v13345_v31, %v11391_v30  ;;  %v13309_v41 = vld [vmem:[#allocation8 + $0x54c] sm:$0xf0]  ;;  %v11375_v44 = vld [vmem:[#allocation8 + $0x640] sm:$0xf] }
 0x296   : > { %7458 = vmatmul.bf16.vlgmr.msra.gmra.mxu0 %v14391_v0  ;;  %v11503_v49 = vld [vmem:[#allocation8 + $0x740] sm:$0xf]  ;;  %v13373_v50 = vld [vmem:[#allocation8 + $0x74c] sm:$0xf0]  ;;  %v11248_v9 = vor.u32 %v13309_v41, %v11247_v37 }
 0x297   : > { %7483 = vmatpush.bf16.msra.mxu2 %v10832_v27  ;;  %7502 = vmatpush.bf16.msrb.mxu0 %v11200_v33  ;;  %v4138_v26 = vadd.f32 %v4137_v18, %v924_v4  ;;  %v4150_v27 = vpop.f32.mrf.mxu1  ;;  %v13377_v33 = vld [vmem:[#allocation8 + $0x76c] sm:$0xf0]  ;;  %v11103_v58 = vld [vmem:[#allocation8 + $0x420] sm:$0xf] }
 0x298   : > { %7471 = vmatmul.bf16.vlgmr.msra.gmra.mxu1 %v14393_v59  ;;  %v13273_v60 = vld [vmem:[#allocation8 + $0x42c] sm:$0xf0]  ;;  %v11359_v1 = vld [vmem:[#allocation8 + $0x620] sm:$0xf] }
 0x299   : > { %7496 = vmatpush.bf16.msra.mxu3 %v10960_v32  ;;  %7515 = vmatpush.bf16.msrb.mxu1 %v11328_v34  ;;  %v11519_v32 = vld [vmem:[#allocation8 + $0x760] sm:$0xf]  ;;  %v4151_v34 = vadd.f32 %v4150_v27, %v4138_v26  ;;  %v13337_v25 = vld [vmem:[#allocation8 + $0x62c] sm:$0xf0]  ;;  %v11104_v7 = vor.u32 %v13273_v60, %v11103_v58 }
 0x29a   : > { %7484 = vmatmul.bf16.vlgmr.msra.gmra.mxu2 %v14395_v46  ;;  %v11520_v40 = vor.u32 %v13377_v33, %v11519_v32  ;;  %v11487_v4 = vld [vmem:[#allocation8 + $0x720] sm:$0xf]  ;;  %v13269_v12 = vld [vmem:[#allocation8 + $0x40c] sm:$0xf0]  ;;  %v11360_v16 = vor.u32 %v13337_v25, %v11359_v1 }
 0x29b   : > { %7528 = vmatpush.bf16.msrb.mxu2 %v11456_v35  ;;  %7503 = vmatpush.bf16.msrb.mxu0 %v11184_v45  ;;  %v11136_v35 = vor.u32 %v13281_v22, %v11135_v21  ;;  %v13341_v45 = vld [vmem:[#allocation8 + $0x64c] sm:$0xf0]  ;;  %v4139_v54 = vpop.f32.mrf.mxu0  ;;  %v11087_v10 = vld [vmem:[#allocation8 + $0x400] sm:$0xf] }
 0x29c   : > { %7497 = vmatmul.bf16.vlgmr.msra.gmra.mxu3 %v14397_v52  ;;  %v11376_v55 = vor.u32 %v13341_v45, %v11375_v44  ;;  %v13301_v18 = vld [vmem:[#allocation8 + $0x50c] sm:$0xf0]  ;;  %v11471_v24 = vld [vmem:[#allocation8 + $0x700] sm:$0xf]  ;;  %v11088_v31 = vor.u32 %v13269_v12, %v11087_v10 }
 0x29d   : > { %7541 = vmatpush.bf16.msrb.mxu3 %v11584_v6  ;;  %7516 = vmatpush.bf16.msrb.mxu1 %v11312_v47  ;;  %v13277_v6 = vld [vmem:[#allocation8 + $0x44c] sm:$0xf0]  ;;  %v4164_v47 = vadd.f32 %v4163_v39, %v4151_v34  ;;  %v11839_v30 = vld [vmem:[#allocation8 + $0x9e0] sm:$0xf]  ;;  %v4342_v39 = vmax.f32 %v14348_v61, 0.0 }
 0x29e   : > { %v11120_v51 = vor.u32 %v13277_v6, %v11119_v38  ;;  %v13333_v22 = vld [vmem:[#allocation8 + $0x60c] sm:$0xf0]  ;;  %v11967_v33 = vld [vmem:[#allocation8 + $0xae0] sm:$0xf] }
 0x29f   : > { %7529 = vmatpush.bf16.msrb.mxu2 %v11440_v48  ;;  %7504 = vmatpush.bf16.msrb.mxu0 %v11168_v8  ;;  %v4176_v48 = vpop.f32.mrf.mxu3  ;;  %v11231_v8 = vld [vmem:[#allocation8 + $0x520] sm:$0xf]  ;;  %v4152_v62 = vpop.f32.mrf.mxu1  ;;  %v13365_v26 = vld [vmem:[#allocation8 + $0x70c] sm:$0xf0]  ;;  %v14416_v60 = vpack.c.bf16 %v4342_v39, %v4342_v39 }
 0x2a0   : > { %v13425_v29 = vld [vmem:[#allocation8 + $0x8ec] sm:$0xf0]  ;;  %v12095_v6 = vld [vmem:[#allocation8 + $0xbe0] sm:$0xf]  ;;  %v11472_v41 = vor.u32 %v13365_v26, %v11471_v24 }
 0x2a1   : > { %7542 = vmatpush.bf16.msrb.mxu3 %v11568_v53  ;;  %7517 = vmatpush.bf16.msrb.mxu1 %v11296_v15  ;;  %v14406_v53 = vadd.f32 %v4176_v48, %v4164_v47  ;;  %v11504_v15 = vor.u32 %v13373_v50, %v11503_v49  ;;  %v13457_v32 = vld [vmem:[#allocation8 + $0x9ec] sm:$0xf0]  ;;  %v11695_v48 = vld [vmem:[#allocation8 + $0x8c0] sm:$0xf] }
 0x2a2   : > { %v13489_v34 = vld [vmem:[#allocation8 + $0xaec] sm:$0xf0]  ;;  %v11840_v45 = vor.u32 %v13457_v32, %v11839_v30  ;;  %v11807_v1 = vld [vmem:[#allocation8 + $0x9a0] sm:$0xf] }
 0x2a3   : > { %7530 = vmatpush.bf16.msrb.mxu2 %v11424_v63  ;;  %7505 = vmatpush.bf16.msrb.mxu0 %v11152_v17  ;;  %v13305_v63 = vld [vmem:[#allocation8 + $0x52c] sm:$0xf0]  ;;  %v11215_v17 = vld [vmem:[#allocation8 + $0x500] sm:$0xf]  ;;  %v11968_v47 = vor.u32 %v13489_v34, %v11967_v33 }
 0x2a4   : > { %v11232_v14 = vor.u32 %v13305_v63, %v11231_v8  ;;  %v13521_v37 = vld [vmem:[#allocation8 + $0xbec] sm:$0xf0]  ;;  %v12063_v12 = vld [vmem:[#allocation8 + $0xba0] sm:$0xf] }
 0x2a5   : > { %7543 = vmatpush.bf16.msrb.mxu3 %v11552_v5  ;;  %7518 = vmatpush.bf16.msrb.mxu1 %v11280_v19  ;;  %v13369_v5 = vld [vmem:[#allocation8 + $0x72c] sm:$0xf0]  ;;  %v11343_v19 = vld [vmem:[#allocation8 + $0x600] sm:$0xf] }
 0x2a6   : > { %v11488_v21 = vor.u32 %v13369_v5, %v11487_v4  ;;  %v11344_v38 = vor.u32 %v13333_v22, %v11343_v19  ;;  %v13421_v49 = vld [vmem:[#allocation8 + $0x8cc] sm:$0xf0]  ;;  %v11663_v19 = vld [vmem:[#allocation8 + $0x880] sm:$0xf] }
 0x2a7   : > { %7531 = vmatpush.bf16.msrb.mxu2 %v11408_v20  ;;  %7506 = vmatpush.bf16.msrb.mxu0 %v11136_v35  ;;  %v4165_v20 = vpop.f32.mrf.mxu2  ;;  %v4178_v27 = vpop.f32.mrf.mxu3  ;;  %v4340_v35 = vmax.f32 %v14334_v56, 0.0  ;;  %v11823_v56 = vld [vmem:[#allocation8 + $0x9c0] sm:$0xf]  ;;  %v13453_v50 = vld [vmem:[#allocation8 + $0x9cc] sm:$0xf0]  ;;  %v11696_v58 = vor.u32 %v13421_v49, %v11695_v48 }
 0x2a8   : > { %v13485_v54 = vld [vmem:[#allocation8 + $0xacc] sm:$0xf0]  ;;  %v11824_v8 = vor.u32 %v13453_v50, %v11823_v56  ;;  %v11919_v26 = vld [vmem:[#allocation8 + $0xa80] sm:$0xf] }
 0x2a9   : > { %7544 = vmatpush.bf16.msrb.mxu3 %v11536_v28  ;;  %7519 = vmatpush.bf16.msrb.mxu1 %v11264_v36  ;;  %v11711_v28 = vld [vmem:[#allocation8 + $0x8e0] sm:$0xf]  ;;  %v4341_v36 = vmax.f32 %v14341_v57, 0.0  ;;  %v12096_v57 = vor.u32 %v13521_v37, %v12095_v6  ;;  %v14412_v61 = vpack.c.bf16 %v4340_v35, %v4340_v35  ;;  %v13417_v63 = vld [vmem:[#allocation8 + $0x8ac] sm:$0xf0] }
 0x2aa   : > { %v11712_v44 = vor.u32 %v13425_v29, %v11711_v28  ;;  %v13449_v5 = vld [vmem:[#allocation8 + $0x9ac] sm:$0xf0]  ;;  %v12047_v28 = vld [vmem:[#allocation8 + $0xb80] sm:$0xf] }
 0x2ab   : > { %7532 = vmatpush.bf16.msrb.mxu2 %v11392_v13  ;;  %7507 = vmatpush.bf16.msrb.mxu0 %v11120_v51  ;;  %v11216_v13 = vor.u32 %v13301_v18, %v11215_v17  ;;  %v11951_v51 = vld [vmem:[#allocation8 + $0xac0] sm:$0xf]  ;;  %v13481_v10 = vld [vmem:[#allocation8 + $0xaac] sm:$0xf0]  ;;  %v11808_v17 = vor.u32 %v13449_v5, %v11807_v1 }
 0x2ac   : > { %v11952_v62 = vor.u32 %v13485_v54, %v11951_v51  ;;  %v13413_v20 = vld [vmem:[#allocation8 + $0x88c] sm:$0xf0]  ;;  %v11647_v34 = vld [vmem:[#allocation8 + $0x860] sm:$0xf] }
 0x2ad   : > { %7545 = vmatpush.bf16.msrb.mxu3 %v11520_v40  ;;  %7520 = vmatpush.bf16.msrb.mxu1 %v11248_v9  ;;  %v4343_v40 = vmax.f32 %v14355_v2, 0.0  ;;  %v12079_v9 = vld [vmem:[#allocation8 + $0xbc0] sm:$0xf]  ;;  %v14414_v2 = vpack.c.bf16 %v4341_v36, %v4341_v36  ;;  %v13445_v24 = vld [vmem:[#allocation8 + $0x98c] sm:$0xf0]  ;;  %v11664_v30 = vor.u32 %v13413_v20, %v11663_v19 }
 0x2ae   : > { %v13477_v27 = vld [vmem:[#allocation8 + $0xa8c] sm:$0xf0]  ;;  %v11775_v36 = vld [vmem:[#allocation8 + $0x960] sm:$0xf] }
 0x2af   : > { %7533 = vmatpush.bf16.msrb.mxu2 %v11376_v55  ;;  %7508 = vmatpush.bf16.msrb.mxu0 %v11104_v7  ;;  %v13517_v55 = vld [vmem:[#allocation8 + $0xbcc] sm:$0xf0]  ;;  %v14418_v25 = vpack.c.bf16 %v4343_v40, %v4343_v40  ;;  %v11935_v7 = vld [vmem:[#allocation8 + $0xaa0] sm:$0xf]  ;;  %v11920_v33 = vor.u32 %v13477_v27, %v11919_v26 }
 0x2b0   : > { %v12080_v4 = vor.u32 %v13517_v55, %v12079_v9  ;;  %v11936_v18 = vor.u32 %v13481_v10, %v11935_v7  ;;  %v13509_v29 = vld [vmem:[#allocation8 + $0xb8c] sm:$0xf0]  ;;  %v11903_v37 = vld [vmem:[#allocation8 + $0xa60] sm:$0xf] }
 0x2b1   : > { %7546 = vmatpush.bf16.msrb.mxu3 %v11504_v15  ;;  %7521 = vmatpush.bf16.msrb.mxu1 %v11232_v14  ;;  %v11679_v15 = vld [vmem:[#allocation8 + $0x8a0] sm:$0xf]  ;;  %v13513_v14 = vld [vmem:[#allocation8 + $0xbac] sm:$0xf0] }
 0x2b2   : > { %v12064_v22 = vor.u32 %v13513_v14, %v12063_v12  ;;  %v13409_v35 = vld [vmem:[#allocation8 + $0x86c] sm:$0xf0]  ;;  %v12031_v40 = vld [vmem:[#allocation8 + $0xb60] sm:$0xf] }
 0x2b3   : > { %7534 = vmatpush.bf16.msrb.mxu2 %v11360_v16  ;;  %7509 = vmatpush.bf16.msrb.mxu0 %v11088_v31  ;;  %v11680_v16 = vor.u32 %v13417_v63, %v11679_v15  ;;  %v14424_v31 = vpop.f32.mrf.mxu0  ;;  %v13441_v6 = vld [vmem:[#allocation8 + $0x96c] sm:$0xf0]  ;;  %v11631_v48 = vld [vmem:[#allocation8 + $0x840] sm:$0xf] }
 0x2b4   : > { %v13473_v39 = vld [vmem:[#allocation8 + $0xa6c] sm:$0xf0]  ;;  %v11759_v56 = vld [vmem:[#allocation8 + $0x940] sm:$0xf] }
 0x2b5   : > { %7547 = vmatpush.bf16.msrb.mxu3 %v11488_v21  ;;  %7522 = vmatpush.bf16.msrb.mxu1 %v11216_v13  ;;  %v11791_v21 = vld [vmem:[#allocation8 + $0x980] sm:$0xf]  ;;  %v14426_v13 = vpop.f32.mrf.mxu1  ;;  %v13405_v49 = vld [vmem:[#allocation8 + $0x84c] sm:$0xf0] }
 0x2b6   : > { %7510 = vmatmul.bf16.vlgmr.msrb.gmra.mxu0 %v14412_v61  ;;  %v11792_v32 = vor.u32 %v13445_v24, %v11791_v21  ;;  %v13437_v51 = vld [vmem:[#allocation8 + $0x94c] sm:$0xf0]  ;;  %v11887_v54 = vld [vmem:[#allocation8 + $0xa40] sm:$0xf] }
 0x2b7   : > { %7535 = vmatpush.bf16.msrb.mxu2 %v11344_v38  ;;  %7554 = vmatpush.bf16.msra.mxu0 %v11712_v44  ;;  %v12048_v38 = vor.u32 %v13509_v29, %v12047_v28  ;;  %v11648_v44 = vor.u32 %v13409_v35, %v11647_v34  ;;  %v13469_v9 = vld [vmem:[#allocation8 + $0xa4c] sm:$0xf0]  ;;  %v11760_v63 = vor.u32 %v13437_v51, %v11759_v56  ;;  %v11743_v7 = vld [vmem:[#allocation8 + $0x920] sm:$0xf]  ;;  %v4346_v51 = vmax.f32 %v14378_v42, 0.0 }
 0x2b8   : > { %7523 = vmatmul.bf16.vlgmr.msrb.gmra.mxu1 %v14414_v2  ;;  %v11888_v1 = vor.u32 %v13469_v9, %v11887_v54  ;;  %v13401_v5 = vld [vmem:[#allocation8 + $0x82c] sm:$0xf0]  ;;  %v11599_v21 = vld [vmem:[#allocation8 + $0x800] sm:$0xf]  ;;  %v4347_v54 = vmax.f32 %v14385_v43, 0.0 }
 0x2b9   : > { %7548 = vmatpush.bf16.msrb.mxu3 %v11472_v41  ;;  %7567 = vmatpush.bf16.msra.mxu1 %v11840_v45  ;;  %v13505_v41 = vld [vmem:[#allocation8 + $0xb6c] sm:$0xf0]  ;;  %v11776_v45 = vor.u32 %v13441_v6, %v11775_v36  ;;  %v14430_v55 = vpop.f32.mrf.mxu3  ;;  %v11727_v27 = vld [vmem:[#allocation8 + $0x900] sm:$0xf] }
 0x2ba   : > { %7536 = vmatmul.bf16.vlgmr.msrb.gmra.mxu2 %v14416_v60  ;;  %v12032_v50 = vor.u32 %v13505_v41, %v12031_v40  ;;  %v13433_v14 = vld [vmem:[#allocation8 + $0x92c] sm:$0xf0]  ;;  %v11855_v29 = vld [vmem:[#allocation8 + $0xa00] sm:$0xf] }
 0x2bb   : > { %7580 = vmatpush.bf16.msra.mxu2 %v11968_v47  ;;  %7555 = vmatpush.bf16.msra.mxu0 %v11696_v58  ;;  %v11904_v47 = vor.u32 %v13473_v39, %v11903_v37  ;;  %v12015_v58 = vld [vmem:[#allocation8 + $0xb40] sm:$0xf]  ;;  %v4191_v15 = vpop.f32.mrf.mxu0  ;;  %v13497_v19 = vld [vmem:[#allocation8 + $0xb2c] sm:$0xf0]  ;;  %v11744_v24 = vor.u32 %v13433_v14, %v11743_v7  ;;  %v14440_v14 = vpack.c.bf16 %v4346_v51, %v4346_v51 }
 0x2bc   : > { %7549 = vmatmul.bf16.vlgmr.msrb.gmra.mxu3 %v14418_v25  ;;  %v13429_v28 = vld [vmem:[#allocation8 + $0x90c] sm:$0xf0]  ;;  %v11983_v34 = vld [vmem:[#allocation8 + $0xb00] sm:$0xf] }
 0x2bd   : > { %7593 = vmatpush.bf16.msra.mxu3 %v12096_v57  ;;  %7568 = vmatpush.bf16.msra.mxu1 %v11824_v8  ;;  %v14428_v57 = vpop.f32.mrf.mxu2  ;;  %v13501_v8 = vld [vmem:[#allocation8 + $0xb4c] sm:$0xf0]  ;;  %v4204_v10 = vpop.f32.mrf.mxu1  ;;  %v12351_v37 = vld [vmem:[#allocation8 + $0xde0] sm:$0xf] }
 0x2be   : > { %v12016_v12 = vor.u32 %v13501_v8, %v12015_v58  ;;  %v13493_v35 = vld [vmem:[#allocation8 + $0xb0c] sm:$0xf0]  ;;  %v12479_v41 = vld [vmem:[#allocation8 + $0xee0] sm:$0xf] }
 0x2bf   : > { %7581 = vmatpush.bf16.msra.mxu2 %v11952_v62  ;;  %7556 = vmatpush.bf16.msra.mxu0 %v11680_v16  ;;  %v11632_v62 = vor.u32 %v13405_v49, %v11631_v48  ;;  %v11871_v16 = vld [vmem:[#allocation8 + $0xa20] sm:$0xf]  ;;  %v13553_v6 = vld [vmem:[#allocation8 + $0xcec] sm:$0xf0]  ;;  %v11728_v48 = vor.u32 %v13429_v28, %v11727_v27  ;;  %v11984_v9 = vor.u32 %v13493_v35, %v11983_v34 }
 0x2c0   : > { %v13585_v40 = vld [vmem:[#allocation8 + $0xdec] sm:$0xf0]  ;;  %v12607_v56 = vld [vmem:[#allocation8 + $0xfe0] sm:$0xf] }
 0x2c1   : > { %7594 = vmatpush.bf16.msra.mxu3 %v12080_v4  ;;  %7569 = vmatpush.bf16.msra.mxu1 %v11808_v17  ;;  %v11615_v4 = vld [vmem:[#allocation8 + $0x820] sm:$0xf]  ;;  %v13465_v17 = vld [vmem:[#allocation8 + $0xa2c] sm:$0xf0]  ;;  %v4230_v36 = vpop.f32.mrf.mxu3  ;;  %v12352_v8 = vor.u32 %v13585_v40, %v12351_v37 }
 0x2c2   : > { %v11616_v20 = vor.u32 %v13401_v5, %v11615_v4  ;;  %v11872_v26 = vor.u32 %v13465_v17, %v11871_v16  ;;  %v12207_v15 = vld [vmem:[#allocation8 + $0xcc0] sm:$0xf]  ;;  %v13613_v5 = vld [vmem:[#allocation8 + $0xecc] sm:$0xf0] }
 0x2c3   : > { %7582 = vmatpush.bf16.msra.mxu2 %v11936_v18  ;;  %7557 = vmatpush.bf16.msra.mxu0 %v11664_v30  ;;  %v11999_v18 = vld [vmem:[#allocation8 + $0xb20] sm:$0xf]  ;;  %v13645_v10 = vld [vmem:[#allocation8 + $0xfcc] sm:$0xf0] }
 0x2c4   : > { %v12463_v4 = vld [vmem:[#allocation8 + $0xec0] sm:$0xf]  ;;  %v13609_v27 = vld [vmem:[#allocation8 + $0xeac] sm:$0xf0] }
 0x2c5   : > { %7595 = vmatpush.bf16.msra.mxu3 %v12064_v22  ;;  %7570 = vmatpush.bf16.msra.mxu1 %v11792_v32  ;;  %v13397_v22 = vld [vmem:[#allocation8 + $0x80c] sm:$0xf0]  ;;  %v4217_v30 = vpop.f32.mrf.mxu2  ;;  %v12000_v32 = vor.u32 %v13497_v19, %v11999_v18  ;;  %v12591_v7 = vld [vmem:[#allocation8 + $0xfc0] sm:$0xf]  ;;  %v12464_v17 = vor.u32 %v13613_v5, %v12463_v4 }
 0x2c6   : > { %v11600_v39 = vor.u32 %v13397_v22, %v11599_v21  ;;  %v12191_v18 = vld [vmem:[#allocation8 + $0xca0] sm:$0xf]  ;;  %v13545_v19 = vld [vmem:[#allocation8 + $0xcac] sm:$0xf0]  ;;  %v14442_v21 = vpack.c.bf16 %v4347_v54, %v4347_v54  ;;  %v12592_v22 = vor.u32 %v13645_v10, %v12591_v7 }
 0x2c7   : > { %7583 = vmatpush.bf16.msra.mxu2 %v11920_v33  ;;  %7558 = vmatpush.bf16.msra.mxu0 %v11648_v44  ;;  %v13461_v33 = vld [vmem:[#allocation8 + $0xa0c] sm:$0xf0]  ;;  %v12575_v28 = vld [vmem:[#allocation8 + $0xfa0] sm:$0xf]  ;;  %v12192_v30 = vor.u32 %v13545_v19, %v12191_v18 }
 0x2c8   : > { %v13617_v44 = vld [vmem:[#allocation8 + $0xeec] sm:$0xf0]  ;;  %v11856_v49 = vor.u32 %v13461_v33, %v11855_v29  ;;  %v925_v33 = vperm.slane %v14403_v3, 5  ;;  %v12431_v40 = vld [vmem:[#allocation8 + $0xe80] sm:$0xf] }
 0x2c9   : > { %7596 = vmatpush.bf16.msra.mxu3 %v12048_v38  ;;  %7571 = vmatpush.bf16.msra.mxu1 %v11776_v45  ;;  %v12223_v38 = vld [vmem:[#allocation8 + $0xce0] sm:$0xf]  ;;  %v4344_v45 = vmax.f32 %v14364_v11, 0.0  ;;  %v13641_v29 = vld [vmem:[#allocation8 + $0xfac] sm:$0xf0] }
 0x2ca   : > { %v12224_v58 = vor.u32 %v13553_v6, %v12223_v38  ;;  %v12335_v11 = vld [vmem:[#allocation8 + $0xdc0] sm:$0xf]  ;;  %v13541_v36 = vld [vmem:[#allocation8 + $0xc8c] sm:$0xf0]  ;;  %v926_v6 = vperm.slane %v14403_v3, 6  ;;  %v12576_v37 = vor.u32 %v13641_v29, %v12575_v28 }
 0x2cb   : > { %7584 = vmatpush.bf16.msra.mxu2 %v11904_v47  ;;  %7559 = vmatpush.bf16.msra.mxu0 %v11632_v62  ;;  %v4345_v47 = vmax.f32 %v14371_v23, 0.0  ;;  %v12480_v62 = vor.u32 %v13617_v44, %v12479_v41  ;;  %v14436_v42 = vpack.c.bf16 %v4344_v45, %v4344_v45  ;;  %v12303_v38 = vld [vmem:[#allocation8 + $0xd80] sm:$0xf]  ;;  %v13605_v41 = vld [vmem:[#allocation8 + $0xe8c] sm:$0xf0] }
 0x2cc   : > { %v12559_v44 = vld [vmem:[#allocation8 + $0xf80] sm:$0xf]  ;;  %v13637_v45 = vld [vmem:[#allocation8 + $0xf8c] sm:$0xf0] }
 0x2cd   : > { %7597 = vmatpush.bf16.msra.mxu3 %v12032_v50  ;;  %7572 = vmatpush.bf16.msra.mxu1 %v11760_v63  ;;  %v13649_v50 = vld [vmem:[#allocation8 + $0xfec] sm:$0xf0]  ;;  %v14438_v43 = vpack.c.bf16 %v4345_v47, %v4345_v47  ;;  %v12287_v54 = vld [vmem:[#allocation8 + $0xd60] sm:$0xf] }
 0x2ce   : > { %v13549_v63 = vld [vmem:[#allocation8 + $0xccc] sm:$0xf0]  ;;  %v12608_v23 = vor.u32 %v13649_v50, %v12607_v56  ;;  %v12432_v56 = vor.u32 %v13605_v41, %v12431_v40  ;;  %v12159_v50 = vld [vmem:[#allocation8 + $0xc60] sm:$0xf] }
 0x2cf   : > { %7585 = vmatpush.bf16.msra.mxu2 %v11888_v1  ;;  %7560 = vmatpush.bf16.msra.mxu0 %v11616_v20  ;;  %v13581_v1 = vld [vmem:[#allocation8 + $0xdcc] sm:$0xf0]  ;;  %v12319_v20 = vld [vmem:[#allocation8 + $0xda0] sm:$0xf] }
 0x2d0   : > { %v12336_v16 = vor.u32 %v13581_v1, %v12335_v11  ;;  %v13537_v51 = vld [vmem:[#allocation8 + $0xc6c] sm:$0xf0]  ;;  %v12383_v40 = vld [vmem:[#allocation8 + $0xe20] sm:$0xf] }
 0x2d1   : > { %7598 = vmatpush.bf16.msra.mxu3 %v12016_v12  ;;  %7573 = vmatpush.bf16.msra.mxu1 %v11744_v24  ;;  %v12208_v12 = vor.u32 %v13549_v63, %v12207_v15  ;;  %v13577_v24 = vld [vmem:[#allocation8 + $0xdac] sm:$0xf0]  ;;  %v12415_v63 = vld [vmem:[#allocation8 + $0xe60] sm:$0xf]  ;;  %v12160_v4 = vor.u32 %v13537_v51, %v12159_v50 }
 0x2d2   : > { %v12320_v34 = vor.u32 %v13577_v24, %v12319_v20  ;;  %v13569_v15 = vld [vmem:[#allocation8 + $0xd6c] sm:$0xf0] }
 0x2d3   : > { %7586 = vmatpush.bf16.msra.mxu2 %v11872_v26  ;;  %7561 = vmatpush.bf16.msra.mxu0 %v11600_v39  ;;  %v12447_v26 = vld [vmem:[#allocation8 + $0xea0] sm:$0xf]  ;;  %v13573_v39 = vld [vmem:[#allocation8 + $0xd8c] sm:$0xf0]  ;;  %v12288_v5 = vor.u32 %v13569_v15, %v12287_v54 }
 0x2d4   : > { %v12448_v35 = vor.u32 %v13609_v27, %v12447_v26  ;;  %v13601_v11 = vld [vmem:[#allocation8 + $0xe6c] sm:$0xf0]  ;;  %v12527_v27 = vld [vmem:[#allocation8 + $0xf40] sm:$0xf] }
 0x2d5   : > { %7599 = vmatpush.bf16.msra.mxu3 %v12000_v32  ;;  %7574 = vmatpush.bf16.msra.mxu1 %v11728_v48  ;;  %v12175_v32 = vld [vmem:[#allocation8 + $0xc80] sm:$0xf]  ;;  %v4241_v48 = vpop.f32.mrf.mxu0  ;;  %v13633_v1 = vld [vmem:[#allocation8 + $0xf6c] sm:$0xf0]  ;;  %v12416_v7 = vor.u32 %v13601_v11, %v12415_v63 }
 0x2d6   : > { %7562 = vmatmul.bf16.vlgmr.msra.gmra.mxu0 %v14436_v42  ;;  %v12176_v47 = vor.u32 %v13541_v36, %v12175_v32  ;;  %v13565_v20 = vld [vmem:[#allocation8 + $0xd4c] sm:$0xf0]  ;;  %v12239_v54 = vld [vmem:[#allocation8 + $0xd00] sm:$0xf] }
 0x2d7   : > { %7587 = vmatpush.bf16.msra.mxu2 %v11856_v49  ;;  %7606 = vmatpush.bf16.msrb.mxu0 %v12224_v58  ;;  %v12304_v49 = vor.u32 %v13573_v39, %v12303_v38  ;;  %v4254_v58 = vpop.f32.mrf.mxu1  ;;  %v13597_v24 = vld [vmem:[#allocation8 + $0xe4c] sm:$0xf0]  ;;  %v12255_v38 = vld [vmem:[#allocation8 + $0xd20] sm:$0xf] }
 0x2d8   : > { %7575 = vmatmul.bf16.vlgmr.msra.gmra.mxu1 %v14438_v43  ;;  %v13629_v28 = vld [vmem:[#allocation8 + $0xf4c] sm:$0xf0]  ;;  %v12495_v63 = vld [vmem:[#allocation8 + $0xf00] sm:$0xf] }
 0x2d9   : > { %7600 = vmatpush.bf16.msra.mxu3 %v11984_v9  ;;  %7619 = vmatpush.bf16.msrb.mxu1 %v12352_v8  ;;  %v4242_v9 = vadd.f32 %v4241_v48, %v926_v6  ;;  %v4190_v8 = vadd.f32 %v14424_v31, %v925_v33  ;;  %v13529_v36 = vld [vmem:[#allocation8 + $0xc2c] sm:$0xf0]  ;;  %v12111_v48 = vld [vmem:[#allocation8 + $0xc00] sm:$0xf] }
 0x2da   : > { %7588 = vmatmul.bf16.vlgmr.msra.gmra.mxu2 %v14440_v14  ;;  %v4267_v18 = vpop.f32.mrf.mxu2  ;;  %v13561_v39 = vld [vmem:[#allocation8 + $0xd2c] sm:$0xf0] }
 0x2db   : > { %7632 = vmatpush.bf16.msrb.mxu2 %v12480_v62  ;;  %7607 = vmatpush.bf16.msrb.mxu0 %v12208_v12  ;;  %v12560_v62 = vor.u32 %v13637_v45, %v12559_v44  ;;  %v4255_v10 = vadd.f32 %v4254_v58, %v4242_v9  ;;  %v12143_v12 = vld [vmem:[#allocation8 + $0xc40] sm:$0xf]  ;;  %v4203_v31 = vadd.f32 %v14426_v13, %v4190_v8  ;;  %v13593_v41 = vld [vmem:[#allocation8 + $0xe2c] sm:$0xf0] }
 0x2dc   : > { %7601 = vmatmul.bf16.vlgmr.msra.gmra.mxu3 %v14442_v21  ;;  %v4280_v26 = vpop.f32.mrf.mxu3  ;;  %v12511_v44 = vld [vmem:[#allocation8 + $0xf20] sm:$0xf]  ;;  %v13625_v45 = vld [vmem:[#allocation8 + $0xf2c] sm:$0xf0]  ;;  %v12256_v50 = vor.u32 %v13561_v39, %v12255_v38  ;;  %v12384_v51 = vor.u32 %v13593_v41, %v12383_v40 }
 0x2dd   : > { %7645 = vmatpush.bf16.msrb.mxu3 %v12608_v23  ;;  %7620 = vmatpush.bf16.msrb.mxu1 %v12336_v16  ;;  %v12543_v23 = vld [vmem:[#allocation8 + $0xf60] sm:$0xf]  ;;  %v13533_v16 = vld [vmem:[#allocation8 + $0xc4c] sm:$0xf0]  ;;  %v4216_v6 = vadd.f32 %v14428_v57, %v4203_v31 }
 0x2de   : > { %v12544_v19 = vor.u32 %v13633_v1, %v12543_v23  ;;  %v12144_v29 = vor.u32 %v13533_v16, %v12143_v12  ;;  %v13557_v9 = vld [vmem:[#allocation8 + $0xd0c] sm:$0xf0]  ;;  %v12367_v58 = vld [vmem:[#allocation8 + $0xe00] sm:$0xf]  ;;  %v13167_v1 = vld [vmem:[#allocation8 + $0xe4] sm:$0xf] }
 0x2df   : > { %7633 = vmatpush.bf16.msrb.mxu2 %v12464_v17  ;;  %7608 = vmatpush.bf16.msrb.mxu0 %v12192_v30  ;;  %v12271_v17 = vld [vmem:[#allocation8 + $0xd40] sm:$0xf]  ;;  %v4243_v30 = vpop.f32.mrf.mxu0  ;;  %v4256_v13 = vpop.f32.mrf.mxu1  ;;  %v4229_v8 = vadd.f32 %v14430_v55, %v4216_v6  ;;  %v13589_v15 = vld [vmem:[#allocation8 + $0xe0c] sm:$0xf0]  ;;  %v13231_v12 = vld [vmem:[#allocation8 + $0x2e4] sm:$0xf] }
 0x2e0   : > { %v12272_v32 = vor.u32 %v13565_v20, %v12271_v17  ;;  %v13621_v11 = vld [vmem:[#allocation8 + $0xf0c] sm:$0xf0]  ;;  %v10945_v16 = vld [vmem:[#allocation8 + $0x2f0] sm:$0xf0]  ;;  %v12368_v31 = vor.u32 %v13589_v15, %v12367_v58  ;;  %v13263_v55 = vld [vmem:[#allocation8 + $0x3e4] sm:$0xf] }
 0x2e1   : > { %7646 = vmatpush.bf16.msrb.mxu3 %v12592_v22  ;;  %7621 = vmatpush.bf16.msrb.mxu1 %v12320_v34  ;;  %v12399_v22 = vld [vmem:[#allocation8 + $0xe40] sm:$0xf]  ;;  %v4268_v34 = vadd.f32 %v4267_v18, %v4255_v10  ;;  %v10817_v10 = vld [vmem:[#allocation8 + $0x1f0] sm:$0xf0]  ;;  %v12240_v18 = vor.u32 %v13557_v9, %v12239_v54  ;;  %v4348_v20 = vmax.f32 %v14406_v53, 0.0  ;;  %v927_v58 = vperm.slane %v14403_v3, 7 }
 0x2e2   : > { %v12400_v33 = vor.u32 %v13597_v24, %v12399_v22  ;;  %v4269_v57 = vpop.f32.mrf.mxu2  ;;  %v4349_v22 = vmax.f32 %v4229_v8, 0.0  ;;  %v12496_v24 = vor.u32 %v13621_v11, %v12495_v63  ;;  %v10673_v30 = vld [vmem:[#allocation8 + $0xd0] sm:$0xf0]  ;;  %v13259_v13 = vld [vmem:[#allocation8 + $0x3c4] sm:$0xf] }
 0x2e3   : > { %7634 = vmatpush.bf16.msrb.mxu2 %v12448_v35  ;;  %7609 = vmatpush.bf16.msrb.mxu0 %v12176_v47  ;;  %v12127_v35 = vld [vmem:[#allocation8 + $0xc20] sm:$0xf]  ;;  %v11057_v53 = vld [vmem:[#allocation8 + $0x3d0] sm:$0xf0]  ;;  %v14457_v6 = vpack.c.bf16 %v4348_v20, %v4348_v20  ;;  %v13187_v63 = vld [vmem:[#allocation8 + $0x184] sm:$0xf] }
 0x2e4   : > { %v12128_v47 = vor.u32 %v13529_v36, %v12127_v35  ;;  %v4282_v23 = vpop.f32.mrf.mxu3  ;;  %v13227_v35 = vld [vmem:[#allocation8 + $0x2c4] sm:$0xf]  ;;  %v10929_v36 = vld [vmem:[#allocation8 + $0x2d0] sm:$0xf0]  ;;  %v14459_v39 = vpack.c.bf16 %v4349_v22, %v4349_v22 }
 0x2e5   : > { %7647 = vmatpush.bf16.msrb.mxu3 %v12576_v37  ;;  %7622 = vmatpush.bf16.msrb.mxu1 %v12304_v49  ;;  %v12528_v37 = vor.u32 %v13629_v28, %v12527_v27  ;;  %v13525_v49 = vld [vmem:[#allocation8 + $0xc0c] sm:$0xf0]  ;;  %v10948_v28 = vor.u32 %v13231_v12, %v10945_v16  ;;  %v10932_v41 = vor.u32 %v13227_v35, %v10929_v36  ;;  %v11041_v54 = vld [vmem:[#allocation8 + $0x3b0] sm:$0xf0]  ;;  %v13179_v36 = vld [vmem:[#allocation8 + $0x144] sm:$0xf] }
 0x2e6   : > { %v10641_v15 = vld [vmem:[#allocation8 + $0x90] sm:$0xf0] }
 0x2e7   : > { %7635 = vmatpush.bf16.msrb.mxu2 %v12432_v56  ;;  %7610 = vmatpush.bf16.msrb.mxu0 %v12160_v4  ;;  %v4281_v56 = vadd.f32 %v4280_v26, %v4268_v34  ;;  %v10689_v4 = vld [vmem:[#allocation8 + $0xf0] sm:$0xf0] }
 0x2e8   : > { %v10692_v26 = vor.u32 %v13167_v1, %v10689_v4  ;;  %v10801_v34 = vld [vmem:[#allocation8 + $0x1d0] sm:$0xf0]  ;;  %v13219_v1 = vld [vmem:[#allocation8 + $0x284] sm:$0xf] }
 0x2e9   : > { %7648 = vmatpush.bf16.msrb.mxu3 %v12560_v62  ;;  %7623 = vmatpush.bf16.msrb.mxu1 %v12288_v5  ;;  %v12512_v62 = vor.u32 %v13625_v45, %v12511_v44  ;;  %v13199_v5 = vld [vmem:[#allocation8 + $0x1e4] sm:$0xf]  ;;  %v4350_v17 = vmax.f32 %v4281_v56, 0.0  ;;  %v10657_v45 = vld [vmem:[#allocation8 + $0xb0] sm:$0xf0] }
 0x2ea   : > { %v10820_v27 = vor.u32 %v13199_v5, %v10817_v10  ;;  %v13159_v44 = vld [vmem:[#allocation8 + $0xa4] sm:$0xf]  ;;  %v10769_v23 = vld [vmem:[#allocation8 + $0x190] sm:$0xf0] }
 0x2eb   : > { %7636 = vmatpush.bf16.msrb.mxu2 %v12416_v7  ;;  %7611 = vmatpush.bf16.msrb.mxu0 %v12144_v29  ;;  %v12112_v7 = vor.u32 %v13525_v49, %v12111_v48  ;;  %v13163_v29 = vld [vmem:[#allocation8 + $0xc4] sm:$0xf]  ;;  %v14455_v38 = vpack.c.bf16 %v4350_v17, %v4350_v17  ;;  %v11060_v48 = vor.u32 %v13259_v13, %v11057_v53  ;;  %v10785_v49 = vld [vmem:[#allocation8 + $0x1b0] sm:$0xf0] }
 0x2ec   : > { %v13223_v56 = vld [vmem:[#allocation8 + $0x2a4] sm:$0xf]  ;;  %v10660_v9 = vor.u32 %v13159_v44, %v10657_v45  ;;  %v10897_v4 = vld [vmem:[#allocation8 + $0x290] sm:$0xf0]  ;;  %v10772_v17 = vor.u32 %v13187_v63, %v10769_v23 }
 0x2ed   : > { %7649 = vmatpush.bf16.msrb.mxu3 %v12544_v19  ;;  %7624 = vmatpush.bf16.msrb.mxu1 %v12272_v32  ;;  %v11073_v19 = vld [vmem:[#allocation8 + $0x3f0] sm:$0xf0]  ;;  %v13195_v32 = vld [vmem:[#allocation8 + $0x1c4] sm:$0xf] }
 0x2ee   : > { %v10804_v40 = vor.u32 %v13195_v32, %v10801_v34  ;;  %v11025_v10 = vld [vmem:[#allocation8 + $0x390] sm:$0xf0]  ;;  %v13147_v34 = vld [vmem:[#allocation8 + $0x44] sm:$0xf] }
 0x2ef   : > { %7637 = vmatpush.bf16.msrb.mxu2 %v12400_v33  ;;  %7612 = vmatpush.bf16.msrb.mxu0 %v12128_v47  ;;  %v11076_v33 = vor.u32 %v13263_v55, %v11073_v19  ;;  %v13191_v47 = vld [vmem:[#allocation8 + $0x1a4] sm:$0xf]  ;;  %v10625_v55 = vld [vmem:[#allocation8 + $0x70] sm:$0xf0] }
 0x2f0   : > { %v10788_v57 = vor.u32 %v13191_v47, %v10785_v49  ;;  %v13183_v19 = vld [vmem:[#allocation8 + $0x164] sm:$0xf]  ;;  %v10753_v22 = vld [vmem:[#allocation8 + $0x170] sm:$0xf0] }
 0x2f1   : > { %7650 = vmatpush.bf16.msrb.mxu3 %v12528_v37  ;;  %7625 = vmatpush.bf16.msrb.mxu1 %v12256_v50  ;;  %v10676_v37 = vor.u32 %v13163_v29, %v10673_v30  ;;  %v10913_v50 = vld [vmem:[#allocation8 + $0x2b0] sm:$0xf0]  ;;  %v10756_v32 = vor.u32 %v13183_v19, %v10753_v22  ;;  %v13207_v63 = vld [vmem:[#allocation8 + $0x224] sm:$0xf] }
 0x2f2   : > { %v10916_v8 = vor.u32 %v13223_v56, %v10913_v50  ;;  %v11009_v29 = vld [vmem:[#allocation8 + $0x370] sm:$0xf0] }
 0x2f3   : > { %7638 = vmatpush.bf16.msrb.mxu2 %v12384_v51  ;;  %7613 = vmatpush.bf16.msrb.mxu0 %v12112_v7  ;;  %v13255_v51 = vld [vmem:[#allocation8 + $0x3a4] sm:$0xf]  ;;  %v4293_v5 = vpop.f32.mrf.mxu0  ;;  %v10609_v35 = vld [vmem:[#allocation8 + $0x50] sm:$0xf0] }
 0x2f4   : > { %v11044_v11 = vor.u32 %v13255_v51, %v11041_v54  ;;  %v13251_v7 = vld [vmem:[#allocation8 + $0x384] sm:$0xf]  ;;  %v4294_v12 = vadd.f32 %v4293_v5, %v927_v58  ;;  %v10865_v44 = vld [vmem:[#allocation8 + $0x250] sm:$0xf0]  ;;  %v10612_v56 = vor.u32 %v13147_v34, %v10609_v35 }
 0x2f5   : > { %7651 = vmatpush.bf16.msrb.mxu3 %v12512_v62  ;;  %7626 = vmatpush.bf16.msrb.mxu1 %v12240_v18  ;;  %v13155_v62 = vld [vmem:[#allocation8 + $0x84] sm:$0xf]  ;;  %v4306_v3 = vpop.f32.mrf.mxu1  ;;  %v10900_v18 = vor.u32 %v13219_v1, %v10897_v4  ;;  %v11028_v20 = vor.u32 %v13251_v7, %v11025_v10  ;;  %v10993_v49 = vld [vmem:[#allocation8 + $0x350] sm:$0xf0] }
 0x2f6   : > { %7614 = vmatmul.bf16.vlgmr.msrb.gmra.mxu0 %v14457_v6  ;;  %v10644_v16 = vor.u32 %v13155_v62, %v10641_v15  ;;  %v13143_v58 = vld [vmem:[#allocation8 + $0x24] sm:$0xf]  ;;  %v10721_v15 = vld [vmem:[#allocation8 + $0x130] sm:$0xf0] }
 0x2f7   : > { %7639 = vmatpush.bf16.msrb.mxu2 %v12368_v31  ;;  %7658 = vmatpush.bf16.msra.mxu0 %v10692_v26  ;;  %v13151_v31 = vld [vmem:[#allocation8 + $0x64] sm:$0xf]  ;;  %v10881_v26 = vld [vmem:[#allocation8 + $0x270] sm:$0xf0] }
 0x2f8   : > { %7627 = vmatmul.bf16.vlgmr.msrb.gmra.mxu1 %v14459_v39  ;;  %v10628_v30 = vor.u32 %v13151_v31, %v10625_v55  ;;  %v13239_v1 = vld [vmem:[#allocation8 + $0x324] sm:$0xf]  ;;  %v10977_v4 = vld [vmem:[#allocation8 + $0x330] sm:$0xf0] }
 0x2f9   : > { %7652 = vmatpush.bf16.msrb.mxu3 %v12496_v24  ;;  %7671 = vmatpush.bf16.msra.mxu1 %v10820_v27  ;;  %v13215_v24 = vld [vmem:[#allocation8 + $0x264] sm:$0xf]  ;;  %v4307_v27 = vadd.f32 %v4306_v3, %v4294_v12  ;;  %v10577_v10 = vld [vmem:[#allocation8 + $0x10] sm:$0xf0]  ;;  %v10980_v55 = vor.u32 %v13239_v1, %v10977_v4 }
 0x2fa   : > { %7640 = vmatmul.bf16.vlgmr.msrb.gmra.mxu2 %v14455_v38  ;;  %v13139_v7 = vld [vmem:[#allocation8 + $0x4] sm:$0xf]  ;;  %v10833_v22 = vld [vmem:[#allocation8 + $0x210] sm:$0xf0] }
 0x2fb   : > { %7684 = vmatpush.bf16.msra.mxu2 %v10948_v28  ;;  %7659 = vmatpush.bf16.msra.mxu0 %v10676_v37  ;;  %v13247_v28 = vld [vmem:[#allocation8 + $0x364] sm:$0xf]  ;;  %v4295_v47 = vpop.f32.mrf.mxu0  ;;  %v11457_v34 = vld [vmem:[#allocation8 + $0x6f0] sm:$0xf0] }
 0x2fc   : > { %v11012_v13 = vor.u32 %v13247_v28, %v11009_v29  ;;  %v13203_v31 = vld [vmem:[#allocation8 + $0x204] sm:$0xf]  ;;  %v11201_v28 = vld [vmem:[#allocation8 + $0x4f0] sm:$0xf0] }
 0x2fd   : > { %7697 = vmatpush.bf16.msra.mxu3 %v11076_v33  ;;  %7672 = vmatpush.bf16.msra.mxu1 %v10804_v40  ;;  %v10884_v33 = vor.u32 %v13215_v24, %v10881_v26  ;;  %v4319_v53 = vpop.f32.mrf.mxu2  ;;  %v10737_v40 = vld [vmem:[#allocation8 + $0x150] sm:$0xf0]  ;;  %v4308_v51 = vpop.f32.mrf.mxu1  ;;  %v13235_v24 = vld [vmem:[#allocation8 + $0x304] sm:$0xf] }
 0x2fe   : > { %v4320_v45 = vadd.f32 %v4319_v53, %v4307_v27  ;;  %v10740_v54 = vor.u32 %v13179_v36, %v10737_v40  ;;  %v10961_v26 = vld [vmem:[#allocation8 + $0x310] sm:$0xf0]  ;;  %v13295_v27 = vld [vmem:[#allocation8 + $0x4e4] sm:$0xf]  ;;  %v10836_v36 = vor.u32 %v13203_v31, %v10833_v22 }
 0x2ff   : > { %7685 = vmatpush.bf16.msra.mxu2 %v10932_v41  ;;  %7660 = vmatpush.bf16.msra.mxu0 %v10660_v9  ;;  %v4332_v37 = vpop.f32.mrf.mxu3  ;;  %v13211_v41 = vld [vmem:[#allocation8 + $0x244] sm:$0xf]  ;;  %v11585_v53 = vld [vmem:[#allocation8 + $0x7f0] sm:$0xf0]  ;;  %v11204_v40 = vor.u32 %v13295_v27, %v11201_v28 }
 0x300   : > { %v4333_v50 = vadd.f32 %v4332_v37, %v4320_v45  ;;  %v10868_v9 = vor.u32 %v13211_v41, %v10865_v44  ;;  %v13327_v29 = vld [vmem:[#allocation8 + $0x5e4] sm:$0xf]  ;;  %v10964_v37 = vor.u32 %v13235_v24, %v10961_v26  ;;  %v11185_v47 = vld [vmem:[#allocation8 + $0x4d0] sm:$0xf0] }
 0x301   : > { %7698 = vmatpush.bf16.msra.mxu3 %v11060_v48  ;;  %7673 = vmatpush.bf16.msra.mxu1 %v10788_v57  ;;  %v13243_v48 = vld [vmem:[#allocation8 + $0x344] sm:$0xf]  ;;  %v10593_v57 = vld [vmem:[#allocation8 + $0x30] sm:$0xf0] }
 0x302   : > { %v10996_v62 = vor.u32 %v13243_v48, %v10993_v49  ;;  %v4351_v23 = vmax.f32 %v4333_v50, 0.0  ;;  %v10596_v5 = vor.u32 %v13143_v58, %v10593_v57  ;;  %v13291_v45 = vld [vmem:[#allocation8 + $0x4c4] sm:$0xf]  ;;  %v11441_v51 = vld [vmem:[#allocation8 + $0x6d0] sm:$0xf0] }
 0x303   : > { %7686 = vmatpush.bf16.msra.mxu2 %v10916_v8  ;;  %7661 = vmatpush.bf16.msra.mxu0 %v10644_v16  ;;  %v13175_v8 = vld [vmem:[#allocation8 + $0x124] sm:$0xf]  ;;  %v11188_v58 = vor.u32 %v13291_v45, %v11185_v47  ;;  %v11297_v1 = vld [vmem:[#allocation8 + $0x5b0] sm:$0xf0] }
 0x304   : > { %v14465_v12 = vpack.c.bf16 %v4351_v23, %v4351_v23  ;;  %v10724_v16 = vor.u32 %v13175_v8, %v10721_v15  ;;  %v13323_v48 = vld [vmem:[#allocation8 + $0x5c4] sm:$0xf]  ;;  %v11169_v15 = vld [vmem:[#allocation8 + $0x4b0] sm:$0xf0] }
 0x305   : > { %7699 = vmatpush.bf16.msra.mxu3 %v11044_v11  ;;  %7674 = vmatpush.bf16.msra.mxu1 %v10772_v17  ;;  %v10849_v11 = vld [vmem:[#allocation8 + $0x230] sm:$0xf0]  ;;  %v13171_v17 = vld [vmem:[#allocation8 + $0x104] sm:$0xf]  ;;  %v4321_v19 = vpop.f32.mrf.mxu2 }
 0x306   : > { %v10852_v3 = vor.u32 %v13207_v63, %v10849_v11  ;;  %7653 = vmatmul.bf16.vlgmr.msrb.gmra.mxu3 %v14465_v12  ;;  %v13355_v50 = vld [vmem:[#allocation8 + $0x6c4] sm:$0xf]  ;;  %v4880_v11 = vld [vmem:[#allocation10] sm:$0xf]  ;;  %v11281_v22 = vld [vmem:[#allocation8 + $0x590] sm:$0xf0] }
 0x307   : > { %7687 = vmatpush.bf16.msra.mxu2 %v10900_v18  ;;  %7662 = vmatpush.bf16.msra.mxu0 %v10628_v30  ;;  %v10705_v18 = vld [vmem:[#allocation8 + $0x110] sm:$0xf0]  ;;  %v10580_v30 = vor.u32 %v13139_v7, %v10577_v10  ;;  %v13287_v57 = vld [vmem:[#allocation8 + $0x4a4] sm:$0xf] }
 0x308   : > { %v10708_v35 = vor.u32 %v13171_v17, %v10705_v18  ;;  %v13319_v63 = vld [vmem:[#allocation8 + $0x5a4] sm:$0xf]  ;;  %v11553_v10 = vld [vmem:[#allocation8 + $0x7b0] sm:$0xf0] }
 0x309   : > { %7700 = vmatpush.bf16.msra.mxu3 %v11028_v20  ;;  %7675 = vmatpush.bf16.msra.mxu1 %v10756_v32  ;;  %v4334_v20 = vpop.f32.mrf.mxu3  ;;  %v11329_v32 = vld [vmem:[#allocation8 + $0x5f0] sm:$0xf0]  ;;  %v13351_v4 = vld [vmem:[#allocation8 + $0x6a4] sm:$0xf]  ;;  %v11300_v17 = vor.u32 %v13319_v63, %v11297_v1 }
 0x30a   : > { %v11332_v41 = vor.u32 %v13327_v29, %v11329_v32  ;;  %v13383_v7 = vld [vmem:[#allocation8 + $0x7a4] sm:$0xf]  ;;  %v11409_v26 = vld [vmem:[#allocation8 + $0x690] sm:$0xf0] }
 0x30b   : > { %7688 = vmatpush.bf16.msra.mxu2 %v10884_v33  ;;  %7663 = vmatpush.bf16.msra.mxu0 %v10612_v56  ;;  %v13359_v33 = vld [vmem:[#allocation8 + $0x6e4] sm:$0xf]  ;;  %v11313_v56 = vld [vmem:[#allocation8 + $0x5d0] sm:$0xf0]  ;;  %v11556_v20 = vor.u32 %v13383_v7, %v11553_v10 }
 0x30c   : > { %v11460_v44 = vor.u32 %v13359_v33, %v11457_v34  ;;  %v11316_v8 = vor.u32 %v13323_v48, %v11313_v56  ;;  %v13283_v31 = vld [vmem:[#allocation8 + $0x484] sm:$0xf]  ;;  %v11537_v29 = vld [vmem:[#allocation8 + $0x790] sm:$0xf0] }
 0x30d   : > { %7701 = vmatpush.bf16.msra.mxu3 %v11012_v13  ;;  %7676 = vmatpush.bf16.msra.mxu1 %v10740_v54  ;;  %v13391_v13 = vld [vmem:[#allocation8 + $0x7e4] sm:$0xf]  ;;  %v11393_v45 = vld [vmem:[#allocation8 + $0x670] sm:$0xf0] }
 0x30e   : > { %v11588_v49 = vor.u32 %v13391_v13, %v11585_v53  ;;  %v13387_v54 = vld [vmem:[#allocation8 + $0x7c4] sm:$0xf]  ;;  %v11137_v13 = vld [vmem:[#allocation8 + $0x470] sm:$0xf0] }
 0x30f   : > { %7689 = vmatpush.bf16.msra.mxu2 %v10868_v9  ;;  %7664 = vmatpush.bf16.msra.mxu0 %v10596_v5  ;;  %v11569_v9 = vld [vmem:[#allocation8 + $0x7d0] sm:$0xf0]  ;;  %v13315_v19 = vld [vmem:[#allocation8 + $0x584] sm:$0xf] }
 0x310   : > { %v11572_v23 = vor.u32 %v13387_v54, %v11569_v9  ;;  %v11425_v5 = vld [vmem:[#allocation8 + $0x6b0] sm:$0xf0]  ;;  %v13347_v24 = vld [vmem:[#allocation8 + $0x684] sm:$0xf]  ;;  %v11284_v34 = vor.u32 %v13315_v19, %v11281_v22 }
 0x311   : > { %7702 = vmatpush.bf16.msra.mxu3 %v10996_v62  ;;  %7677 = vmatpush.bf16.msra.mxu1 %v10724_v16  ;;  %v11444_v62 = vor.u32 %v13355_v50, %v11441_v51  ;;  %v11172_v16 = vor.u32 %v13287_v57, %v11169_v15  ;;  %v11428_v18 = vor.u32 %v13351_v4, %v11425_v5  ;;  %v13379_v28 = vld [vmem:[#allocation8 + $0x784] sm:$0xf]  ;;  %v11521_v48 = vld [vmem:[#allocation8 + $0x770] sm:$0xf0] }
 0x312   : > { %v13311_v53 = vld [vmem:[#allocation8 + $0x564] sm:$0xf]  ;;  %v11121_v54 = vld [vmem:[#allocation8 + $0x450] sm:$0xf0] }
 0x313   : > { %7690 = vmatpush.bf16.msra.mxu2 %v10852_v3  ;;  %7665 = vmatpush.bf16.msra.mxu0 %v10580_v30  ;;  %v4882_v3 = vperm.slane %v4880_v11, 0  ;;  %v7459_v27 = vpop.f32.mrf.mxu0  ;;  %v13375_v47 = vld [vmem:[#allocation8 + $0x764] sm:$0xf]  ;;  %v11377_v15 = vld [vmem:[#allocation8 + $0x650] sm:$0xf0] }
 0x314   : > { %v13275_v51 = vld [vmem:[#allocation8 + $0x444] sm:$0xf]  ;;  %v11505_v4 = vld [vmem:[#allocation8 + $0x750] sm:$0xf0] }
 0x315   : > { %7703 = vmatpush.bf16.msra.mxu3 %v10980_v55  ;;  %7678 = vmatpush.bf16.msra.mxu1 %v10708_v35  ;;  %v11153_v55 = vld [vmem:[#allocation8 + $0x490] sm:$0xf0]  ;;  %v7460_v30 = vadd.f32 %v7459_v27, %v4882_v3  ;;  %v7472_v32 = vpop.f32.mrf.mxu1  ;;  %v11412_v35 = vor.u32 %v13347_v24, %v11409_v26  ;;  %v13307_v9 = vld [vmem:[#allocation8 + $0x544] sm:$0xf]  ;;  %v11124_v7 = vor.u32 %v13275_v51, %v11121_v54 }
 0x316   : > { %7666 = vmatmul.bf16.vlgmr.msra.gmra.mxu0 %v14391_v0  ;;  %v11156_v33 = vor.u32 %v13283_v31, %v11153_v55  ;;  %v13371_v1 = vld [vmem:[#allocation8 + $0x744] sm:$0xf]  ;;  %v11233_v19 = vld [vmem:[#allocation8 + $0x530] sm:$0xf0] }
 0x317   : > { %7691 = vmatpush.bf16.msra.mxu2 %v10836_v36  ;;  %7710 = vmatpush.bf16.msrb.mxu0 %v11204_v40  ;;  %v13279_v36 = vld [vmem:[#allocation8 + $0x464] sm:$0xf]  ;;  %v11540_v40 = vor.u32 %v13379_v28, %v11537_v29  ;;  %v11508_v55 = vor.u32 %v13371_v1, %v11505_v4  ;;  %v11361_v22 = vld [vmem:[#allocation8 + $0x630] sm:$0xf0] }
 0x318   : > { %7679 = vmatmul.bf16.vlgmr.msra.gmra.mxu1 %v14393_v59  ;;  %v13303_v31 = vld [vmem:[#allocation8 + $0x524] sm:$0xf]  ;;  %v11489_v26 = vld [vmem:[#allocation8 + $0x730] sm:$0xf0] }
 0x319   : > { %7704 = vmatpush.bf16.msra.mxu3 %v10964_v37  ;;  %7723 = vmatpush.bf16.msrb.mxu1 %v11332_v41  ;;  %v7473_v37 = vadd.f32 %v7472_v32, %v7460_v30  ;;  %v11265_v41 = vld [vmem:[#allocation8 + $0x570] sm:$0xf0]  ;;  %v13367_v24 = vld [vmem:[#allocation8 + $0x724] sm:$0xf]  ;;  %v11236_v30 = vor.u32 %v13303_v31, %v11233_v19 }
 0x31a   : > { %7692 = vmatmul.bf16.vlgmr.msra.gmra.mxu2 %v14395_v46  ;;  %v11268_v56 = vor.u32 %v13311_v53, %v11265_v41  ;;  %v13267_v28 = vld [vmem:[#allocation8 + $0x404] sm:$0xf]  ;;  %v11089_v29 = vld [vmem:[#allocation8 + $0x410] sm:$0xf0] }
 0x31b   : > { %7736 = vmatpush.bf16.msrb.mxu2 %v11460_v44  ;;  %7711 = vmatpush.bf16.msrb.mxu0 %v11188_v58  ;;  %v13343_v44 = vld [vmem:[#allocation8 + $0x664] sm:$0xf]  ;;  %v11524_v58 = vor.u32 %v13375_v47, %v11521_v48  ;;  %v11345_v53 = vld [vmem:[#allocation8 + $0x610] sm:$0xf0]  ;;  %v11092_v48 = vor.u32 %v13267_v28, %v11089_v29 }
 0x31c   : > { %7705 = vmatmul.bf16.vlgmr.msra.gmra.mxu3 %v14397_v52  ;;  %v11396_v50 = vor.u32 %v13343_v44, %v11393_v45  ;;  %v13423_v44 = vld [vmem:[#allocation8 + $0x8e4] sm:$0xf]  ;;  %v11713_v45 = vld [vmem:[#allocation8 + $0x8f0] sm:$0xf0] }
 0x31d   : > { %7749 = vmatpush.bf16.msrb.mxu3 %v11588_v49  ;;  %7724 = vmatpush.bf16.msrb.mxu1 %v11316_v8  ;;  %v11140_v49 = vor.u32 %v13279_v36, %v11137_v13  ;;  %v7485_v57 = vpop.f32.mrf.mxu2  ;;  %v11249_v8 = vld [vmem:[#allocation8 + $0x550] sm:$0xf0]  ;;  %v7474_v5 = vpop.f32.mrf.mxu1  ;;  %v11492_v36 = vor.u32 %v13367_v24, %v11489_v26  ;;  %v13455_v47 = vld [vmem:[#allocation8 + $0x9e4] sm:$0xf] }
 0x31e   : > { %v7486_v63 = vadd.f32 %v7485_v57, %v7473_v37  ;;  %v13363_v37 = vld [vmem:[#allocation8 + $0x704] sm:$0xf]  ;;  %v11825_v4 = vld [vmem:[#allocation8 + $0x9d0] sm:$0xf0] }
 0x31f   : > { %7737 = vmatpush.bf16.msrb.mxu2 %v11444_v62  ;;  %7712 = vmatpush.bf16.msrb.mxu0 %v11172_v16  ;;  %v13339_v62 = vld [vmem:[#allocation8 + $0x644] sm:$0xf]  ;;  %v7498_v11 = vpop.f32.mrf.mxu3  ;;  %v11252_v16 = vor.u32 %v13307_v9, %v11249_v8  ;;  %v11716_v8 = vor.u32 %v13423_v44, %v11713_v45  ;;  %v11681_v19 = vld [vmem:[#allocation8 + $0x8b0] sm:$0xf0] }
 0x320   : > { %v14472_v10 = vadd.f32 %v7498_v11, %v7486_v63  ;;  %v11380_v3 = vor.u32 %v13339_v62, %v11377_v15  ;;  %v13519_v9 = vld [vmem:[#allocation8 + $0xbe4] sm:$0xf]  ;;  %v11697_v11 = vld [vmem:[#allocation8 + $0x8d0] sm:$0xf0] }
 0x321   : > { %7750 = vmatpush.bf16.msrb.mxu3 %v11572_v23  ;;  %7725 = vmatpush.bf16.msrb.mxu1 %v11300_v17  ;;  %v7461_v23 = vpop.f32.mrf.mxu0  ;;  %v13271_v17 = vld [vmem:[#allocation8 + $0x424] sm:$0xf]  ;;  %v11809_v24 = vld [vmem:[#allocation8 + $0x9b0] sm:$0xf0] }
 0x322   : > { %v13419_v63 = vld [vmem:[#allocation8 + $0x8c4] sm:$0xf]  ;;  %v12065_v29 = vld [vmem:[#allocation8 + $0xbb0] sm:$0xf0] }
 0x323   : > { %7738 = vmatpush.bf16.msrb.mxu2 %v11428_v18  ;;  %7713 = vmatpush.bf16.msrb.mxu0 %v11156_v33  ;;  %v11105_v18 = vld [vmem:[#allocation8 + $0x430] sm:$0xf0]  ;;  %v13299_v33 = vld [vmem:[#allocation8 + $0x504] sm:$0xf] }
 0x324   : > { %v11108_v27 = vor.u32 %v13271_v17, %v11105_v18  ;;  %v13451_v23 = vld [vmem:[#allocation8 + $0x9c4] sm:$0xf]  ;;  %v11700_v17 = vor.u32 %v13419_v63, %v11697_v11  ;;  %v12049_v45 = vld [vmem:[#allocation8 + $0xb90] sm:$0xf0] }
 0x325   : > { %7751 = vmatpush.bf16.msrb.mxu3 %v11556_v20  ;;  %7726 = vmatpush.bf16.msrb.mxu1 %v11284_v34  ;;  %v13335_v20 = vld [vmem:[#allocation8 + $0x624] sm:$0xf]  ;;  %v11217_v34 = vld [vmem:[#allocation8 + $0x510] sm:$0xf0]  ;;  %v7487_v13 = vpop.f32.mrf.mxu2  ;;  %v11828_v18 = vor.u32 %v13451_v23, %v11825_v4 }
 0x326   : > { %v11364_v32 = vor.u32 %v13335_v20, %v11361_v22  ;;  %v11220_v51 = vor.u32 %v13299_v33, %v11217_v34  ;;  %v13483_v5 = vld [vmem:[#allocation8 + $0xac4] sm:$0xf]  ;;  %v12033_v11 = vld [vmem:[#allocation8 + $0xb70] sm:$0xf0] }
 0x327   : > { %7739 = vmatpush.bf16.msrb.mxu2 %v11412_v35  ;;  %7714 = vmatpush.bf16.msrb.mxu0 %v11140_v49  ;;  %v13331_v35 = vld [vmem:[#allocation8 + $0x604] sm:$0xf]  ;;  %v7500_v41 = vpop.f32.mrf.mxu3  ;;  %v11841_v49 = vld [vmem:[#allocation8 + $0x9f0] sm:$0xf0] }
 0x328   : > { %v11348_v54 = vor.u32 %v13331_v35, %v11345_v53  ;;  %v11844_v62 = vor.u32 %v13455_v47, %v11841_v49  ;;  %v13447_v20 = vld [vmem:[#allocation8 + $0x9a4] sm:$0xf]  ;;  %v11665_v35 = vld [vmem:[#allocation8 + $0x890] sm:$0xf0] }
 0x329   : > { %7752 = vmatpush.bf16.msrb.mxu3 %v11540_v40  ;;  %7727 = vmatpush.bf16.msrb.mxu1 %v11268_v56  ;;  %v11473_v40 = vld [vmem:[#allocation8 + $0x710] sm:$0xf0]  ;;  %v13487_v56 = vld [vmem:[#allocation8 + $0xae4] sm:$0xf] }
 0x32a   : > { %v11476_v57 = vor.u32 %v13363_v37, %v11473_v40  ;;  %v13479_v26 = vld [vmem:[#allocation8 + $0xaa4] sm:$0xf]  ;;  %v11793_v53 = vld [vmem:[#allocation8 + $0x990] sm:$0xf0] }
 0x32b   : > { %7740 = vmatpush.bf16.msrb.mxu2 %v11396_v50  ;;  %7715 = vmatpush.bf16.msrb.mxu0 %v11124_v7  ;;  %v11969_v50 = vld [vmem:[#allocation8 + $0xaf0] sm:$0xf0]  ;;  %v13511_v28 = vld [vmem:[#allocation8 + $0xba4] sm:$0xf] }
 0x32c   : > { %v11972_v15 = vor.u32 %v13487_v56, %v11969_v50  ;;  %v11953_v7 = vld [vmem:[#allocation8 + $0xad0] sm:$0xf0]  ;;  %v13411_v34 = vld [vmem:[#allocation8 + $0x884] sm:$0xf]  ;;  %v12068_v13 = vor.u32 %v13511_v28, %v12065_v29 }
 0x32d   : > { %7753 = vmatpush.bf16.msrb.mxu3 %v11524_v58  ;;  %7728 = vmatpush.bf16.msrb.mxu1 %v11252_v16  ;;  %v12097_v58 = vld [vmem:[#allocation8 + $0xbf0] sm:$0xf0]  ;;  %v13515_v16 = vld [vmem:[#allocation8 + $0xbc4] sm:$0xf]  ;;  %v11956_v31 = vor.u32 %v13483_v5, %v11953_v7  ;;  %v11668_v49 = vor.u32 %v13411_v34, %v11665_v35 }
 0x32e   : > { %v12100_v1 = vor.u32 %v13519_v9, %v12097_v58  ;;  %v13475_v37 = vld [vmem:[#allocation8 + $0xa84] sm:$0xf]  ;;  %v11921_v40 = vld [vmem:[#allocation8 + $0xa90] sm:$0xf0] }
 0x32f   : > { %7741 = vmatpush.bf16.msrb.mxu2 %v11380_v3  ;;  %7716 = vmatpush.bf16.msrb.mxu0 %v11108_v27  ;;  %v12081_v3 = vld [vmem:[#allocation8 + $0xbd0] sm:$0xf0]  ;;  %v13507_v44 = vld [vmem:[#allocation8 + $0xb84] sm:$0xf]  ;;  %v11924_v50 = vor.u32 %v13475_v37, %v11921_v40 }
 0x330   : > { %v12084_v22 = vor.u32 %v13515_v16, %v12081_v3  ;;  %v11937_v27 = vld [vmem:[#allocation8 + $0xab0] sm:$0xf0]  ;;  %v13439_v9 = vld [vmem:[#allocation8 + $0x964] sm:$0xf] }
 0x331   : > { %7754 = vmatpush.bf16.msrb.mxu3 %v11508_v55  ;;  %7729 = vmatpush.bf16.msrb.mxu1 %v11236_v30  ;;  %v13415_v55 = vld [vmem:[#allocation8 + $0x8a4] sm:$0xf]  ;;  %v11940_v33 = vor.u32 %v13479_v26, %v11937_v27  ;;  %v11633_v5 = vld [vmem:[#allocation8 + $0x850] sm:$0xf0] }
 0x332   : > { %v11684_v30 = vor.u32 %v13415_v55, %v11681_v19  ;;  %v13503_v63 = vld [vmem:[#allocation8 + $0xb64] sm:$0xf]  ;;  %v12001_v40 = vld [vmem:[#allocation8 + $0xb30] sm:$0xf0] }
 0x333   : > { %7742 = vmatpush.bf16.msrb.mxu2 %v11364_v32  ;;  %7717 = vmatpush.bf16.msrb.mxu0 %v11092_v48  ;;  %v11812_v32 = vor.u32 %v13447_v20, %v11809_v24  ;;  %v7511_v41 = vpop.f32.mrf.mxu0  ;;  %v13403_v4 = vld [vmem:[#allocation8 + $0x844] sm:$0xf]  ;;  %v12036_v16 = vor.u32 %v13503_v63, %v12033_v11  ;;  %v12017_v24 = vld [vmem:[#allocation8 + $0xb50] sm:$0xf0] }
 0x334   : > { %v7512_v47 = vadd.f32 %v7511_v41, %v14472_v10  ;;  %v13435_v7 = vld [vmem:[#allocation8 + $0x944] sm:$0xf]  ;;  %v11636_v27 = vor.u32 %v13403_v4, %v11633_v5 }
 0x335   : > { %7755 = vmatpush.bf16.msrb.mxu3 %v11492_v36  ;;  %7730 = vmatpush.bf16.msrb.mxu1 %v11220_v51  ;;  %v13443_v36 = vld [vmem:[#allocation8 + $0x984] sm:$0xf]  ;;  %v7524_v48 = vpop.f32.mrf.mxu1 }
 0x336   : > { %7718 = vmatmul.bf16.vlgmr.msrb.gmra.mxu0 %v14412_v61  ;;  %v11796_v56 = vor.u32 %v13443_v36, %v11793_v53  ;;  %v13407_v51 = vld [vmem:[#allocation8 + $0x864] sm:$0xf]  ;;  %v7525_v58 = vadd.f32 %v7524_v48, %v7512_v47  ;;  %v11745_v36 = vld [vmem:[#allocation8 + $0x930] sm:$0xf0] }
 0x337   : > { %7743 = vmatpush.bf16.msrb.mxu2 %v11348_v54  ;;  %7762 = vmatpush.bf16.msra.mxu0 %v11716_v8  ;;  %v11649_v54 = vld [vmem:[#allocation8 + $0x870] sm:$0xf0]  ;;  %v13431_v34 = vld [vmem:[#allocation8 + $0x924] sm:$0xf] }
 0x338   : > { %7731 = vmatmul.bf16.vlgmr.msrb.gmra.mxu1 %v14414_v2  ;;  %v11777_v8 = vld [vmem:[#allocation8 + $0x970] sm:$0xf0]  ;;  %v11652_v23 = vor.u32 %v13407_v51, %v11649_v54  ;;  %v13495_v37 = vld [vmem:[#allocation8 + $0xb24] sm:$0xf]  ;;  %v11748_v47 = vor.u32 %v13431_v34, %v11745_v36 }
 0x339   : > { %7756 = vmatpush.bf16.msrb.mxu3 %v11476_v57  ;;  %7775 = vmatpush.bf16.msra.mxu1 %v11844_v62  ;;  %v12052_v57 = vor.u32 %v13507_v44, %v12049_v45  ;;  %v13471_v62 = vld [vmem:[#allocation8 + $0xa64] sm:$0xf]  ;;  %v11780_v10 = vor.u32 %v13439_v9, %v11777_v8  ;;  %v11873_v53 = vld [vmem:[#allocation8 + $0xa30] sm:$0xf0]  ;;  %v12004_v51 = vor.u32 %v13495_v37, %v12001_v40 }
 0x33a   : > { %7744 = vmatmul.bf16.vlgmr.msrb.gmra.mxu2 %v14416_v60  ;;  %v13395_v44 = vld [vmem:[#allocation8 + $0x804] sm:$0xf]  ;;  %v11601_v45 = vld [vmem:[#allocation8 + $0x810] sm:$0xf0] }
 0x33b   : > { %7788 = vmatpush.bf16.msra.mxu2 %v11972_v15  ;;  %7763 = vmatpush.bf16.msra.mxu0 %v11700_v17  ;;  %v11905_v15 = vld [vmem:[#allocation8 + $0xa70] sm:$0xf0]  ;;  %v7513_v20 = vpop.f32.mrf.mxu0  ;;  %v13583_v63 = vld [vmem:[#allocation8 + $0xde4] sm:$0xf]  ;;  %v11604_v11 = vor.u32 %v13395_v44, %v11601_v45 }
 0x33c   : > { %7757 = vmatmul.bf16.vlgmr.msrb.gmra.mxu3 %v14418_v25  ;;  %v11761_v17 = vld [vmem:[#allocation8 + $0x950] sm:$0xf0]  ;;  %v13579_v20 = vld [vmem:[#allocation8 + $0xdc4] sm:$0xf] }
 0x33d   : > { %7801 = vmatpush.bf16.msra.mxu3 %v12100_v1  ;;  %7776 = vmatpush.bf16.msra.mxu1 %v11828_v18  ;;  %v11908_v1 = vor.u32 %v13471_v62, %v11905_v15  ;;  %v7537_v3 = vpop.f32.mrf.mxu2  ;;  %v13467_v18 = vld [vmem:[#allocation8 + $0xa44] sm:$0xf]  ;;  %v7526_v26 = vpop.f32.mrf.mxu1  ;;  %v11764_v29 = vor.u32 %v13435_v7, %v11761_v17  ;;  %v11857_v9 = vld [vmem:[#allocation8 + $0xa10] sm:$0xf0] }
 0x33e   : > { %v7538_v55 = vadd.f32 %v7537_v3, %v7525_v58  ;;  %v13491_v58 = vld [vmem:[#allocation8 + $0xb04] sm:$0xf]  ;;  %v12225_v15 = vld [vmem:[#allocation8 + $0xcf0] sm:$0xf0] }
 0x33f   : > { %7789 = vmatpush.bf16.msra.mxu2 %v11956_v31  ;;  %7764 = vmatpush.bf16.msra.mxu0 %v11684_v30  ;;  %v11889_v31 = vld [vmem:[#allocation8 + $0xa50] sm:$0xf0]  ;;  %v7550_v19 = vpop.f32.mrf.mxu3  ;;  %v13551_v62 = vld [vmem:[#allocation8 + $0xce4] sm:$0xf] }
 0x340   : > { %v14479_v28 = vadd.f32 %v7550_v19, %v7538_v55  ;;  %v11892_v30 = vor.u32 %v13467_v18, %v11889_v31  ;;  %v13647_v7 = vld [vmem:[#allocation8 + $0xfe4] sm:$0xf]  ;;  %v12228_v17 = vor.u32 %v13551_v62, %v12225_v15  ;;  %v12209_v19 = vld [vmem:[#allocation8 + $0xcd0] sm:$0xf0] }
 0x341   : > { %7802 = vmatpush.bf16.msra.mxu3 %v12084_v22  ;;  %7777 = vmatpush.bf16.msra.mxu1 %v11812_v32  ;;  %v13499_v22 = vld [vmem:[#allocation8 + $0xb44] sm:$0xf]  ;;  %v12193_v36 = vld [vmem:[#allocation8 + $0xcb0] sm:$0xf0] }
 0x342   : > { %v13399_v32 = vld [vmem:[#allocation8 + $0x824] sm:$0xf]  ;;  %v12020_v35 = vor.u32 %v13499_v22, %v12017_v24  ;;  %v12337_v24 = vld [vmem:[#allocation8 + $0xdd0] sm:$0xf0] }
 0x343   : > { %7790 = vmatpush.bf16.msra.mxu2 %v11940_v33  ;;  %7765 = vmatpush.bf16.msra.mxu0 %v11668_v49  ;;  %v11617_v33 = vld [vmem:[#allocation8 + $0x830] sm:$0xf0]  ;;  %v13427_v49 = vld [vmem:[#allocation8 + $0x904] sm:$0xf] }
 0x344   : > { %v11620_v41 = vor.u32 %v13399_v32, %v11617_v33  ;;  %v13547_v55 = vld [vmem:[#allocation8 + $0xcc4] sm:$0xf]  ;;  %v12340_v33 = vor.u32 %v13579_v20, %v12337_v24  ;;  %v12321_v37 = vld [vmem:[#allocation8 + $0xdb0] sm:$0xf0] }
 0x345   : > { %7803 = vmatpush.bf16.msra.mxu3 %v12068_v13  ;;  %7778 = vmatpush.bf16.msra.mxu1 %v11796_v56  ;;  %v13463_v13 = vld [vmem:[#allocation8 + $0xa24] sm:$0xf]  ;;  %v11729_v56 = vld [vmem:[#allocation8 + $0x910] sm:$0xf0]  ;;  %v7539_v54 = vpop.f32.mrf.mxu2  ;;  %v12212_v32 = vor.u32 %v13547_v55, %v12209_v19 }
 0x346   : > { %v11876_v48 = vor.u32 %v13463_v13, %v11873_v53  ;;  %v11732_v4 = vor.u32 %v13427_v49, %v11729_v56  ;;  %v13611_v26 = vld [vmem:[#allocation8 + $0xec4] sm:$0xf]  ;;  %v12577_v45 = vld [vmem:[#allocation8 + $0xfb0] sm:$0xf0] }
 0x347   : > { %7791 = vmatpush.bf16.msra.mxu2 %v11924_v50  ;;  %7766 = vmatpush.bf16.msra.mxu0 %v11652_v23  ;;  %v13459_v50 = vld [vmem:[#allocation8 + $0xa04] sm:$0xf]  ;;  %v7552_v8 = vpop.f32.mrf.mxu3  ;;  %v12353_v23 = vld [vmem:[#allocation8 + $0xdf0] sm:$0xf0] }
 0x348   : > { %v11860_v5 = vor.u32 %v13459_v50, %v11857_v9  ;;  %v12356_v18 = vor.u32 %v13583_v63, %v12353_v23  ;;  %v13575_v13 = vld [vmem:[#allocation8 + $0xda4] sm:$0xf]  ;;  %v12177_v50 = vld [vmem:[#allocation8 + $0xc90] sm:$0xf0] }
 0x349   : > { %7804 = vmatpush.bf16.msra.mxu3 %v12052_v57  ;;  %7779 = vmatpush.bf16.msra.mxu1 %v11780_v10  ;;  %v11985_v57 = vld [vmem:[#allocation8 + $0xb10] sm:$0xf0]  ;;  %v13615_v10 = vld [vmem:[#allocation8 + $0xee4] sm:$0xf] }
 0x34a   : > { %v11988_v3 = vor.u32 %v13491_v58, %v11985_v57  ;;  %v13607_v40 = vld [vmem:[#allocation8 + $0xea4] sm:$0xf]  ;;  %v12305_v9 = vld [vmem:[#allocation8 + $0xd90] sm:$0xf0] }
 0x34b   : > { %7792 = vmatpush.bf16.msra.mxu2 %v11908_v1  ;;  %7767 = vmatpush.bf16.msra.mxu0 %v11636_v27  ;;  %v12481_v1 = vld [vmem:[#allocation8 + $0xef0] sm:$0xf0]  ;;  %v13639_v44 = vld [vmem:[#allocation8 + $0xfa4] sm:$0xf] }
 0x34c   : > { %v12484_v31 = vor.u32 %v13615_v10, %v12481_v1  ;;  %v12465_v27 = vld [vmem:[#allocation8 + $0xed0] sm:$0xf0]  ;;  %v13539_v56 = vld [vmem:[#allocation8 + $0xc84] sm:$0xf]  ;;  %v12580_v54 = vor.u32 %v13639_v44, %v12577_v45 }
 0x34d   : > { %7805 = vmatpush.bf16.msra.mxu3 %v12036_v16  ;;  %7780 = vmatpush.bf16.msra.mxu1 %v11764_v29  ;;  %v12609_v16 = vld [vmem:[#allocation8 + $0xff0] sm:$0xf0]  ;;  %v13643_v29 = vld [vmem:[#allocation8 + $0xfc4] sm:$0xf]  ;;  %v12468_v34 = vor.u32 %v13611_v26, %v12465_v27  ;;  %v12180_v23 = vor.u32 %v13539_v56, %v12177_v50 }
 0x34e   : > { %v12612_v22 = vor.u32 %v13647_v7, %v12609_v16  ;;  %v13603_v58 = vld [vmem:[#allocation8 + $0xe84] sm:$0xf]  ;;  %v12433_v57 = vld [vmem:[#allocation8 + $0xe90] sm:$0xf0] }
 0x34f   : > { %7793 = vmatpush.bf16.msra.mxu2 %v11892_v30  ;;  %7768 = vmatpush.bf16.msra.mxu0 %v11620_v41  ;;  %v12593_v30 = vld [vmem:[#allocation8 + $0xfd0] sm:$0xf0]  ;;  %v13635_v62 = vld [vmem:[#allocation8 + $0xf84] sm:$0xf]  ;;  %v12436_v1 = vor.u32 %v13603_v58, %v12433_v57 }
 0x350   : > { %v12596_v53 = vor.u32 %v13643_v29, %v12593_v30  ;;  %v12449_v41 = vld [vmem:[#allocation8 + $0xeb0] sm:$0xf0]  ;;  %v13567_v7 = vld [vmem:[#allocation8 + $0xd64] sm:$0xf] }
 0x351   : > { %7806 = vmatpush.bf16.msra.mxu3 %v12020_v35  ;;  %7781 = vmatpush.bf16.msra.mxu1 %v11748_v47  ;;  %v13543_v35 = vld [vmem:[#allocation8 + $0xca4] sm:$0xf]  ;;  %v12452_v49 = vor.u32 %v13607_v40, %v12449_v41  ;;  %v12561_v15 = vld [vmem:[#allocation8 + $0xf90] sm:$0xf0] }
 0x352   : > { %v12196_v47 = vor.u32 %v13543_v35, %v12193_v36  ;;  %v13631_v55 = vld [vmem:[#allocation8 + $0xf64] sm:$0xf]  ;;  %v12545_v19 = vld [vmem:[#allocation8 + $0xf70] sm:$0xf0] }
 0x353   : > { %7794 = vmatpush.bf16.msra.mxu2 %v11876_v48  ;;  %7769 = vmatpush.bf16.msra.mxu0 %v11604_v11  ;;  %v12324_v48 = vor.u32 %v13575_v13, %v12321_v37  ;;  %v7563_v8 = vpop.f32.mrf.mxu0  ;;  %v13531_v24 = vld [vmem:[#allocation8 + $0xc44] sm:$0xf]  ;;  %v12145_v26 = vld [vmem:[#allocation8 + $0xc50] sm:$0xf0]  ;;  %v12548_v29 = vor.u32 %v13631_v55, %v12545_v19  ;;  %v10823_v55 = vld [vmem:[#allocation8 + $0x1e8] sm:$0xf] }
 0x354   : > { %v7564_v63 = vadd.f32 %v7563_v8, %v14479_v28  ;;  %v13563_v27 = vld [vmem:[#allocation8 + $0xd44] sm:$0xf]  ;;  %v12529_v37 = vld [vmem:[#allocation8 + $0xf50] sm:$0xf0]  ;;  %v12148_v41 = vor.u32 %v13531_v24, %v12145_v26 }
 0x355   : > { %7807 = vmatpush.bf16.msra.mxu3 %v12004_v51  ;;  %7782 = vmatpush.bf16.msra.mxu1 %v11732_v4  ;;  %v13571_v51 = vld [vmem:[#allocation8 + $0xd84] sm:$0xf]  ;;  %v7576_v11 = vpop.f32.mrf.mxu1  ;;  %v12513_v57 = vld [vmem:[#allocation8 + $0xf30] sm:$0xf0] }
 0x356   : > { %7770 = vmatmul.bf16.vlgmr.msra.gmra.mxu0 %v14436_v42  ;;  %v12308_v10 = vor.u32 %v13571_v51, %v12305_v9  ;;  %v13535_v4 = vld [vmem:[#allocation8 + $0xc64] sm:$0xf]  ;;  %v7577_v16 = vadd.f32 %v7576_v11, %v7564_v63  ;;  %v12257_v51 = vld [vmem:[#allocation8 + $0xd30] sm:$0xf0] }
 0x357   : > { %7795 = vmatpush.bf16.msra.mxu2 %v11860_v5  ;;  %7814 = vmatpush.bf16.msrb.mxu0 %v12228_v17  ;;  %v12161_v5 = vld [vmem:[#allocation8 + $0xc70] sm:$0xf0]  ;;  %v13559_v56 = vld [vmem:[#allocation8 + $0xd24] sm:$0xf] }
 0x358   : > { %7783 = vmatmul.bf16.vlgmr.msra.gmra.mxu1 %v14438_v43  ;;  %v12289_v17 = vld [vmem:[#allocation8 + $0xd70] sm:$0xf0]  ;;  %v12164_v20 = vor.u32 %v13535_v4, %v12161_v5  ;;  %v13623_v58 = vld [vmem:[#allocation8 + $0xf24] sm:$0xf]  ;;  %v12260_v63 = vor.u32 %v13559_v56, %v12257_v51  ;;  %v13162_v51 = vld [vmem:[#allocation8 + $0xb4] sm:$0xf0] }
 0x359   : > { %7808 = vmatpush.bf16.msra.mxu3 %v11988_v3  ;;  %7827 = vmatpush.bf16.msrb.mxu1 %v12356_v18  ;;  %v12564_v3 = vor.u32 %v13635_v62, %v12561_v15  ;;  %v13599_v18 = vld [vmem:[#allocation8 + $0xe64] sm:$0xf]  ;;  %v12292_v28 = vor.u32 %v13567_v7, %v12289_v17  ;;  %v12385_v9 = vld [vmem:[#allocation8 + $0xe30] sm:$0xf0]  ;;  %v12516_v4 = vor.u32 %v13623_v58, %v12513_v57  ;;  %v13194_v58 = vld [vmem:[#allocation8 + $0x1b4] sm:$0xf0] }
 0x35a   : > { %7796 = vmatmul.bf16.vlgmr.msra.gmra.mxu2 %v14440_v14  ;;  %v13523_v62 = vld [vmem:[#allocation8 + $0xc04] sm:$0xf]  ;;  %v12113_v15 = vld [vmem:[#allocation8 + $0xc10] sm:$0xf0]  ;;  %v10919_v57 = vld [vmem:[#allocation8 + $0x2a8] sm:$0xf] }
 0x35b   : > { %7840 = vmatpush.bf16.msrb.mxu2 %v12484_v31  ;;  %7815 = vmatpush.bf16.msrb.mxu0 %v12212_v32  ;;  %v12417_v31 = vld [vmem:[#allocation8 + $0xe70] sm:$0xf0]  ;;  %v7565_v13 = vpop.f32.mrf.mxu0  ;;  %v12116_v19 = vor.u32 %v13523_v62, %v12113_v15  ;;  %v11047_v62 = vld [vmem:[#allocation8 + $0x3a8] sm:$0xf]  ;;  %v13258_v15 = vld [vmem:[#allocation8 + $0x3b4] sm:$0xf0] }
 0x35c   : > { %7809 = vmatmul.bf16.vlgmr.msra.gmra.mxu3 %v14442_v21  ;;  %v12273_v32 = vld [vmem:[#allocation8 + $0xd50] sm:$0xf0]  ;;  %v10807_v13 = vld [vmem:[#allocation8 + $0x1c8] sm:$0xf] }
 0x35d   : > { %7853 = vmatpush.bf16.msrb.mxu3 %v12612_v22  ;;  %7828 = vmatpush.bf16.msrb.mxu1 %v12340_v33  ;;  %v12420_v22 = vor.u32 %v13599_v18, %v12417_v31  ;;  %v7589_v30 = vpop.f32.mrf.mxu2  ;;  %v13595_v33 = vld [vmem:[#allocation8 + $0xe44] sm:$0xf]  ;;  %v7578_v40 = vpop.f32.mrf.mxu1  ;;  %v12276_v45 = vor.u32 %v13563_v27, %v12273_v32  ;;  %v12369_v7 = vld [vmem:[#allocation8 + $0xe10] sm:$0xf0]  ;;  %v10695_v18 = vld [vmem:[#allocation8 + $0xe8] sm:$0xf] }
 0x35e   : > { %v7590_v35 = vadd.f32 %v7589_v30, %v7577_v16  ;;  %v13619_v16 = vld [vmem:[#allocation8 + $0xf04] sm:$0xf]  ;;  %v13170_v31 = vld [vmem:[#allocation8 + $0xf4] sm:$0xf0]  ;;  %v11079_v27 = vld [vmem:[#allocation8 + $0x3e8] sm:$0xf] }
 0x35f   : > { %7841 = vmatpush.bf16.msrb.mxu2 %v12468_v34  ;;  %7816 = vmatpush.bf16.msrb.mxu0 %v12196_v47  ;;  %v12401_v34 = vld [vmem:[#allocation8 + $0xe50] sm:$0xf0]  ;;  %v7602_v36 = vpop.f32.mrf.mxu3  ;;  %v10696_v32 = vor.u32 %v13170_v31, %v10695_v18  ;;  %v10935_v40 = vld [vmem:[#allocation8 + $0x2c8] sm:$0xf]  ;;  %v13254_v31 = vld [vmem:[#allocation8 + $0x394] sm:$0xf0] }
 0x360   : > { %v14486_v44 = vadd.f32 %v7602_v36, %v7590_v35  ;;  %v12404_v47 = vor.u32 %v13595_v33, %v12401_v34  ;;  %v10679_v35 = vld [vmem:[#allocation8 + $0xc8] sm:$0xf]  ;;  %v13166_v36 = vld [vmem:[#allocation8 + $0xd4] sm:$0xf0] }
 0x361   : > { %7854 = vmatpush.bf16.msrb.mxu3 %v12596_v53  ;;  %7829 = vmatpush.bf16.msrb.mxu1 %v12324_v48  ;;  %v13627_v53 = vld [vmem:[#allocation8 + $0xf44] sm:$0xf]  ;;  %v11031_v18 = vld [vmem:[#allocation8 + $0x388] sm:$0xf] }
 0x362   : > { %v13527_v48 = vld [vmem:[#allocation8 + $0xc24] sm:$0xf]  ;;  %v12532_v50 = vor.u32 %v13627_v53, %v12529_v37  ;;  %v13198_v37 = vld [vmem:[#allocation8 + $0x1d4] sm:$0xf0] }
 0x363   : > { %7842 = vmatpush.bf16.msrb.mxu2 %v12452_v49  ;;  %7817 = vmatpush.bf16.msrb.mxu0 %v12180_v23  ;;  %v12129_v49 = vld [vmem:[#allocation8 + $0xc30] sm:$0xf0]  ;;  %v13555_v23 = vld [vmem:[#allocation8 + $0xd04] sm:$0xf] }
 0x364   : > { %v12132_v8 = vor.u32 %v13527_v48, %v12129_v49  ;;  %v10680_v48 = vor.u32 %v13166_v36, %v10679_v35  ;;  %v10808_v49 = vor.u32 %v13198_v37, %v10807_v13  ;;  %v11015_v35 = vld [vmem:[#allocation8 + $0x368] sm:$0xf]  ;;  %v13250_v36 = vld [vmem:[#allocation8 + $0x374] sm:$0xf0] }
 0x365   : > { %7855 = vmatpush.bf16.msrb.mxu3 %v12580_v54  ;;  %7830 = vmatpush.bf16.msrb.mxu1 %v12308_v10  ;;  %v13591_v54 = vld [vmem:[#allocation8 + $0xe24] sm:$0xf]  ;;  %v12241_v10 = vld [vmem:[#allocation8 + $0xd10] sm:$0xf0]  ;;  %v7591_v5 = vpop.f32.mrf.mxu2  ;;  %v10615_v37 = vld [vmem:[#allocation8 + $0x48] sm:$0xf] }
 0x366   : > { %v12388_v11 = vor.u32 %v13591_v54, %v12385_v9  ;;  %v12244_v24 = vor.u32 %v13555_v23, %v12241_v10  ;;  %v10791_v54 = vld [vmem:[#allocation8 + $0x1a8] sm:$0xf]  ;;  %v11048_v5 = vor.u32 %v13258_v15, %v11047_v62 }
 0x367   : > { %7843 = vmatpush.bf16.msrb.mxu2 %v12436_v1  ;;  %7818 = vmatpush.bf16.msrb.mxu0 %v12164_v20  ;;  %v13587_v1 = vld [vmem:[#allocation8 + $0xe04] sm:$0xf]  ;;  %v7604_v17 = vpop.f32.mrf.mxu3  ;;  %v13202_v20 = vld [vmem:[#allocation8 + $0x1f4] sm:$0xf0]  ;;  %v10647_v10 = vld [vmem:[#allocation8 + $0x88] sm:$0xf] }
 0x368   : > { %v12372_v26 = vor.u32 %v13587_v1, %v12369_v7  ;;  %v10824_v33 = vor.u32 %v13202_v20, %v10823_v55  ;;  %v13158_v1 = vld [vmem:[#allocation8 + $0x94] sm:$0xf0]  ;;  %v10599_v15 = vld [vmem:[#allocation8 + $0x28] sm:$0xf] }
 0x369   : > { %7856 = vmatpush.bf16.msrb.mxu3 %v12564_v3  ;;  %7831 = vmatpush.bf16.msrb.mxu1 %v12292_v28  ;;  %v12497_v3 = vld [vmem:[#allocation8 + $0xf10] sm:$0xf0]  ;;  %v10951_v28 = vld [vmem:[#allocation8 + $0x2e8] sm:$0xf]  ;;  %v13190_v7 = vld [vmem:[#allocation8 + $0x194] sm:$0xf0]  ;;  %v10648_v20 = vor.u32 %v13158_v1, %v10647_v10 }
 0x36a   : > { %v12500_v30 = vor.u32 %v13619_v16, %v12497_v3  ;;  %v10903_v16 = vld [vmem:[#allocation8 + $0x288] sm:$0xf]  ;;  %v13222_v3 = vld [vmem:[#allocation8 + $0x294] sm:$0xf0] }
 0x36b   : > { %7844 = vmatpush.bf16.msrb.mxu2 %v12420_v22  ;;  %7819 = vmatpush.bf16.msrb.mxu0 %v12148_v41  ;;  %v13234_v22 = vld [vmem:[#allocation8 + $0x2f4] sm:$0xf0]  ;;  %v10855_v1 = vld [vmem:[#allocation8 + $0x228] sm:$0xf] }
 0x36c   : > { %v10952_v34 = vor.u32 %v13234_v22, %v10951_v28  ;;  %v13230_v41 = vld [vmem:[#allocation8 + $0x2d4] sm:$0xf0]  ;;  %v10904_v22 = vor.u32 %v13222_v3, %v10903_v16  ;;  %v10583_v3 = vld [vmem:[#allocation8 + $0x8] sm:$0xf] }
 0x36d   : > { %7857 = vmatpush.bf16.msrb.mxu3 %v12548_v29  ;;  %7832 = vmatpush.bf16.msrb.mxu1 %v12276_v45  ;;  %v13266_v29 = vld [vmem:[#allocation8 + $0x3f4] sm:$0xf0]  ;;  %v11063_v45 = vld [vmem:[#allocation8 + $0x3c8] sm:$0xf]  ;;  %v10936_v56 = vor.u32 %v13230_v41, %v10935_v40 }
 0x36e   : > { %v11080_v53 = vor.u32 %v13266_v29, %v11079_v27  ;;  %v10759_v27 = vld [vmem:[#allocation8 + $0x168] sm:$0xf]  ;;  %v13150_v40 = vld [vmem:[#allocation8 + $0x54] sm:$0xf0] }
 0x36f   : > { %7845 = vmatpush.bf16.msrb.mxu2 %v12404_v47  ;;  %7820 = vmatpush.bf16.msrb.mxu0 %v12132_v8  ;;  %v13262_v47 = vld [vmem:[#allocation8 + $0x3d4] sm:$0xf0]  ;;  %v10743_v41 = vld [vmem:[#allocation8 + $0x148] sm:$0xf] }
 0x370   : > { %v11064_v9 = vor.u32 %v13262_v47, %v11063_v45  ;;  %v13226_v8 = vld [vmem:[#allocation8 + $0x2b4] sm:$0xf0]  ;;  %v11016_v45 = vor.u32 %v13250_v36, %v11015_v35  ;;  %v11463_v35 = vld [vmem:[#allocation8 + $0x6e8] sm:$0xf] }
 0x371   : > { %7858 = vmatpush.bf16.msrb.mxu3 %v12532_v50  ;;  %7833 = vmatpush.bf16.msrb.mxu1 %v12260_v63  ;;  %v10663_v50 = vld [vmem:[#allocation8 + $0xa8] sm:$0xf]  ;;  %v10920_v23 = vor.u32 %v13226_v8, %v10919_v57  ;;  %v10616_v57 = vor.u32 %v13150_v40, %v10615_v37  ;;  %v13178_v10 = vld [vmem:[#allocation8 + $0x134] sm:$0xf0] }
 0x372   : > { %v10664_v63 = vor.u32 %v13162_v51, %v10663_v50  ;;  %v13362_v36 = vld [vmem:[#allocation8 + $0x6f4] sm:$0xf0] }
 0x373   : > { %7846 = vmatpush.bf16.msrb.mxu2 %v12388_v11  ;;  %7821 = vmatpush.bf16.msrb.mxu0 %v12116_v19  ;;  %v10792_v11 = vor.u32 %v13194_v58, %v10791_v54  ;;  %v7615_v17 = vpop.f32.mrf.mxu0  ;;  %v10999_v54 = vld [vmem:[#allocation8 + $0x348] sm:$0xf]  ;;  %v13394_v37 = vld [vmem:[#allocation8 + $0x7f4] sm:$0xf0] }
 0x374   : > { %v7616_v55 = vadd.f32 %v7615_v17, %v14486_v44  ;;  %v13142_v17 = vld [vmem:[#allocation8 + $0x14] sm:$0xf0] }
 0x375   : > { %7859 = vmatpush.bf16.msrb.mxu3 %v12516_v4  ;;  %7834 = vmatpush.bf16.msrb.mxu1 %v12244_v24  ;;  %v10775_v4 = vld [vmem:[#allocation8 + $0x188] sm:$0xf]  ;;  %v7628_v19 = vpop.f32.mrf.mxu1 }
 0x376   : > { %7822 = vmatmul.bf16.vlgmr.msrb.gmra.mxu0 %v14457_v6  ;;  %v10776_v28 = vor.u32 %v13190_v7, %v10775_v4  ;;  %v10631_v24 = vld [vmem:[#allocation8 + $0x68] sm:$0xf]  ;;  %v7629_v29 = vadd.f32 %v7628_v19, %v7616_v55  ;;  %v13210_v4 = vld [vmem:[#allocation8 + $0x234] sm:$0xf0] }
 0x377   : > { %7847 = vmatpush.bf16.msrb.mxu2 %v12372_v26  ;;  %7866 = vmatpush.bf16.msra.mxu0 %v10696_v32  ;;  %v13154_v26 = vld [vmem:[#allocation8 + $0x74] sm:$0xf0]  ;;  %v10711_v55 = vld [vmem:[#allocation8 + $0x108] sm:$0xf] }
 0x378   : > { %7835 = vmatmul.bf16.vlgmr.msrb.gmra.mxu1 %v14459_v39  ;;  %v13186_v32 = vld [vmem:[#allocation8 + $0x174] sm:$0xf0]  ;;  %v10632_v13 = vor.u32 %v13154_v26, %v10631_v24  ;;  %v10967_v24 = vld [vmem:[#allocation8 + $0x308] sm:$0xf] }
 0x379   : > { %7860 = vmatpush.bf16.msrb.mxu3 %v12500_v30  ;;  %7879 = vmatpush.bf16.msra.mxu1 %v10824_v33  ;;  %v11032_v30 = vor.u32 %v13254_v31, %v11031_v18  ;;  %v10887_v33 = vld [vmem:[#allocation8 + $0x268] sm:$0xf]  ;;  %v10760_v44 = vor.u32 %v13186_v32, %v10759_v27  ;;  %v13242_v7 = vld [vmem:[#allocation8 + $0x334] sm:$0xf0]  ;;  %v10856_v31 = vor.u32 %v13210_v4, %v10855_v1 }
 0x37a   : > { %7848 = vmatmul.bf16.vlgmr.msrb.gmra.mxu2 %v14455_v38  ;;  %v13174_v19 = vld [vmem:[#allocation8 + $0x114] sm:$0xf0]  ;;  %v11335_v32 = vld [vmem:[#allocation8 + $0x5e8] sm:$0xf] }
 0x37b   : > { %7892 = vmatpush.bf16.msra.mxu2 %v10952_v34  ;;  %7867 = vmatpush.bf16.msra.mxu0 %v10680_v48  ;;  %v13218_v34 = vld [vmem:[#allocation8 + $0x274] sm:$0xf0]  ;;  %v7617_v51 = vpop.f32.mrf.mxu0 }
 0x37c   : > { %7861 = vmatmul.bf16.vlgmr.msrb.gmra.mxu3 %v14465_v12  ;;  %v13182_v48 = vld [vmem:[#allocation8 + $0x154] sm:$0xf0] }
 0x37d   : > { %7905 = vmatpush.bf16.msra.mxu3 %v11080_v53  ;;  %7880 = vmatpush.bf16.msra.mxu1 %v10808_v49  ;;  %v10888_v53 = vor.u32 %v13218_v34, %v10887_v33  ;;  %v7641_v47 = vpop.f32.mrf.mxu2  ;;  %v10871_v49 = vld [vmem:[#allocation8 + $0x248] sm:$0xf]  ;;  %v7630_v58 = vpop.f32.mrf.mxu1  ;;  %v10744_v8 = vor.u32 %v13182_v48, %v10743_v41  ;;  %v13238_v26 = vld [vmem:[#allocation8 + $0x314] sm:$0xf0]  ;;  %v10584_v33 = vor.u32 %v13142_v17, %v10583_v3 }
 0x37e   : > { %v14493_v50 = vadd.f32 %v7641_v47, %v7629_v29  ;;  %v11207_v29 = vld [vmem:[#allocation8 + $0x4e8] sm:$0xf]  ;;  %v13330_v34 = vld [vmem:[#allocation8 + $0x5f4] sm:$0xf0]  ;;  %v10968_v40 = vor.u32 %v13238_v26, %v10967_v24  ;;  %v11464_v47 = vor.u32 %v13362_v36, %v11463_v35 }
 0x37f   : > { %7893 = vmatpush.bf16.msra.mxu2 %v10936_v56  ;;  %7868 = vmatpush.bf16.msra.mxu0 %v10664_v63  ;;  %v13214_v56 = vld [vmem:[#allocation8 + $0x254] sm:$0xf0]  ;;  %v11191_v48 = vld [vmem:[#allocation8 + $0x4c8] sm:$0xf] }
 0x380   : > { %v10872_v62 = vor.u32 %v13214_v56, %v10871_v49  ;;  %v13146_v63 = vld [vmem:[#allocation8 + $0x34] sm:$0xf0]  ;;  %v11319_v56 = vld [vmem:[#allocation8 + $0x5c8] sm:$0xf] }
 0x381   : > { %7906 = vmatpush.bf16.msra.mxu3 %v11064_v9  ;;  %7881 = vmatpush.bf16.msra.mxu1 %v10792_v11  ;;  %v13246_v9 = vld [vmem:[#allocation8 + $0x354] sm:$0xf0]  ;;  %v10727_v11 = vld [vmem:[#allocation8 + $0x128] sm:$0xf]  ;;  %v10600_v16 = vor.u32 %v13146_v63, %v10599_v15 }
 0x382   : > { %v10728_v18 = vor.u32 %v13178_v10, %v10727_v11  ;;  %v13294_v49 = vld [vmem:[#allocation8 + $0x4d4] sm:$0xf0]  ;;  %v11175_v11 = vld [vmem:[#allocation8 + $0x4a8] sm:$0xf] }
 0x383   : > { %7894 = vmatpush.bf16.msra.mxu2 %v10920_v23  ;;  %7869 = vmatpush.bf16.msra.mxu0 %v10648_v20  ;;  %v11000_v23 = vor.u32 %v13246_v9, %v10999_v54  ;;  %v10839_v20 = vld [vmem:[#allocation8 + $0x208] sm:$0xf]  ;;  %v13326_v54 = vld [vmem:[#allocation8 + $0x5d4] sm:$0xf0] }
 0x384   : > { %v11447_v9 = vld [vmem:[#allocation8 + $0x6c8] sm:$0xf]  ;;  %v13358_v58 = vld [vmem:[#allocation8 + $0x6d4] sm:$0xf0]  ;;  %v11320_v15 = vor.u32 %v13326_v54, %v11319_v56 }
 0x385   : > { %7907 = vmatpush.bf16.msra.mxu3 %v11048_v5  ;;  %7882 = vmatpush.bf16.msra.mxu1 %v10776_v28  ;;  %v10983_v5 = vld [vmem:[#allocation8 + $0x328] sm:$0xf]  ;;  %v7643_v27 = vpop.f32.mrf.mxu2  ;;  %v11448_v63 = vor.u32 %v13358_v58, %v11447_v9  ;;  %v13322_v4 = vld [vmem:[#allocation8 + $0x5b4] sm:$0xf0] }
 0x386   : > { %v10984_v28 = vor.u32 %v13242_v7, %v10983_v5  ;;  %v11303_v10 = vld [vmem:[#allocation8 + $0x5a8] sm:$0xf]  ;;  %v13354_v7 = vld [vmem:[#allocation8 + $0x6b4] sm:$0xf0] }
 0x387   : > { %7895 = vmatpush.bf16.msra.mxu2 %v10904_v22  ;;  %7870 = vmatpush.bf16.msra.mxu0 %v10632_v13  ;;  %v13206_v22 = vld [vmem:[#allocation8 + $0x214] sm:$0xf0]  ;;  %v10712_v13 = vor.u32 %v13174_v19, %v10711_v55  ;;  %v11431_v5 = vld [vmem:[#allocation8 + $0x6a8] sm:$0xf]  ;;  %v11304_v19 = vor.u32 %v13322_v4, %v11303_v10 }
 0x388   : > { %v13386_v3 = vld [vmem:[#allocation8 + $0x7b4] sm:$0xf0]  ;;  %v11287_v26 = vld [vmem:[#allocation8 + $0x588] sm:$0xf] }
 0x389   : > { %7908 = vmatpush.bf16.msra.mxu3 %v11032_v30  ;;  %7883 = vmatpush.bf16.msra.mxu1 %v10760_v44  ;;  %v13298_v30 = vld [vmem:[#allocation8 + $0x4f4] sm:$0xf0]  ;;  %v10840_v44 = vor.u32 %v13206_v22, %v10839_v20  ;;  %v7654_v55 = vpop.f32.mrf.mxu3  ;;  %v11432_v20 = vor.u32 %v13354_v7, %v11431_v5  ;;  %v11159_v22 = vld [vmem:[#allocation8 + $0x488] sm:$0xf] }
 0x38a   : > { %v11208_v41 = vor.u32 %v13298_v30, %v11207_v29  ;;  %v13286_v24 = vld [vmem:[#allocation8 + $0x494] sm:$0xf0]  ;;  %v11415_v30 = vld [vmem:[#allocation8 + $0x688] sm:$0xf] }
 0x38b   : > { %7896 = vmatpush.bf16.msra.mxu2 %v10888_v53  ;;  %7871 = vmatpush.bf16.msra.mxu0 %v10616_v57  ;;  %v11591_v53 = vld [vmem:[#allocation8 + $0x7e8] sm:$0xf]  ;;  %v13318_v29 = vld [vmem:[#allocation8 + $0x594] sm:$0xf0] }
 0x38c   : > { %v11592_v51 = vor.u32 %v13394_v37, %v11591_v53  ;;  %v11575_v57 = vld [vmem:[#allocation8 + $0x7c8] sm:$0xf]  ;;  %v13382_v35 = vld [vmem:[#allocation8 + $0x794] sm:$0xf0]  ;;  %v11288_v53 = vor.u32 %v13318_v29, %v11287_v26 }
 0x38d   : > { %7909 = vmatpush.bf16.msra.mxu3 %v11016_v45  ;;  %7884 = vmatpush.bf16.msra.mxu1 %v10744_v8  ;;  %v11336_v45 = vor.u32 %v13330_v34, %v11335_v32  ;;  %v13390_v8 = vld [vmem:[#allocation8 + $0x7d4] sm:$0xf0]  ;;  %v11543_v34 = vld [vmem:[#allocation8 + $0x788] sm:$0xf] }
 0x38e   : > { %v11576_v1 = vor.u32 %v13390_v8, %v11575_v57  ;;  %v13350_v32 = vld [vmem:[#allocation8 + $0x694] sm:$0xf0]  ;;  %v11143_v37 = vld [vmem:[#allocation8 + $0x468] sm:$0xf] }
 0x38f   : > { %7897 = vmatpush.bf16.msra.mxu2 %v10872_v62  ;;  %7872 = vmatpush.bf16.msra.mxu0 %v10600_v16  ;;  %v11192_v62 = vor.u32 %v13294_v49, %v11191_v48  ;;  %v11559_v16 = vld [vmem:[#allocation8 + $0x7a8] sm:$0xf]  ;;  %v13314_v48 = vld [vmem:[#allocation8 + $0x574] sm:$0xf0] }
 0x390   : > { %v11560_v27 = vor.u32 %v13386_v3, %v11559_v16  ;;  %v11399_v49 = vld [vmem:[#allocation8 + $0x668] sm:$0xf]  ;;  %v13346_v56 = vld [vmem:[#allocation8 + $0x674] sm:$0xf0] }
 0x391   : > { %7910 = vmatpush.bf16.msra.mxu3 %v11000_v23  ;;  %7885 = vmatpush.bf16.msra.mxu1 %v10728_v18  ;;  %v13290_v23 = vld [vmem:[#allocation8 + $0x4b4] sm:$0xf0]  ;;  %v13770_v18 = vld [vmem:[#allocation10] sm:$0xf]  ;;  %v7656_v58 = vpop.f32.mrf.mxu3  ;;  %v11400_v8 = vor.u32 %v13346_v56, %v11399_v49  ;;  %v11511_v16 = vld [vmem:[#allocation8 + $0x748] sm:$0xf] }
 0x392   : > { %v11176_v17 = vor.u32 %v13290_v23, %v11175_v11  ;;  %v13378_v54 = vld [vmem:[#allocation8 + $0x774] sm:$0xf0]  ;;  %v11719_v56 = vld [vmem:[#allocation8 + $0x8e8] sm:$0xf] }
 0x393   : > { %7898 = vmatpush.bf16.msra.mxu2 %v10856_v31  ;;  %7873 = vmatpush.bf16.msra.mxu0 %v10584_v33  ;;  %v4883_v31 = vperm.slane %v13770_v18, 1  ;;  %v7667_v33 = vpop.f32.mrf.mxu0  ;;  %v13310_v10 = vld [vmem:[#allocation8 + $0x554] sm:$0xf0] }
 0x394   : > { %v13342_v4 = vld [vmem:[#allocation8 + $0x654] sm:$0xf0] }
 0x395   : > { %7911 = vmatpush.bf16.msra.mxu3 %v10984_v28  ;;  %7886 = vmatpush.bf16.msra.mxu1 %v10712_v13  ;;  %v14500_v28 = vadd.f32 %v7654_v55, %v14493_v50  ;;  %v7668_v36 = vadd.f32 %v7667_v33, %v4883_v31  ;;  %v7680_v13 = vpop.f32.mrf.mxu1  ;;  %v11416_v50 = vor.u32 %v13350_v32, %v11415_v30  ;;  %v13374_v3 = vld [vmem:[#allocation8 + $0x754] sm:$0xf0]  ;;  %v11495_v30 = vld [vmem:[#allocation8 + $0x728] sm:$0xf] }
 0x396   : > { %7874 = vmatmul.bf16.vlgmr.msra.gmra.mxu0 %v14391_v0  ;;  %v13306_v26 = vld [vmem:[#allocation8 + $0x534] sm:$0xf0] }
 0x397   : > { %7899 = vmatpush.bf16.msra.mxu2 %v10840_v44  ;;  %7918 = vmatpush.bf16.msrb.mxu0 %v11208_v41  ;;  %v11160_v44 = vor.u32 %v13286_v24, %v11159_v22  ;;  %v11271_v41 = vld [vmem:[#allocation8 + $0x568] sm:$0xf]  ;;  %v11512_v24 = vor.u32 %v13374_v3, %v11511_v16  ;;  %v13338_v29 = vld [vmem:[#allocation8 + $0x634] sm:$0xf0] }
 0x398   : > { %7887 = vmatmul.bf16.vlgmr.msra.gmra.mxu1 %v14393_v59  ;;  %v11272_v57 = vor.u32 %v13314_v48, %v11271_v41  ;;  %v11239_v22 = vld [vmem:[#allocation8 + $0x528] sm:$0xf]  ;;  %v13370_v32 = vld [vmem:[#allocation8 + $0x734] sm:$0xf0] }
 0x399   : > { %7912 = vmatpush.bf16.msra.mxu3 %v10968_v40  ;;  %7931 = vmatpush.bf16.msrb.mxu1 %v11336_v45  ;;  %v13282_v40 = vld [vmem:[#allocation8 + $0x474] sm:$0xf0]  ;;  %v7681_v45 = vadd.f32 %v7680_v13, %v7668_v36  ;;  %v11240_v36 = vor.u32 %v13306_v26, %v11239_v22  ;;  %v11831_v16 = vld [vmem:[#allocation8 + $0x9c8] sm:$0xf] }
 0x39a   : > { %7900 = vmatmul.bf16.vlgmr.msra.gmra.mxu2 %v14395_v46  ;;  %v11144_v9 = vor.u32 %v13282_v40, %v11143_v37  ;;  %v11496_v37 = vor.u32 %v13370_v32, %v11495_v30  ;;  %v13366_v48 = vld [vmem:[#allocation8 + $0x714] sm:$0xf0]  ;;  %v11815_v30 = vld [vmem:[#allocation8 + $0x9a8] sm:$0xf] }
 0x39b   : > { %7944 = vmatpush.bf16.msrb.mxu2 %v11464_v47  ;;  %7919 = vmatpush.bf16.msrb.mxu0 %v11192_v62  ;;  %v11544_v47 = vor.u32 %v13382_v35, %v11543_v34  ;;  %v11127_v62 = vld [vmem:[#allocation8 + $0x448] sm:$0xf]  ;;  %v7669_v7 = vpop.f32.mrf.mxu0  ;;  %v13270_v35 = vld [vmem:[#allocation8 + $0x414] sm:$0xf0] }
 0x39c   : > { %7913 = vmatmul.bf16.vlgmr.msra.gmra.mxu3 %v14397_v52  ;;  %v11095_v34 = vld [vmem:[#allocation8 + $0x408] sm:$0xf]  ;;  %v13458_v58 = vld [vmem:[#allocation8 + $0x9f4] sm:$0xf0] }
 0x39d   : > { %7957 = vmatpush.bf16.msrb.mxu3 %v11592_v51  ;;  %7932 = vmatpush.bf16.msrb.mxu1 %v11320_v15  ;;  %v11527_v51 = vld [vmem:[#allocation8 + $0x768] sm:$0xf]  ;;  %v13278_v15 = vld [vmem:[#allocation8 + $0x454] sm:$0xf0]  ;;  %v7693_v23 = vpop.f32.mrf.mxu2 }
 0x39e   : > { %v11528_v11 = vor.u32 %v13378_v54, %v11527_v51  ;;  %v7694_v5 = vadd.f32 %v7693_v23, %v7681_v45  ;;  %v11128_v18 = vor.u32 %v13278_v15, %v11127_v62  ;;  %v13334_v45 = vld [vmem:[#allocation8 + $0x614] sm:$0xf0]  ;;  %v11847_v54 = vld [vmem:[#allocation8 + $0x9e8] sm:$0xf] }
 0x39f   : > { %7945 = vmatpush.bf16.msrb.mxu2 %v11448_v63  ;;  %7920 = vmatpush.bf16.msrb.mxu0 %v11176_v17  ;;  %v11255_v63 = vld [vmem:[#allocation8 + $0x548] sm:$0xf]  ;;  %v7682_v17 = vpop.f32.mrf.mxu1  ;;  %v7706_v41 = vpop.f32.mrf.mxu3  ;;  %v13426_v51 = vld [vmem:[#allocation8 + $0x8f4] sm:$0xf0] }
 0x3a0   : > { %v11256_v31 = vor.u32 %v13310_v10, %v11255_v63  ;;  %v14502_v49 = vadd.f32 %v7706_v41, %v7694_v5  ;;  %v12103_v63 = vld [vmem:[#allocation8 + $0xbe8] sm:$0xf]  ;;  %v11720_v10 = vor.u32 %v13426_v51, %v11719_v56  ;;  %v13422_v7 = vld [vmem:[#allocation8 + $0x8d4] sm:$0xf0] }
 0x3a1   : > { %7958 = vmatpush.bf16.msrb.mxu3 %v11576_v1  ;;  %7933 = vmatpush.bf16.msrb.mxu1 %v11304_v19  ;;  %v11383_v1 = vld [vmem:[#allocation8 + $0x648] sm:$0xf]  ;;  %v13454_v17 = vld [vmem:[#allocation8 + $0x9d4] sm:$0xf0] }
 0x3a2   : > { %v11384_v55 = vor.u32 %v13342_v4, %v11383_v1  ;;  %v11111_v19 = vld [vmem:[#allocation8 + $0x428] sm:$0xf]  ;;  %v11848_v1 = vor.u32 %v13458_v58, %v11847_v54  ;;  %v13478_v56 = vld [vmem:[#allocation8 + $0xa94] sm:$0xf0] }
 0x3a3   : > { %7946 = vmatpush.bf16.msrb.mxu2 %v11432_v20  ;;  %7921 = vmatpush.bf16.msrb.mxu0 %v11160_v44  ;;  %v13274_v20 = vld [vmem:[#allocation8 + $0x434] sm:$0xf0]  ;;  %v11223_v44 = vld [vmem:[#allocation8 + $0x508] sm:$0xf] }
 0x3a4   : > { %v11112_v33 = vor.u32 %v13274_v20, %v11111_v19  ;;  %v11703_v5 = vld [vmem:[#allocation8 + $0x8c8] sm:$0xf]  ;;  %v13518_v19 = vld [vmem:[#allocation8 + $0xbd4] sm:$0xf0] }
 0x3a5   : > { %7959 = vmatpush.bf16.msrb.mxu3 %v11560_v27  ;;  %7934 = vmatpush.bf16.msrb.mxu1 %v11288_v53  ;;  %v11367_v27 = vld [vmem:[#allocation8 + $0x628] sm:$0xf]  ;;  %v13302_v53 = vld [vmem:[#allocation8 + $0x514] sm:$0xf0]  ;;  %v7695_v40 = vpop.f32.mrf.mxu2  ;;  %v11704_v20 = vor.u32 %v13422_v7, %v11703_v5 }
 0x3a6   : > { %v11368_v13 = vor.u32 %v13338_v29, %v11367_v27  ;;  %v11224_v62 = vor.u32 %v13302_v53, %v11223_v44  ;;  %v11687_v27 = vld [vmem:[#allocation8 + $0x8a8] sm:$0xf]  ;;  %v13418_v29 = vld [vmem:[#allocation8 + $0x8b4] sm:$0xf0] }
 0x3a7   : > { %7947 = vmatpush.bf16.msrb.mxu2 %v11416_v50  ;;  %7922 = vmatpush.bf16.msrb.mxu0 %v11144_v9  ;;  %v11351_v50 = vld [vmem:[#allocation8 + $0x608] sm:$0xf]  ;;  %v11096_v9 = vor.u32 %v13270_v35, %v11095_v34  ;;  %v7708_v22 = vpop.f32.mrf.mxu3  ;;  %v13482_v35 = vld [vmem:[#allocation8 + $0xab4] sm:$0xf0]  ;;  %v11688_v44 = vor.u32 %v13418_v29, %v11687_v27 }
 0x3a8   : > { %v11352_v15 = vor.u32 %v13334_v45, %v11351_v50  ;;  %v11943_v34 = vld [vmem:[#allocation8 + $0xaa8] sm:$0xf]  ;;  %v13414_v40 = vld [vmem:[#allocation8 + $0x894] sm:$0xf0] }
 0x3a9   : > { %7960 = vmatpush.bf16.msrb.mxu3 %v11544_v47  ;;  %7935 = vmatpush.bf16.msrb.mxu1 %v11272_v57  ;;  %v11479_v47 = vld [vmem:[#allocation8 + $0x708] sm:$0xf]  ;;  %v11944_v50 = vor.u32 %v13482_v35, %v11943_v34  ;;  %v13474_v7 = vld [vmem:[#allocation8 + $0xa74] sm:$0xf0] }
 0x3aa   : > { %v11975_v57 = vld [vmem:[#allocation8 + $0xae8] sm:$0xf]  ;;  %v11480_v23 = vor.u32 %v13366_v48, %v11479_v47  ;;  %v13446_v47 = vld [vmem:[#allocation8 + $0x994] sm:$0xf0] }
 0x3ab   : > { %7948 = vmatpush.bf16.msrb.mxu2 %v11400_v8  ;;  %7923 = vmatpush.bf16.msrb.mxu0 %v11128_v18  ;;  %v13490_v8 = vld [vmem:[#allocation8 + $0xaf4] sm:$0xf0]  ;;  %v11959_v18 = vld [vmem:[#allocation8 + $0xac8] sm:$0xf] }
 0x3ac   : > { %v11976_v4 = vor.u32 %v13490_v8, %v11975_v57  ;;  %v11799_v41 = vld [vmem:[#allocation8 + $0x988] sm:$0xf]  ;;  %v13470_v27 = vld [vmem:[#allocation8 + $0xa54] sm:$0xf0] }
 0x3ad   : > { %7961 = vmatpush.bf16.msrb.mxu3 %v11528_v11  ;;  %7936 = vmatpush.bf16.msrb.mxu1 %v11256_v31  ;;  %v13522_v11 = vld [vmem:[#allocation8 + $0xbf4] sm:$0xf0]  ;;  %v11927_v48 = vld [vmem:[#allocation8 + $0xa88] sm:$0xf] }
 0x3ae   : > { %v12104_v3 = vor.u32 %v13522_v11, %v12103_v63  ;;  %v13486_v31 = vld [vmem:[#allocation8 + $0xad4] sm:$0xf0]  ;;  %v12055_v54 = vld [vmem:[#allocation8 + $0xb88] sm:$0xf] }
 0x3af   : > { %7949 = vmatpush.bf16.msrb.mxu2 %v11384_v55  ;;  %7924 = vmatpush.bf16.msrb.mxu0 %v11112_v33  ;;  %v12087_v55 = vld [vmem:[#allocation8 + $0xbc8] sm:$0xf]  ;;  %v11960_v26 = vor.u32 %v13486_v31, %v11959_v18  ;;  %v13450_v33 = vld [vmem:[#allocation8 + $0x9b4] sm:$0xf0] }
 0x3b0   : > { %v12088_v32 = vor.u32 %v13518_v19, %v12087_v55  ;;  %v11816_v53 = vor.u32 %v13450_v33, %v11815_v30  ;;  %v11655_v63 = vld [vmem:[#allocation8 + $0x868] sm:$0xf]  ;;  %v13410_v11 = vld [vmem:[#allocation8 + $0x874] sm:$0xf0] }
 0x3b1   : > { %7962 = vmatpush.bf16.msrb.mxu3 %v11512_v24  ;;  %7937 = vmatpush.bf16.msrb.mxu1 %v11240_v36  ;;  %v11832_v24 = vor.u32 %v13454_v17, %v11831_v16  ;;  %v12071_v36 = vld [vmem:[#allocation8 + $0xba8] sm:$0xf]  ;;  %v11656_v17 = vor.u32 %v13410_v11, %v11655_v63  ;;  %v13406_v55 = vld [vmem:[#allocation8 + $0x854] sm:$0xf0] }
 0x3b2   : > { %v11911_v5 = vld [vmem:[#allocation8 + $0xa68] sm:$0xf]  ;;  %v13502_v34 = vld [vmem:[#allocation8 + $0xb54] sm:$0xf0] }
 0x3b3   : > { %7950 = vmatpush.bf16.msrb.mxu2 %v11368_v13  ;;  %7925 = vmatpush.bf16.msrb.mxu0 %v11096_v9  ;;  %v13514_v13 = vld [vmem:[#allocation8 + $0xbb4] sm:$0xf0]  ;;  %v7719_v51 = vpop.f32.mrf.mxu0  ;;  %v12039_v16 = vld [vmem:[#allocation8 + $0xb68] sm:$0xf]  ;;  %v11912_v18 = vor.u32 %v13474_v7, %v11911_v5 }
 0x3b4   : > { %v12072_v45 = vor.u32 %v13514_v13, %v12071_v36  ;;  %v13510_v9 = vld [vmem:[#allocation8 + $0xb94] sm:$0xf0]  ;;  %v7720_v58 = vadd.f32 %v7719_v51, %v14502_v49  ;;  %v11639_v31 = vld [vmem:[#allocation8 + $0x848] sm:$0xf] }
 0x3b5   : > { %7963 = vmatpush.bf16.msrb.mxu3 %v11496_v37  ;;  %7938 = vmatpush.bf16.msrb.mxu1 %v11224_v62  ;;  %v11671_v37 = vld [vmem:[#allocation8 + $0x888] sm:$0xf]  ;;  %v7732_v57 = vpop.f32.mrf.mxu1  ;;  %v11800_v62 = vor.u32 %v13446_v47, %v11799_v41  ;;  %v11640_v36 = vor.u32 %v13406_v55, %v11639_v31  ;;  %v13498_v51 = vld [vmem:[#allocation8 + $0xb34] sm:$0xf0] }
 0x3b6   : > { %7926 = vmatmul.bf16.vlgmr.msrb.gmra.mxu0 %v14412_v61  ;;  %v11672_v8 = vor.u32 %v13414_v40, %v11671_v37  ;;  %v11767_v19 = vld [vmem:[#allocation8 + $0x948] sm:$0xf]  ;;  %v13402_v37 = vld [vmem:[#allocation8 + $0x834] sm:$0xf0] }
 0x3b7   : > { %7951 = vmatpush.bf16.msrb.mxu2 %v11352_v15  ;;  %7970 = vmatpush.bf16.msra.mxu0 %v11720_v10  ;;  %v11928_v15 = vor.u32 %v13478_v56, %v11927_v48  ;;  %v7733_v10 = vadd.f32 %v7732_v57, %v7720_v58  ;;  %v12023_v33 = vld [vmem:[#allocation8 + $0xb48] sm:$0xf]  ;;  %v13466_v48 = vld [vmem:[#allocation8 + $0xa34] sm:$0xf0] }
 0x3b8   : > { %7939 = vmatmul.bf16.vlgmr.msrb.gmra.mxu1 %v14414_v2  ;;  %v11751_v40 = vld [vmem:[#allocation8 + $0x928] sm:$0xf]  ;;  %v12024_v41 = vor.u32 %v13502_v34, %v12023_v33  ;;  %v13398_v58 = vld [vmem:[#allocation8 + $0x814] sm:$0xf0] }
 0x3b9   : > { %7964 = vmatpush.bf16.msrb.mxu3 %v11480_v23  ;;  %7983 = vmatpush.bf16.msra.mxu1 %v11848_v1  ;;  %v11783_v23 = vld [vmem:[#allocation8 + $0x968] sm:$0xf]  ;;  %v12056_v1 = vor.u32 %v13510_v9, %v12055_v54  ;;  %v13618_v31 = vld [vmem:[#allocation8 + $0xef4] sm:$0xf0] }
 0x3ba   : > { %7952 = vmatmul.bf16.vlgmr.msrb.gmra.mxu2 %v14416_v60  ;;  %v11879_v47 = vld [vmem:[#allocation8 + $0xa28] sm:$0xf] }
 0x3bb   : > { %7996 = vmatpush.bf16.msra.mxu2 %v11976_v4  ;;  %7971 = vmatpush.bf16.msra.mxu0 %v11704_v20  ;;  %v13442_v4 = vld [vmem:[#allocation8 + $0x974] sm:$0xf0]  ;;  %v12007_v56 = vld [vmem:[#allocation8 + $0xb28] sm:$0xf] }
 0x3bc   : > { %7965 = vmatmul.bf16.vlgmr.msrb.gmra.mxu3 %v14418_v25  ;;  %v11784_v49 = vor.u32 %v13442_v4, %v11783_v23  ;;  %v11607_v9 = vld [vmem:[#allocation8 + $0x808] sm:$0xf]  ;;  %v12008_v11 = vor.u32 %v13498_v51, %v12007_v56  ;;  %v13494_v4 = vld [vmem:[#allocation8 + $0xb14] sm:$0xf0] }
 0x3bd   : > { %8009 = vmatpush.bf16.msra.mxu3 %v12104_v3  ;;  %7984 = vmatpush.bf16.msra.mxu1 %v11832_v24  ;;  %v13506_v3 = vld [vmem:[#allocation8 + $0xb74] sm:$0xf0]  ;;  %v7745_v22 = vpop.f32.mrf.mxu2  ;;  %v7734_v35 = vpop.f32.mrf.mxu1  ;;  %v11863_v63 = vld [vmem:[#allocation8 + $0xa08] sm:$0xf] }
 0x3be   : > { %v12040_v20 = vor.u32 %v13506_v3, %v12039_v16  ;;  %v13438_v24 = vld [vmem:[#allocation8 + $0x954] sm:$0xf0]  ;;  %v7746_v29 = vadd.f32 %v7745_v22, %v7733_v10  ;;  %v12231_v7 = vld [vmem:[#allocation8 + $0xce8] sm:$0xf] }
 0x3bf   : > { %7997 = vmatpush.bf16.msra.mxu2 %v11960_v26  ;;  %7972 = vmatpush.bf16.msra.mxu0 %v11688_v44  ;;  %v11895_v26 = vld [vmem:[#allocation8 + $0xa48] sm:$0xf]  ;;  %v7758_v30 = vpop.f32.mrf.mxu3  ;;  %v11768_v44 = vor.u32 %v13438_v24, %v11767_v19  ;;  %v13462_v10 = vld [vmem:[#allocation8 + $0xa14] sm:$0xf0] }
 0x3c0   : > { %v14509_v13 = vadd.f32 %v7758_v30, %v7746_v29  ;;  %v13554_v16 = vld [vmem:[#allocation8 + $0xcf4] sm:$0xf0]  ;;  %v12359_v3 = vld [vmem:[#allocation8 + $0xde8] sm:$0xf]  ;;  %v11864_v19 = vor.u32 %v13462_v10, %v11863_v63 }
 0x3c1   : > { %8010 = vmatpush.bf16.msra.mxu3 %v12088_v32  ;;  %7985 = vmatpush.bf16.msra.mxu1 %v11816_v53  ;;  %v7721_v32 = vpop.f32.mrf.mxu0  ;;  %v11896_v53 = vor.u32 %v13470_v27, %v11895_v26  ;;  %v13650_v22 = vld [vmem:[#allocation8 + $0xff4] sm:$0xf0]  ;;  %v12232_v26 = vor.u32 %v13554_v16, %v12231_v7  ;;  %v12215_v30 = vld [vmem:[#allocation8 + $0xcc8] sm:$0xf] }
 0x3c2   : > { %v13550_v32 = vld [vmem:[#allocation8 + $0xcd4] sm:$0xf0]  ;;  %v12343_v33 = vld [vmem:[#allocation8 + $0xdc8] sm:$0xf] }
 0x3c3   : > { %7998 = vmatpush.bf16.msra.mxu2 %v11944_v50  ;;  %7973 = vmatpush.bf16.msra.mxu0 %v11672_v8  ;;  %v11623_v50 = vld [vmem:[#allocation8 + $0x828] sm:$0xf]  ;;  %v11880_v8 = vor.u32 %v13466_v48, %v11879_v47  ;;  %v13582_v35 = vld [vmem:[#allocation8 + $0xdd4] sm:$0xf0] }
 0x3c4   : > { %v11624_v54 = vor.u32 %v13402_v37, %v11623_v50  ;;  %v13646_v50 = vld [vmem:[#allocation8 + $0xfd4] sm:$0xf0]  ;;  %v12216_v37 = vor.u32 %v13550_v32, %v12215_v30  ;;  %v12327_v48 = vld [vmem:[#allocation8 + $0xda8] sm:$0xf] }
 0x3c5   : > { %8011 = vmatpush.bf16.msra.mxu3 %v12072_v45  ;;  %7986 = vmatpush.bf16.msra.mxu1 %v11800_v62  ;;  %v13434_v45 = vld [vmem:[#allocation8 + $0x934] sm:$0xf0]  ;;  %v11735_v62 = vld [vmem:[#allocation8 + $0x908] sm:$0xf]  ;;  %v7747_v23 = vpop.f32.mrf.mxu2 }
 0x3c6   : > { %v11752_v57 = vor.u32 %v13434_v45, %v11751_v40  ;;  %v12344_v40 = vor.u32 %v13582_v35, %v12343_v33  ;;  %v12199_v45 = vld [vmem:[#allocation8 + $0xca8] sm:$0xf]  ;;  %v13546_v47 = vld [vmem:[#allocation8 + $0xcb4] sm:$0xf0] }
 0x3c7   : > { %7999 = vmatpush.bf16.msra.mxu2 %v11928_v15  ;;  %7974 = vmatpush.bf16.msra.mxu0 %v11656_v17  ;;  %v13430_v15 = vld [vmem:[#allocation8 + $0x914] sm:$0xf0]  ;;  %v7760_v5 = vpop.f32.mrf.mxu3  ;;  %v11608_v17 = vor.u32 %v13398_v58, %v11607_v9  ;;  %v12583_v58 = vld [vmem:[#allocation8 + $0xfa8] sm:$0xf] }
 0x3c8   : > { %v11736_v55 = vor.u32 %v13430_v15, %v11735_v62  ;;  %v13578_v51 = vld [vmem:[#allocation8 + $0xdb4] sm:$0xf0]  ;;  %v12183_v63 = vld [vmem:[#allocation8 + $0xc88] sm:$0xf] }
 0x3c9   : > { %8012 = vmatpush.bf16.msra.mxu3 %v12056_v1  ;;  %7987 = vmatpush.bf16.msra.mxu1 %v11784_v49  ;;  %v11991_v1 = vld [vmem:[#allocation8 + $0xb08] sm:$0xf]  ;;  %v13586_v49 = vld [vmem:[#allocation8 + $0xdf4] sm:$0xf0]  ;;  %v12328_v62 = vor.u32 %v13578_v51, %v12327_v48 }
 0x3ca   : > { %v11992_v24 = vor.u32 %v13494_v4, %v11991_v1  ;;  %v12360_v27 = vor.u32 %v13586_v49, %v12359_v3  ;;  %v13610_v9 = vld [vmem:[#allocation8 + $0xeb4] sm:$0xf0]  ;;  %v12311_v23 = vld [vmem:[#allocation8 + $0xd88] sm:$0xf] }
 0x3cb   : > { %8000 = vmatpush.bf16.msra.mxu2 %v11912_v18  ;;  %7975 = vmatpush.bf16.msra.mxu0 %v11640_v36  ;;  %v12487_v18 = vld [vmem:[#allocation8 + $0xee8] sm:$0xf]  ;;  %v13574_v1 = vld [vmem:[#allocation8 + $0xd94] sm:$0xf0] }
 0x3cc   : > { %v12488_v29 = vor.u32 %v13618_v31, %v12487_v18  ;;  %v12471_v36 = vld [vmem:[#allocation8 + $0xec8] sm:$0xf]  ;;  %v13606_v5 = vld [vmem:[#allocation8 + $0xe94] sm:$0xf0]  ;;  %v12312_v31 = vor.u32 %v13574_v1, %v12311_v23 }
 0x3cd   : > { %8013 = vmatpush.bf16.msra.mxu3 %v12040_v20  ;;  %7988 = vmatpush.bf16.msra.mxu1 %v11768_v44  ;;  %v12615_v20 = vld [vmem:[#allocation8 + $0xfe8] sm:$0xf]  ;;  %v13614_v44 = vld [vmem:[#allocation8 + $0xed4] sm:$0xf0] }
 0x3ce   : > { %v12616_v34 = vor.u32 %v13650_v22, %v12615_v20  ;;  %v12439_v4 = vld [vmem:[#allocation8 + $0xe88] sm:$0xf]  ;;  %v13638_v3 = vld [vmem:[#allocation8 + $0xf94] sm:$0xf0] }
 0x3cf   : > { %8001 = vmatpush.bf16.msra.mxu2 %v11896_v53  ;;  %7976 = vmatpush.bf16.msra.mxu0 %v11624_v54  ;;  %v12599_v53 = vld [vmem:[#allocation8 + $0xfc8] sm:$0xf]  ;;  %v13538_v20 = vld [vmem:[#allocation8 + $0xc74] sm:$0xf0] }
 0x3d0   : > { %v12600_v56 = vor.u32 %v13646_v50, %v12599_v53  ;;  %v12455_v54 = vld [vmem:[#allocation8 + $0xea8] sm:$0xf]  ;;  %v13602_v30 = vld [vmem:[#allocation8 + $0xe74] sm:$0xf0] }
 0x3d1   : > { %8014 = vmatpush.bf16.msra.mxu3 %v12024_v41  ;;  %7989 = vmatpush.bf16.msra.mxu1 %v11752_v57  ;;  %v12472_v41 = vor.u32 %v13614_v44, %v12471_v36  ;;  %v13642_v57 = vld [vmem:[#allocation8 + $0xfb4] sm:$0xf0]  ;;  %v12456_v15 = vor.u32 %v13610_v9, %v12455_v54  ;;  %v12567_v16 = vld [vmem:[#allocation8 + $0xf88] sm:$0xf] }
 0x3d2   : > { %v12584_v10 = vor.u32 %v13642_v57, %v12583_v58  ;;  %v12295_v22 = vld [vmem:[#allocation8 + $0xd68] sm:$0xf]  ;;  %v13634_v33 = vld [vmem:[#allocation8 + $0xf74] sm:$0xf0] }
 0x3d3   : > { %8002 = vmatpush.bf16.msra.mxu2 %v11880_v8  ;;  %7977 = vmatpush.bf16.msra.mxu0 %v11608_v17  ;;  %v12200_v8 = vor.u32 %v13546_v47, %v12199_v45  ;;  %v7771_v7 = vpop.f32.mrf.mxu0  ;;  %v12551_v32 = vld [vmem:[#allocation8 + $0xf68] sm:$0xf]  ;;  %v13534_v44 = vld [vmem:[#allocation8 + $0xc54] sm:$0xf0] }
 0x3d4   : > { %v7772_v17 = vadd.f32 %v7771_v7, %v14509_v13  ;;  %v12151_v36 = vld [vmem:[#allocation8 + $0xc48] sm:$0xf]  ;;  %v12552_v50 = vor.u32 %v13634_v33, %v12551_v32  ;;  %v13598_v45 = vld [vmem:[#allocation8 + $0xe54] sm:$0xf0]  ;;  %v10697_v32 = vld [vmem:[#allocation8 + $0xf8] sm:$0xf0] }
 0x3d5   : > { %8015 = vmatpush.bf16.msra.mxu3 %v12008_v11  ;;  %7990 = vmatpush.bf16.msra.mxu1 %v11736_v55  ;;  %v13542_v11 = vld [vmem:[#allocation8 + $0xc94] sm:$0xf0]  ;;  %v7784_v49 = vpop.f32.mrf.mxu1  ;;  %v12440_v55 = vor.u32 %v13606_v5, %v12439_v4  ;;  %v12279_v53 = vld [vmem:[#allocation8 + $0xd48] sm:$0xf]  ;;  %v12152_v58 = vor.u32 %v13534_v44, %v12151_v36  ;;  %v13200_v33 = vld [vmem:[#allocation8 + $0x1ec] sm:$0xf] }
 0x3d6   : > { %7978 = vmatmul.bf16.vlgmr.msra.gmra.mxu0 %v14436_v42  ;;  %v12184_v18 = vor.u32 %v13542_v11, %v12183_v63  ;;  %v12535_v51 = vld [vmem:[#allocation8 + $0xf48] sm:$0xf]  ;;  %v13630_v54 = vld [vmem:[#allocation8 + $0xf54] sm:$0xf0]  ;;  %v10953_v36 = vld [vmem:[#allocation8 + $0x2f8] sm:$0xf0] }
 0x3d7   : > { %8003 = vmatpush.bf16.msra.mxu2 %v11864_v19  ;;  %8022 = vmatpush.bf16.msrb.mxu0 %v12232_v26  ;;  %v12167_v19 = vld [vmem:[#allocation8 + $0xc68] sm:$0xf]  ;;  %v12568_v26 = vor.u32 %v13638_v3, %v12567_v16  ;;  %v13530_v63 = vld [vmem:[#allocation8 + $0xc34] sm:$0xf0]  ;;  %v12536_v23 = vor.u32 %v13630_v54, %v12535_v51  ;;  %v13196_v51 = vld [vmem:[#allocation8 + $0x1cc] sm:$0xf] }
 0x3d8   : > { %7991 = vmatmul.bf16.vlgmr.msra.gmra.mxu1 %v14438_v43  ;;  %v12263_v11 = vld [vmem:[#allocation8 + $0xd28] sm:$0xf]  ;;  %v13594_v4 = vld [vmem:[#allocation8 + $0xe34] sm:$0xf0] }
 0x3d9   : > { %8016 = vmatpush.bf16.msra.mxu3 %v11992_v24  ;;  %8035 = vmatpush.bf16.msrb.mxu1 %v12360_v27  ;;  %v7785_v24 = vadd.f32 %v7784_v49, %v7772_v17  ;;  %v13570_v27 = vld [vmem:[#allocation8 + $0xd74] sm:$0xf0]  ;;  %v12391_v1 = vld [vmem:[#allocation8 + $0xe28] sm:$0xf] }
 0x3da   : > { %8004 = vmatmul.bf16.vlgmr.msra.gmra.mxu2 %v14440_v14  ;;  %v12296_v13 = vor.u32 %v13570_v27, %v12295_v22  ;;  %v12519_v5 = vld [vmem:[#allocation8 + $0xf28] sm:$0xf]  ;;  %v13626_v7 = vld [vmem:[#allocation8 + $0xf34] sm:$0xf0] }
 0x3db   : > { %8048 = vmatpush.bf16.msrb.mxu2 %v12488_v29  ;;  %8023 = vmatpush.bf16.msrb.mxu0 %v12216_v37  ;;  %v12423_v29 = vld [vmem:[#allocation8 + $0xe68] sm:$0xf]  ;;  %v13526_v17 = vld [vmem:[#allocation8 + $0xc14] sm:$0xf0] }
 0x3dc   : > { %8017 = vmatmul.bf16.vlgmr.msra.gmra.mxu3 %v14442_v21  ;;  %v12424_v35 = vor.u32 %v13602_v30, %v12423_v29  ;;  %v12119_v3 = vld [vmem:[#allocation8 + $0xc08] sm:$0xf]  ;;  %v13622_v27 = vld [vmem:[#allocation8 + $0xf14] sm:$0xf0]  ;;  %v13168_v30 = vld [vmem:[#allocation8 + $0xec] sm:$0xf] }
 0x3dd   : > { %8061 = vmatpush.bf16.msrb.mxu3 %v12616_v34  ;;  %8036 = vmatpush.bf16.msrb.mxu1 %v12344_v40  ;;  %v12168_v34 = vor.u32 %v13538_v20, %v12167_v19  ;;  %v7797_v37 = vpop.f32.mrf.mxu2  ;;  %v13566_v40 = vld [vmem:[#allocation8 + $0xd54] sm:$0xf0]  ;;  %v7786_v9 = vpop.f32.mrf.mxu1  ;;  %v12375_v19 = vld [vmem:[#allocation8 + $0xe08] sm:$0xf]  ;;  %v12520_v20 = vor.u32 %v13626_v7, %v12519_v5  ;;  %v10793_v7 = vld [vmem:[#allocation8 + $0x1b8] sm:$0xf0] }
 0x3de   : > { %v7798_v47 = vadd.f32 %v7797_v37, %v7785_v24  ;;  %v13590_v24 = vld [vmem:[#allocation8 + $0xe14] sm:$0xf0]  ;;  %v11081_v37 = vld [vmem:[#allocation8 + $0x3f8] sm:$0xf0] }
 0x3df   : > { %8049 = vmatpush.bf16.msrb.mxu2 %v12472_v41  ;;  %8024 = vmatpush.bf16.msrb.mxu0 %v12200_v8  ;;  %v12407_v41 = vld [vmem:[#allocation8 + $0xe48] sm:$0xf]  ;;  %v7810_v48 = vpop.f32.mrf.mxu3  ;;  %v12280_v8 = vor.u32 %v13566_v40, %v12279_v53  ;;  %v12376_v53 = vor.u32 %v13590_v24, %v12375_v19  ;;  %v10809_v9 = vld [vmem:[#allocation8 + $0x1d8] sm:$0xf0]  ;;  %v13156_v19 = vld [vmem:[#allocation8 + $0x8c] sm:$0xf] }
 0x3e0   : > { %v14516_v57 = vadd.f32 %v7810_v48, %v7798_v47  ;;  %v13164_v48 = vld [vmem:[#allocation8 + $0xcc] sm:$0xf] }
 0x3e1   : > { %8062 = vmatpush.bf16.msrb.mxu3 %v12600_v56  ;;  %8037 = vmatpush.bf16.msrb.mxu1 %v12328_v62  ;;  %v7773_v56 = vpop.f32.mrf.mxu0  ;;  %v12408_v62 = vor.u32 %v13598_v45, %v12407_v41  ;;  %v10700_v41 = vor.u32 %v13168_v30, %v10697_v32  ;;  %v13252_v32 = vld [vmem:[#allocation8 + $0x38c] sm:$0xf] }
 0x3e2   : > { %v10681_v56 = vld [vmem:[#allocation8 + $0xd8] sm:$0xf0] }
 0x3e3   : > { %8050 = vmatpush.bf16.msrb.mxu2 %v12456_v15  ;;  %8025 = vmatpush.bf16.msrb.mxu0 %v12184_v18  ;;  %v12135_v15 = vld [vmem:[#allocation8 + $0xc28] sm:$0xf]  ;;  %v12392_v18 = vor.u32 %v13594_v4, %v12391_v1  ;;  %v10665_v1 = vld [vmem:[#allocation8 + $0xb8] sm:$0xf0]  ;;  %v13192_v4 = vld [vmem:[#allocation8 + $0x1ac] sm:$0xf] }
 0x3e4   : > { %v12136_v16 = vor.u32 %v13530_v63, %v12135_v15  ;;  %v11065_v15 = vld [vmem:[#allocation8 + $0x3d8] sm:$0xf0]  ;;  %v10684_v63 = vor.u32 %v13164_v48, %v10681_v56  ;;  %v13248_v56 = vld [vmem:[#allocation8 + $0x36c] sm:$0xf] }
 0x3e5   : > { %8063 = vmatpush.bf16.msrb.mxu3 %v12584_v10  ;;  %8038 = vmatpush.bf16.msrb.mxu1 %v12312_v31  ;;  %v13562_v10 = vld [vmem:[#allocation8 + $0xd34] sm:$0xf0]  ;;  %v12247_v31 = vld [vmem:[#allocation8 + $0xd08] sm:$0xf]  ;;  %v7799_v22 = vpop.f32.mrf.mxu2  ;;  %v10889_v48 = vld [vmem:[#allocation8 + $0x278] sm:$0xf0] }
 0x3e6   : > { %v12264_v49 = vor.u32 %v13562_v10, %v12263_v11  ;;  %v10812_v11 = vor.u32 %v13196_v51, %v10809_v9  ;;  %v13160_v10 = vld [vmem:[#allocation8 + $0xac] sm:$0xf]  ;;  %v11017_v51 = vld [vmem:[#allocation8 + $0x378] sm:$0xf0] }
 0x3e7   : > { %8051 = vmatpush.bf16.msrb.mxu2 %v12440_v55  ;;  %8026 = vmatpush.bf16.msrb.mxu0 %v12168_v34  ;;  %v13558_v55 = vld [vmem:[#allocation8 + $0xd14] sm:$0xf0]  ;;  %v7812_v29 = vpop.f32.mrf.mxu3  ;;  %v12120_v34 = vor.u32 %v13526_v17, %v12119_v3  ;;  %v10921_v3 = vld [vmem:[#allocation8 + $0x2b8] sm:$0xf0]  ;;  %v13256_v17 = vld [vmem:[#allocation8 + $0x3ac] sm:$0xf] }
 0x3e8   : > { %v12248_v44 = vor.u32 %v13558_v55, %v12247_v31  ;;  %v10796_v31 = vor.u32 %v13192_v4, %v10793_v7  ;;  %v13188_v22 = vld [vmem:[#allocation8 + $0x18c] sm:$0xf]  ;;  %v10905_v29 = vld [vmem:[#allocation8 + $0x298] sm:$0xf0] }
 0x3e9   : > { %8064 = vmatpush.bf16.msrb.mxu3 %v12568_v26  ;;  %8039 = vmatpush.bf16.msrb.mxu1 %v12296_v13  ;;  %v12503_v26 = vld [vmem:[#allocation8 + $0xf08] sm:$0xf]  ;;  %v10825_v13 = vld [vmem:[#allocation8 + $0x1f8] sm:$0xf0]  ;;  %v13244_v7 = vld [vmem:[#allocation8 + $0x34c] sm:$0xf] }
 0x3ea   : > { %v12504_v40 = vor.u32 %v13622_v27, %v12503_v26  ;;  %v10828_v45 = vor.u32 %v13200_v33, %v10825_v13  ;;  %v10777_v26 = vld [vmem:[#allocation8 + $0x198] sm:$0xf0]  ;;  %v13220_v27 = vld [vmem:[#allocation8 + $0x28c] sm:$0xf] }
 0x3eb   : > { %8052 = vmatpush.bf16.msrb.mxu2 %v12424_v35  ;;  %8027 = vmatpush.bf16.msrb.mxu0 %v12152_v58  ;;  %v13232_v35 = vld [vmem:[#allocation8 + $0x2ec] sm:$0xf]  ;;  %v11033_v33 = vld [vmem:[#allocation8 + $0x398] sm:$0xf0] }
 0x3ec   : > { %v10956_v47 = vor.u32 %v13232_v35, %v10953_v36  ;;  %v13228_v58 = vld [vmem:[#allocation8 + $0x2cc] sm:$0xf]  ;;  %v10780_v36 = vor.u32 %v13188_v22, %v10777_v26 }
 0x3ed   : > { %8065 = vmatpush.bf16.msrb.mxu3 %v12552_v50  ;;  %8040 = vmatpush.bf16.msrb.mxu1 %v12280_v8  ;;  %v13264_v50 = vld [vmem:[#allocation8 + $0x3ec] sm:$0xf]  ;;  %v10937_v8 = vld [vmem:[#allocation8 + $0x2d8] sm:$0xf0] }
 0x3ee   : > { %v11084_v54 = vor.u32 %v13264_v50, %v11081_v37  ;;  %v10633_v50 = vld [vmem:[#allocation8 + $0x78] sm:$0xf0]  ;;  %v13184_v37 = vld [vmem:[#allocation8 + $0x16c] sm:$0xf] }
 0x3ef   : > { %8053 = vmatpush.bf16.msrb.mxu2 %v12408_v62  ;;  %8028 = vmatpush.bf16.msrb.mxu0 %v12136_v16  ;;  %v13260_v62 = vld [vmem:[#allocation8 + $0x3cc] sm:$0xf] }
 0x3f0   : > { %v11068_v5 = vor.u32 %v13260_v62, %v11065_v15  ;;  %v13224_v16 = vld [vmem:[#allocation8 + $0x2ac] sm:$0xf]  ;;  %v11020_v15 = vor.u32 %v13248_v56, %v11017_v51  ;;  %v11209_v56 = vld [vmem:[#allocation8 + $0x4f8] sm:$0xf0] }
 0x3f1   : > { %8066 = vmatpush.bf16.msrb.mxu3 %v12536_v23  ;;  %8041 = vmatpush.bf16.msrb.mxu1 %v12264_v49  ;;  %v10940_v23 = vor.u32 %v13228_v58, %v10937_v8  ;;  %v11049_v49 = vld [vmem:[#allocation8 + $0x3b8] sm:$0xf0]  ;;  %v10924_v55 = vor.u32 %v13224_v16, %v10921_v3  ;;  %v13148_v58 = vld [vmem:[#allocation8 + $0x4c] sm:$0xf] }
 0x3f2   : > { %v11052_v24 = vor.u32 %v13256_v17, %v11049_v49  ;;  %v10617_v8 = vld [vmem:[#allocation8 + $0x58] sm:$0xf0]  ;;  %v13180_v62 = vld [vmem:[#allocation8 + $0x14c] sm:$0xf] }
 0x3f3   : > { %8054 = vmatpush.bf16.msrb.mxu2 %v12392_v18  ;;  %8029 = vmatpush.bf16.msrb.mxu0 %v12120_v34  ;;  %v10668_v18 = vor.u32 %v13160_v10, %v10665_v1  ;;  %v7823_v30 = vpop.f32.mrf.mxu0  ;;  %v10873_v10 = vld [vmem:[#allocation8 + $0x258] sm:$0xf0]  ;;  %v10620_v17 = vor.u32 %v13148_v58, %v10617_v8  ;;  %v13208_v26 = vld [vmem:[#allocation8 + $0x22c] sm:$0xf] }
 0x3f4   : > { %v7824_v34 = vadd.f32 %v7823_v30, %v14516_v57  ;;  %v11001_v16 = vld [vmem:[#allocation8 + $0x358] sm:$0xf0]  ;;  %v13328_v51 = vld [vmem:[#allocation8 + $0x5ec] sm:$0xf] }
 0x3f5   : > { %8067 = vmatpush.bf16.msrb.mxu3 %v12520_v20  ;;  %8042 = vmatpush.bf16.msrb.mxu1 %v12248_v44  ;;  %v10649_v20 = vld [vmem:[#allocation8 + $0x98] sm:$0xf0]  ;;  %v7836_v13 = vpop.f32.mrf.mxu1  ;;  %v10908_v44 = vor.u32 %v13220_v27, %v10905_v29  ;;  %v11004_v22 = vor.u32 %v13244_v7, %v11001_v16  ;;  %v13240_v29 = vld [vmem:[#allocation8 + $0x32c] sm:$0xf] }
 0x3f6   : > { %8030 = vmatmul.bf16.vlgmr.msrb.gmra.mxu0 %v14457_v6  ;;  %v10652_v35 = vor.u32 %v13156_v19, %v10649_v20  ;;  %v10601_v19 = vld [vmem:[#allocation8 + $0x38] sm:$0xf0]  ;;  %v13176_v20 = vld [vmem:[#allocation8 + $0x12c] sm:$0xf] }
 0x3f7   : > { %8055 = vmatpush.bf16.msrb.mxu2 %v12376_v53  ;;  %8074 = vmatpush.bf16.msra.mxu0 %v10700_v41  ;;  %v13152_v53 = vld [vmem:[#allocation8 + $0x6c] sm:$0xf]  ;;  %v11036_v41 = vor.u32 %v13252_v32, %v11033_v33  ;;  %v10857_v27 = vld [vmem:[#allocation8 + $0x238] sm:$0xf0] }
 0x3f8   : > { %8043 = vmatmul.bf16.vlgmr.msrb.gmra.mxu1 %v14459_v39  ;;  %v10985_v30 = vld [vmem:[#allocation8 + $0x338] sm:$0xf0]  ;;  %v13140_v33 = vld [vmem:[#allocation8 + $0xc] sm:$0xf] }
 0x3f9   : > { %8068 = vmatpush.bf16.msrb.mxu3 %v12504_v40  ;;  %8087 = vmatpush.bf16.msra.mxu1 %v10828_v45  ;;  %v7837_v40 = vadd.f32 %v7836_v13, %v7824_v34  ;;  %v10761_v45 = vld [vmem:[#allocation8 + $0x178] sm:$0xf0]  ;;  %v13324_v7 = vld [vmem:[#allocation8 + $0x5cc] sm:$0xf] }
 0x3fa   : > { %8056 = vmatmul.bf16.vlgmr.msrb.gmra.mxu2 %v14455_v38  ;;  %v10764_v57 = vor.u32 %v13184_v37, %v10761_v45  ;;  %v10585_v34 = vld [vmem:[#allocation8 + $0x18] sm:$0xf0] }
 0x3fb   : > { %8100 = vmatpush.bf16.msra.mxu2 %v10956_v47  ;;  %8075 = vmatpush.bf16.msra.mxu0 %v10684_v63  ;;  %v13216_v47 = vld [vmem:[#allocation8 + $0x26c] sm:$0xf]  ;;  %v10969_v45 = vld [vmem:[#allocation8 + $0x318] sm:$0xf0] }
 0x3fc   : > { %8069 = vmatmul.bf16.vlgmr.msrb.gmra.mxu3 %v14465_v12  ;;  %v10892_v9 = vor.u32 %v13216_v47, %v10889_v48  ;;  %v13296_v48 = vld [vmem:[#allocation8 + $0x4ec] sm:$0xf]  ;;  %v11465_v58 = vld [vmem:[#allocation8 + $0x6f8] sm:$0xf0] }
 0x3fd   : > { %8113 = vmatpush.bf16.msra.mxu3 %v11084_v54  ;;  %8088 = vmatpush.bf16.msra.mxu1 %v10812_v11  ;;  %v10636_v54 = vor.u32 %v13152_v53, %v10633_v50  ;;  %v7849_v63 = vpop.f32.mrf.mxu2  ;;  %v10745_v11 = vld [vmem:[#allocation8 + $0x158] sm:$0xf0]  ;;  %v7838_v3 = vpop.f32.mrf.mxu1  ;;  %v13204_v53 = vld [vmem:[#allocation8 + $0x20c] sm:$0xf]  ;;  %v10988_v50 = vor.u32 %v13240_v29, %v10985_v30 }
 0x3fe   : > { %v7850_v1 = vadd.f32 %v7849_v63, %v7837_v40  ;;  %v10841_v40 = vld [vmem:[#allocation8 + $0x218] sm:$0xf0] }
 0x3ff   : > { %8101 = vmatpush.bf16.msra.mxu2 %v10940_v23  ;;  %8076 = vmatpush.bf16.msra.mxu0 %v10668_v18  ;;  %v13212_v23 = vld [vmem:[#allocation8 + $0x24c] sm:$0xf]  ;;  %v7862_v4 = vpop.f32.mrf.mxu3  ;;  %v10748_v18 = vor.u32 %v13180_v62, %v10745_v11  ;;  %v10844_v62 = vor.u32 %v13204_v53, %v10841_v40  ;;  %v11593_v63 = vld [vmem:[#allocation8 + $0x7f8] sm:$0xf0] }
 0x400   : > { %v14523_v49 = vadd.f32 %v7862_v4, %v7850_v1  ;;  %v13292_v4 = vld [vmem:[#allocation8 + $0x4cc] sm:$0xf]  ;;  %v11321_v3 = vld [vmem:[#allocation8 + $0x5d8] sm:$0xf0] }
 0x401   : > { %8114 = vmatpush.bf16.msra.mxu3 %v11068_v5  ;;  %8089 = vmatpush.bf16.msra.mxu1 %v10796_v31  ;;  %v7825_v5 = vpop.f32.mrf.mxu0  ;;  %v10876_v31 = vor.u32 %v13212_v23, %v10873_v10  ;;  %v11212_v23 = vor.u32 %v13296_v48, %v11209_v56  ;;  %v11305_v30 = vld [vmem:[#allocation8 + $0x5b8] sm:$0xf0]  ;;  %v13316_v40 = vld [vmem:[#allocation8 + $0x58c] sm:$0xf] }
 0x402   : > { %v11193_v5 = vld [vmem:[#allocation8 + $0x4d8] sm:$0xf0] }
 0x403   : > { %8102 = vmatpush.bf16.msra.mxu2 %v10924_v55  ;;  %8077 = vmatpush.bf16.msra.mxu0 %v10652_v35  ;;  %v13144_v55 = vld [vmem:[#allocation8 + $0x2c] sm:$0xf]  ;;  %v10860_v35 = vor.u32 %v13208_v26, %v10857_v27  ;;  %v11177_v26 = vld [vmem:[#allocation8 + $0x4b8] sm:$0xf0] }
 0x404   : > { %v10604_v32 = vor.u32 %v13144_v55, %v10601_v19  ;;  %v11577_v55 = vld [vmem:[#allocation8 + $0x7d8] sm:$0xf0]  ;;  %v11196_v19 = vor.u32 %v13292_v4, %v11193_v5  ;;  %v13320_v27 = vld [vmem:[#allocation8 + $0x5ac] sm:$0xf] }
 0x405   : > { %8115 = vmatpush.bf16.msra.mxu3 %v11052_v24  ;;  %8090 = vmatpush.bf16.msra.mxu1 %v10780_v36  ;;  %v10729_v24 = vld [vmem:[#allocation8 + $0x138] sm:$0xf0]  ;;  %v13172_v36 = vld [vmem:[#allocation8 + $0x10c] sm:$0xf]  ;;  %v7851_v37 = vpop.f32.mrf.mxu2 }
 0x406   : > { %v10732_v13 = vor.u32 %v13176_v20, %v10729_v24  ;;  %v11324_v20 = vor.u32 %v13324_v7, %v11321_v3  ;;  %v13288_v24 = vld [vmem:[#allocation8 + $0x4ac] sm:$0xf]  ;;  %v11161_v37 = vld [vmem:[#allocation8 + $0x498] sm:$0xf0] }
 0x407   : > { %8103 = vmatpush.bf16.msra.mxu2 %v10908_v44  ;;  %8078 = vmatpush.bf16.msra.mxu0 %v10636_v54  ;;  %v10713_v44 = vld [vmem:[#allocation8 + $0x118] sm:$0xf0]  ;;  %v7864_v47 = vpop.f32.mrf.mxu3  ;;  %v10588_v54 = vor.u32 %v13140_v33, %v10585_v34  ;;  %v13384_v34 = vld [vmem:[#allocation8 + $0x7ac] sm:$0xf] }
 0x408   : > { %v10716_v8 = vor.u32 %v13172_v36, %v10713_v44  ;;  %v11433_v33 = vld [vmem:[#allocation8 + $0x6b8] sm:$0xf0]  ;;  %v14529_v36 = vld [vmem:[#allocation10] sm:$0xf]  ;;  %v13276_v3 = vld [vmem:[#allocation8 + $0x44c] sm:$0xf] }
 0x409   : > { %8116 = vmatpush.bf16.msra.mxu3 %v11036_v41  ;;  %8091 = vmatpush.bf16.msra.mxu1 %v10764_v57  ;;  %v13236_v41 = vld [vmem:[#allocation8 + $0x30c] sm:$0xf]  ;;  %v11337_v57 = vld [vmem:[#allocation8 + $0x5f8] sm:$0xf0]  ;;  %v4884_v44 = vperm.slane %v14529_v36, 2 }
 0x40a   : > { %v10972_v11 = vor.u32 %v13236_v41, %v10969_v45  ;;  %v11340_v10 = vor.u32 %v13328_v51, %v11337_v57  ;;  %v13348_v41 = vld [vmem:[#allocation8 + $0x68c] sm:$0xf]  ;;  %v11417_v45 = vld [vmem:[#allocation8 + $0x698] sm:$0xf0] }
 0x40b   : > { %8104 = vmatpush.bf16.msra.mxu2 %v10892_v9  ;;  %8079 = vmatpush.bf16.msra.mxu0 %v10620_v17  ;;  %v13360_v9 = vld [vmem:[#allocation8 + $0x6ec] sm:$0xf]  ;;  %v11545_v48 = vld [vmem:[#allocation8 + $0x798] sm:$0xf0] }
 0x40c   : > { %v11468_v1 = vor.u32 %v13360_v9, %v11465_v58  ;;  %v13356_v17 = vld [vmem:[#allocation8 + $0x6cc] sm:$0xf]  ;;  %v11420_v9 = vor.u32 %v13348_v41, %v11417_v45  ;;  %v11529_v4 = vld [vmem:[#allocation8 + $0x778] sm:$0xf0] }
 0x40d   : > { %8117 = vmatpush.bf16.msra.mxu3 %v11020_v15  ;;  %8092 = vmatpush.bf16.msra.mxu1 %v10748_v18  ;;  %v13392_v15 = vld [vmem:[#allocation8 + $0x7ec] sm:$0xf]  ;;  %v11449_v18 = vld [vmem:[#allocation8 + $0x6d8] sm:$0xf0] }
 0x40e   : > { %v11596_v16 = vor.u32 %v13392_v15, %v11593_v63  ;;  %v13280_v58 = vld [vmem:[#allocation8 + $0x46c] sm:$0xf]  ;;  %v11497_v41 = vld [vmem:[#allocation8 + $0x738] sm:$0xf0] }
 0x40f   : > { %8105 = vmatpush.bf16.msra.mxu2 %v10876_v31  ;;  %8080 = vmatpush.bf16.msra.mxu0 %v10604_v32  ;;  %v13388_v31 = vld [vmem:[#allocation8 + $0x7cc] sm:$0xf] }
 0x410   : > { %v11580_v29 = vor.u32 %v13388_v31, %v11577_v55  ;;  %v13352_v32 = vld [vmem:[#allocation8 + $0x6ac] sm:$0xf] }
 0x411   : > { %8118 = vmatpush.bf16.msra.mxu3 %v11004_v22  ;;  %8093 = vmatpush.bf16.msra.mxu1 %v10732_v13  ;;  %v11452_v22 = vor.u32 %v13356_v17, %v11449_v18  ;;  %v11561_v13 = vld [vmem:[#allocation8 + $0x7b8] sm:$0xf0]  ;;  %v11436_v53 = vor.u32 %v13352_v32, %v11433_v33  ;;  %v13308_v18 = vld [vmem:[#allocation8 + $0x54c] sm:$0xf] }
 0x412   : > { %v11129_v17 = vld [vmem:[#allocation8 + $0x458] sm:$0xf0] }
 0x413   : > { %8106 = vmatpush.bf16.msra.mxu2 %v10860_v35  ;;  %8081 = vmatpush.bf16.msra.mxu0 %v10588_v54  ;;  %v11180_v35 = vor.u32 %v13288_v24, %v11177_v26  ;;  %v7875_v47 = vpop.f32.mrf.mxu0  ;;  %v11132_v33 = vor.u32 %v13276_v3, %v11129_v17  ;;  %v13520_v17 = vld [vmem:[#allocation8 + $0xbec] sm:$0xf] }
 0x414   : > { %v7876_v56 = vadd.f32 %v7875_v47, %v4884_v44  ;;  %v13272_v44 = vld [vmem:[#allocation8 + $0x42c] sm:$0xf] }
 0x415   : > { %8119 = vmatpush.bf16.msra.mxu3 %v10988_v50  ;;  %8094 = vmatpush.bf16.msra.mxu1 %v10716_v8  ;;  %v13284_v50 = vld [vmem:[#allocation8 + $0x48c] sm:$0xf]  ;;  %v7888_v51 = vpop.f32.mrf.mxu1  ;;  %v11145_v8 = vld [vmem:[#allocation8 + $0x478] sm:$0xf0] }
 0x416   : > { %8082 = vmatmul.bf16.vlgmr.msra.gmra.mxu0 %v14391_v0  ;;  %v11308_v0 = vor.u32 %v13320_v27, %v11305_v30  ;;  %v11164_v54 = vor.u32 %v13284_v50, %v11161_v37  ;;  %v7889_v15 = vadd.f32 %v7888_v51, %v7876_v56  ;;  %v11148_v5 = vor.u32 %v13280_v58, %v11145_v8  ;;  %v11513_v30 = vld [vmem:[#allocation8 + $0x758] sm:$0xf0]  ;;  %v13268_v47 = vld [vmem:[#allocation8 + $0x40c] sm:$0xf] }
 0x417   : > { %8107 = vmatpush.bf16.msra.mxu2 %v10844_v62  ;;  %8126 = vmatpush.bf16.msrb.mxu0 %v11212_v23  ;;  %v13312_v62 = vld [vmem:[#allocation8 + $0x56c] sm:$0xf]  ;;  %v11241_v37 = vld [vmem:[#allocation8 + $0x538] sm:$0xf0] }
 0x418   : > { %8095 = vmatmul.bf16.vlgmr.msra.gmra.mxu1 %v14393_v59  ;;  %v11564_v59 = vor.u32 %v13384_v34, %v11561_v13  ;;  %v13344_v23 = vld [vmem:[#allocation8 + $0x66c] sm:$0xf]  ;;  %v11353_v8 = vld [vmem:[#allocation8 + $0x618] sm:$0xf0] }
 0x419   : > { %8120 = vmatpush.bf16.msra.mxu3 %v10972_v11  ;;  %8139 = vmatpush.bf16.msrb.mxu1 %v11340_v10  ;;  %v11273_v11 = vld [vmem:[#allocation8 + $0x578] sm:$0xf0]  ;;  %v13300_v51 = vld [vmem:[#allocation8 + $0x50c] sm:$0xf] }
 0x41a   : > { %8108 = vmatmul.bf16.vlgmr.msra.gmra.mxu2 %v14395_v46  ;;  %v11289_v46 = vld [vmem:[#allocation8 + $0x598] sm:$0xf0]  ;;  %v11276_v7 = vor.u32 %v13312_v62, %v11273_v11  ;;  %v13364_v62 = vld [vmem:[#allocation8 + $0x70c] sm:$0xf] }
 0x41b   : > { %8152 = vmatpush.bf16.msrb.mxu2 %v11468_v1  ;;  %8127 = vmatpush.bf16.msrb.mxu0 %v11196_v19  ;;  %v11292_v57 = vor.u32 %v13316_v40, %v11289_v46  ;;  %v11401_v10 = vld [vmem:[#allocation8 + $0x678] sm:$0xf0]  ;;  %v13376_v1 = vld [vmem:[#allocation8 + $0x76c] sm:$0xf]  ;;  %v7877_v27 = vpop.f32.mrf.mxu0 }
 0x41c   : > { %8121 = vmatmul.bf16.vlgmr.msra.gmra.mxu3 %v14397_v52  ;;  %v13380_v52 = vld [vmem:[#allocation8 + $0x78c] sm:$0xf]  ;;  %v11532_v31 = vor.u32 %v13376_v1, %v11529_v4  ;;  %v11257_v19 = vld [vmem:[#allocation8 + $0x558] sm:$0xf0] }
 0x41d   : > { %8165 = vmatpush.bf16.msrb.mxu3 %v11596_v16  ;;  %8140 = vmatpush.bf16.msrb.mxu1 %v11324_v20  ;;  %v11548_v63 = vor.u32 %v13380_v52, %v11545_v48  ;;  %v11404_v16 = vor.u32 %v13344_v23, %v11401_v10  ;;  %v7901_v55 = vpop.f32.mrf.mxu2  ;;  %v13340_v20 = vld [vmem:[#allocation8 + $0x64c] sm:$0xf]  ;;  %v7890_v32 = vpop.f32.mrf.mxu1  ;;  %v11260_v13 = vor.u32 %v13308_v18, %v11257_v19  ;;  %v11097_v52 = vld [vmem:[#allocation8 + $0x418] sm:$0xf0] }
 0x41e   : > { %v7902_v24 = vadd.f32 %v7901_v55, %v7889_v15  ;;  %v13336_v40 = vld [vmem:[#allocation8 + $0x62c] sm:$0xf]  ;;  %v11481_v15 = vld [vmem:[#allocation8 + $0x718] sm:$0xf0]  ;;  %v11100_v1 = vor.u32 %v13268_v47, %v11097_v52 }
 0x41f   : > { %8153 = vmatpush.bf16.msrb.mxu2 %v11452_v22  ;;  %8128 = vmatpush.bf16.msrb.mxu0 %v11180_v35  ;;  %v11385_v22 = vld [vmem:[#allocation8 + $0x658] sm:$0xf0]  ;;  %v7914_v26 = vpop.f32.mrf.mxu3  ;;  %v13368_v46 = vld [vmem:[#allocation8 + $0x72c] sm:$0xf] }
 0x420   : > { %v14532_v34 = vadd.f32 %v7914_v26, %v7902_v24  ;;  %v11388_v35 = vor.u32 %v13340_v20, %v11385_v22  ;;  %v13424_v11 = vld [vmem:[#allocation8 + $0x8ec] sm:$0xf]  ;;  %v11721_v23 = vld [vmem:[#allocation8 + $0x8f8] sm:$0xf0] }
 0x421   : > { %8166 = vmatpush.bf16.msrb.mxu3 %v11580_v29  ;;  %8141 = vmatpush.bf16.msrb.mxu1 %v11308_v0  ;;  %v13372_v29 = vld [vmem:[#allocation8 + $0x74c] sm:$0xf]  ;;  %v11113_v0 = vld [vmem:[#allocation8 + $0x438] sm:$0xf0]  ;;  %v11724_v55 = vor.u32 %v13424_v11, %v11721_v23 }
 0x422   : > { %v11516_v50 = vor.u32 %v13372_v29, %v11513_v30  ;;  %v11116_v45 = vor.u32 %v13272_v44, %v11113_v0  ;;  %v13456_v10 = vld [vmem:[#allocation8 + $0x9ec] sm:$0xf]  ;;  %v11849_v4 = vld [vmem:[#allocation8 + $0x9f8] sm:$0xf0] }
 0x423   : > { %8154 = vmatpush.bf16.msrb.mxu2 %v11436_v53  ;;  %8129 = vmatpush.bf16.msrb.mxu0 %v11164_v54  ;;  %v13304_v53 = vld [vmem:[#allocation8 + $0x52c] sm:$0xf]  ;;  %v11225_v54 = vld [vmem:[#allocation8 + $0x518] sm:$0xf0]  ;;  %v11852_v19 = vor.u32 %v13456_v10, %v11849_v4 }
 0x424   : > { %v11244_v48 = vor.u32 %v13304_v53, %v11241_v37  ;;  %v12105_v18 = vld [vmem:[#allocation8 + $0xbf8] sm:$0xf0]  ;;  %v13420_v22 = vld [vmem:[#allocation8 + $0x8cc] sm:$0xf] }
 0x425   : > { %8167 = vmatpush.bf16.msrb.mxu3 %v11564_v59  ;;  %8142 = vmatpush.bf16.msrb.mxu1 %v11292_v57  ;;  %v11369_v59 = vld [vmem:[#allocation8 + $0x638] sm:$0xf0]  ;;  %v13332_v57 = vld [vmem:[#allocation8 + $0x60c] sm:$0xf]  ;;  %v7903_v58 = vpop.f32.mrf.mxu2  ;;  %v12108_v27 = vor.u32 %v13520_v17, %v12105_v18 }
 0x426   : > { %v11372_v56 = vor.u32 %v13336_v40, %v11369_v59  ;;  %v11356_v3 = vor.u32 %v13332_v57, %v11353_v8  ;;  %v11705_v24 = vld [vmem:[#allocation8 + $0x8d8] sm:$0xf0]  ;;  %v13452_v26 = vld [vmem:[#allocation8 + $0x9cc] sm:$0xf] }
 0x427   : > { %8155 = vmatpush.bf16.msrb.mxu2 %v11420_v9  ;;  %8130 = vmatpush.bf16.msrb.mxu0 %v11148_v5  ;;  %v11500_v9 = vor.u32 %v13368_v46, %v11497_v41  ;;  %v13488_v5 = vld [vmem:[#allocation8 + $0xaec] sm:$0xf]  ;;  %v11833_v29 = vld [vmem:[#allocation8 + $0x9d8] sm:$0xf0] }
 0x428   : > { %v13484_v30 = vld [vmem:[#allocation8 + $0xacc] sm:$0xf]  ;;  %v11961_v32 = vld [vmem:[#allocation8 + $0xad8] sm:$0xf0]  ;;  %v11836_v44 = vor.u32 %v13452_v26, %v11833_v29 }
 0x429   : > { %8168 = vmatpush.bf16.msrb.mxu3 %v11548_v63  ;;  %8143 = vmatpush.bf16.msrb.mxu1 %v11276_v7  ;;  %v7916_v63 = vpop.f32.mrf.mxu3  ;;  %v11977_v7 = vld [vmem:[#allocation8 + $0xaf8] sm:$0xf0]  ;;  %v11964_v0 = vor.u32 %v13484_v30, %v11961_v32  ;;  %v13416_v53 = vld [vmem:[#allocation8 + $0x8ac] sm:$0xf] }
 0x42a   : > { %v11980_v20 = vor.u32 %v13488_v5, %v11977_v7  ;;  %v13448_v37 = vld [vmem:[#allocation8 + $0x9ac] sm:$0xf]  ;;  %v11817_v59 = vld [vmem:[#allocation8 + $0x9b8] sm:$0xf0] }
 0x42b   : > { %8156 = vmatpush.bf16.msrb.mxu2 %v11404_v16  ;;  %8131 = vmatpush.bf16.msrb.mxu0 %v11132_v33  ;;  %v11228_v16 = vor.u32 %v13300_v51, %v11225_v54  ;;  %v13516_v33 = vld [vmem:[#allocation8 + $0xbcc] sm:$0xf]  ;;  %v11945_v41 = vld [vmem:[#allocation8 + $0xab8] sm:$0xf0] }
 0x42c   : > { %v13480_v46 = vld [vmem:[#allocation8 + $0xaac] sm:$0xf]  ;;  %v12073_v47 = vld [vmem:[#allocation8 + $0xbb8] sm:$0xf0] }
 0x42d   : > { %8169 = vmatpush.bf16.msrb.mxu3 %v11532_v31  ;;  %8144 = vmatpush.bf16.msrb.mxu1 %v11260_v13  ;;  %v11484_v31 = vor.u32 %v13364_v62, %v11481_v15  ;;  %v12089_v13 = vld [vmem:[#allocation8 + $0xbd8] sm:$0xf0]  ;;  %v13412_v51 = vld [vmem:[#allocation8 + $0x88c] sm:$0xf] }
 0x42e   : > { %v12092_v40 = vor.u32 %v13516_v33, %v12089_v13  ;;  %v13444_v54 = vld [vmem:[#allocation8 + $0x98c] sm:$0xf]  ;;  %v12057_v62 = vld [vmem:[#allocation8 + $0xb98] sm:$0xf0] }
 0x42f   : > { %8157 = vmatpush.bf16.msrb.mxu2 %v11388_v35  ;;  %8132 = vmatpush.bf16.msrb.mxu0 %v11116_v45  ;;  %v11708_v35 = vor.u32 %v13420_v22, %v11705_v24  ;;  %v13512_v45 = vld [vmem:[#allocation8 + $0xbac] sm:$0xf]  ;;  %v11913_v17 = vld [vmem:[#allocation8 + $0xa78] sm:$0xf0] }
 0x430   : > { %v12076_v57 = vor.u32 %v13512_v45, %v12073_v47  ;;  %v13476_v58 = vld [vmem:[#allocation8 + $0xa8c] sm:$0xf]  ;;  %v11641_v22 = vld [vmem:[#allocation8 + $0x858] sm:$0xf0] }
 0x431   : > { %8170 = vmatpush.bf16.msrb.mxu3 %v11516_v50  ;;  %8145 = vmatpush.bf16.msrb.mxu1 %v11244_v48  ;;  %v11689_v50 = vld [vmem:[#allocation8 + $0x8b8] sm:$0xf0]  ;;  %v11820_v48 = vor.u32 %v13448_v37, %v11817_v59  ;;  %v13408_v10 = vld [vmem:[#allocation8 + $0x86c] sm:$0xf] }
 0x432   : > { %v11692_v52 = vor.u32 %v13416_v53, %v11689_v50  ;;  %v13440_v4 = vld [vmem:[#allocation8 + $0x96c] sm:$0xf]  ;;  %v11769_v29 = vld [vmem:[#allocation8 + $0x958] sm:$0xf0] }
 0x433   : > { %8158 = vmatpush.bf16.msrb.mxu2 %v11372_v56  ;;  %8133 = vmatpush.bf16.msrb.mxu0 %v11100_v1  ;;  %v11948_v56 = vor.u32 %v13480_v46, %v11945_v41  ;;  %v7927_v8 = vpop.f32.mrf.mxu0  ;;  %v11657_v1 = vld [vmem:[#allocation8 + $0x878] sm:$0xf0]  ;;  %v13504_v18 = vld [vmem:[#allocation8 + $0xb6c] sm:$0xf] }
 0x434   : > { %v13436_v24 = vld [vmem:[#allocation8 + $0x94c] sm:$0xf]  ;;  %v11897_v32 = vld [vmem:[#allocation8 + $0xa58] sm:$0xf0] }
 0x435   : > { %8171 = vmatpush.bf16.msrb.mxu3 %v11500_v9  ;;  %8146 = vmatpush.bf16.msrb.mxu1 %v11228_v16  ;;  %v11801_v9 = vld [vmem:[#allocation8 + $0x998] sm:$0xf0]  ;;  %v7940_v15 = vpop.f32.mrf.mxu1  ;;  %v13468_v30 = vld [vmem:[#allocation8 + $0xa4c] sm:$0xf] }
 0x436   : > { %8134 = vmatmul.bf16.vlgmr.msrb.gmra.mxu0 %v14412_v61  ;;  %v11673_v61 = vld [vmem:[#allocation8 + $0x898] sm:$0xf0]  ;;  %v11804_v11 = vor.u32 %v13444_v54, %v11801_v9  ;;  %v11900_v59 = vor.u32 %v13468_v30, %v11897_v32  ;;  %v13400_v46 = vld [vmem:[#allocation8 + $0x82c] sm:$0xf] }
 0x437   : > { %8159 = vmatpush.bf16.msrb.mxu2 %v11356_v3  ;;  %8178 = vmatpush.bf16.msra.mxu0 %v11724_v55  ;;  %v11676_v63 = vor.u32 %v13412_v51, %v11673_v61  ;;  %v11785_v16 = vld [vmem:[#allocation8 + $0x978] sm:$0xf0]  ;;  %v13472_v3 = vld [vmem:[#allocation8 + $0xa6c] sm:$0xf]  ;;  %v11660_v55 = vor.u32 %v13408_v10, %v11657_v1 }
 0x438   : > { %8147 = vmatmul.bf16.vlgmr.msrb.gmra.mxu1 %v14414_v2  ;;  %v11929_v2 = vld [vmem:[#allocation8 + $0xa98] sm:$0xf0]  ;;  %v13432_v45 = vld [vmem:[#allocation8 + $0x92c] sm:$0xf] }
 0x439   : > { %8172 = vmatpush.bf16.msrb.mxu3 %v11484_v31  ;;  %8191 = vmatpush.bf16.msra.mxu1 %v11852_v19  ;;  %v11932_v23 = vor.u32 %v13476_v58, %v11929_v2  ;;  %v12041_v31 = vld [vmem:[#allocation8 + $0xb78] sm:$0xf0]  ;;  %v11916_v19 = vor.u32 %v13472_v3, %v11913_v17  ;;  %v13496_v51 = vld [vmem:[#allocation8 + $0xb2c] sm:$0xf] }
 0x43a   : > { %8160 = vmatmul.bf16.vlgmr.msrb.gmra.mxu2 %v14416_v60  ;;  %v13508_v60 = vld [vmem:[#allocation8 + $0xb8c] sm:$0xf]  ;;  %v12044_v26 = vor.u32 %v13504_v18, %v12041_v31  ;;  %v11625_v41 = vld [vmem:[#allocation8 + $0x838] sm:$0xf0] }
 0x43b   : > { %8204 = vmatpush.bf16.msra.mxu2 %v11980_v20  ;;  %8179 = vmatpush.bf16.msra.mxu0 %v11708_v35  ;;  %v12060_v7 = vor.u32 %v13508_v60, %v12057_v62  ;;  %v13404_v20 = vld [vmem:[#allocation8 + $0x84c] sm:$0xf]  ;;  %v7929_v35 = vpop.f32.mrf.mxu0  ;;  %v12009_v61 = vld [vmem:[#allocation8 + $0xb38] sm:$0xf0]  ;;  %v11628_v54 = vor.u32 %v13400_v46, %v11625_v41 }
 0x43c   : > { %8173 = vmatmul.bf16.vlgmr.msrb.gmra.mxu3 %v14418_v25  ;;  %v7928_v25 = vadd.f32 %v7927_v8, %v14532_v34  ;;  %v11788_v34 = vor.u32 %v13440_v4, %v11785_v16  ;;  %v11644_v50 = vor.u32 %v13404_v20, %v11641_v22  ;;  %v11609_v9 = vld [vmem:[#allocation8 + $0x818] sm:$0xf0]  ;;  %v13428_v8 = vld [vmem:[#allocation8 + $0x90c] sm:$0xf] }
 0x43d   : > { %8217 = vmatpush.bf16.msra.mxu3 %v12108_v27  ;;  %8192 = vmatpush.bf16.msra.mxu1 %v11836_v44  ;;  %v7953_v27 = vpop.f32.mrf.mxu2  ;;  %v13500_v44 = vld [vmem:[#allocation8 + $0xb4c] sm:$0xf]  ;;  %v7942_v53 = vpop.f32.mrf.mxu1  ;;  %v11737_v60 = vld [vmem:[#allocation8 + $0x918] sm:$0xf0] }
 0x43e   : > { %v7941_v5 = vadd.f32 %v7940_v15, %v7928_v25  ;;  %v13460_v62 = vld [vmem:[#allocation8 + $0xa0c] sm:$0xf]  ;;  %v12012_v25 = vor.u32 %v13496_v51, %v12009_v61  ;;  %v12233_v4 = vld [vmem:[#allocation8 + $0xcf8] sm:$0xf0]  ;;  %v11740_v18 = vor.u32 %v13428_v8, %v11737_v60 }
 0x43f   : > { %8205 = vmatpush.bf16.msra.mxu2 %v11964_v0  ;;  %8180 = vmatpush.bf16.msra.mxu0 %v11692_v52  ;;  %v7966_v13 = vpop.f32.mrf.mxu3  ;;  %v12025_v0 = vld [vmem:[#allocation8 + $0xb58] sm:$0xf0]  ;;  %v13552_v1 = vld [vmem:[#allocation8 + $0xcec] sm:$0xf] }
 0x440   : > { %v7954_v33 = vadd.f32 %v7953_v27, %v7941_v5  ;;  %v12028_v47 = vor.u32 %v13500_v44, %v12025_v0  ;;  %v11753_v52 = vld [vmem:[#allocation8 + $0x938] sm:$0xf0]  ;;  %v13584_v5 = vld [vmem:[#allocation8 + $0xdec] sm:$0xf]  ;;  %v12236_v20 = vor.u32 %v13552_v1, %v12233_v4 }
 0x441   : > { %8218 = vmatpush.bf16.msra.mxu3 %v12092_v40  ;;  %8193 = vmatpush.bf16.msra.mxu1 %v11820_v48  ;;  %v11772_v40 = vor.u32 %v13436_v24, %v11769_v29  ;;  %v13464_v48 = vld [vmem:[#allocation8 + $0xa2c] sm:$0xf]  ;;  %v11756_v58 = vor.u32 %v13432_v45, %v11753_v52  ;;  %v12361_v16 = vld [vmem:[#allocation8 + $0xdf8] sm:$0xf0] }
 0x442   : > { %v14539_v37 = vadd.f32 %v7966_v13, %v7954_v33  ;;  %v13616_v3 = vld [vmem:[#allocation8 + $0xeec] sm:$0xf]  ;;  %v12489_v17 = vld [vmem:[#allocation8 + $0xef8] sm:$0xf0]  ;;  %v12364_v22 = vor.u32 %v13584_v5, %v12361_v16 }
 0x443   : > { %8206 = vmatpush.bf16.msra.mxu2 %v11948_v56  ;;  %8181 = vmatpush.bf16.msra.mxu0 %v11676_v63  ;;  %v11881_v56 = vld [vmem:[#allocation8 + $0xa38] sm:$0xf0]  ;;  %v12492_v24 = vor.u32 %v13616_v3, %v12489_v17  ;;  %v13580_v29 = vld [vmem:[#allocation8 + $0xdcc] sm:$0xf] }
 0x444   : > { %v11884_v2 = vor.u32 %v13464_v48, %v11881_v56  ;;  %v11865_v63 = vld [vmem:[#allocation8 + $0xa18] sm:$0xf0]  ;;  %v13612_v33 = vld [vmem:[#allocation8 + $0xecc] sm:$0xf] }
 0x445   : > { %8219 = vmatpush.bf16.msra.mxu3 %v12076_v57  ;;  %8194 = vmatpush.bf16.msra.mxu1 %v11804_v11  ;;  %v13396_v57 = vld [vmem:[#allocation8 + $0x80c] sm:$0xf]  ;;  %v7955_v15 = vpop.f32.mrf.mxu2  ;;  %v11868_v31 = vor.u32 %v13460_v62, %v11865_v63  ;;  %v12217_v27 = vld [vmem:[#allocation8 + $0xcd8] sm:$0xf0] }
 0x446   : > { %v13492_v11 = vld [vmem:[#allocation8 + $0xb0c] sm:$0xf]  ;;  %v12345_v32 = vld [vmem:[#allocation8 + $0xdd8] sm:$0xf0] }
 0x447   : > { %8207 = vmatpush.bf16.msra.mxu2 %v11932_v23  ;;  %8182 = vmatpush.bf16.msra.mxu0 %v11660_v55  ;;  %v11993_v23 = vld [vmem:[#allocation8 + $0xb18] sm:$0xf0]  ;;  %v7968_v10 = vpop.f32.mrf.mxu3  ;;  %v13648_v55 = vld [vmem:[#allocation8 + $0xfec] sm:$0xf]  ;;  %v12348_v53 = vor.u32 %v13580_v29, %v12345_v32 }
 0x448   : > { %v12473_v13 = vld [vmem:[#allocation8 + $0xed8] sm:$0xf0]  ;;  %v13644_v35 = vld [vmem:[#allocation8 + $0xfcc] sm:$0xf] }
 0x449   : > { %8220 = vmatpush.bf16.msra.mxu3 %v12060_v7  ;;  %8195 = vmatpush.bf16.msra.mxu1 %v11788_v34  ;;  %v11612_v7 = vor.u32 %v13396_v57, %v11609_v9  ;;  %v12617_v34 = vld [vmem:[#allocation8 + $0xff8] sm:$0xf0]  ;;  %v13576_v46 = vld [vmem:[#allocation8 + $0xdac] sm:$0xf] }
 0x44a   : > { %v12620_v30 = vor.u32 %v13648_v55, %v12617_v34  ;;  %v12601_v44 = vld [vmem:[#allocation8 + $0xfd8] sm:$0xf0]  ;;  %v13640_v48 = vld [vmem:[#allocation8 + $0xfac] sm:$0xf] }
 0x44b   : > { %8208 = vmatpush.bf16.msra.mxu2 %v11916_v19  ;;  %8183 = vmatpush.bf16.msra.mxu0 %v11644_v50  ;;  %v11996_v19 = vor.u32 %v13492_v11, %v11993_v23  ;;  %v12476_v50 = vor.u32 %v13612_v33, %v12473_v13  ;;  %v12604_v41 = vor.u32 %v13644_v35, %v12601_v44  ;;  %v12329_v45 = vld [vmem:[#allocation8 + $0xdb8] sm:$0xf0]  ;;  %v13540_v57 = vld [vmem:[#allocation8 + $0xc8c] sm:$0xf] }
 0x44c   : > { %v12457_v52 = vld [vmem:[#allocation8 + $0xeb8] sm:$0xf0]  ;;  %v12332_v61 = vor.u32 %v13576_v46, %v12329_v45  ;;  %v13572_v9 = vld [vmem:[#allocation8 + $0xd8c] sm:$0xf] }
 0x44d   : > { %8221 = vmatpush.bf16.msra.mxu3 %v12044_v26  ;;  %8196 = vmatpush.bf16.msra.mxu1 %v11772_v40  ;;  %v13548_v26 = vld [vmem:[#allocation8 + $0xccc] sm:$0xf]  ;;  %v12585_v56 = vld [vmem:[#allocation8 + $0xfb8] sm:$0xf0] }
 0x44e   : > { %v12220_v0 = vor.u32 %v13548_v26, %v12217_v27  ;;  %v13544_v40 = vld [vmem:[#allocation8 + $0xcac] sm:$0xf]  ;;  %v12569_v62 = vld [vmem:[#allocation8 + $0xf98] sm:$0xf0] }
 0x44f   : > { %8209 = vmatpush.bf16.msra.mxu2 %v11900_v59  ;;  %8184 = vmatpush.bf16.msra.mxu0 %v11628_v54  ;;  %v12201_v59 = vld [vmem:[#allocation8 + $0xcb8] sm:$0xf0]  ;;  %v13604_v8 = vld [vmem:[#allocation8 + $0xe8c] sm:$0xf] }
 0x450   : > { %v12204_v51 = vor.u32 %v13544_v40, %v12201_v59  ;;  %v13536_v23 = vld [vmem:[#allocation8 + $0xc6c] sm:$0xf]  ;;  %v12169_v10 = vld [vmem:[#allocation8 + $0xc78] sm:$0xf0] }
 0x451   : > { %8222 = vmatpush.bf16.msra.mxu3 %v12028_v47  ;;  %8197 = vmatpush.bf16.msra.mxu1 %v11756_v58  ;;  %v13608_v47 = vld [vmem:[#allocation8 + $0xeac] sm:$0xf]  ;;  %v12588_v58 = vor.u32 %v13640_v48, %v12585_v56  ;;  %v12425_v3 = vld [vmem:[#allocation8 + $0xe78] sm:$0xf0] }
 0x452   : > { %v12460_v54 = vor.u32 %v13608_v47, %v12457_v52  ;;  %v13568_v1 = vld [vmem:[#allocation8 + $0xd6c] sm:$0xf]  ;;  %v12281_v26 = vld [vmem:[#allocation8 + $0xd58] sm:$0xf0] }
 0x453   : > { %8210 = vmatpush.bf16.msra.mxu2 %v11884_v2  ;;  %8185 = vmatpush.bf16.msra.mxu0 %v11612_v7  ;;  %v12313_v2 = vld [vmem:[#allocation8 + $0xd98] sm:$0xf0]  ;;  %v7979_v60 = vpop.f32.mrf.mxu0  ;;  %v13600_v16 = vld [vmem:[#allocation8 + $0xe6c] sm:$0xf] }
 0x454   : > { %v12316_v63 = vor.u32 %v13572_v9, %v12313_v2  ;;  %v12297_v7 = vld [vmem:[#allocation8 + $0xd78] sm:$0xf0]  ;;  %v13632_v17 = vld [vmem:[#allocation8 + $0xf6c] sm:$0xf]  ;;  %v12428_v55 = vor.u32 %v13600_v16, %v12425_v3 }
 0x455   : > { %8223 = vmatpush.bf16.msra.mxu3 %v12012_v25  ;;  %8198 = vmatpush.bf16.msra.mxu1 %v11740_v18  ;;  %v7992_v25 = vpop.f32.mrf.mxu1  ;;  %v12553_v18 = vld [vmem:[#allocation8 + $0xf78] sm:$0xf0]  ;;  %v13532_v34 = vld [vmem:[#allocation8 + $0xc4c] sm:$0xf] }
 0x456   : > { %8186 = vmatmul.bf16.vlgmr.msra.gmra.mxu0 %v14436_v42  ;;  %v12185_v42 = vld [vmem:[#allocation8 + $0xc98] sm:$0xf0]  ;;  %v13596_v27 = vld [vmem:[#allocation8 + $0xe4c] sm:$0xf] }
 0x457   : > { %8211 = vmatpush.bf16.msra.mxu2 %v11868_v31  ;;  %8230 = vmatpush.bf16.msrb.mxu0 %v12236_v20  ;;  %v12188_v15 = vor.u32 %v13540_v57, %v12185_v42  ;;  %v12172_v31 = vor.u32 %v13536_v23, %v12169_v10  ;;  %v13564_v20 = vld [vmem:[#allocation8 + $0xd4c] sm:$0xf]  ;;  %v12409_v29 = vld [vmem:[#allocation8 + $0xe58] sm:$0xf0] }
 0x458   : > { %8199 = vmatmul.bf16.vlgmr.msra.gmra.mxu1 %v14438_v43  ;;  %v12441_v43 = vld [vmem:[#allocation8 + $0xe98] sm:$0xf0]  ;;  %v13628_v13 = vld [vmem:[#allocation8 + $0xf4c] sm:$0xf]  ;;  %v12412_v40 = vor.u32 %v13596_v27, %v12409_v29 }
 0x459   : > { %8224 = vmatpush.bf16.msra.mxu3 %v11996_v19  ;;  %8243 = vmatpush.bf16.msrb.mxu1 %v12364_v22  ;;  %v12444_v11 = vor.u32 %v13604_v8, %v12441_v43  ;;  %v12153_v19 = vld [vmem:[#allocation8 + $0xc58] sm:$0xf0]  ;;  %v12556_v22 = vor.u32 %v13632_v17, %v12553_v18  ;;  %v13528_v59 = vld [vmem:[#allocation8 + $0xc2c] sm:$0xf] }
 0x45a   : > { %8212 = vmatmul.bf16.vlgmr.msra.gmra.mxu2 %v14440_v14  ;;  %v13636_v14 = vld [vmem:[#allocation8 + $0xf8c] sm:$0xf]  ;;  %v12537_v35 = vld [vmem:[#allocation8 + $0xf58] sm:$0xf0] }
 0x45b   : > { %8256 = vmatpush.bf16.msrb.mxu2 %v12492_v24  ;;  %8231 = vmatpush.bf16.msrb.mxu0 %v12220_v0  ;;  %v12572_v5 = vor.u32 %v13636_v14, %v12569_v62  ;;  %v7981_v33 = vpop.f32.mrf.mxu0  ;;  %v12156_v0 = vor.u32 %v13532_v34, %v12153_v19  ;;  %v12137_v46 = vld [vmem:[#allocation8 + $0xc38] sm:$0xf0]  ;;  %v12540_v45 = vor.u32 %v13628_v13, %v12537_v35  ;;  %v13592_v52 = vld [vmem:[#allocation8 + $0xe2c] sm:$0xf] }
 0x45c   : > { %8225 = vmatmul.bf16.vlgmr.msra.gmra.mxu3 %v14442_v21  ;;  %v7980_v21 = vadd.f32 %v7979_v60, %v14539_v37  ;;  %v12300_v37 = vor.u32 %v13568_v1, %v12297_v7  ;;  %v12265_v47 = vld [vmem:[#allocation8 + $0xd38] sm:$0xf0]  ;;  %v13624_v56 = vld [vmem:[#allocation8 + $0xf2c] sm:$0xf] }
 0x45d   : > { %8269 = vmatpush.bf16.msrb.mxu3 %v12620_v30  ;;  %8244 = vmatpush.bf16.msrb.mxu1 %v12348_v53  ;;  %v8005_v24 = vpop.f32.mrf.mxu2  ;;  %v7994_v44 = vpop.f32.mrf.mxu1  ;;  %v12393_v48 = vld [vmem:[#allocation8 + $0xe38] sm:$0xf0]  ;;  %v13524_v42 = vld [vmem:[#allocation8 + $0xc0c] sm:$0xf] }
 0x45e   : > { %v7993_v4 = vadd.f32 %v7992_v25, %v7980_v21  ;;  %v12396_v57 = vor.u32 %v13592_v52, %v12393_v48  ;;  %v12121_v9 = vld [vmem:[#allocation8 + $0xc18] sm:$0xf0]  ;;  %v13588_v60 = vld [vmem:[#allocation8 + $0xe0c] sm:$0xf] }
 0x45f   : > { %8257 = vmatpush.bf16.msrb.mxu2 %v12476_v50  ;;  %8232 = vmatpush.bf16.msrb.mxu0 %v12204_v51  ;;  %v8018_v32 = vpop.f32.mrf.mxu3  ;;  %v12284_v50 = vor.u32 %v13564_v20, %v12281_v26  ;;  %v12521_v51 = vld [vmem:[#allocation8 + $0xf38] sm:$0xf0]  ;;  %v13620_v21 = vld [vmem:[#allocation8 + $0xf0c] sm:$0xf] }
 0x460   : > { %v8006_v30 = vadd.f32 %v8005_v24, %v7993_v4  ;;  %v12524_v2 = vor.u32 %v13624_v56, %v12521_v51  ;;  %v12249_v43 = vld [vmem:[#allocation8 + $0xd18] sm:$0xf0] }
 0x461   : > { %8270 = vmatpush.bf16.msrb.mxu3 %v12604_v41  ;;  %8245 = vmatpush.bf16.msrb.mxu1 %v12332_v61  ;;  %v13560_v41 = vld [vmem:[#allocation8 + $0xd2c] sm:$0xf]  ;;  %v12140_v61 = vor.u32 %v13528_v59, %v12137_v46  ;;  %v12377_v14 = vld [vmem:[#allocation8 + $0xe18] sm:$0xf0] }
 0x462   : > { %v8019_v53 = vadd.f32 %v8018_v32, %v8006_v30  ;;  %v12505_v25 = vld [vmem:[#allocation8 + $0xf18] sm:$0xf0] }
 0x463   : > { %8258 = vmatpush.bf16.msrb.mxu2 %v12460_v54  ;;  %8233 = vmatpush.bf16.msrb.mxu0 %v12188_v15  ;;  %v12268_v54 = vor.u32 %v13560_v41, %v12265_v47  ;;  %v12124_v15 = vor.u32 %v13524_v42, %v12121_v9  ;;  %v12508_v23 = vor.u32 %v13620_v21, %v12505_v25  ;;  %v13773_v21 = vld [vmem:[%s14251_s1] sm:$0xff] }
 0x464   : > { %v8282_v25 = vadd.f32 %v13773_v21, %v14500_v28 }
 0x465   : > { %8271 = vmatpush.bf16.msrb.mxu3 %v12588_v58  ;;  %8246 = vmatpush.bf16.msrb.mxu1 %v12316_v63  ;;  %v13556_v58 = vld [vmem:[#allocation8 + $0xd0c] sm:$0xf]  ;;  %v8007_v8 = vpop.f32.mrf.mxu2 }
 0x466   : > { %v12252_v63 = vor.u32 %v13556_v58, %v12249_v43  ;;  %v13772_v43 = vld [vmem:[%s14251_s1 + $0x8] sm:$0xff] }
 0x467   : > { %8259 = vmatpush.bf16.msrb.mxu2 %v12444_v11  ;;  %8234 = vmatpush.bf16.msrb.mxu0 %v12172_v31  ;;  %v8020_v62 = vpop.f32.mrf.mxu3  ;;  %v12380_v11 = vor.u32 %v13588_v60, %v12377_v14  ;;  %v8283_v60 = vadd.f32 %v13772_v43, %v14523_v49  ;;  %v14076_v49 = vmov 512.0  }
 0x468   : > { %13764 = vrcp.f32 %v14076_v49 }
 0x469   : > { %8272 = vmatpush.bf16.msrb.mxu3 %v12572_v5  ;;  %8247 = vmatpush.bf16.msrb.mxu1 %v12300_v37 }
 0x46b   : > { %8260 = vmatpush.bf16.msrb.mxu2 %v12428_v55  ;;  %8235 = vmatpush.bf16.msrb.mxu0 %v12156_v0 }
 0x46d   : > { %8273 = vmatpush.bf16.msrb.mxu3 %v12556_v22  ;;  %8248 = vmatpush.bf16.msrb.mxu1 %v12284_v50 }
 0x46f   : > { %8261 = vmatpush.bf16.msrb.mxu2 %v12412_v40  ;;  %8236 = vmatpush.bf16.msrb.mxu0 %v12140_v61 }
 0x471   : > { %8274 = vmatpush.bf16.msrb.mxu3 %v12540_v45  ;;  %8249 = vmatpush.bf16.msrb.mxu1 %v12268_v54 }
 0x473   : > { %8262 = vmatpush.bf16.msrb.mxu2 %v12396_v57  ;;  %8237 = vmatpush.bf16.msrb.mxu0 %v12124_v15  ;;  %v8031_v10 = vpop.f32.mrf.mxu0  ;;  %v13774_v15 = vld [vmem:[%s14251_s1 + $0x10] sm:$0xff] }
 0x474   : > { %v8032_v1 = vadd.f32 %v8031_v10, %v8019_v53 }
 0x475   : > { %8275 = vmatpush.bf16.msrb.mxu3 %v12524_v2  ;;  %8250 = vmatpush.bf16.msrb.mxu1 %v12252_v63  ;;  %v8044_v4 = vpop.f32.mrf.mxu1 }
 0x476   : > { %8238 = vmatmul.bf16.vlgmr.msrb.gmra.mxu0 %v14457_v6  ;;  %v8045_v5 = vadd.f32 %v8044_v4, %v8032_v1  ;;  %v4885_v6 = vperm.slane %v14529_v36, 3 }
 0x477   : > { %8263 = vmatpush.bf16.msrb.mxu2 %v12380_v11 }
 0x478   : > { %8251 = vmatmul.bf16.vlgmr.msrb.gmra.mxu1 %v14459_v39 }
 0x479   : > { %8276 = vmatpush.bf16.msrb.mxu3 %v12508_v23 }
 0x47a   : > { %8264 = vmatmul.bf16.vlgmr.msrb.gmra.mxu2 %v14455_v38 }
 0x47b   : > { %v8033_v17 = vpop.f32.mrf.mxu0 }
 0x47c   : > { %8277 = vmatmul.bf16.vlgmr.msrb.gmra.mxu3 %v14465_v12 }
 0x47d   : > { %v8057_v7 = vpop.f32.mrf.mxu2  ;;  %v8046_v18 = vpop.f32.mrf.mxu1 }
 0x47e   : > { %v8058_v16 = vadd.f32 %v8057_v7, %v8045_v5  ;;  %v8286_v5 = vadd.f32 %v8283_v60, %v8282_v25  ;;  %v13775_v7 = vld [vmem:[%s14251_s1 + $0x18] sm:$0xff] }
 0x47f   : > { %v8070_v3 = vpop.f32.mrf.mxu3 }
 0x480   : > { %v8071_v31 = vadd.f32 %v8070_v3, %v8058_v16 }
 0x482   : > { %v8284_v63 = vadd.f32 %v13774_v15, %v8071_v31 }
 0x484   : > { %v8287_v3 = vadd.f32 %v8286_v5, %v8284_v63 }
 0x485   : > { %v8059_v37 = vpop.f32.mrf.mxu2 }
 0x487   : > { %v8072_v55 = vpop.f32.mrf.mxu3 }
 0x488   : > { %v13765_v55 = vpop.eup %13764 }
 0x489   : > { %vm8296_vm0 = vweird.f32 %v13765_v55 }
 0x493   : > { %v8083_v34 = vpop.f32.mrf.mxu0 }
 0x494   : > { %v8084_v39 = vadd.f32 %v8083_v34, %v4885_v6  ;;  %v8292_v6 = vmul.f32 512.0, %v13765_v55 }
 0x495   : > { %v8096_v19 = vpop.f32.mrf.mxu1 }
 0x496   : > { %v8097_v38 = vadd.f32 %v8096_v19, %v8084_v39  ;;  %v8293_v28 = vsub.f32 1.0, %v8292_v6 }
 0x498   : > { %v8294_v34 = vmul.f32 %v13765_v55, %v8293_v28 }
 0x49a   : > { %v8295_v31 = vadd.f32 %v13765_v55, %v8294_v34 }
 0x49b   : > { %v8085_v24 = vpop.f32.mrf.mxu0 }
 0x49c   : > { %v8297_v39 = vsel %vm8296_vm0, %v13765_v55, %v8295_v31 }
 0x49d   : > { %v8109_v20 = vpop.f32.mrf.mxu2  ;;  %v8098_v26 = vpop.f32.mrf.mxu1 }
 0x49e   : > { %v8110_v12 = vadd.f32 %v8109_v20, %v8097_v38 }
 0x49f   : > { %v8122_v22 = vpop.f32.mrf.mxu3 }
 0x4a0   : > { %v8123_v27 = vadd.f32 %v8122_v22, %v8110_v12 }
 0x4a5   : > { %v8111_v29 = vpop.f32.mrf.mxu2 }
 0x4a7   : > { %v8124_v30 = vpop.f32.mrf.mxu3 }
 0x4b3   : > { %v8135_v32 = vpop.f32.mrf.mxu0 }
 0x4b4   : > { %v8136_v59 = vadd.f32 %v8135_v32, %v8123_v27 }
 0x4b5   : > { %v8148_v33 = vpop.f32.mrf.mxu1 }
 0x4b6   : > { %v8149_v52 = vadd.f32 %v8148_v33, %v8136_v59  ;;  %v8328_v59 = vld [vmem:[#allocation11] sm:$0xf] }
 0x4bb   : > { %v8137_v44 = vpop.f32.mrf.mxu0 }
 0x4bd   : > { %v8161_v13 = vpop.f32.mrf.mxu2  ;;  %v8150_v0 = vpop.f32.mrf.mxu1 }
 0x4be   : > { %v8162_v48 = vadd.f32 %v8161_v13, %v8149_v52  ;;  %v8331_v52 = vperm.slane %v8328_v59, 1 }
 0x4bf   : > { %v8174_v35 = vpop.f32.mrf.mxu3 }
 0x4c0   : > { %v8175_v61 = vadd.f32 %v8174_v35, %v8162_v48  ;;  %v8332_v48 = vperm.slane %v8328_v59, 2 }
 0x4c5   : > { %v8163_v53 = vpop.f32.mrf.mxu2 }
 0x4c7   : > { %v8176_v36 = vpop.f32.mrf.mxu3 }
 0x4d3   : > { %v8187_v50 = vpop.f32.mrf.mxu0 }
 0x4d4   : > { %v8188_v54 = vadd.f32 %v8187_v50, %v8175_v61 }
 0x4d5   : > { %v8200_v40 = vpop.f32.mrf.mxu1 }
 0x4d6   : > { %v8201_v57 = vadd.f32 %v8200_v40, %v8188_v54 }
 0x4db   : > { %v8189_v45 = vpop.f32.mrf.mxu0 }
 0x4dd   : > { %v8213_v46 = vpop.f32.mrf.mxu2  ;;  %v8202_v47 = vpop.f32.mrf.mxu1 }
 0x4de   : > { %v8214_v42 = vadd.f32 %v8213_v46, %v8201_v57  ;;  %v8330_v47 = vperm.slane %v8328_v59, 0 }
 0x4df   : > { %v8226_v41 = vpop.f32.mrf.mxu3 }
 0x4e0   : > { %v8227_v9 = vadd.f32 %v8226_v41, %v8214_v42  ;;  %v8342_v41 = vld [vmem:[#allocation13] sm:$0xf] }
 0x4e1   : > { %v8345_v61 = vperm.slane %v8342_v41, 1  ;;  %v8346_v54 = vperm.slane %v8342_v41, 2 }
 0x4e5   : > { %v8215_v56 = vpop.f32.mrf.mxu2 }
 0x4e6   : > { %v8333_v56 = vperm.slane %v8328_v59, 3 }
 0x4e7   : > { %v8228_v51 = vpop.f32.mrf.mxu3 }
 0x4e8   : > { %v8344_v51 = vperm.slane %v8342_v41, 0 }
 0x4f3   : > { %v8239_v58 = vpop.f32.mrf.mxu0 }
 0x4f4   : > { %v8240_v8 = vadd.f32 %v8239_v58, %v8227_v9 }
 0x4f5   : > { %v8252_v2 = vpop.f32.mrf.mxu1 }
 0x4f6   : > { %v8253_v14 = vadd.f32 %v8252_v2, %v8240_v8  ;;  %v8347_v8 = vperm.slane %v8342_v41, 3 }
 0x4fb   : > { %v8241_v10 = vpop.f32.mrf.mxu0 }
 0x4fd   : > { %v8265_v62 = vpop.f32.mrf.mxu2  ;;  %v8254_v1 = vpop.f32.mrf.mxu1 }
 0x4fe   : > { %v8266_v11 = vadd.f32 %v8265_v62, %v8253_v14 }
 0x4ff   : > { %v8278_v23 = vpop.f32.mrf.mxu3 }
 0x500   : > { %v8279_v4 = vadd.f32 %v8278_v23, %v8266_v11 }
 0x502   : > { %v8285_v16 = vadd.f32 %v13775_v7, %v8279_v4 }
 0x504   : > { %v8288_v17 = vadd.f32 %v8287_v3, %v8285_v16 }
 0x505   : > { %v8267_v18 = vpop.f32.mrf.mxu2 }
 0x506   : > { %8289 = vadd.xlane.f32.xlu0 %v8288_v17 }
 0x507   : > { %v8280_v37 = vpop.f32.mrf.mxu3 }
 0x579   : > { %v8290_v19 = vpop.xlane.xlu0 %8289 }
 0x57a   : > { %v8298_v38 = vmul.f32 %v8297_v39, %v8290_v19 }
 0x57c   : > { %v8299_v20 = vsub.f32 %v8282_v25, %v8298_v38  ;;  %v8300_v12 = vsub.f32 %v8283_v60, %v8298_v38  ;;  %v8301_v22 = vsub.f32 %v8284_v63, %v8298_v38  ;;  %v8302_v24 = vsub.f32 %v8285_v16, %v8298_v38 }
 0x57e   : > { %v8303_v26 = vmul.f32 %v8299_v20, %v8299_v20  ;;  %v8304_v27 = vmul.f32 %v8300_v12, %v8300_v12  ;;  %v8305_v29 = vmul.f32 %v8301_v22, %v8301_v22  ;;  %v8306_v32 = vmul.f32 %v8302_v24, %v8302_v24 }
 0x580   : > { %v8307_v30 = vadd.f32 %v8304_v27, %v8303_v26 }
 0x582   : > { %v8308_v33 = vadd.f32 %v8307_v30, %v8305_v29 }
 0x584   : > { %v8309_v13 = vadd.f32 %v8308_v33, %v8306_v32 }
 0x586   : > { %8310 = vadd.xlane.f32.xlu0 %v8309_v13 }
 0x5f9   : > { %v8311_v35 = vpop.xlane.xlu0 %8310 }
 0x5fa   : > { %v8312_v44 = vmul.f32 %v8311_v35, %v8297_v39 }
 0x5fc   : > { %v8313_v0 = vadd.f32 1e-05, %v8312_v44 }
 0x5fe   : > { %13766 = vrsqrt.f32 %v8313_v0  ;;  %vm8320_vm2 = vweird.f32 %v8313_v0 }
 0x604   : > { %v13767_v53 = vpop.eup %13766 }
 0x605   : > { %v8315_v36 = vmul.f32 %v13767_v53, %v8313_v0  ;;  %vm8321_vm1 = vweird.f32 %v13767_v53 }
 0x606   : > { %vm8322_vm3 = vmor %vm8320_vm2, %vm8321_vm1 }
 0x607   : > { %v8316_v50 = vmul.f32 %v13767_v53, %v8315_v36 }
 0x609   : > { %v8317_v40 = vmul.f32 0.5, %v8316_v50 }
 0x60b   : > { %v8318_v46 = vsub.f32 1.5, %v8317_v40 }
 0x60d   : > { %v8319_v45 = vmul.f32 %v13767_v53, %v8318_v46 }
 0x60f   : > { %v8323_v57 = vsel %vm8322_vm3, %v13767_v53, %v8319_v45 }
 0x610   : > { %v8324_v42 = vmul.f32 %v8323_v57, %v8299_v20  ;;  %v8325_v9 = vmul.f32 %v8323_v57, %v8300_v12  ;;  %v8326_v58 = vmul.f32 %v8323_v57, %v8301_v22  ;;  %v8327_v2 = vmul.f32 %v8323_v57, %v8302_v24 }
 0x612   : > { %v8338_v43 = vmul.f32 %v8330_v47, %v8324_v42  ;;  %v8339_v60 = vmul.f32 %v8331_v52, %v8325_v9  ;;  %v8340_v14 = vmul.f32 %v8332_v48, %v8326_v58  ;;  %v8341_v62 = vmul.f32 %v8333_v56, %v8327_v2 }
 0x614   : > { %v8352_v21 = vadd.f32 %v8344_v51, %v8338_v43  ;;  %v8353_v25 = vadd.f32 %v8345_v61, %v8339_v60  ;;  %v8354_v15 = vadd.f32 %v8346_v54, %v8340_v14  ;;  %v8355_v63 = vadd.f32 %v8347_v8, %v8341_v62 }
 0x616   : > { %8356 = vst [vmem:[%s387_s8] sm:$0xff] %v8352_v21 }
 0x617   : > { %8357 = vst [vmem:[%s387_s8 + $0x8] sm:$0xff] %v8353_v25 }
 0x618   : > { %8358 = vst [vmem:[%s387_s8 + $0x10] sm:$0xff] %v8354_v15 }
 0x619   : > { %8359 = vst [vmem:[%s387_s8 + $0x18] sm:$0xff] %v8355_v63 }
 0x61a   : > { %14013 = shalt.err (!%p14010_p9)
}
 0x61b   : > { %13678 = dma.vmem_to_hbm [thread:$0]  (%p14214_p4), %s8375_s13, 512, %s8377_s10, %s8361_s16  }
 0x61c PF: > { %s8388_s14 = sand.u32 1, %s14052_s24   ;;  %p14611_p10 = scmp.ge.s32.totalorder %s14064_s27, 2 }
 0x61d   : > { %s8389_s1 = scalar_lea.sflag [#allocation4], %s8388_s14 }
 0x61e   : > { %p13704_p13 = pnand %p14611_p10, %p14218_p6 }
 0x620   : > { %p13705_p11 = pneg %p13704_p13 }
 0x622   : > { %14047 = dma.done.wait (%p13705_p11), %s8389_s1, 512  }
 0x623   : > { %14049 = vsyncadd (%p13705_p11), %s8389_s1, 4294966784  ;;  %p23_p0 = scmp.ge.s32.totalorder %s14188_s12, 4   ;;  %s14612_s24 = smov %s14056_s25 }
 0x624   : > { %s14613_s25 = smov %s14060_s26  ;;  %s14614_s26 = smov %s14199_s30 }
 0x625   : > { %s14615_s27 = smov %s14188_s12  ;;  %25 = sbr.rel (!%p23_p0) target bundleno = 11 (0xb), region = 117 }
 0x62a   :  { %8395 = vsyncpa [#allocation3], 1 }
 0x62b   :  { %8397 = vsyncpa [#allocation3 + $0x1], 1 }
 0x62c   :  { %8398 = vsyncpa [#allocation6], 1 }
 0x62d   :  { %8399 = vsyncpa [#allocation9], 1 }
 0x62e   :  { %8400 = vsyncpa [#allocation12], 1 }
 0x62f   :  { %8401 = vsyncpa [#allocation4], 1 }
 0x630   :  { %8403 = vsyncpa [#allocation4 + $0x1], 1 }

</bundles_post_ra>
